<compile_context>
chip_gen: v7x
topology: tpu7x:2x2x1
jax: 0.10.0
libtpu: 0.0.40
codegen_flags: <defaults>
</compile_context>

<pallas_src>
import functools
import math

import numpy as np
import jax
import jax.numpy as jnp
from jax.experimental import pallas as pl
from jax.experimental.pallas import tpu as pltpu

F32 = jnp.float32
NEG = -1e30
EMB = 12                      # src/tgt embedding inner dim (reference)
_VMEM = pl.BlockSpec(memory_space=pltpu.MemorySpace.VMEM)


def _sigmoid(z):
    # overflow-free sigmoid on the EUP (tanh) path
    return 0.5 * (jnp.tanh(0.5 * z) + 1.0)


# ----------------------------------------------------------------------------
# The single fused kernel
# ----------------------------------------------------------------------------
def _staggcn_kernel(x_attn_ref, x_g0_ref, mask_ref, mha_w_ref, mha_b_ref,
                    tcn_mat_ref, tcn_bias_ref, tlin_ref, seq_ref,
                    src_ref, tgt_ref, graph_ref, rrep_ref, rrepT_ref,
                    bmask_ref, origin_ref, gat_w_ref, vec_ref, lin_w_ref,
                    outw_ref, o_ref, *, dims):
    B = dims["B"]; L = dims["L"]; Din = dims["Din"]; Nn = dims["Nn"]
    E = dims["E"]; H = dims["H"]; DH = dims["DH"]; N = dims["N"]
    Fin = dims["Fin"]; CtL = dims["Ct"] * L; G = dims["G"]
    MAXIN = dims["MAXIN"]; MAXH = dims["MAXH"]
    OSTR = dims["OSTR"]; TSTR = dims["TSTR"]; SSTR = dims["SSTR"]
    heads_all = dims["heads"]
    NATTN = 2 * 4 * 2 * MAXH
    DinL = Din * L

    # ---- 1. multi-head self-attention (+ residual tanh) ------------------
    # rows are (batch, time) pairs; a static additive mask keeps attention
    # within each batch element (so no in-kernel head/batch transposes).
    x_attn = x_attn_ref[...]                                   # (B*L, E)
    mha_w = mha_w_ref[...]                                     # (E, 4E)
    mha_b = mha_b_ref[...]                                     # (1, 4E)
    qkv = (jnp.dot(x_attn, mha_w[:, :3 * E], preferred_element_type=F32)
           + mha_b[:, :3 * E])                 # Q already scaled by 1/sqrt(DH)
    out_wT = mha_w[:, 3 * E:]
    mask = mask_ref[...]
    acc = jnp.zeros((B * L, E), F32)
    for h in range(H):
        q = qkv[:, h * DH:(h + 1) * DH]
        k = qkv[:, E + h * DH:E + (h + 1) * DH]
        v = qkv[:, 2 * E + h * DH:2 * E + (h + 1) * DH]
        s = jnp.einsum("nd,md->nm", q, k, preferred_element_type=F32) + mask
        s = s - jnp.max(s, axis=1, keepdims=True)
        p = jnp.exp(s)
        p = p * pl.reciprocal(jnp.sum(p, axis=1, keepdims=True), approx=True)
        oh = jnp.dot(p, v, preferred_element_type=F32)
        acc = acc + jnp.dot(oh, out_wT[h * DH:(h + 1) * DH, :],
                            preferred_element_type=F32)
    mha = jnp.tanh(acc + mha_b[:, 3 * E:] + x_attn)            # (B*L, E)

    # ---- 2. TemporalBlock + tlinear (causal convs as banded matmuls) -----
    # TODO(synk): weight_norm is folded into effective conv weights; the
    #             Dropout layers (TemporalBlock, adaptive mix) are identity
    #             (eval mode).
    rrep = rrep_ref[...]                                       # (N, Nn)
    eye_n = rrep[:Nn, :]                                       # (Nn, Nn) = I
    tcn_mat = tcn_mat_ref[...]
    m1 = tcn_mat[:DinL, :]
    md = tcn_mat[DinL:2 * DinL, :]
    m2 = tcn_mat[2 * DinL:2 * DinL + CtL, :]
    tbias = tcn_bias_ref[...]
    b1r, b2r, bdr = tbias[0:1, :], tbias[1:2, :], tbias[2:3, :]
    tlin = tlin_ref[...]
    tlin_wT, tlin_br = tlin[:CtL, :], tlin[CtL:CtL + 1, :]

    tcn_rows = []
    for b in range(B):
        mb = mha[b * L:(b + 1) * L, :]                         # (L, E)
        # (L, Nn)->(Nn, L) relayout via identity matmul (transpose_rhs path)
        if Din == 1:
            xrow = jnp.einsum("ng,lg->nl", eye_n, mb,
                              preferred_element_type=F32)      # (Nn, DinL)
        else:
            parts = [jnp.einsum("ng,lg->nl", eye_n,
                                mb[:, d * Nn:(d + 1) * Nn],
                                preferred_element_type=F32)
                     for d in range(Din)]
            xrow = jnp.concatenate(parts, axis=1)
        h1 = jnp.maximum(
            jnp.dot(xrow, m1, preferred_element_type=F32) + b1r, 0.0)
        h2 = jnp.maximum(
            jnp.dot(h1, m2, preferred_element_type=F32) + b2r, 0.0)
        res = jnp.dot(xrow, md, preferred_element_type=F32) + bdr
        t = jnp.maximum(h2 + res, 0.0)                         # (Nn, CtL)
        tcn_rows.append(
            jnp.dot(t, tlin_wT, preferred_element_type=F32) + tlin_br)

    # ---- 3. shared seq_linear residual (used by both graph branches) -----
    x_g0 = x_g0_ref[...]                                       # (N, Fin)
    seq = seq_ref[...]
    g0 = (jnp.dot(x_g0, seq[:Fin, :], preferred_element_type=F32)
          + seq[Fin:Fin + 1, :] + x_g0)

    rrepT = rrepT_ref[...]                                     # (Nn, N)
    bmask = bmask_ref[...]                                     # (N, N)
    graph = graph_ref[...]                                     # (6N, N)
    src_all = src_ref[...]
    tgt_all = tgt_ref[...]
    origin_all = origin_ref[...]
    gat_w_all = gat_w_ref[...]
    vec_all = vec_ref[...]
    lin_w_all = lin_w_ref[...]

    ins = (Fin, G, G, G)
    branch_out = []
    for br in range(2):                      # 0 = SP branch, 1 = DTW branch
        g_base = br * 3 * N
        cnt = graph[g_base:g_base + N, :]
        pjT = graph[g_base + N:g_base + 2 * N, :]
        pi = graph[g_base + 2 * N:g_base + 3 * N, :]
        emask = cnt > 0.0

        # learned adjacency: softmax(relu(src @ tgt), dim=1)
        src = src_all[br * SSTR:br * SSTR + Nn, :]
        tgt = tgt_all[br * TSTR:br * TSTR + EMB, :]
        lm = jnp.maximum(jnp.dot(src, tgt, preferred_element_type=F32), 0.0)
        lm = lm - jnp.max(lm, axis=1, keepdims=True)
        le = jnp.exp(lm)
        matrix = le * pl.reciprocal(
            jnp.sum(le, axis=1, keepdims=True), approx=True)   # (Nn, Nn)
        # block-diag per-batch mixer
        bdm = jnp.dot(jnp.dot(rrep, matrix, preferred_element_type=F32),
                      rrepT, preferred_element_type=F32) * bmask

        ow = origin_all[br * OSTR:br * OSTR + Fin + 1, :]
        origin = (jnp.dot(g0, ow[:Fin, :], preferred_element_type=F32)
                  + ow[Fin:Fin + 1, :])

        def gat(x_in, layer, nheads, in_dim):
            base = (br * 4 + layer) * MAXIN
            wT = gat_w_all[base:base + in_dim, :nheads * G]
            xf = jnp.dot(x_in, wT, preferred_element_type=F32)  # (N, h*G)
            acc_g = jnp.zeros((N, G), F32)
            for hh in range(nheads):
                xh = xf[:, hh * G:(hh + 1) * G]
                rj = ((br * 4 + layer) * 2 + 0) * MAXH + hh
                ri = ((br * 4 + layer) * 2 + 1) * MAXH + hh
                ajh = vec_all[rj:rj + 1, :]                     # (1, G)
                aih = vec_all[ri:ri + 1, :]
                # rank-1 attention scores (reproduces the reference GATConv
                # including its double-indexing quirk via pjT / pi matrices)
                wj = jnp.dot(jnp.einsum("hg,ng->hn", ajh, xh,
                                        preferred_element_type=F32),
                             pjT, preferred_element_type=F32)   # (1, N)
                wi = jnp.dot(pi, jnp.sum(xh * aih, axis=1, keepdims=True),
                             preferred_element_type=F32)        # (N, 1)
                s = wi + wj                                     # (N, N)
                s = jnp.where(s > 0, s, 0.2 * s)                # leaky 0.2
                s = jnp.where(emask, s, NEG)
                s = s - jnp.max(s, axis=1, keepdims=True)
                p = jnp.exp(s) * cnt            # duplicate edges via counts
                p = p * pl.reciprocal(jnp.sum(p, axis=1, keepdims=True),
                                      approx=True)
                acc_g = acc_g + jnp.dot(p, xh, preferred_element_type=F32)
            gb = vec_all[NATTN + br * 4 + layer:
                         NATTN + br * 4 + layer + 1, :]
            return acc_g * (1.0 / nheads) + gb                  # head mean

        def adp(x_in, layer, in_dim):
            base = (br * 4 + layer) * MAXIN
            lwT = lin_w_all[base:base + in_dim, :]
            row = NATTN + 8 + br * 4 + layer
            lb = vec_all[row:row + 1, :]
            mixed = jnp.dot(bdm, x_in, preferred_element_type=F32)
            return jnp.dot(mixed, lwT, preferred_element_type=F32) + lb

        hs = heads_all[br]
        g1 = gat(g0, 0, hs[0], ins[0])
        s1 = _sigmoid(adp(g0, 0, ins[0]))
        out1 = jnp.tanh(g1) * s1 + origin * (1.0 - s1)

        in2 = jnp.tanh(out1)
        g2 = gat(in2, 1, hs[1], ins[1])
        s2 = _sigmoid(adp(in2, 1, ins[1]))
        out2 = jnp.where(g2 > 0, g2, 0.01 * g2) * s2 + out1 * (1.0 - s2)

        in3 = jnp.maximum(out2, 0.0)
        g3 = gat(in3, 2, hs[2], ins[2])
        s3 = _sigmoid(adp(in3, 2, ins[2]))
        out3 = jnp.maximum(g3, 0.0) * s3 + out2 * (1.0 - s3)

        in4 = jnp.maximum(out3, 0.0)
        g4 = gat(in4, 3, hs[3], ins[3])
        s4 = _sigmoid(adp(in4, 3, ins[3]))
        branch_out.append(jnp.maximum(g4, 0.0) * s4 + out3 * (1.0 - s4))

    # ---- 4. output linear over concat([tcn, sp, dtw]) --------------------
    outw = outw_ref[...]                                       # (3G+1, Pred)
    sp_out, dtw_out = branch_out
    base_sd = (jnp.dot(sp_out, outw[G:2 * G, :], preferred_element_type=F32)
               + jnp.dot(dtw_out, outw[2 * G:3 * G, :],
                         preferred_element_type=F32)
               + outw[3 * G:3 * G + 1, :])
    for b in range(B):
        o_ref[b * Nn:(b + 1) * Nn, :] = (
            base_sd[b * Nn:(b + 1) * Nn, :]
            + jnp.dot(tcn_rows[b], outw[:G, :], preferred_element_type=F32))


# ----------------------------------------------------------------------------
# One-time host-side preparation (hoisted out of the per-step forward)
# ----------------------------------------------------------------------------
def _conv_matrix_np(w, b, L, dilation):
    """Causal Conv1d(+Chomp) as a banded matmul: y_flat = x_flat @ M + b_flat
    with flat index = channel * L + t."""
    cout, cin, k_sz = w.shape
    m = np.zeros((cin * L, cout * L), np.float32)
    for k in range(k_sz):
        shift = (k_sz - 1 - k) * dilation
        s = np.eye(L, L, k=shift, dtype=np.float32)
        m += np.einsum("cd,ab->dacb", w[:, :, k], s).reshape(cin * L, cout * L)
    return m, np.repeat(b, L).astype(np.float32)


def _graph_consts_np(ei_np, n_nodes):
    """cnt / pjT / pi matrices that reproduce the reference GATConv message
    passing (incl. its double-indexing quirk) as dense matmuls."""
    ei = ei_np[:, ei_np[0] != ei_np[1]]
    loops = np.arange(n_nodes, dtype=ei.dtype)
    ei = np.concatenate([ei, np.stack([loops, loops])], axis=1)
    ej, eii = ei[0], ei[1]
    # self-loops guarantee |E| >= N, which the reference double-indexing needs
    assert ei.shape[1] >= n_nodes
    cnt = np.zeros((n_nodes, n_nodes), np.float32)
    np.add.at(cnt, (eii, ej), 1.0)
    pj_map = np.asarray(ej[:n_nodes])
    pi_map = np.asarray(eii[:n_nodes])
    pj = np.zeros((n_nodes, n_nodes), np.float32)
    pj[np.arange(n_nodes), pj_map] = 1.0
    pi = np.zeros((n_nodes, n_nodes), np.float32)
    pi[np.arange(n_nodes), pi_map] = 1.0
    return cnt, np.ascontiguousarray(pj.T), pi


def prepare(P, cfg, batch, edge_index, dtw_edge_index):
    """Pack every parameter / static structure tensor into a small number of
    padded slabs.  Runs ONCE (outside the per-step jit)."""
    L = cfg["seq_len"]; Din = cfg["input_dim"]; Nn = cfg["node_num"]
    Odim = cfg["output_dim"]
    B = batch; N = B * Nn; Fin = Din * L
    G = Odim * cfg["graph_dim"]
    Ct = cfg["tcn_dim"][0] * Odim; CtL = Ct * L
    E = Nn * Din; H = cfg["attn_head"]; DH = E // H
    Pred = cfg["pred_len"]; MAXIN = max(Fin, G)
    heads_all = ((3, 3, 3, 1), (3, 3, 3, 3))
    MAXH = max(max(hs) for hs in heads_all)
    OSTR = -(-(Fin + 1) // 8) * 8
    TSTR = -(-EMB // 8) * 8
    SSTR = -(-Nn // 8) * 8

    def npa(a):
        return np.asarray(a, dtype=np.float32)

    S = {}
    # attention mask over rows ordered (batch, time)
    rb = np.arange(B * L) // L
    S["mask"] = jnp.asarray(
        np.where(rb[:, None] == rb[None, :], 0.0, NEG).astype(np.float32))

    # MHA weights; fold the 1/sqrt(head_dim) scale into the Q projection
    scale = 1.0 / math.sqrt(DH)
    in_wT = npa(P["mha_in_w"]).T.copy()
    in_b = npa(P["mha_in_b"]).copy()
    in_wT[:, :E] *= scale
    in_b[:E] *= scale
    S["mha_w"] = jnp.asarray(
        np.concatenate([in_wT, npa(P["mha_out_w"]).T], axis=1))
    S["mha_b"] = jnp.asarray(
        np.concatenate([in_b, npa(P["mha_out_b"])])[None, :])

    # TCN causal convs as banded matmuls (built once, not per forward)
    m1, b1 = _conv_matrix_np(npa(P["tcn_w1"]), npa(P["tcn_b1"]), L, 1)
    m2, b2 = _conv_matrix_np(npa(P["tcn_w2"]), npa(P["tcn_b2"]), L, 1)
    md, bd = _conv_matrix_np(npa(P["tcn_wd"]), npa(P["tcn_bd"]), L, 1)
    S["tcn_mat"] = jnp.asarray(np.concatenate([m1, md, m2], axis=0))
    S["tcn_bias"] = jnp.asarray(np.stack([b1, b2, bd], axis=0))
    S["tlin"] = jnp.asarray(np.concatenate(
        [npa(P["tlin_w"]).T, npa(P["tlin_b"])[None, :]], axis=0))

    S["seq"] = jnp.asarray(np.concatenate(
        [npa(P["seq_w"]).T, npa(P["seq_b"])[None, :]], axis=0))

    # branch slabs ---------------------------------------------------------
    src = np.zeros((2 * SSTR, EMB), np.float32)
    tgt = np.zeros((2 * TSTR, Nn), np.float32)
    orig = np.zeros((2 * OSTR, G), np.float32)
    gat_w = np.zeros((2 * 4 * MAXIN, MAXH * G), np.float32)
    lin_w = np.zeros((2 * 4 * MAXIN, G), np.float32)
    natt = 2 * 4 * 2 * MAXH
    vec = np.zeros((natt + 16, G), np.float32)
    graphs = []
    ins = (Fin, G, G, G)
    for bi, (pre, ei) in enumerate(
            (("sp", edge_index), ("dtw", dtw_edge_index))):
        src[bi * SSTR:bi * SSTR + Nn] = npa(P[pre + "_src"])
        tgt[bi * TSTR:bi * TSTR + EMB] = npa(P[pre + "_tgt"])
        orig[bi * OSTR:bi * OSTR + Fin] = npa(P[pre + "_origin_w"]).T
        orig[bi * OSTR + Fin] = npa(P[pre + "_origin_b"])
        cnt, pjT, pi = _graph_consts_np(np.asarray(ei), N)
        graphs.append(np.concatenate([cnt, pjT, pi], axis=0))
        for l in range(4):
            gp = P[f"{pre}_gat{l + 1}"]
            h = heads_all[bi][l]
            ind = ins[l]
            base = (bi * 4 + l) * MAXIN
            gat_w[base:base + ind, :h * G] = npa(gp["W"]).T
            lin_w[base:base + ind, :] = npa(P[f"{pre}_lin{l + 1}_w"]).T
            aj, ai = npa(gp["attn_j"]), npa(gp["attn_i"])
            for hh in range(h):
                vec[((bi * 4 + l) * 2 + 0) * MAXH + hh] = aj[hh]
                vec[((bi * 4 + l) * 2 + 1) * MAXH + hh] = ai[hh]
            vec[natt + bi * 4 + l] = npa(gp["bias"])
            vec[natt + 8 + bi * 4 + l] = npa(P[f"{pre}_lin{l + 1}_b"])
    S["src"] = jnp.asarray(src)
    S["tgt"] = jnp.asarray(tgt)
    S["origin"] = jnp.asarray(orig)
    S["gat_w"] = jnp.asarray(gat_w)
    S["lin_w"] = jnp.asarray(lin_w)
    S["vec"] = jnp.asarray(vec)
    S["graph"] = jnp.asarray(np.concatenate(graphs, axis=0))

    rrep = np.zeros((N, Nn), np.float32)
    rrep[np.arange(N), np.arange(N) % Nn] = 1.0
    S["rrep"] = jnp.asarray(rrep)
    S["rrepT"] = jnp.asarray(np.ascontiguousarray(rrep.T))
    S["bmask"] = jnp.asarray(
        (np.arange(N)[:, None] // Nn == np.arange(N)[None, :] // Nn)
        .astype(np.float32))

    S["outw"] = jnp.asarray(np.concatenate(
        [npa(P["out_w"]).T, npa(P["out_b"])[None, :]], axis=0))

    dims = dict(B=B, L=L, Din=Din, Nn=Nn, E=E, H=H, DH=DH, N=N, Fin=Fin,
                Ct=Ct, G=G, Pred=Pred, Odim=Odim, MAXIN=MAXIN, MAXH=MAXH,
                OSTR=OSTR, TSTR=TSTR, SSTR=SSTR, heads=heads_all)
    return S, dims


# ----------------------------------------------------------------------------
# Forward pass: ONE pallas_call
# ----------------------------------------------------------------------------
def staggcn_forward(S, x, dims):
    B = dims["B"]; L = dims["L"]; Nn = dims["Nn"]
    N = dims["N"]; Fin = dims["Fin"]; E = dims["E"]; Pred = dims["Pred"]

    # the reference's own input permutes (tiny, applied to the raw input only)
    x_attn = x.transpose(0, 1, 3, 2).reshape(B * L, E)      # rows = (b, l)
    x_g0 = x.transpose(0, 2, 3, 1).reshape(N, Fin)          # rows = (b, n)

    out2d = pl.pallas_call(
        functools.partial(_staggcn_kernel, dims=dims),
        out_shape=jax.ShapeDtypeStruct((N, Pred), F32),
        in_specs=[_VMEM] * 20,
        out_specs=_VMEM,
    )(x_attn, x_g0, S["mask"], S["mha_w"], S["mha_b"], S["tcn_mat"],
      S["tcn_bias"], S["tlin"], S["seq"], S["src"], S["tgt"], S["graph"],
      S["rrep"], S["rrepT"], S["bmask"], S["origin"], S["gat_w"], S["vec"],
      S["lin_w"], S["outw"])

    out = out2d.reshape(B, Nn, dims["Odim"], Pred)
    return out.transpose(0, 3, 1, 2)                        # (B, Pred, Nn, 1)


# ----------------------------------------------------------------------------
# Deterministic parameter initialization
# ----------------------------------------------------------------------------
def init_params(key, cfg):
    keys = iter(jax.random.split(key, 256))

    def nrm(shape, s=0.1):
        return (s * jax.random.normal(next(keys), shape)).astype(F32)

    Nn = cfg["node_num"]; L = cfg["seq_len"]; Din = cfg["input_dim"]
    G = cfg["output_dim"] * cfg["graph_dim"]
    Ct = cfg["tcn_dim"][0] * cfg["output_dim"]
    E = Nn * Din; Fin = Din * L

    P = {}
    P["mha_in_w"] = nrm((3 * E, E)); P["mha_in_b"] = nrm((3 * E,))
    P["mha_out_w"] = nrm((E, E));    P["mha_out_b"] = nrm((E,))

    P["tcn_w1"] = nrm((Ct, Din, 2)); P["tcn_b1"] = nrm((Ct,))
    P["tcn_w2"] = nrm((Ct, Ct, 2));  P["tcn_b2"] = nrm((Ct,))
    P["tcn_wd"] = nrm((Ct, Din, 1)); P["tcn_bd"] = nrm((Ct,))
    P["tlin_w"] = nrm((G, Ct * L));  P["tlin_b"] = nrm((G,))

    P["seq_w"] = nrm((Fin, Fin));    P["seq_b"] = nrm((Fin,))

    for pre in ("sp", "dtw"):
        P[pre + "_src"] = nrm((Nn, EMB))
        P[pre + "_tgt"] = nrm((EMB, Nn))
        P[pre + "_origin_w"] = nrm((G, Fin))
        P[pre + "_origin_b"] = nrm((G,))
        heads_list = [3, 3, 3, 1] if pre == "sp" else [3, 3, 3, 3]
        in_dims = [Fin, G, G, G]
        for l in range(4):
            h = heads_list[l]
            P[f"{pre}_gat{l + 1}"] = dict(
                W=nrm((h * G, in_dims[l])),
                attn_j=nrm((h, G)),
                attn_i=nrm((h, G)),
                bias=jnp.zeros((G,), F32),
            )
            P[f"{pre}_lin{l + 1}_w"] = nrm((G, in_dims[l]))
            P[f"{pre}_lin{l + 1}_b"] = nrm((G,))

    P["out_w"] = nrm((cfg["pred_len"], 3 * cfg["graph_dim"]))
    P["out_b"] = nrm((cfg["pred_len"],))
    return P


# ----------------------------------------------------------------------------
# Main
# ----------------------------------------------------------------------------
if __name__ == "__main__":
    cfg = dict(input_dim=1, output_dim=1, node_num=16, seq_len=8, pred_len=4,
               graph_dim=16, tcn_dim=[4], attn_head=4)

    key = jax.random.PRNGKey(0)
    kx, kp = jax.random.split(key)

    batch = 2
    x = jax.random.normal(
        kx, (batch, cfg["seq_len"], cfg["input_dim"], cfg["node_num"]),
        dtype=F32)

    # graph over batch*node_num "nodes" (same convention as the reference
    # STCell, where GATConv sees x of shape (batch*node_num, feat)).
    n_tot = batch * cfg["node_num"]
    idx = np.arange(n_tot, dtype=np.int32)
    edge_index = np.stack(
        [np.concatenate([idx, (idx + 1) % n_tot]),
         np.concatenate([(idx + 1) % n_tot, idx])]).astype(np.int32)
    dtw_edge_index = np.stack(
        [np.concatenate([idx, (idx + 3) % n_tot]),
         np.concatenate([(idx + 3) % n_tot, idx])]).astype(np.int32)

    params = init_params(kp, cfg)
    slabs, dims = prepare(params, cfg, batch, edge_index, dtw_edge_index)

    fwd = jax.jit(functools.partial(staggcn_forward, dims=dims))
    out = jax.block_until_ready(fwd(slabs, x))

    expected = (batch, cfg["pred_len"], cfg["node_num"], cfg["output_dim"])
    assert out.shape == expected, (out.shape, expected)
    assert bool(jnp.all(jnp.isfinite(out)))
    print("KERNEL_OK")
</pallas_src>

<mosaic_0001>
module attributes {stable_mosaic.version = 11 : i64} {
  func.func @_staggcn_kernel(%arg0: memref<16x16xf32, #tpu.memory_space<vmem>>, %arg1: memref<32x8xf32, #tpu.memory_space<vmem>>, %arg2: memref<16x16xf32, #tpu.memory_space<vmem>>, %arg3: memref<16x64xf32, #tpu.memory_space<vmem>>, %arg4: memref<1x64xf32, #tpu.memory_space<vmem>>, %arg5: memref<48x32xf32, #tpu.memory_space<vmem>>, %arg6: memref<3x32xf32, #tpu.memory_space<vmem>>, %arg7: memref<33x16xf32, #tpu.memory_space<vmem>>, %arg8: memref<9x8xf32, #tpu.memory_space<vmem>>, %arg9: memref<32x12xf32, #tpu.memory_space<vmem>>, %arg10: memref<32x16xf32, #tpu.memory_space<vmem>>, %arg11: memref<192x32xf32, #tpu.memory_space<vmem>>, %arg12: memref<32x16xf32, #tpu.memory_space<vmem>>, %arg13: memref<16x32xf32, #tpu.memory_space<vmem>>, %arg14: memref<32x32xf32, #tpu.memory_space<vmem>>, %arg15: memref<32x16xf32, #tpu.memory_space<vmem>>, %arg16: memref<128x48xf32, #tpu.memory_space<vmem>>, %arg17: memref<64x16xf32, #tpu.memory_space<vmem>>, %arg18: memref<128x16xf32, #tpu.memory_space<vmem>>, %arg19: memref<49x4xf32, #tpu.memory_space<vmem>>, %arg20: memref<32x4xf32, #tpu.memory_space<vmem>>) attributes {dimension_semantics = [], scalar_prefetch = 0 : i64, scratch_operands = 0 : i64, tpu.core_type = #tpu.core_type<tc>} {
    %c0 = arith.constant 0 : index
    %c0_0 = arith.constant 0 : index
    %0 = vector.load %arg0[%c0, %c0_0] : memref<16x16xf32, #tpu.memory_space<vmem>>, vector<16x16xf32>
    %c0_1 = arith.constant 0 : index
    %c0_2 = arith.constant 0 : index
    %1 = vector.load %arg3[%c0_1, %c0_2] : memref<16x64xf32, #tpu.memory_space<vmem>>, vector<16x64xf32>
    %c0_3 = arith.constant 0 : index
    %c0_4 = arith.constant 0 : index
    %2 = vector.load %arg4[%c0_3, %c0_4] : memref<1x64xf32, #tpu.memory_space<vmem>>, vector<1x64xf32>
    %3 = vector.extract_strided_slice %1 {offsets = [0, 0], sizes = [16, 48], strides = [1, 1]} : vector<16x64xf32> to vector<16x48xf32>
    %cst = arith.constant dense<0.000000e+00> : vector<16x48xf32>
    %4 = tpu.matmul %0, %3, %cst {dimension_numbers = #tpu.dot_dimension_numbers<[1], [0], [0], [1], [0, 0, 1, 1], [], []>} : vector<16x16xf32>, vector<16x48xf32>, vector<16x48xf32> -> vector<16x48xf32>
    %5 = vector.extract_strided_slice %2 {offsets = [0, 0], sizes = [1, 48], strides = [1, 1]} : vector<1x64xf32> to vector<1x48xf32>
    %6 = vector.broadcast %5 : vector<1x48xf32> to vector<16x48xf32>
    %7 = arith.addf %4, %6 : vector<16x48xf32>
    %8 = vector.extract_strided_slice %1 {offsets = [0, 48], sizes = [16, 16], strides = [1, 1]} : vector<16x64xf32> to vector<16x16xf32>
    %c0_5 = arith.constant 0 : index
    %c0_6 = arith.constant 0 : index
    %9 = vector.load %arg2[%c0_5, %c0_6] : memref<16x16xf32, #tpu.memory_space<vmem>>, vector<16x16xf32>
    %cst_7 = arith.constant 0.000000e+00 : f32
    %10 = vector.broadcast %cst_7 : f32 to vector<16x16xf32>
    %11 = vector.extract_strided_slice %7 {offsets = [0, 0], sizes = [16, 4], strides = [1, 1]} : vector<16x48xf32> to vector<16x4xf32>
    %12 = vector.extract_strided_slice %7 {offsets = [0, 16], sizes = [16, 4], strides = [1, 1]} : vector<16x48xf32> to vector<16x4xf32>
    %13 = vector.extract_strided_slice %7 {offsets = [0, 32], sizes = [16, 4], strides = [1, 1]} : vector<16x48xf32> to vector<16x4xf32>
    "tpu.trace_start"() <{level = 10 : i32, message = "nd,md->nm"}> : () -> ()
    %cst_8 = arith.constant dense<0.000000e+00> : vector<16x16xf32>
    %14 = tpu.matmul %11, %12, %cst_8 {dimension_numbers = #tpu.dot_dimension_numbers<[1], [1], [0], [0], [0, 0, 1, 0], [], []>} : vector<16x4xf32>, vector<16x4xf32>, vector<16x16xf32> -> vector<16x16xf32>
    "tpu.trace_stop"() : () -> ()
    %15 = arith.addf %14, %9 : vector<16x16xf32>
    %cst_9 = arith.constant dense<0xFF800000> : vector<16xf32>
    %16 = vector.multi_reduction <maximumf>, %15, %cst_9 [1] : vector<16x16xf32> to vector<16xf32>
    %17 = vector.shape_cast %16 : vector<16xf32> to vector<16x1xf32>
    %18 = vector.broadcast %17 : vector<16x1xf32> to vector<16x16xf32>
    %19 = arith.subf %15, %18 : vector<16x16xf32>
    %20 = math.exp %19 : vector<16x16xf32>
    %cst_10 = arith.constant dense<0.000000e+00> : vector<16xf32>
    %21 = vector.multi_reduction <add>, %20, %cst_10 [1] : vector<16x16xf32> to vector<16xf32>
    %22 = vector.shape_cast %21 : vector<16xf32> to vector<16x1xf32>
    %23 = tpu.reciprocal %22 {approx = true} : vector<16x1xf32> -> vector<16x1xf32>
    %24 = vector.broadcast %23 : vector<16x1xf32> to vector<16x16xf32>
    %25 = arith.mulf %20, %24 : vector<16x16xf32>
    %cst_11 = arith.constant dense<0.000000e+00> : vector<16x4xf32>
    %26 = tpu.matmul %25, %13, %cst_11 {dimension_numbers = #tpu.dot_dimension_numbers<[1], [0], [0], [1], [0, 0, 1, 1], [], []>} : vector<16x16xf32>, vector<16x4xf32>, vector<16x4xf32> -> vector<16x4xf32>
    %27 = vector.extract_strided_slice %8 {offsets = [0, 0], sizes = [4, 16], strides = [1, 1]} : vector<16x16xf32> to vector<4x16xf32>
    %cst_12 = arith.constant dense<0.000000e+00> : vector<16x16xf32>
    %28 = tpu.matmul %26, %27, %cst_12 {dimension_numbers = #tpu.dot_dimension_numbers<[1], [0], [0], [1], [0, 0, 1, 1], [], []>} : vector<16x4xf32>, vector<4x16xf32>, vector<16x16xf32> -> vector<16x16xf32>
    %29 = arith.addf %10, %28 : vector<16x16xf32>
    %30 = vector.extract_strided_slice %7 {offsets = [0, 4], sizes = [16, 4], strides = [1, 1]} : vector<16x48xf32> to vector<16x4xf32>
    %31 = vector.extract_strided_slice %7 {offsets = [0, 20], sizes = [16, 4], strides = [1, 1]} : vector<16x48xf32> to vector<16x4xf32>
    %32 = vector.extract_strided_slice %7 {offsets = [0, 36], sizes = [16, 4], strides = [1, 1]} : vector<16x48xf32> to vector<16x4xf32>
    "tpu.trace_start"() <{level = 10 : i32, message = "nd,md->nm"}> : () -> ()
    %cst_13 = arith.constant dense<0.000000e+00> : vector<16x16xf32>
    %33 = tpu.matmul %30, %31, %cst_13 {dimension_numbers = #tpu.dot_dimension_numbers<[1], [1], [0], [0], [0, 0, 1, 0], [], []>} : vector<16x4xf32>, vector<16x4xf32>, vector<16x16xf32> -> vector<16x16xf32>
    "tpu.trace_stop"() : () -> ()
    %34 = arith.addf %33, %9 : vector<16x16xf32>
    %cst_14 = arith.constant dense<0xFF800000> : vector<16xf32>
    %35 = vector.multi_reduction <maximumf>, %34, %cst_14 [1] : vector<16x16xf32> to vector<16xf32>
    %36 = vector.shape_cast %35 : vector<16xf32> to vector<16x1xf32>
    %37 = vector.broadcast %36 : vector<16x1xf32> to vector<16x16xf32>
    %38 = arith.subf %34, %37 : vector<16x16xf32>
    %39 = math.exp %38 : vector<16x16xf32>
    %cst_15 = arith.constant dense<0.000000e+00> : vector<16xf32>
    %40 = vector.multi_reduction <add>, %39, %cst_15 [1] : vector<16x16xf32> to vector<16xf32>
    %41 = vector.shape_cast %40 : vector<16xf32> to vector<16x1xf32>
    %42 = tpu.reciprocal %41 {approx = true} : vector<16x1xf32> -> vector<16x1xf32>
    %43 = vector.broadcast %42 : vector<16x1xf32> to vector<16x16xf32>
    %44 = arith.mulf %39, %43 : vector<16x16xf32>
    %cst_16 = arith.constant dense<0.000000e+00> : vector<16x4xf32>
    %45 = tpu.matmul %44, %32, %cst_16 {dimension_numbers = #tpu.dot_dimension_numbers<[1], [0], [0], [1], [0, 0, 1, 1], [], []>} : vector<16x16xf32>, vector<16x4xf32>, vector<16x4xf32> -> vector<16x4xf32>
    %46 = vector.extract_strided_slice %8 {offsets = [4, 0], sizes = [4, 16], strides = [1, 1]} : vector<16x16xf32> to vector<4x16xf32>
    %cst_17 = arith.constant dense<0.000000e+00> : vector<16x16xf32>
    %47 = tpu.matmul %45, %46, %cst_17 {dimension_numbers = #tpu.dot_dimension_numbers<[1], [0], [0], [1], [0, 0, 1, 1], [], []>} : vector<16x4xf32>, vector<4x16xf32>, vector<16x16xf32> -> vector<16x16xf32>
    %48 = arith.addf %29, %47 : vector<16x16xf32>
    %49 = vector.extract_strided_slice %7 {offsets = [0, 8], sizes = [16, 4], strides = [1, 1]} : vector<16x48xf32> to vector<16x4xf32>
    %50 = vector.extract_strided_slice %7 {offsets = [0, 24], sizes = [16, 4], strides = [1, 1]} : vector<16x48xf32> to vector<16x4xf32>
    %51 = vector.extract_strided_slice %7 {offsets = [0, 40], sizes = [16, 4], strides = [1, 1]} : vector<16x48xf32> to vector<16x4xf32>
    "tpu.trace_start"() <{level = 10 : i32, message = "nd,md->nm"}> : () -> ()
    %cst_18 = arith.constant dense<0.000000e+00> : vector<16x16xf32>
    %52 = tpu.matmul %49, %50, %cst_18 {dimension_numbers = #tpu.dot_dimension_numbers<[1], [1], [0], [0], [0, 0, 1, 0], [], []>} : vector<16x4xf32>, vector<16x4xf32>, vector<16x16xf32> -> vector<16x16xf32>
    "tpu.trace_stop"() : () -> ()
    %53 = arith.addf %52, %9 : vector<16x16xf32>
    %cst_19 = arith.constant dense<0xFF800000> : vector<16xf32>
    %54 = vector.multi_reduction <maximumf>, %53, %cst_19 [1] : vector<16x16xf32> to vector<16xf32>
    %55 = vector.shape_cast %54 : vector<16xf32> to vector<16x1xf32>
    %56 = vector.broadcast %55 : vector<16x1xf32> to vector<16x16xf32>
    %57 = arith.subf %53, %56 : vector<16x16xf32>
    %58 = math.exp %57 : vector<16x16xf32>
    %cst_20 = arith.constant dense<0.000000e+00> : vector<16xf32>
    %59 = vector.multi_reduction <add>, %58, %cst_20 [1] : vector<16x16xf32> to vector<16xf32>
    %60 = vector.shape_cast %59 : vector<16xf32> to vector<16x1xf32>
    %61 = tpu.reciprocal %60 {approx = true} : vector<16x1xf32> -> vector<16x1xf32>
    %62 = vector.broadcast %61 : vector<16x1xf32> to vector<16x16xf32>
    %63 = arith.mulf %58, %62 : vector<16x16xf32>
    %cst_21 = arith.constant dense<0.000000e+00> : vector<16x4xf32>
    %64 = tpu.matmul %63, %51, %cst_21 {dimension_numbers = #tpu.dot_dimension_numbers<[1], [0], [0], [1], [0, 0, 1, 1], [], []>} : vector<16x16xf32>, vector<16x4xf32>, vector<16x4xf32> -> vector<16x4xf32>
    %65 = vector.extract_strided_slice %8 {offsets = [8, 0], sizes = [4, 16], strides = [1, 1]} : vector<16x16xf32> to vector<4x16xf32>
    %cst_22 = arith.constant dense<0.000000e+00> : vector<16x16xf32>
    %66 = tpu.matmul %64, %65, %cst_22 {dimension_numbers = #tpu.dot_dimension_numbers<[1], [0], [0], [1], [0, 0, 1, 1], [], []>} : vector<16x4xf32>, vector<4x16xf32>, vector<16x16xf32> -> vector<16x16xf32>
    %67 = arith.addf %48, %66 : vector<16x16xf32>
    %68 = vector.extract_strided_slice %7 {offsets = [0, 12], sizes = [16, 4], strides = [1, 1]} : vector<16x48xf32> to vector<16x4xf32>
    %69 = vector.extract_strided_slice %7 {offsets = [0, 28], sizes = [16, 4], strides = [1, 1]} : vector<16x48xf32> to vector<16x4xf32>
    %70 = vector.extract_strided_slice %7 {offsets = [0, 44], sizes = [16, 4], strides = [1, 1]} : vector<16x48xf32> to vector<16x4xf32>
    "tpu.trace_start"() <{level = 10 : i32, message = "nd,md->nm"}> : () -> ()
    %cst_23 = arith.constant dense<0.000000e+00> : vector<16x16xf32>
    %71 = tpu.matmul %68, %69, %cst_23 {dimension_numbers = #tpu.dot_dimension_numbers<[1], [1], [0], [0], [0, 0, 1, 0], [], []>} : vector<16x4xf32>, vector<16x4xf32>, vector<16x16xf32> -> vector<16x16xf32>
    "tpu.trace_stop"() : () -> ()
    %72 = arith.addf %71, %9 : vector<16x16xf32>
    %cst_24 = arith.constant dense<0xFF800000> : vector<16xf32>
    %73 = vector.multi_reduction <maximumf>, %72, %cst_24 [1] : vector<16x16xf32> to vector<16xf32>
    %74 = vector.shape_cast %73 : vector<16xf32> to vector<16x1xf32>
    %75 = vector.broadcast %74 : vector<16x1xf32> to vector<16x16xf32>
    %76 = arith.subf %72, %75 : vector<16x16xf32>
    %77 = math.exp %76 : vector<16x16xf32>
    %cst_25 = arith.constant dense<0.000000e+00> : vector<16xf32>
    %78 = vector.multi_reduction <add>, %77, %cst_25 [1] : vector<16x16xf32> to vector<16xf32>
    %79 = vector.shape_cast %78 : vector<16xf32> to vector<16x1xf32>
    %80 = tpu.reciprocal %79 {approx = true} : vector<16x1xf32> -> vector<16x1xf32>
    %81 = vector.broadcast %80 : vector<16x1xf32> to vector<16x16xf32>
    %82 = arith.mulf %77, %81 : vector<16x16xf32>
    %cst_26 = arith.constant dense<0.000000e+00> : vector<16x4xf32>
    %83 = tpu.matmul %82, %70, %cst_26 {dimension_numbers = #tpu.dot_dimension_numbers<[1], [0], [0], [1], [0, 0, 1, 1], [], []>} : vector<16x16xf32>, vector<16x4xf32>, vector<16x4xf32> -> vector<16x4xf32>
    %84 = vector.extract_strided_slice %8 {offsets = [12, 0], sizes = [4, 16], strides = [1, 1]} : vector<16x16xf32> to vector<4x16xf32>
    %cst_27 = arith.constant dense<0.000000e+00> : vector<16x16xf32>
    %85 = tpu.matmul %83, %84, %cst_27 {dimension_numbers = #tpu.dot_dimension_numbers<[1], [0], [0], [1], [0, 0, 1, 1], [], []>} : vector<16x4xf32>, vector<4x16xf32>, vector<16x16xf32> -> vector<16x16xf32>
    %86 = arith.addf %67, %85 : vector<16x16xf32>
    %87 = vector.extract_strided_slice %2 {offsets = [0, 48], sizes = [1, 16], strides = [1, 1]} : vector<1x64xf32> to vector<1x16xf32>
    %88 = vector.broadcast %87 : vector<1x16xf32> to vector<16x16xf32>
    %89 = arith.addf %86, %88 : vector<16x16xf32>
    %90 = arith.addf %89, %0 : vector<16x16xf32>
    %91 = math.tanh %90 : vector<16x16xf32>
    %c0_28 = arith.constant 0 : index
    %c0_29 = arith.constant 0 : index
    %92 = vector.load %arg12[%c0_28, %c0_29] : memref<32x16xf32, #tpu.memory_space<vmem>>, vector<32x16xf32>
    %93 = vector.extract_strided_slice %92 {offsets = [0, 0], sizes = [16, 16], strides = [1, 1]} : vector<32x16xf32> to vector<16x16xf32>
    %c0_30 = arith.constant 0 : index
    %c0_31 = arith.constant 0 : index
    %94 = vector.load %arg5[%c0_30, %c0_31] : memref<48x32xf32, #tpu.memory_space<vmem>>, vector<48x32xf32>
    %95 = vector.extract_strided_slice %94 {offsets = [0, 0], sizes = [8, 32], strides = [1, 1]} : vector<48x32xf32> to vector<8x32xf32>
    %96 = vector.extract_strided_slice %94 {offsets = [8, 0], sizes = [8, 32], strides = [1, 1]} : vector<48x32xf32> to vector<8x32xf32>
    %97 = vector.extract_strided_slice %94 {offsets = [16, 0], sizes = [32, 32], strides = [1, 1]} : vector<48x32xf32> to vector<32x32xf32>
    %c0_32 = arith.constant 0 : index
    %c0_33 = arith.constant 0 : index
    %98 = vector.load %arg6[%c0_32, %c0_33] : memref<3x32xf32, #tpu.memory_space<vmem>>, vector<3x32xf32>
    %99 = vector.extract_strided_slice %98 {offsets = [0, 0], sizes = [1, 32], strides = [1, 1]} : vector<3x32xf32> to vector<1x32xf32>
    %100 = vector.extract_strided_slice %98 {offsets = [1, 0], sizes = [1, 32], strides = [1, 1]} : vector<3x32xf32> to vector<1x32xf32>
    %101 = vector.extract_strided_slice %98 {offsets = [2, 0], sizes = [1, 32], strides = [1, 1]} : vector<3x32xf32> to vector<1x32xf32>
    %c0_34 = arith.constant 0 : index
    %c0_35 = arith.constant 0 : index
    %102 = vector.load %arg7[%c0_34, %c0_35] : memref<33x16xf32, #tpu.memory_space<vmem>>, vector<33x16xf32>
    %103 = vector.extract_strided_slice %102 {offsets = [0, 0], sizes = [32, 16], strides = [1, 1]} : vector<33x16xf32> to vector<32x16xf32>
    %104 = vector.extract_strided_slice %102 {offsets = [32, 0], sizes = [1, 16], strides = [1, 1]} : vector<33x16xf32> to vector<1x16xf32>
    %105 = vector.extract_strided_slice %91 {offsets = [0, 0], sizes = [8, 16], strides = [1, 1]} : vector<16x16xf32> to vector<8x16xf32>
    "tpu.trace_start"() <{level = 10 : i32, message = "ng,lg->nl"}> : () -> ()
    %cst_36 = arith.constant dense<0.000000e+00> : vector<16x8xf32>
    %106 = tpu.matmul %93, %105, %cst_36 {dimension_numbers = #tpu.dot_dimension_numbers<[1], [1], [0], [0], [0, 0, 1, 0], [], []>} : vector<16x16xf32>, vector<8x16xf32>, vector<16x8xf32> -> vector<16x8xf32>
    "tpu.trace_stop"() : () -> ()
    %cst_37 = arith.constant dense<0.000000e+00> : vector<16x32xf32>
    %107 = tpu.matmul %106, %95, %cst_37 {dimension_numbers = #tpu.dot_dimension_numbers<[1], [0], [0], [1], [0, 0, 1, 1], [], []>} : vector<16x8xf32>, vector<8x32xf32>, vector<16x32xf32> -> vector<16x32xf32>
    %108 = vector.broadcast %99 : vector<1x32xf32> to vector<16x32xf32>
    %109 = arith.addf %107, %108 : vector<16x32xf32>
    %cst_38 = arith.constant 0.000000e+00 : f32
    %110 = vector.broadcast %cst_38 : f32 to vector<16x32xf32>
    %111 = arith.maximumf %109, %110 : vector<16x32xf32>
    %cst_39 = arith.constant dense<0.000000e+00> : vector<16x32xf32>
    %112 = tpu.matmul %111, %97, %cst_39 {dimension_numbers = #tpu.dot_dimension_numbers<[1], [0], [0], [1], [0, 0, 1, 1], [], []>} : vector<16x32xf32>, vector<32x32xf32>, vector<16x32xf32> -> vector<16x32xf32>
    %113 = vector.broadcast %100 : vector<1x32xf32> to vector<16x32xf32>
    %114 = arith.addf %112, %113 : vector<16x32xf32>
    %cst_40 = arith.constant 0.000000e+00 : f32
    %115 = vector.broadcast %cst_40 : f32 to vector<16x32xf32>
    %116 = arith.maximumf %114, %115 : vector<16x32xf32>
    %cst_41 = arith.constant dense<0.000000e+00> : vector<16x32xf32>
    %117 = tpu.matmul %106, %96, %cst_41 {dimension_numbers = #tpu.dot_dimension_numbers<[1], [0], [0], [1], [0, 0, 1, 1], [], []>} : vector<16x8xf32>, vector<8x32xf32>, vector<16x32xf32> -> vector<16x32xf32>
    %118 = vector.broadcast %101 : vector<1x32xf32> to vector<16x32xf32>
    %119 = arith.addf %117, %118 : vector<16x32xf32>
    %120 = arith.addf %116, %119 : vector<16x32xf32>
    %cst_42 = arith.constant 0.000000e+00 : f32
    %121 = vector.broadcast %cst_42 : f32 to vector<16x32xf32>
    %122 = arith.maximumf %120, %121 : vector<16x32xf32>
    %cst_43 = arith.constant dense<0.000000e+00> : vector<16x16xf32>
    %123 = tpu.matmul %122, %103, %cst_43 {dimension_numbers = #tpu.dot_dimension_numbers<[1], [0], [0], [1], [0, 0, 1, 1], [], []>} : vector<16x32xf32>, vector<32x16xf32>, vector<16x16xf32> -> vector<16x16xf32>
    %124 = vector.broadcast %104 : vector<1x16xf32> to vector<16x16xf32>
    %125 = arith.addf %123, %124 : vector<16x16xf32>
    %126 = vector.extract_strided_slice %91 {offsets = [8, 0], sizes = [8, 16], strides = [1, 1]} : vector<16x16xf32> to vector<8x16xf32>
    "tpu.trace_start"() <{level = 10 : i32, message = "ng,lg->nl"}> : () -> ()
    %cst_44 = arith.constant dense<0.000000e+00> : vector<16x8xf32>
    %127 = tpu.matmul %93, %126, %cst_44 {dimension_numbers = #tpu.dot_dimension_numbers<[1], [1], [0], [0], [0, 0, 1, 0], [], []>} : vector<16x16xf32>, vector<8x16xf32>, vector<16x8xf32> -> vector<16x8xf32>
    "tpu.trace_stop"() : () -> ()
    %cst_45 = arith.constant dense<0.000000e+00> : vector<16x32xf32>
    %128 = tpu.matmul %127, %95, %cst_45 {dimension_numbers = #tpu.dot_dimension_numbers<[1], [0], [0], [1], [0, 0, 1, 1], [], []>} : vector<16x8xf32>, vector<8x32xf32>, vector<16x32xf32> -> vector<16x32xf32>
    %129 = vector.broadcast %99 : vector<1x32xf32> to vector<16x32xf32>
    %130 = arith.addf %128, %129 : vector<16x32xf32>
    %cst_46 = arith.constant 0.000000e+00 : f32
    %131 = vector.broadcast %cst_46 : f32 to vector<16x32xf32>
    %132 = arith.maximumf %130, %131 : vector<16x32xf32>
    %cst_47 = arith.constant dense<0.000000e+00> : vector<16x32xf32>
    %133 = tpu.matmul %132, %97, %cst_47 {dimension_numbers = #tpu.dot_dimension_numbers<[1], [0], [0], [1], [0, 0, 1, 1], [], []>} : vector<16x32xf32>, vector<32x32xf32>, vector<16x32xf32> -> vector<16x32xf32>
    %134 = vector.broadcast %100 : vector<1x32xf32> to vector<16x32xf32>
    %135 = arith.addf %133, %134 : vector<16x32xf32>
    %cst_48 = arith.constant 0.000000e+00 : f32
    %136 = vector.broadcast %cst_48 : f32 to vector<16x32xf32>
    %137 = arith.maximumf %135, %136 : vector<16x32xf32>
    %cst_49 = arith.constant dense<0.000000e+00> : vector<16x32xf32>
    %138 = tpu.matmul %127, %96, %cst_49 {dimension_numbers = #tpu.dot_dimension_numbers<[1], [0], [0], [1], [0, 0, 1, 1], [], []>} : vector<16x8xf32>, vector<8x32xf32>, vector<16x32xf32> -> vector<16x32xf32>
    %139 = vector.broadcast %101 : vector<1x32xf32> to vector<16x32xf32>
    %140 = arith.addf %138, %139 : vector<16x32xf32>
    %141 = arith.addf %137, %140 : vector<16x32xf32>
    %cst_50 = arith.constant 0.000000e+00 : f32
    %142 = vector.broadcast %cst_50 : f32 to vector<16x32xf32>
    %143 = arith.maximumf %141, %142 : vector<16x32xf32>
    %cst_51 = arith.constant dense<0.000000e+00> : vector<16x16xf32>
    %144 = tpu.matmul %143, %103, %cst_51 {dimension_numbers = #tpu.dot_dimension_numbers<[1], [0], [0], [1], [0, 0, 1, 1], [], []>} : vector<16x32xf32>, vector<32x16xf32>, vector<16x16xf32> -> vector<16x16xf32>
    %145 = vector.broadcast %104 : vector<1x16xf32> to vector<16x16xf32>
    %146 = arith.addf %144, %145 : vector<16x16xf32>
    %c0_52 = arith.constant 0 : index
    %c0_53 = arith.constant 0 : index
    %147 = vector.load %arg1[%c0_52, %c0_53] : memref<32x8xf32, #tpu.memory_space<vmem>>, vector<32x8xf32>
    %c0_54 = arith.constant 0 : index
    %c0_55 = arith.constant 0 : index
    %148 = vector.load %arg8[%c0_54, %c0_55] : memref<9x8xf32, #tpu.memory_space<vmem>>, vector<9x8xf32>
    %149 = vector.extract_strided_slice %148 {offsets = [0, 0], sizes = [8, 8], strides = [1, 1]} : vector<9x8xf32> to vector<8x8xf32>
    %cst_56 = arith.constant dense<0.000000e+00> : vector<32x8xf32>
    %150 = tpu.matmul %147, %149, %cst_56 {dimension_numbers = #tpu.dot_dimension_numbers<[1], [0], [0], [1], [0, 0, 1, 1], [], []>} : vector<32x8xf32>, vector<8x8xf32>, vector<32x8xf32> -> vector<32x8xf32>
    %151 = vector.extract_strided_slice %148 {offsets = [8, 0], sizes = [1, 8], strides = [1, 1]} : vector<9x8xf32> to vector<1x8xf32>
    %152 = vector.broadcast %151 : vector<1x8xf32> to vector<32x8xf32>
    %153 = arith.addf %150, %152 : vector<32x8xf32>
    %154 = arith.addf %153, %147 : vector<32x8xf32>
    %c0_57 = arith.constant 0 : index
    %c0_58 = arith.constant 0 : index
    %155 = vector.load %arg13[%c0_57, %c0_58] : memref<16x32xf32, #tpu.memory_space<vmem>>, vector<16x32xf32>
    %c0_59 = arith.constant 0 : index
    %c0_60 = arith.constant 0 : index
    %156 = vector.load %arg14[%c0_59, %c0_60] : memref<32x32xf32, #tpu.memory_space<vmem>>, vector<32x32xf32>
    %c0_61 = arith.constant 0 : index
    %c0_62 = arith.constant 0 : index
    %157 = vector.load %arg11[%c0_61, %c0_62] : memref<192x32xf32, #tpu.memory_space<vmem>>, vector<192x32xf32>
    %c0_63 = arith.constant 0 : index
    %c0_64 = arith.constant 0 : index
    %158 = vector.load %arg9[%c0_63, %c0_64] : memref<32x12xf32, #tpu.memory_space<vmem>>, vector<32x12xf32>
    %c0_65 = arith.constant 0 : index
    %c0_66 = arith.constant 0 : index
    %159 = vector.load %arg10[%c0_65, %c0_66] : memref<32x16xf32, #tpu.memory_space<vmem>>, vector<32x16xf32>
    %c0_67 = arith.constant 0 : index
    %c0_68 = arith.constant 0 : index
    %160 = vector.load %arg15[%c0_67, %c0_68] : memref<32x16xf32, #tpu.memory_space<vmem>>, vector<32x16xf32>
    %c0_69 = arith.constant 0 : index
    %c0_70 = arith.constant 0 : index
    %161 = vector.load %arg16[%c0_69, %c0_70] : memref<128x48xf32, #tpu.memory_space<vmem>>, vector<128x48xf32>
    %c0_71 = arith.constant 0 : index
    %c0_72 = arith.constant 0 : index
    %162 = vector.load %arg17[%c0_71, %c0_72] : memref<64x16xf32, #tpu.memory_space<vmem>>, vector<64x16xf32>
    %c0_73 = arith.constant 0 : index
    %c0_74 = arith.constant 0 : index
    %163 = vector.load %arg18[%c0_73, %c0_74] : memref<128x16xf32, #tpu.memory_space<vmem>>, vector<128x16xf32>
    %164 = vector.extract_strided_slice %157 {offsets = [0, 0], sizes = [32, 32], strides = [1, 1]} : vector<192x32xf32> to vector<32x32xf32>
    %165 = vector.extract_strided_slice %157 {offsets = [32, 0], sizes = [32, 32], strides = [1, 1]} : vector<192x32xf32> to vector<32x32xf32>
    %166 = vector.extract_strided_slice %157 {offsets = [64, 0], sizes = [32, 32], strides = [1, 1]} : vector<192x32xf32> to vector<32x32xf32>
    %cst_75 = arith.constant 0.000000e+00 : f32
    %167 = vector.broadcast %cst_75 : f32 to vector<32x32xf32>
    %168 = arith.cmpf ogt, %164, %167 : vector<32x32xf32>
    %169 = vector.extract_strided_slice %158 {offsets = [0, 0], sizes = [16, 12], strides = [1, 1]} : vector<32x12xf32> to vector<16x12xf32>
    %170 = vector.extract_strided_slice %159 {offsets = [0, 0], sizes = [12, 16], strides = [1, 1]} : vector<32x16xf32> to vector<12x16xf32>
    %cst_76 = arith.constant dense<0.000000e+00> : vector<16x16xf32>
    %171 = tpu.matmul %169, %170, %cst_76 {dimension_numbers = #tpu.dot_dimension_numbers<[1], [0], [0], [1], [0, 0, 1, 1], [], []>} : vector<16x12xf32>, vector<12x16xf32>, vector<16x16xf32> -> vector<16x16xf32>
    %cst_77 = arith.constant 0.000000e+00 : f32
    %172 = vector.broadcast %cst_77 : f32 to vector<16x16xf32>
    %173 = arith.maximumf %171, %172 : vector<16x16xf32>
    %cst_78 = arith.constant dense<0xFF800000> : vector<16xf32>
    %174 = vector.multi_reduction <maximumf>, %173, %cst_78 [1] : vector<16x16xf32> to vector<16xf32>
    %175 = vector.shape_cast %174 : vector<16xf32> to vector<16x1xf32>
    %176 = vector.broadcast %175 : vector<16x1xf32> to vector<16x16xf32>
    %177 = arith.subf %173, %176 : vector<16x16xf32>
    %178 = math.exp %177 : vector<16x16xf32>
    %cst_79 = arith.constant dense<0.000000e+00> : vector<16xf32>
    %179 = vector.multi_reduction <add>, %178, %cst_79 [1] : vector<16x16xf32> to vector<16xf32>
    %180 = vector.shape_cast %179 : vector<16xf32> to vector<16x1xf32>
    %181 = tpu.reciprocal %180 {approx = true} : vector<16x1xf32> -> vector<16x1xf32>
    %182 = vector.broadcast %181 : vector<16x1xf32> to vector<16x16xf32>
    %183 = arith.mulf %178, %182 : vector<16x16xf32>
    %cst_80 = arith.constant dense<0.000000e+00> : vector<32x16xf32>
    %184 = tpu.matmul %92, %183, %cst_80 {dimension_numbers = #tpu.dot_dimension_numbers<[1], [0], [0], [1], [0, 0, 1, 1], [], []>} : vector<32x16xf32>, vector<16x16xf32>, vector<32x16xf32> -> vector<32x16xf32>
    %cst_81 = arith.constant dense<0.000000e+00> : vector<32x32xf32>
    %185 = tpu.matmul %184, %155, %cst_81 {dimension_numbers = #tpu.dot_dimension_numbers<[1], [0], [0], [1], [0, 0, 1, 1], [], []>} : vector<32x16xf32>, vector<16x32xf32>, vector<32x32xf32> -> vector<32x32xf32>
    %186 = arith.mulf %185, %156 : vector<32x32xf32>
    %187 = vector.extract_strided_slice %160 {offsets = [0, 0], sizes = [9, 16], strides = [1, 1]} : vector<32x16xf32> to vector<9x16xf32>
    %188 = vector.extract_strided_slice %187 {offsets = [0, 0], sizes = [8, 16], strides = [1, 1]} : vector<9x16xf32> to vector<8x16xf32>
    %cst_82 = arith.constant dense<0.000000e+00> : vector<32x16xf32>
    %189 = tpu.matmul %154, %188, %cst_82 {dimension_numbers = #tpu.dot_dimension_numbers<[1], [0], [0], [1], [0, 0, 1, 1], [], []>} : vector<32x8xf32>, vector<8x16xf32>, vector<32x16xf32> -> vector<32x16xf32>
    %190 = vector.extract_strided_slice %187 {offsets = [8, 0], sizes = [1, 16], strides = [1, 1]} : vector<9x16xf32> to vector<1x16xf32>
    %191 = vector.broadcast %190 : vector<1x16xf32> to vector<32x16xf32>
    %192 = arith.addf %189, %191 : vector<32x16xf32>
    %193 = vector.extract_strided_slice %161 {offsets = [0, 0], sizes = [8, 48], strides = [1, 1]} : vector<128x48xf32> to vector<8x48xf32>
    %cst_83 = arith.constant dense<0.000000e+00> : vector<32x48xf32>
    %194 = tpu.matmul %154, %193, %cst_83 {dimension_numbers = #tpu.dot_dimension_numbers<[1], [0], [0], [1], [0, 0, 1, 1], [], []>} : vector<32x8xf32>, vector<8x48xf32>, vector<32x48xf32> -> vector<32x48xf32>
    %cst_84 = arith.constant 0.000000e+00 : f32
    %195 = vector.broadcast %cst_84 : f32 to vector<32x16xf32>
    %196 = vector.extract_strided_slice %194 {offsets = [0, 0], sizes = [32, 16], strides = [1, 1]} : vector<32x48xf32> to vector<32x16xf32>
    %197 = vector.extract_strided_slice %162 {offsets = [0, 0], sizes = [1, 16], strides = [1, 1]} : vector<64x16xf32> to vector<1x16xf32>
    %198 = vector.extract_strided_slice %162 {offsets = [3, 0], sizes = [1, 16], strides = [1, 1]} : vector<64x16xf32> to vector<1x16xf32>
    "tpu.trace_start"() <{level = 10 : i32, message = "hg,ng->hn"}> : () -> ()
    %cst_85 = arith.constant dense<0.000000e+00> : vector<1x32xf32>
    %199 = tpu.matmul %197, %196, %cst_85 {dimension_numbers = #tpu.dot_dimension_numbers<[1], [1], [0], [0], [0, 0, 1, 0], [], []>} : vector<1x16xf32>, vector<32x16xf32>, vector<1x32xf32> -> vector<1x32xf32>
    "tpu.trace_stop"() : () -> ()
    %cst_86 = arith.constant dense<0.000000e+00> : vector<1x32xf32>
    %200 = tpu.matmul %199, %165, %cst_86 {dimension_numbers = #tpu.dot_dimension_numbers<[1], [0], [0], [1], [0, 0, 1, 1], [], []>} : vector<1x32xf32>, vector<32x32xf32>, vector<1x32xf32> -> vector<1x32xf32>
    %201 = vector.broadcast %198 : vector<1x16xf32> to vector<32x16xf32>
    %202 = arith.mulf %196, %201 : vector<32x16xf32>
    %cst_87 = arith.constant dense<0.000000e+00> : vector<32xf32>
    %203 = vector.multi_reduction <add>, %202, %cst_87 [1] : vector<32x16xf32> to vector<32xf32>
    %204 = vector.shape_cast %203 : vector<32xf32> to vector<32x1xf32>
    %cst_88 = arith.constant dense<0.000000e+00> : vector<32x1xf32>
    %205 = tpu.matmul %166, %204, %cst_88 {dimension_numbers = #tpu.dot_dimension_numbers<[1], [0], [0], [1], [0, 0, 1, 1], [], []>} : vector<32x32xf32>, vector<32x1xf32>, vector<32x1xf32> -> vector<32x1xf32>
    %206 = vector.broadcast %205 : vector<32x1xf32> to vector<32x32xf32>
    %207 = vector.broadcast %200 : vector<1x32xf32> to vector<32x32xf32>
    %208 = arith.addf %206, %207 : vector<32x32xf32>
    %cst_89 = arith.constant 0.000000e+00 : f32
    %209 = vector.broadcast %cst_89 : f32 to vector<32x32xf32>
    %210 = arith.cmpf ogt, %208, %209 : vector<32x32xf32>
    %cst_90 = arith.constant 2.000000e-01 : f32
    %211 = vector.broadcast %cst_90 : f32 to vector<32x32xf32>
    %212 = arith.mulf %211, %208 : vector<32x32xf32>
    %213 = arith.select %210, %208, %212 : vector<32x32xi1>, vector<32x32xf32>
    %cst_91 = arith.constant -1.000000e+30 : f32
    %214 = vector.broadcast %cst_91 : f32 to vector<32x32xf32>
    %215 = arith.select %168, %213, %214 : vector<32x32xi1>, vector<32x32xf32>
    %cst_92 = arith.constant dense<0xFF800000> : vector<32xf32>
    %216 = vector.multi_reduction <maximumf>, %215, %cst_92 [1] : vector<32x32xf32> to vector<32xf32>
    %217 = vector.shape_cast %216 : vector<32xf32> to vector<32x1xf32>
    %218 = vector.broadcast %217 : vector<32x1xf32> to vector<32x32xf32>
    %219 = arith.subf %215, %218 : vector<32x32xf32>
    %220 = math.exp %219 : vector<32x32xf32>
    %221 = arith.mulf %220, %164 : vector<32x32xf32>
    %cst_93 = arith.constant dense<0.000000e+00> : vector<32xf32>
    %222 = vector.multi_reduction <add>, %221, %cst_93 [1] : vector<32x32xf32> to vector<32xf32>
    %223 = vector.shape_cast %222 : vector<32xf32> to vector<32x1xf32>
    %224 = tpu.reciprocal %223 {approx = true} : vector<32x1xf32> -> vector<32x1xf32>
    %225 = vector.broadcast %224 : vector<32x1xf32> to vector<32x32xf32>
    %226 = arith.mulf %221, %225 : vector<32x32xf32>
    %cst_94 = arith.constant dense<0.000000e+00> : vector<32x16xf32>
    %227 = tpu.matmul %226, %196, %cst_94 {dimension_numbers = #tpu.dot_dimension_numbers<[1], [0], [0], [1], [0, 0, 1, 1], [], []>} : vector<32x32xf32>, vector<32x16xf32>, vector<32x16xf32> -> vector<32x16xf32>
    %228 = arith.addf %195, %227 : vector<32x16xf32>
    %229 = vector.extract_strided_slice %194 {offsets = [0, 16], sizes = [32, 16], strides = [1, 1]} : vector<32x48xf32> to vector<32x16xf32>
    %230 = vector.extract_strided_slice %162 {offsets = [1, 0], sizes = [1, 16], strides = [1, 1]} : vector<64x16xf32> to vector<1x16xf32>
    %231 = vector.extract_strided_slice %162 {offsets = [4, 0], sizes = [1, 16], strides = [1, 1]} : vector<64x16xf32> to vector<1x16xf32>
    "tpu.trace_start"() <{level = 10 : i32, message = "hg,ng->hn"}> : () -> ()
    %cst_95 = arith.constant dense<0.000000e+00> : vector<1x32xf32>
    %232 = tpu.matmul %230, %229, %cst_95 {dimension_numbers = #tpu.dot_dimension_numbers<[1], [1], [0], [0], [0, 0, 1, 0], [], []>} : vector<1x16xf32>, vector<32x16xf32>, vector<1x32xf32> -> vector<1x32xf32>
    "tpu.trace_stop"() : () -> ()
    %cst_96 = arith.constant dense<0.000000e+00> : vector<1x32xf32>
    %233 = tpu.matmul %232, %165, %cst_96 {dimension_numbers = #tpu.dot_dimension_numbers<[1], [0], [0], [1], [0, 0, 1, 1], [], []>} : vector<1x32xf32>, vector<32x32xf32>, vector<1x32xf32> -> vector<1x32xf32>
    %234 = vector.broadcast %231 : vector<1x16xf32> to vector<32x16xf32>
    %235 = arith.mulf %229, %234 : vector<32x16xf32>
    %cst_97 = arith.constant dense<0.000000e+00> : vector<32xf32>
    %236 = vector.multi_reduction <add>, %235, %cst_97 [1] : vector<32x16xf32> to vector<32xf32>
    %237 = vector.shape_cast %236 : vector<32xf32> to vector<32x1xf32>
    %cst_98 = arith.constant dense<0.000000e+00> : vector<32x1xf32>
    %238 = tpu.matmul %166, %237, %cst_98 {dimension_numbers = #tpu.dot_dimension_numbers<[1], [0], [0], [1], [0, 0, 1, 1], [], []>} : vector<32x32xf32>, vector<32x1xf32>, vector<32x1xf32> -> vector<32x1xf32>
    %239 = vector.broadcast %238 : vector<32x1xf32> to vector<32x32xf32>
    %240 = vector.broadcast %233 : vector<1x32xf32> to vector<32x32xf32>
    %241 = arith.addf %239, %240 : vector<32x32xf32>
    %cst_99 = arith.constant 0.000000e+00 : f32
    %242 = vector.broadcast %cst_99 : f32 to vector<32x32xf32>
    %243 = arith.cmpf ogt, %241, %242 : vector<32x32xf32>
    %cst_100 = arith.constant 2.000000e-01 : f32
    %244 = vector.broadcast %cst_100 : f32 to vector<32x32xf32>
    %245 = arith.mulf %244, %241 : vector<32x32xf32>
    %246 = arith.select %243, %241, %245 : vector<32x32xi1>, vector<32x32xf32>
    %cst_101 = arith.constant -1.000000e+30 : f32
    %247 = vector.broadcast %cst_101 : f32 to vector<32x32xf32>
    %248 = arith.select %168, %246, %247 : vector<32x32xi1>, vector<32x32xf32>
    %cst_102 = arith.constant dense<0xFF800000> : vector<32xf32>
    %249 = vector.multi_reduction <maximumf>, %248, %cst_102 [1] : vector<32x32xf32> to vector<32xf32>
    %250 = vector.shape_cast %249 : vector<32xf32> to vector<32x1xf32>
    %251 = vector.broadcast %250 : vector<32x1xf32> to vector<32x32xf32>
    %252 = arith.subf %248, %251 : vector<32x32xf32>
    %253 = math.exp %252 : vector<32x32xf32>
    %254 = arith.mulf %253, %164 : vector<32x32xf32>
    %cst_103 = arith.constant dense<0.000000e+00> : vector<32xf32>
    %255 = vector.multi_reduction <add>, %254, %cst_103 [1] : vector<32x32xf32> to vector<32xf32>
    %256 = vector.shape_cast %255 : vector<32xf32> to vector<32x1xf32>
    %257 = tpu.reciprocal %256 {approx = true} : vector<32x1xf32> -> vector<32x1xf32>
    %258 = vector.broadcast %257 : vector<32x1xf32> to vector<32x32xf32>
    %259 = arith.mulf %254, %258 : vector<32x32xf32>
    %cst_104 = arith.constant dense<0.000000e+00> : vector<32x16xf32>
    %260 = tpu.matmul %259, %229, %cst_104 {dimension_numbers = #tpu.dot_dimension_numbers<[1], [0], [0], [1], [0, 0, 1, 1], [], []>} : vector<32x32xf32>, vector<32x16xf32>, vector<32x16xf32> -> vector<32x16xf32>
    %261 = arith.addf %228, %260 : vector<32x16xf32>
    %262 = vector.extract_strided_slice %194 {offsets = [0, 32], sizes = [32, 16], strides = [1, 1]} : vector<32x48xf32> to vector<32x16xf32>
    %263 = vector.extract_strided_slice %162 {offsets = [2, 0], sizes = [1, 16], strides = [1, 1]} : vector<64x16xf32> to vector<1x16xf32>
    %264 = vector.extract_strided_slice %162 {offsets = [5, 0], sizes = [1, 16], strides = [1, 1]} : vector<64x16xf32> to vector<1x16xf32>
    "tpu.trace_start"() <{level = 10 : i32, message = "hg,ng->hn"}> : () -> ()
    %cst_105 = arith.constant dense<0.000000e+00> : vector<1x32xf32>
    %265 = tpu.matmul %263, %262, %cst_105 {dimension_numbers = #tpu.dot_dimension_numbers<[1], [1], [0], [0], [0, 0, 1, 0], [], []>} : vector<1x16xf32>, vector<32x16xf32>, vector<1x32xf32> -> vector<1x32xf32>
    "tpu.trace_stop"() : () -> ()
    %cst_106 = arith.constant dense<0.000000e+00> : vector<1x32xf32>
    %266 = tpu.matmul %265, %165, %cst_106 {dimension_numbers = #tpu.dot_dimension_numbers<[1], [0], [0], [1], [0, 0, 1, 1], [], []>} : vector<1x32xf32>, vector<32x32xf32>, vector<1x32xf32> -> vector<1x32xf32>
    %267 = vector.broadcast %264 : vector<1x16xf32> to vector<32x16xf32>
    %268 = arith.mulf %262, %267 : vector<32x16xf32>
    %cst_107 = arith.constant dense<0.000000e+00> : vector<32xf32>
    %269 = vector.multi_reduction <add>, %268, %cst_107 [1] : vector<32x16xf32> to vector<32xf32>
    %270 = vector.shape_cast %269 : vector<32xf32> to vector<32x1xf32>
    %cst_108 = arith.constant dense<0.000000e+00> : vector<32x1xf32>
    %271 = tpu.matmul %166, %270, %cst_108 {dimension_numbers = #tpu.dot_dimension_numbers<[1], [0], [0], [1], [0, 0, 1, 1], [], []>} : vector<32x32xf32>, vector<32x1xf32>, vector<32x1xf32> -> vector<32x1xf32>
    %272 = vector.broadcast %271 : vector<32x1xf32> to vector<32x32xf32>
    %273 = vector.broadcast %266 : vector<1x32xf32> to vector<32x32xf32>
    %274 = arith.addf %272, %273 : vector<32x32xf32>
    %cst_109 = arith.constant 0.000000e+00 : f32
    %275 = vector.broadcast %cst_109 : f32 to vector<32x32xf32>
    %276 = arith.cmpf ogt, %274, %275 : vector<32x32xf32>
    %cst_110 = arith.constant 2.000000e-01 : f32
    %277 = vector.broadcast %cst_110 : f32 to vector<32x32xf32>
    %278 = arith.mulf %277, %274 : vector<32x32xf32>
    %279 = arith.select %276, %274, %278 : vector<32x32xi1>, vector<32x32xf32>
    %cst_111 = arith.constant -1.000000e+30 : f32
    %280 = vector.broadcast %cst_111 : f32 to vector<32x32xf32>
    %281 = arith.select %168, %279, %280 : vector<32x32xi1>, vector<32x32xf32>
    %cst_112 = arith.constant dense<0xFF800000> : vector<32xf32>
    %282 = vector.multi_reduction <maximumf>, %281, %cst_112 [1] : vector<32x32xf32> to vector<32xf32>
    %283 = vector.shape_cast %282 : vector<32xf32> to vector<32x1xf32>
    %284 = vector.broadcast %283 : vector<32x1xf32> to vector<32x32xf32>
    %285 = arith.subf %281, %284 : vector<32x32xf32>
    %286 = math.exp %285 : vector<32x32xf32>
    %287 = arith.mulf %286, %164 : vector<32x32xf32>
    %cst_113 = arith.constant dense<0.000000e+00> : vector<32xf32>
    %288 = vector.multi_reduction <add>, %287, %cst_113 [1] : vector<32x32xf32> to vector<32xf32>
    %289 = vector.shape_cast %288 : vector<32xf32> to vector<32x1xf32>
    %290 = tpu.reciprocal %289 {approx = true} : vector<32x1xf32> -> vector<32x1xf32>
    %291 = vector.broadcast %290 : vector<32x1xf32> to vector<32x32xf32>
    %292 = arith.mulf %287, %291 : vector<32x32xf32>
    %cst_114 = arith.constant dense<0.000000e+00> : vector<32x16xf32>
    %293 = tpu.matmul %292, %262, %cst_114 {dimension_numbers = #tpu.dot_dimension_numbers<[1], [0], [0], [1], [0, 0, 1, 1], [], []>} : vector<32x32xf32>, vector<32x16xf32>, vector<32x16xf32> -> vector<32x16xf32>
    %294 = arith.addf %261, %293 : vector<32x16xf32>
    %295 = vector.extract_strided_slice %162 {offsets = [48, 0], sizes = [1, 16], strides = [1, 1]} : vector<64x16xf32> to vector<1x16xf32>
    %cst_115 = arith.constant 0.333333343 : f32
    %296 = vector.broadcast %cst_115 : f32 to vector<32x16xf32>
    %297 = arith.mulf %294, %296 : vector<32x16xf32>
    %298 = vector.broadcast %295 : vector<1x16xf32> to vector<32x16xf32>
    %299 = arith.addf %297, %298 : vector<32x16xf32>
    %300 = vector.extract_strided_slice %163 {offsets = [0, 0], sizes = [8, 16], strides = [1, 1]} : vector<128x16xf32> to vector<8x16xf32>
    %301 = vector.extract_strided_slice %162 {offsets = [56, 0], sizes = [1, 16], strides = [1, 1]} : vector<64x16xf32> to vector<1x16xf32>
    %cst_116 = arith.constant dense<0.000000e+00> : vector<32x8xf32>
    %302 = tpu.matmul %186, %154, %cst_116 {dimension_numbers = #tpu.dot_dimension_numbers<[1], [0], [0], [1], [0, 0, 1, 1], [], []>} : vector<32x32xf32>, vector<32x8xf32>, vector<32x8xf32> -> vector<32x8xf32>
    %cst_117 = arith.constant dense<0.000000e+00> : vector<32x16xf32>
    %303 = tpu.matmul %302, %300, %cst_117 {dimension_numbers = #tpu.dot_dimension_numbers<[1], [0], [0], [1], [0, 0, 1, 1], [], []>} : vector<32x8xf32>, vector<8x16xf32>, vector<32x16xf32> -> vector<32x16xf32>
    %304 = vector.broadcast %301 : vector<1x16xf32> to vector<32x16xf32>
    %305 = arith.addf %303, %304 : vector<32x16xf32>
    %cst_118 = arith.constant 5.000000e-01 : f32
    %306 = vector.broadcast %cst_118 : f32 to vector<32x16xf32>
    %307 = arith.mulf %306, %305 : vector<32x16xf32>
    %308 = math.tanh %307 : vector<32x16xf32>
    %cst_119 = arith.constant 1.000000e+00 : f32
    %309 = vector.broadcast %cst_119 : f32 to vector<32x16xf32>
    %310 = arith.addf %308, %309 : vector<32x16xf32>
    %cst_120 = arith.constant 5.000000e-01 : f32
    %311 = vector.broadcast %cst_120 : f32 to vector<32x16xf32>
    %312 = arith.mulf %311, %310 : vector<32x16xf32>
    %313 = math.tanh %299 : vector<32x16xf32>
    %314 = arith.mulf %313, %312 : vector<32x16xf32>
    %cst_121 = arith.constant 1.000000e+00 : f32
    %315 = vector.broadcast %cst_121 : f32 to vector<32x16xf32>
    %316 = arith.subf %315, %312 : vector<32x16xf32>
    %317 = arith.mulf %192, %316 : vector<32x16xf32>
    %318 = arith.addf %314, %317 : vector<32x16xf32>
    %319 = math.tanh %318 : vector<32x16xf32>
    %320 = vector.extract_strided_slice %161 {offsets = [16, 0], sizes = [16, 48], strides = [1, 1]} : vector<128x48xf32> to vector<16x48xf32>
    %cst_122 = arith.constant dense<0.000000e+00> : vector<32x48xf32>
    %321 = tpu.matmul %319, %320, %cst_122 {dimension_numbers = #tpu.dot_dimension_numbers<[1], [0], [0], [1], [0, 0, 1, 1], [], []>} : vector<32x16xf32>, vector<16x48xf32>, vector<32x48xf32> -> vector<32x48xf32>
    %cst_123 = arith.constant 0.000000e+00 : f32
    %322 = vector.broadcast %cst_123 : f32 to vector<32x16xf32>
    %323 = vector.extract_strided_slice %321 {offsets = [0, 0], sizes = [32, 16], strides = [1, 1]} : vector<32x48xf32> to vector<32x16xf32>
    %324 = vector.extract_strided_slice %162 {offsets = [6, 0], sizes = [1, 16], strides = [1, 1]} : vector<64x16xf32> to vector<1x16xf32>
    %325 = vector.extract_strided_slice %162 {offsets = [9, 0], sizes = [1, 16], strides = [1, 1]} : vector<64x16xf32> to vector<1x16xf32>
    "tpu.trace_start"() <{level = 10 : i32, message = "hg,ng->hn"}> : () -> ()
    %cst_124 = arith.constant dense<0.000000e+00> : vector<1x32xf32>
    %326 = tpu.matmul %324, %323, %cst_124 {dimension_numbers = #tpu.dot_dimension_numbers<[1], [1], [0], [0], [0, 0, 1, 0], [], []>} : vector<1x16xf32>, vector<32x16xf32>, vector<1x32xf32> -> vector<1x32xf32>
    "tpu.trace_stop"() : () -> ()
    %cst_125 = arith.constant dense<0.000000e+00> : vector<1x32xf32>
    %327 = tpu.matmul %326, %165, %cst_125 {dimension_numbers = #tpu.dot_dimension_numbers<[1], [0], [0], [1], [0, 0, 1, 1], [], []>} : vector<1x32xf32>, vector<32x32xf32>, vector<1x32xf32> -> vector<1x32xf32>
    %328 = vector.broadcast %325 : vector<1x16xf32> to vector<32x16xf32>
    %329 = arith.mulf %323, %328 : vector<32x16xf32>
    %cst_126 = arith.constant dense<0.000000e+00> : vector<32xf32>
    %330 = vector.multi_reduction <add>, %329, %cst_126 [1] : vector<32x16xf32> to vector<32xf32>
    %331 = vector.shape_cast %330 : vector<32xf32> to vector<32x1xf32>
    %cst_127 = arith.constant dense<0.000000e+00> : vector<32x1xf32>
    %332 = tpu.matmul %166, %331, %cst_127 {dimension_numbers = #tpu.dot_dimension_numbers<[1], [0], [0], [1], [0, 0, 1, 1], [], []>} : vector<32x32xf32>, vector<32x1xf32>, vector<32x1xf32> -> vector<32x1xf32>
    %333 = vector.broadcast %332 : vector<32x1xf32> to vector<32x32xf32>
    %334 = vector.broadcast %327 : vector<1x32xf32> to vector<32x32xf32>
    %335 = arith.addf %333, %334 : vector<32x32xf32>
    %cst_128 = arith.constant 0.000000e+00 : f32
    %336 = vector.broadcast %cst_128 : f32 to vector<32x32xf32>
    %337 = arith.cmpf ogt, %335, %336 : vector<32x32xf32>
    %cst_129 = arith.constant 2.000000e-01 : f32
    %338 = vector.broadcast %cst_129 : f32 to vector<32x32xf32>
    %339 = arith.mulf %338, %335 : vector<32x32xf32>
    %340 = arith.select %337, %335, %339 : vector<32x32xi1>, vector<32x32xf32>
    %cst_130 = arith.constant -1.000000e+30 : f32
    %341 = vector.broadcast %cst_130 : f32 to vector<32x32xf32>
    %342 = arith.select %168, %340, %341 : vector<32x32xi1>, vector<32x32xf32>
    %cst_131 = arith.constant dense<0xFF800000> : vector<32xf32>
    %343 = vector.multi_reduction <maximumf>, %342, %cst_131 [1] : vector<32x32xf32> to vector<32xf32>
    %344 = vector.shape_cast %343 : vector<32xf32> to vector<32x1xf32>
    %345 = vector.broadcast %344 : vector<32x1xf32> to vector<32x32xf32>
    %346 = arith.subf %342, %345 : vector<32x32xf32>
    %347 = math.exp %346 : vector<32x32xf32>
    %348 = arith.mulf %347, %164 : vector<32x32xf32>
    %cst_132 = arith.constant dense<0.000000e+00> : vector<32xf32>
    %349 = vector.multi_reduction <add>, %348, %cst_132 [1] : vector<32x32xf32> to vector<32xf32>
    %350 = vector.shape_cast %349 : vector<32xf32> to vector<32x1xf32>
    %351 = tpu.reciprocal %350 {approx = true} : vector<32x1xf32> -> vector<32x1xf32>
    %352 = vector.broadcast %351 : vector<32x1xf32> to vector<32x32xf32>
    %353 = arith.mulf %348, %352 : vector<32x32xf32>
    %cst_133 = arith.constant dense<0.000000e+00> : vector<32x16xf32>
    %354 = tpu.matmul %353, %323, %cst_133 {dimension_numbers = #tpu.dot_dimension_numbers<[1], [0], [0], [1], [0, 0, 1, 1], [], []>} : vector<32x32xf32>, vector<32x16xf32>, vector<32x16xf32> -> vector<32x16xf32>
    %355 = arith.addf %322, %354 : vector<32x16xf32>
    %356 = vector.extract_strided_slice %321 {offsets = [0, 16], sizes = [32, 16], strides = [1, 1]} : vector<32x48xf32> to vector<32x16xf32>
    %357 = vector.extract_strided_slice %162 {offsets = [7, 0], sizes = [1, 16], strides = [1, 1]} : vector<64x16xf32> to vector<1x16xf32>
    %358 = vector.extract_strided_slice %162 {offsets = [10, 0], sizes = [1, 16], strides = [1, 1]} : vector<64x16xf32> to vector<1x16xf32>
    "tpu.trace_start"() <{level = 10 : i32, message = "hg,ng->hn"}> : () -> ()
    %cst_134 = arith.constant dense<0.000000e+00> : vector<1x32xf32>
    %359 = tpu.matmul %357, %356, %cst_134 {dimension_numbers = #tpu.dot_dimension_numbers<[1], [1], [0], [0], [0, 0, 1, 0], [], []>} : vector<1x16xf32>, vector<32x16xf32>, vector<1x32xf32> -> vector<1x32xf32>
    "tpu.trace_stop"() : () -> ()
    %cst_135 = arith.constant dense<0.000000e+00> : vector<1x32xf32>
    %360 = tpu.matmul %359, %165, %cst_135 {dimension_numbers = #tpu.dot_dimension_numbers<[1], [0], [0], [1], [0, 0, 1, 1], [], []>} : vector<1x32xf32>, vector<32x32xf32>, vector<1x32xf32> -> vector<1x32xf32>
    %361 = vector.broadcast %358 : vector<1x16xf32> to vector<32x16xf32>
    %362 = arith.mulf %356, %361 : vector<32x16xf32>
    %cst_136 = arith.constant dense<0.000000e+00> : vector<32xf32>
    %363 = vector.multi_reduction <add>, %362, %cst_136 [1] : vector<32x16xf32> to vector<32xf32>
    %364 = vector.shape_cast %363 : vector<32xf32> to vector<32x1xf32>
    %cst_137 = arith.constant dense<0.000000e+00> : vector<32x1xf32>
    %365 = tpu.matmul %166, %364, %cst_137 {dimension_numbers = #tpu.dot_dimension_numbers<[1], [0], [0], [1], [0, 0, 1, 1], [], []>} : vector<32x32xf32>, vector<32x1xf32>, vector<32x1xf32> -> vector<32x1xf32>
    %366 = vector.broadcast %365 : vector<32x1xf32> to vector<32x32xf32>
    %367 = vector.broadcast %360 : vector<1x32xf32> to vector<32x32xf32>
    %368 = arith.addf %366, %367 : vector<32x32xf32>
    %cst_138 = arith.constant 0.000000e+00 : f32
    %369 = vector.broadcast %cst_138 : f32 to vector<32x32xf32>
    %370 = arith.cmpf ogt, %368, %369 : vector<32x32xf32>
    %cst_139 = arith.constant 2.000000e-01 : f32
    %371 = vector.broadcast %cst_139 : f32 to vector<32x32xf32>
    %372 = arith.mulf %371, %368 : vector<32x32xf32>
    %373 = arith.select %370, %368, %372 : vector<32x32xi1>, vector<32x32xf32>
    %cst_140 = arith.constant -1.000000e+30 : f32
    %374 = vector.broadcast %cst_140 : f32 to vector<32x32xf32>
    %375 = arith.select %168, %373, %374 : vector<32x32xi1>, vector<32x32xf32>
    %cst_141 = arith.constant dense<0xFF800000> : vector<32xf32>
    %376 = vector.multi_reduction <maximumf>, %375, %cst_141 [1] : vector<32x32xf32> to vector<32xf32>
    %377 = vector.shape_cast %376 : vector<32xf32> to vector<32x1xf32>
    %378 = vector.broadcast %377 : vector<32x1xf32> to vector<32x32xf32>
    %379 = arith.subf %375, %378 : vector<32x32xf32>
    %380 = math.exp %379 : vector<32x32xf32>
    %381 = arith.mulf %380, %164 : vector<32x32xf32>
    %cst_142 = arith.constant dense<0.000000e+00> : vector<32xf32>
    %382 = vector.multi_reduction <add>, %381, %cst_142 [1] : vector<32x32xf32> to vector<32xf32>
    %383 = vector.shape_cast %382 : vector<32xf32> to vector<32x1xf32>
    %384 = tpu.reciprocal %383 {approx = true} : vector<32x1xf32> -> vector<32x1xf32>
    %385 = vector.broadcast %384 : vector<32x1xf32> to vector<32x32xf32>
    %386 = arith.mulf %381, %385 : vector<32x32xf32>
    %cst_143 = arith.constant dense<0.000000e+00> : vector<32x16xf32>
    %387 = tpu.matmul %386, %356, %cst_143 {dimension_numbers = #tpu.dot_dimension_numbers<[1], [0], [0], [1], [0, 0, 1, 1], [], []>} : vector<32x32xf32>, vector<32x16xf32>, vector<32x16xf32> -> vector<32x16xf32>
    %388 = arith.addf %355, %387 : vector<32x16xf32>
    %389 = vector.extract_strided_slice %321 {offsets = [0, 32], sizes = [32, 16], strides = [1, 1]} : vector<32x48xf32> to vector<32x16xf32>
    %390 = vector.extract_strided_slice %162 {offsets = [8, 0], sizes = [1, 16], strides = [1, 1]} : vector<64x16xf32> to vector<1x16xf32>
    %391 = vector.extract_strided_slice %162 {offsets = [11, 0], sizes = [1, 16], strides = [1, 1]} : vector<64x16xf32> to vector<1x16xf32>
    "tpu.trace_start"() <{level = 10 : i32, message = "hg,ng->hn"}> : () -> ()
    %cst_144 = arith.constant dense<0.000000e+00> : vector<1x32xf32>
    %392 = tpu.matmul %390, %389, %cst_144 {dimension_numbers = #tpu.dot_dimension_numbers<[1], [1], [0], [0], [0, 0, 1, 0], [], []>} : vector<1x16xf32>, vector<32x16xf32>, vector<1x32xf32> -> vector<1x32xf32>
    "tpu.trace_stop"() : () -> ()
    %cst_145 = arith.constant dense<0.000000e+00> : vector<1x32xf32>
    %393 = tpu.matmul %392, %165, %cst_145 {dimension_numbers = #tpu.dot_dimension_numbers<[1], [0], [0], [1], [0, 0, 1, 1], [], []>} : vector<1x32xf32>, vector<32x32xf32>, vector<1x32xf32> -> vector<1x32xf32>
    %394 = vector.broadcast %391 : vector<1x16xf32> to vector<32x16xf32>
    %395 = arith.mulf %389, %394 : vector<32x16xf32>
    %cst_146 = arith.constant dense<0.000000e+00> : vector<32xf32>
    %396 = vector.multi_reduction <add>, %395, %cst_146 [1] : vector<32x16xf32> to vector<32xf32>
    %397 = vector.shape_cast %396 : vector<32xf32> to vector<32x1xf32>
    %cst_147 = arith.constant dense<0.000000e+00> : vector<32x1xf32>
    %398 = tpu.matmul %166, %397, %cst_147 {dimension_numbers = #tpu.dot_dimension_numbers<[1], [0], [0], [1], [0, 0, 1, 1], [], []>} : vector<32x32xf32>, vector<32x1xf32>, vector<32x1xf32> -> vector<32x1xf32>
    %399 = vector.broadcast %398 : vector<32x1xf32> to vector<32x32xf32>
    %400 = vector.broadcast %393 : vector<1x32xf32> to vector<32x32xf32>
    %401 = arith.addf %399, %400 : vector<32x32xf32>
    %cst_148 = arith.constant 0.000000e+00 : f32
    %402 = vector.broadcast %cst_148 : f32 to vector<32x32xf32>
    %403 = arith.cmpf ogt, %401, %402 : vector<32x32xf32>
    %cst_149 = arith.constant 2.000000e-01 : f32
    %404 = vector.broadcast %cst_149 : f32 to vector<32x32xf32>
    %405 = arith.mulf %404, %401 : vector<32x32xf32>
    %406 = arith.select %403, %401, %405 : vector<32x32xi1>, vector<32x32xf32>
    %cst_150 = arith.constant -1.000000e+30 : f32
    %407 = vector.broadcast %cst_150 : f32 to vector<32x32xf32>
    %408 = arith.select %168, %406, %407 : vector<32x32xi1>, vector<32x32xf32>
    %cst_151 = arith.constant dense<0xFF800000> : vector<32xf32>
    %409 = vector.multi_reduction <maximumf>, %408, %cst_151 [1] : vector<32x32xf32> to vector<32xf32>
    %410 = vector.shape_cast %409 : vector<32xf32> to vector<32x1xf32>
    %411 = vector.broadcast %410 : vector<32x1xf32> to vector<32x32xf32>
    %412 = arith.subf %408, %411 : vector<32x32xf32>
    %413 = math.exp %412 : vector<32x32xf32>
    %414 = arith.mulf %413, %164 : vector<32x32xf32>
    %cst_152 = arith.constant dense<0.000000e+00> : vector<32xf32>
    %415 = vector.multi_reduction <add>, %414, %cst_152 [1] : vector<32x32xf32> to vector<32xf32>
    %416 = vector.shape_cast %415 : vector<32xf32> to vector<32x1xf32>
    %417 = tpu.reciprocal %416 {approx = true} : vector<32x1xf32> -> vector<32x1xf32>
    %418 = vector.broadcast %417 : vector<32x1xf32> to vector<32x32xf32>
    %419 = arith.mulf %414, %418 : vector<32x32xf32>
    %cst_153 = arith.constant dense<0.000000e+00> : vector<32x16xf32>
    %420 = tpu.matmul %419, %389, %cst_153 {dimension_numbers = #tpu.dot_dimension_numbers<[1], [0], [0], [1], [0, 0, 1, 1], [], []>} : vector<32x32xf32>, vector<32x16xf32>, vector<32x16xf32> -> vector<32x16xf32>
    %421 = arith.addf %388, %420 : vector<32x16xf32>
    %422 = vector.extract_strided_slice %162 {offsets = [49, 0], sizes = [1, 16], strides = [1, 1]} : vector<64x16xf32> to vector<1x16xf32>
    %cst_154 = arith.constant 0.333333343 : f32
    %423 = vector.broadcast %cst_154 : f32 to vector<32x16xf32>
    %424 = arith.mulf %421, %423 : vector<32x16xf32>
    %425 = vector.broadcast %422 : vector<1x16xf32> to vector<32x16xf32>
    %426 = arith.addf %424, %425 : vector<32x16xf32>
    %427 = vector.extract_strided_slice %163 {offsets = [16, 0], sizes = [16, 16], strides = [1, 1]} : vector<128x16xf32> to vector<16x16xf32>
    %428 = vector.extract_strided_slice %162 {offsets = [57, 0], sizes = [1, 16], strides = [1, 1]} : vector<64x16xf32> to vector<1x16xf32>
    %cst_155 = arith.constant dense<0.000000e+00> : vector<32x16xf32>
    %429 = tpu.matmul %186, %319, %cst_155 {dimension_numbers = #tpu.dot_dimension_numbers<[1], [0], [0], [1], [0, 0, 1, 1], [], []>} : vector<32x32xf32>, vector<32x16xf32>, vector<32x16xf32> -> vector<32x16xf32>
    %cst_156 = arith.constant dense<0.000000e+00> : vector<32x16xf32>
    %430 = tpu.matmul %429, %427, %cst_156 {dimension_numbers = #tpu.dot_dimension_numbers<[1], [0], [0], [1], [0, 0, 1, 1], [], []>} : vector<32x16xf32>, vector<16x16xf32>, vector<32x16xf32> -> vector<32x16xf32>
    %431 = vector.broadcast %428 : vector<1x16xf32> to vector<32x16xf32>
    %432 = arith.addf %430, %431 : vector<32x16xf32>
    %cst_157 = arith.constant 5.000000e-01 : f32
    %433 = vector.broadcast %cst_157 : f32 to vector<32x16xf32>
    %434 = arith.mulf %433, %432 : vector<32x16xf32>
    %435 = math.tanh %434 : vector<32x16xf32>
    %cst_158 = arith.constant 1.000000e+00 : f32
    %436 = vector.broadcast %cst_158 : f32 to vector<32x16xf32>
    %437 = arith.addf %435, %436 : vector<32x16xf32>
    %cst_159 = arith.constant 5.000000e-01 : f32
    %438 = vector.broadcast %cst_159 : f32 to vector<32x16xf32>
    %439 = arith.mulf %438, %437 : vector<32x16xf32>
    %cst_160 = arith.constant 0.000000e+00 : f32
    %440 = vector.broadcast %cst_160 : f32 to vector<32x16xf32>
    %441 = arith.cmpf ogt, %426, %440 : vector<32x16xf32>
    %cst_161 = arith.constant 0.00999999977 : f32
    %442 = vector.broadcast %cst_161 : f32 to vector<32x16xf32>
    %443 = arith.mulf %442, %426 : vector<32x16xf32>
    %444 = arith.select %441, %426, %443 : vector<32x16xi1>, vector<32x16xf32>
    %445 = arith.mulf %444, %439 : vector<32x16xf32>
    %cst_162 = arith.constant 1.000000e+00 : f32
    %446 = vector.broadcast %cst_162 : f32 to vector<32x16xf32>
    %447 = arith.subf %446, %439 : vector<32x16xf32>
    %448 = arith.mulf %318, %447 : vector<32x16xf32>
    %449 = arith.addf %445, %448 : vector<32x16xf32>
    %cst_163 = arith.constant 0.000000e+00 : f32
    %450 = vector.broadcast %cst_163 : f32 to vector<32x16xf32>
    %451 = arith.maximumf %449, %450 : vector<32x16xf32>
    %452 = vector.extract_strided_slice %161 {offsets = [32, 0], sizes = [16, 48], strides = [1, 1]} : vector<128x48xf32> to vector<16x48xf32>
    %cst_164 = arith.constant dense<0.000000e+00> : vector<32x48xf32>
    %453 = tpu.matmul %451, %452, %cst_164 {dimension_numbers = #tpu.dot_dimension_numbers<[1], [0], [0], [1], [0, 0, 1, 1], [], []>} : vector<32x16xf32>, vector<16x48xf32>, vector<32x48xf32> -> vector<32x48xf32>
    %cst_165 = arith.constant 0.000000e+00 : f32
    %454 = vector.broadcast %cst_165 : f32 to vector<32x16xf32>
    %455 = vector.extract_strided_slice %453 {offsets = [0, 0], sizes = [32, 16], strides = [1, 1]} : vector<32x48xf32> to vector<32x16xf32>
    %456 = vector.extract_strided_slice %162 {offsets = [12, 0], sizes = [1, 16], strides = [1, 1]} : vector<64x16xf32> to vector<1x16xf32>
    %457 = vector.extract_strided_slice %162 {offsets = [15, 0], sizes = [1, 16], strides = [1, 1]} : vector<64x16xf32> to vector<1x16xf32>
    "tpu.trace_start"() <{level = 10 : i32, message = "hg,ng->hn"}> : () -> ()
    %cst_166 = arith.constant dense<0.000000e+00> : vector<1x32xf32>
    %458 = tpu.matmul %456, %455, %cst_166 {dimension_numbers = #tpu.dot_dimension_numbers<[1], [1], [0], [0], [0, 0, 1, 0], [], []>} : vector<1x16xf32>, vector<32x16xf32>, vector<1x32xf32> -> vector<1x32xf32>
    "tpu.trace_stop"() : () -> ()
    %cst_167 = arith.constant dense<0.000000e+00> : vector<1x32xf32>
    %459 = tpu.matmul %458, %165, %cst_167 {dimension_numbers = #tpu.dot_dimension_numbers<[1], [0], [0], [1], [0, 0, 1, 1], [], []>} : vector<1x32xf32>, vector<32x32xf32>, vector<1x32xf32> -> vector<1x32xf32>
    %460 = vector.broadcast %457 : vector<1x16xf32> to vector<32x16xf32>
    %461 = arith.mulf %455, %460 : vector<32x16xf32>
    %cst_168 = arith.constant dense<0.000000e+00> : vector<32xf32>
    %462 = vector.multi_reduction <add>, %461, %cst_168 [1] : vector<32x16xf32> to vector<32xf32>
    %463 = vector.shape_cast %462 : vector<32xf32> to vector<32x1xf32>
    %cst_169 = arith.constant dense<0.000000e+00> : vector<32x1xf32>
    %464 = tpu.matmul %166, %463, %cst_169 {dimension_numbers = #tpu.dot_dimension_numbers<[1], [0], [0], [1], [0, 0, 1, 1], [], []>} : vector<32x32xf32>, vector<32x1xf32>, vector<32x1xf32> -> vector<32x1xf32>
    %465 = vector.broadcast %464 : vector<32x1xf32> to vector<32x32xf32>
    %466 = vector.broadcast %459 : vector<1x32xf32> to vector<32x32xf32>
    %467 = arith.addf %465, %466 : vector<32x32xf32>
    %cst_170 = arith.constant 0.000000e+00 : f32
    %468 = vector.broadcast %cst_170 : f32 to vector<32x32xf32>
    %469 = arith.cmpf ogt, %467, %468 : vector<32x32xf32>
    %cst_171 = arith.constant 2.000000e-01 : f32
    %470 = vector.broadcast %cst_171 : f32 to vector<32x32xf32>
    %471 = arith.mulf %470, %467 : vector<32x32xf32>
    %472 = arith.select %469, %467, %471 : vector<32x32xi1>, vector<32x32xf32>
    %cst_172 = arith.constant -1.000000e+30 : f32
    %473 = vector.broadcast %cst_172 : f32 to vector<32x32xf32>
    %474 = arith.select %168, %472, %473 : vector<32x32xi1>, vector<32x32xf32>
    %cst_173 = arith.constant dense<0xFF800000> : vector<32xf32>
    %475 = vector.multi_reduction <maximumf>, %474, %cst_173 [1] : vector<32x32xf32> to vector<32xf32>
    %476 = vector.shape_cast %475 : vector<32xf32> to vector<32x1xf32>
    %477 = vector.broadcast %476 : vector<32x1xf32> to vector<32x32xf32>
    %478 = arith.subf %474, %477 : vector<32x32xf32>
    %479 = math.exp %478 : vector<32x32xf32>
    %480 = arith.mulf %479, %164 : vector<32x32xf32>
    %cst_174 = arith.constant dense<0.000000e+00> : vector<32xf32>
    %481 = vector.multi_reduction <add>, %480, %cst_174 [1] : vector<32x32xf32> to vector<32xf32>
    %482 = vector.shape_cast %481 : vector<32xf32> to vector<32x1xf32>
    %483 = tpu.reciprocal %482 {approx = true} : vector<32x1xf32> -> vector<32x1xf32>
    %484 = vector.broadcast %483 : vector<32x1xf32> to vector<32x32xf32>
    %485 = arith.mulf %480, %484 : vector<32x32xf32>
    %cst_175 = arith.constant dense<0.000000e+00> : vector<32x16xf32>
    %486 = tpu.matmul %485, %455, %cst_175 {dimension_numbers = #tpu.dot_dimension_numbers<[1], [0], [0], [1], [0, 0, 1, 1], [], []>} : vector<32x32xf32>, vector<32x16xf32>, vector<32x16xf32> -> vector<32x16xf32>
    %487 = arith.addf %454, %486 : vector<32x16xf32>
    %488 = vector.extract_strided_slice %453 {offsets = [0, 16], sizes = [32, 16], strides = [1, 1]} : vector<32x48xf32> to vector<32x16xf32>
    %489 = vector.extract_strided_slice %162 {offsets = [13, 0], sizes = [1, 16], strides = [1, 1]} : vector<64x16xf32> to vector<1x16xf32>
    %490 = vector.extract_strided_slice %162 {offsets = [16, 0], sizes = [1, 16], strides = [1, 1]} : vector<64x16xf32> to vector<1x16xf32>
    "tpu.trace_start"() <{level = 10 : i32, message = "hg,ng->hn"}> : () -> ()
    %cst_176 = arith.constant dense<0.000000e+00> : vector<1x32xf32>
    %491 = tpu.matmul %489, %488, %cst_176 {dimension_numbers = #tpu.dot_dimension_numbers<[1], [1], [0], [0], [0, 0, 1, 0], [], []>} : vector<1x16xf32>, vector<32x16xf32>, vector<1x32xf32> -> vector<1x32xf32>
    "tpu.trace_stop"() : () -> ()
    %cst_177 = arith.constant dense<0.000000e+00> : vector<1x32xf32>
    %492 = tpu.matmul %491, %165, %cst_177 {dimension_numbers = #tpu.dot_dimension_numbers<[1], [0], [0], [1], [0, 0, 1, 1], [], []>} : vector<1x32xf32>, vector<32x32xf32>, vector<1x32xf32> -> vector<1x32xf32>
    %493 = vector.broadcast %490 : vector<1x16xf32> to vector<32x16xf32>
    %494 = arith.mulf %488, %493 : vector<32x16xf32>
    %cst_178 = arith.constant dense<0.000000e+00> : vector<32xf32>
    %495 = vector.multi_reduction <add>, %494, %cst_178 [1] : vector<32x16xf32> to vector<32xf32>
    %496 = vector.shape_cast %495 : vector<32xf32> to vector<32x1xf32>
    %cst_179 = arith.constant dense<0.000000e+00> : vector<32x1xf32>
    %497 = tpu.matmul %166, %496, %cst_179 {dimension_numbers = #tpu.dot_dimension_numbers<[1], [0], [0], [1], [0, 0, 1, 1], [], []>} : vector<32x32xf32>, vector<32x1xf32>, vector<32x1xf32> -> vector<32x1xf32>
    %498 = vector.broadcast %497 : vector<32x1xf32> to vector<32x32xf32>
    %499 = vector.broadcast %492 : vector<1x32xf32> to vector<32x32xf32>
    %500 = arith.addf %498, %499 : vector<32x32xf32>
    %cst_180 = arith.constant 0.000000e+00 : f32
    %501 = vector.broadcast %cst_180 : f32 to vector<32x32xf32>
    %502 = arith.cmpf ogt, %500, %501 : vector<32x32xf32>
    %cst_181 = arith.constant 2.000000e-01 : f32
    %503 = vector.broadcast %cst_181 : f32 to vector<32x32xf32>
    %504 = arith.mulf %503, %500 : vector<32x32xf32>
    %505 = arith.select %502, %500, %504 : vector<32x32xi1>, vector<32x32xf32>
    %cst_182 = arith.constant -1.000000e+30 : f32
    %506 = vector.broadcast %cst_182 : f32 to vector<32x32xf32>
    %507 = arith.select %168, %505, %506 : vector<32x32xi1>, vector<32x32xf32>
    %cst_183 = arith.constant dense<0xFF800000> : vector<32xf32>
    %508 = vector.multi_reduction <maximumf>, %507, %cst_183 [1] : vector<32x32xf32> to vector<32xf32>
    %509 = vector.shape_cast %508 : vector<32xf32> to vector<32x1xf32>
    %510 = vector.broadcast %509 : vector<32x1xf32> to vector<32x32xf32>
    %511 = arith.subf %507, %510 : vector<32x32xf32>
    %512 = math.exp %511 : vector<32x32xf32>
    %513 = arith.mulf %512, %164 : vector<32x32xf32>
    %cst_184 = arith.constant dense<0.000000e+00> : vector<32xf32>
    %514 = vector.multi_reduction <add>, %513, %cst_184 [1] : vector<32x32xf32> to vector<32xf32>
    %515 = vector.shape_cast %514 : vector<32xf32> to vector<32x1xf32>
    %516 = tpu.reciprocal %515 {approx = true} : vector<32x1xf32> -> vector<32x1xf32>
    %517 = vector.broadcast %516 : vector<32x1xf32> to vector<32x32xf32>
    %518 = arith.mulf %513, %517 : vector<32x32xf32>
    %cst_185 = arith.constant dense<0.000000e+00> : vector<32x16xf32>
    %519 = tpu.matmul %518, %488, %cst_185 {dimension_numbers = #tpu.dot_dimension_numbers<[1], [0], [0], [1], [0, 0, 1, 1], [], []>} : vector<32x32xf32>, vector<32x16xf32>, vector<32x16xf32> -> vector<32x16xf32>
    %520 = arith.addf %487, %519 : vector<32x16xf32>
    %521 = vector.extract_strided_slice %453 {offsets = [0, 32], sizes = [32, 16], strides = [1, 1]} : vector<32x48xf32> to vector<32x16xf32>
    %522 = vector.extract_strided_slice %162 {offsets = [14, 0], sizes = [1, 16], strides = [1, 1]} : vector<64x16xf32> to vector<1x16xf32>
    %523 = vector.extract_strided_slice %162 {offsets = [17, 0], sizes = [1, 16], strides = [1, 1]} : vector<64x16xf32> to vector<1x16xf32>
    "tpu.trace_start"() <{level = 10 : i32, message = "hg,ng->hn"}> : () -> ()
    %cst_186 = arith.constant dense<0.000000e+00> : vector<1x32xf32>
    %524 = tpu.matmul %522, %521, %cst_186 {dimension_numbers = #tpu.dot_dimension_numbers<[1], [1], [0], [0], [0, 0, 1, 0], [], []>} : vector<1x16xf32>, vector<32x16xf32>, vector<1x32xf32> -> vector<1x32xf32>
    "tpu.trace_stop"() : () -> ()
    %cst_187 = arith.constant dense<0.000000e+00> : vector<1x32xf32>
    %525 = tpu.matmul %524, %165, %cst_187 {dimension_numbers = #tpu.dot_dimension_numbers<[1], [0], [0], [1], [0, 0, 1, 1], [], []>} : vector<1x32xf32>, vector<32x32xf32>, vector<1x32xf32> -> vector<1x32xf32>
    %526 = vector.broadcast %523 : vector<1x16xf32> to vector<32x16xf32>
    %527 = arith.mulf %521, %526 : vector<32x16xf32>
    %cst_188 = arith.constant dense<0.000000e+00> : vector<32xf32>
    %528 = vector.multi_reduction <add>, %527, %cst_188 [1] : vector<32x16xf32> to vector<32xf32>
    %529 = vector.shape_cast %528 : vector<32xf32> to vector<32x1xf32>
    %cst_189 = arith.constant dense<0.000000e+00> : vector<32x1xf32>
    %530 = tpu.matmul %166, %529, %cst_189 {dimension_numbers = #tpu.dot_dimension_numbers<[1], [0], [0], [1], [0, 0, 1, 1], [], []>} : vector<32x32xf32>, vector<32x1xf32>, vector<32x1xf32> -> vector<32x1xf32>
    %531 = vector.broadcast %530 : vector<32x1xf32> to vector<32x32xf32>
    %532 = vector.broadcast %525 : vector<1x32xf32> to vector<32x32xf32>
    %533 = arith.addf %531, %532 : vector<32x32xf32>
    %cst_190 = arith.constant 0.000000e+00 : f32
    %534 = vector.broadcast %cst_190 : f32 to vector<32x32xf32>
    %535 = arith.cmpf ogt, %533, %534 : vector<32x32xf32>
    %cst_191 = arith.constant 2.000000e-01 : f32
    %536 = vector.broadcast %cst_191 : f32 to vector<32x32xf32>
    %537 = arith.mulf %536, %533 : vector<32x32xf32>
    %538 = arith.select %535, %533, %537 : vector<32x32xi1>, vector<32x32xf32>
    %cst_192 = arith.constant -1.000000e+30 : f32
    %539 = vector.broadcast %cst_192 : f32 to vector<32x32xf32>
    %540 = arith.select %168, %538, %539 : vector<32x32xi1>, vector<32x32xf32>
    %cst_193 = arith.constant dense<0xFF800000> : vector<32xf32>
    %541 = vector.multi_reduction <maximumf>, %540, %cst_193 [1] : vector<32x32xf32> to vector<32xf32>
    %542 = vector.shape_cast %541 : vector<32xf32> to vector<32x1xf32>
    %543 = vector.broadcast %542 : vector<32x1xf32> to vector<32x32xf32>
    %544 = arith.subf %540, %543 : vector<32x32xf32>
    %545 = math.exp %544 : vector<32x32xf32>
    %546 = arith.mulf %545, %164 : vector<32x32xf32>
    %cst_194 = arith.constant dense<0.000000e+00> : vector<32xf32>
    %547 = vector.multi_reduction <add>, %546, %cst_194 [1] : vector<32x32xf32> to vector<32xf32>
    %548 = vector.shape_cast %547 : vector<32xf32> to vector<32x1xf32>
    %549 = tpu.reciprocal %548 {approx = true} : vector<32x1xf32> -> vector<32x1xf32>
    %550 = vector.broadcast %549 : vector<32x1xf32> to vector<32x32xf32>
    %551 = arith.mulf %546, %550 : vector<32x32xf32>
    %cst_195 = arith.constant dense<0.000000e+00> : vector<32x16xf32>
    %552 = tpu.matmul %551, %521, %cst_195 {dimension_numbers = #tpu.dot_dimension_numbers<[1], [0], [0], [1], [0, 0, 1, 1], [], []>} : vector<32x32xf32>, vector<32x16xf32>, vector<32x16xf32> -> vector<32x16xf32>
    %553 = arith.addf %520, %552 : vector<32x16xf32>
    %554 = vector.extract_strided_slice %162 {offsets = [50, 0], sizes = [1, 16], strides = [1, 1]} : vector<64x16xf32> to vector<1x16xf32>
    %cst_196 = arith.constant 0.333333343 : f32
    %555 = vector.broadcast %cst_196 : f32 to vector<32x16xf32>
    %556 = arith.mulf %553, %555 : vector<32x16xf32>
    %557 = vector.broadcast %554 : vector<1x16xf32> to vector<32x16xf32>
    %558 = arith.addf %556, %557 : vector<32x16xf32>
    %559 = vector.extract_strided_slice %163 {offsets = [32, 0], sizes = [16, 16], strides = [1, 1]} : vector<128x16xf32> to vector<16x16xf32>
    %560 = vector.extract_strided_slice %162 {offsets = [58, 0], sizes = [1, 16], strides = [1, 1]} : vector<64x16xf32> to vector<1x16xf32>
    %cst_197 = arith.constant dense<0.000000e+00> : vector<32x16xf32>
    %561 = tpu.matmul %186, %451, %cst_197 {dimension_numbers = #tpu.dot_dimension_numbers<[1], [0], [0], [1], [0, 0, 1, 1], [], []>} : vector<32x32xf32>, vector<32x16xf32>, vector<32x16xf32> -> vector<32x16xf32>
    %cst_198 = arith.constant dense<0.000000e+00> : vector<32x16xf32>
    %562 = tpu.matmul %561, %559, %cst_198 {dimension_numbers = #tpu.dot_dimension_numbers<[1], [0], [0], [1], [0, 0, 1, 1], [], []>} : vector<32x16xf32>, vector<16x16xf32>, vector<32x16xf32> -> vector<32x16xf32>
    %563 = vector.broadcast %560 : vector<1x16xf32> to vector<32x16xf32>
    %564 = arith.addf %562, %563 : vector<32x16xf32>
    %cst_199 = arith.constant 5.000000e-01 : f32
    %565 = vector.broadcast %cst_199 : f32 to vector<32x16xf32>
    %566 = arith.mulf %565, %564 : vector<32x16xf32>
    %567 = math.tanh %566 : vector<32x16xf32>
    %cst_200 = arith.constant 1.000000e+00 : f32
    %568 = vector.broadcast %cst_200 : f32 to vector<32x16xf32>
    %569 = arith.addf %567, %568 : vector<32x16xf32>
    %cst_201 = arith.constant 5.000000e-01 : f32
    %570 = vector.broadcast %cst_201 : f32 to vector<32x16xf32>
    %571 = arith.mulf %570, %569 : vector<32x16xf32>
    %cst_202 = arith.constant 0.000000e+00 : f32
    %572 = vector.broadcast %cst_202 : f32 to vector<32x16xf32>
    %573 = arith.maximumf %558, %572 : vector<32x16xf32>
    %574 = arith.mulf %573, %571 : vector<32x16xf32>
    %cst_203 = arith.constant 1.000000e+00 : f32
    %575 = vector.broadcast %cst_203 : f32 to vector<32x16xf32>
    %576 = arith.subf %575, %571 : vector<32x16xf32>
    %577 = arith.mulf %449, %576 : vector<32x16xf32>
    %578 = arith.addf %574, %577 : vector<32x16xf32>
    %cst_204 = arith.constant 0.000000e+00 : f32
    %579 = vector.broadcast %cst_204 : f32 to vector<32x16xf32>
    %580 = arith.maximumf %578, %579 : vector<32x16xf32>
    %581 = vector.extract_strided_slice %161 {offsets = [48, 0], sizes = [16, 16], strides = [1, 1]} : vector<128x48xf32> to vector<16x16xf32>
    %cst_205 = arith.constant dense<0.000000e+00> : vector<32x16xf32>
    %582 = tpu.matmul %580, %581, %cst_205 {dimension_numbers = #tpu.dot_dimension_numbers<[1], [0], [0], [1], [0, 0, 1, 1], [], []>} : vector<32x16xf32>, vector<16x16xf32>, vector<32x16xf32> -> vector<32x16xf32>
    %cst_206 = arith.constant 0.000000e+00 : f32
    %583 = vector.broadcast %cst_206 : f32 to vector<32x16xf32>
    %584 = vector.extract_strided_slice %162 {offsets = [18, 0], sizes = [1, 16], strides = [1, 1]} : vector<64x16xf32> to vector<1x16xf32>
    %585 = vector.extract_strided_slice %162 {offsets = [21, 0], sizes = [1, 16], strides = [1, 1]} : vector<64x16xf32> to vector<1x16xf32>
    "tpu.trace_start"() <{level = 10 : i32, message = "hg,ng->hn"}> : () -> ()
    %cst_207 = arith.constant dense<0.000000e+00> : vector<1x32xf32>
    %586 = tpu.matmul %584, %582, %cst_207 {dimension_numbers = #tpu.dot_dimension_numbers<[1], [1], [0], [0], [0, 0, 1, 0], [], []>} : vector<1x16xf32>, vector<32x16xf32>, vector<1x32xf32> -> vector<1x32xf32>
    "tpu.trace_stop"() : () -> ()
    %cst_208 = arith.constant dense<0.000000e+00> : vector<1x32xf32>
    %587 = tpu.matmul %586, %165, %cst_208 {dimension_numbers = #tpu.dot_dimension_numbers<[1], [0], [0], [1], [0, 0, 1, 1], [], []>} : vector<1x32xf32>, vector<32x32xf32>, vector<1x32xf32> -> vector<1x32xf32>
    %588 = vector.broadcast %585 : vector<1x16xf32> to vector<32x16xf32>
    %589 = arith.mulf %582, %588 : vector<32x16xf32>
    %cst_209 = arith.constant dense<0.000000e+00> : vector<32xf32>
    %590 = vector.multi_reduction <add>, %589, %cst_209 [1] : vector<32x16xf32> to vector<32xf32>
    %591 = vector.shape_cast %590 : vector<32xf32> to vector<32x1xf32>
    %cst_210 = arith.constant dense<0.000000e+00> : vector<32x1xf32>
    %592 = tpu.matmul %166, %591, %cst_210 {dimension_numbers = #tpu.dot_dimension_numbers<[1], [0], [0], [1], [0, 0, 1, 1], [], []>} : vector<32x32xf32>, vector<32x1xf32>, vector<32x1xf32> -> vector<32x1xf32>
    %593 = vector.broadcast %592 : vector<32x1xf32> to vector<32x32xf32>
    %594 = vector.broadcast %587 : vector<1x32xf32> to vector<32x32xf32>
    %595 = arith.addf %593, %594 : vector<32x32xf32>
    %cst_211 = arith.constant 0.000000e+00 : f32
    %596 = vector.broadcast %cst_211 : f32 to vector<32x32xf32>
    %597 = arith.cmpf ogt, %595, %596 : vector<32x32xf32>
    %cst_212 = arith.constant 2.000000e-01 : f32
    %598 = vector.broadcast %cst_212 : f32 to vector<32x32xf32>
    %599 = arith.mulf %598, %595 : vector<32x32xf32>
    %600 = arith.select %597, %595, %599 : vector<32x32xi1>, vector<32x32xf32>
    %cst_213 = arith.constant -1.000000e+30 : f32
    %601 = vector.broadcast %cst_213 : f32 to vector<32x32xf32>
    %602 = arith.select %168, %600, %601 : vector<32x32xi1>, vector<32x32xf32>
    %cst_214 = arith.constant dense<0xFF800000> : vector<32xf32>
    %603 = vector.multi_reduction <maximumf>, %602, %cst_214 [1] : vector<32x32xf32> to vector<32xf32>
    %604 = vector.shape_cast %603 : vector<32xf32> to vector<32x1xf32>
    %605 = vector.broadcast %604 : vector<32x1xf32> to vector<32x32xf32>
    %606 = arith.subf %602, %605 : vector<32x32xf32>
    %607 = math.exp %606 : vector<32x32xf32>
    %608 = arith.mulf %607, %164 : vector<32x32xf32>
    %cst_215 = arith.constant dense<0.000000e+00> : vector<32xf32>
    %609 = vector.multi_reduction <add>, %608, %cst_215 [1] : vector<32x32xf32> to vector<32xf32>
    %610 = vector.shape_cast %609 : vector<32xf32> to vector<32x1xf32>
    %611 = tpu.reciprocal %610 {approx = true} : vector<32x1xf32> -> vector<32x1xf32>
    %612 = vector.broadcast %611 : vector<32x1xf32> to vector<32x32xf32>
    %613 = arith.mulf %608, %612 : vector<32x32xf32>
    %cst_216 = arith.constant dense<0.000000e+00> : vector<32x16xf32>
    %614 = tpu.matmul %613, %582, %cst_216 {dimension_numbers = #tpu.dot_dimension_numbers<[1], [0], [0], [1], [0, 0, 1, 1], [], []>} : vector<32x32xf32>, vector<32x16xf32>, vector<32x16xf32> -> vector<32x16xf32>
    %615 = arith.addf %583, %614 : vector<32x16xf32>
    %616 = vector.extract_strided_slice %162 {offsets = [51, 0], sizes = [1, 16], strides = [1, 1]} : vector<64x16xf32> to vector<1x16xf32>
    %cst_217 = arith.constant 1.000000e+00 : f32
    %617 = vector.broadcast %cst_217 : f32 to vector<32x16xf32>
    %618 = arith.mulf %615, %617 : vector<32x16xf32>
    %619 = vector.broadcast %616 : vector<1x16xf32> to vector<32x16xf32>
    %620 = arith.addf %618, %619 : vector<32x16xf32>
    %621 = vector.extract_strided_slice %163 {offsets = [48, 0], sizes = [16, 16], strides = [1, 1]} : vector<128x16xf32> to vector<16x16xf32>
    %622 = vector.extract_strided_slice %162 {offsets = [59, 0], sizes = [1, 16], strides = [1, 1]} : vector<64x16xf32> to vector<1x16xf32>
    %cst_218 = arith.constant dense<0.000000e+00> : vector<32x16xf32>
    %623 = tpu.matmul %186, %580, %cst_218 {dimension_numbers = #tpu.dot_dimension_numbers<[1], [0], [0], [1], [0, 0, 1, 1], [], []>} : vector<32x32xf32>, vector<32x16xf32>, vector<32x16xf32> -> vector<32x16xf32>
    %cst_219 = arith.constant dense<0.000000e+00> : vector<32x16xf32>
    %624 = tpu.matmul %623, %621, %cst_219 {dimension_numbers = #tpu.dot_dimension_numbers<[1], [0], [0], [1], [0, 0, 1, 1], [], []>} : vector<32x16xf32>, vector<16x16xf32>, vector<32x16xf32> -> vector<32x16xf32>
    %625 = vector.broadcast %622 : vector<1x16xf32> to vector<32x16xf32>
    %626 = arith.addf %624, %625 : vector<32x16xf32>
    %cst_220 = arith.constant 5.000000e-01 : f32
    %627 = vector.broadcast %cst_220 : f32 to vector<32x16xf32>
    %628 = arith.mulf %627, %626 : vector<32x16xf32>
    %629 = math.tanh %628 : vector<32x16xf32>
    %cst_221 = arith.constant 1.000000e+00 : f32
    %630 = vector.broadcast %cst_221 : f32 to vector<32x16xf32>
    %631 = arith.addf %629, %630 : vector<32x16xf32>
    %cst_222 = arith.constant 5.000000e-01 : f32
    %632 = vector.broadcast %cst_222 : f32 to vector<32x16xf32>
    %633 = arith.mulf %632, %631 : vector<32x16xf32>
    %cst_223 = arith.constant 0.000000e+00 : f32
    %634 = vector.broadcast %cst_223 : f32 to vector<32x16xf32>
    %635 = arith.maximumf %620, %634 : vector<32x16xf32>
    %636 = arith.mulf %635, %633 : vector<32x16xf32>
    %cst_224 = arith.constant 1.000000e+00 : f32
    %637 = vector.broadcast %cst_224 : f32 to vector<32x16xf32>
    %638 = arith.subf %637, %633 : vector<32x16xf32>
    %639 = arith.mulf %578, %638 : vector<32x16xf32>
    %640 = arith.addf %636, %639 : vector<32x16xf32>
    %641 = vector.extract_strided_slice %157 {offsets = [96, 0], sizes = [32, 32], strides = [1, 1]} : vector<192x32xf32> to vector<32x32xf32>
    %642 = vector.extract_strided_slice %157 {offsets = [128, 0], sizes = [32, 32], strides = [1, 1]} : vector<192x32xf32> to vector<32x32xf32>
    %643 = vector.extract_strided_slice %157 {offsets = [160, 0], sizes = [32, 32], strides = [1, 1]} : vector<192x32xf32> to vector<32x32xf32>
    %cst_225 = arith.constant 0.000000e+00 : f32
    %644 = vector.broadcast %cst_225 : f32 to vector<32x32xf32>
    %645 = arith.cmpf ogt, %641, %644 : vector<32x32xf32>
    %646 = vector.extract_strided_slice %158 {offsets = [16, 0], sizes = [16, 12], strides = [1, 1]} : vector<32x12xf32> to vector<16x12xf32>
    %647 = vector.extract_strided_slice %159 {offsets = [16, 0], sizes = [12, 16], strides = [1, 1]} : vector<32x16xf32> to vector<12x16xf32>
    %cst_226 = arith.constant dense<0.000000e+00> : vector<16x16xf32>
    %648 = tpu.matmul %646, %647, %cst_226 {dimension_numbers = #tpu.dot_dimension_numbers<[1], [0], [0], [1], [0, 0, 1, 1], [], []>} : vector<16x12xf32>, vector<12x16xf32>, vector<16x16xf32> -> vector<16x16xf32>
    %cst_227 = arith.constant 0.000000e+00 : f32
    %649 = vector.broadcast %cst_227 : f32 to vector<16x16xf32>
    %650 = arith.maximumf %648, %649 : vector<16x16xf32>
    %cst_228 = arith.constant dense<0xFF800000> : vector<16xf32>
    %651 = vector.multi_reduction <maximumf>, %650, %cst_228 [1] : vector<16x16xf32> to vector<16xf32>
    %652 = vector.shape_cast %651 : vector<16xf32> to vector<16x1xf32>
    %653 = vector.broadcast %652 : vector<16x1xf32> to vector<16x16xf32>
    %654 = arith.subf %650, %653 : vector<16x16xf32>
    %655 = math.exp %654 : vector<16x16xf32>
    %cst_229 = arith.constant dense<0.000000e+00> : vector<16xf32>
    %656 = vector.multi_reduction <add>, %655, %cst_229 [1] : vector<16x16xf32> to vector<16xf32>
    %657 = vector.shape_cast %656 : vector<16xf32> to vector<16x1xf32>
    %658 = tpu.reciprocal %657 {approx = true} : vector<16x1xf32> -> vector<16x1xf32>
    %659 = vector.broadcast %658 : vector<16x1xf32> to vector<16x16xf32>
    %660 = arith.mulf %655, %659 : vector<16x16xf32>
    %cst_230 = arith.constant dense<0.000000e+00> : vector<32x16xf32>
    %661 = tpu.matmul %92, %660, %cst_230 {dimension_numbers = #tpu.dot_dimension_numbers<[1], [0], [0], [1], [0, 0, 1, 1], [], []>} : vector<32x16xf32>, vector<16x16xf32>, vector<32x16xf32> -> vector<32x16xf32>
    %cst_231 = arith.constant dense<0.000000e+00> : vector<32x32xf32>
    %662 = tpu.matmul %661, %155, %cst_231 {dimension_numbers = #tpu.dot_dimension_numbers<[1], [0], [0], [1], [0, 0, 1, 1], [], []>} : vector<32x16xf32>, vector<16x32xf32>, vector<32x32xf32> -> vector<32x32xf32>
    %663 = arith.mulf %662, %156 : vector<32x32xf32>
    %664 = vector.extract_strided_slice %160 {offsets = [16, 0], sizes = [9, 16], strides = [1, 1]} : vector<32x16xf32> to vector<9x16xf32>
    %665 = vector.extract_strided_slice %664 {offsets = [0, 0], sizes = [8, 16], strides = [1, 1]} : vector<9x16xf32> to vector<8x16xf32>
    %cst_232 = arith.constant dense<0.000000e+00> : vector<32x16xf32>
    %666 = tpu.matmul %154, %665, %cst_232 {dimension_numbers = #tpu.dot_dimension_numbers<[1], [0], [0], [1], [0, 0, 1, 1], [], []>} : vector<32x8xf32>, vector<8x16xf32>, vector<32x16xf32> -> vector<32x16xf32>
    %667 = vector.extract_strided_slice %664 {offsets = [8, 0], sizes = [1, 16], strides = [1, 1]} : vector<9x16xf32> to vector<1x16xf32>
    %668 = vector.broadcast %667 : vector<1x16xf32> to vector<32x16xf32>
    %669 = arith.addf %666, %668 : vector<32x16xf32>
    %670 = vector.extract_strided_slice %161 {offsets = [64, 0], sizes = [8, 48], strides = [1, 1]} : vector<128x48xf32> to vector<8x48xf32>
    %cst_233 = arith.constant dense<0.000000e+00> : vector<32x48xf32>
    %671 = tpu.matmul %154, %670, %cst_233 {dimension_numbers = #tpu.dot_dimension_numbers<[1], [0], [0], [1], [0, 0, 1, 1], [], []>} : vector<32x8xf32>, vector<8x48xf32>, vector<32x48xf32> -> vector<32x48xf32>
    %cst_234 = arith.constant 0.000000e+00 : f32
    %672 = vector.broadcast %cst_234 : f32 to vector<32x16xf32>
    %673 = vector.extract_strided_slice %671 {offsets = [0, 0], sizes = [32, 16], strides = [1, 1]} : vector<32x48xf32> to vector<32x16xf32>
    %674 = vector.extract_strided_slice %162 {offsets = [24, 0], sizes = [1, 16], strides = [1, 1]} : vector<64x16xf32> to vector<1x16xf32>
    %675 = vector.extract_strided_slice %162 {offsets = [27, 0], sizes = [1, 16], strides = [1, 1]} : vector<64x16xf32> to vector<1x16xf32>
    "tpu.trace_start"() <{level = 10 : i32, message = "hg,ng->hn"}> : () -> ()
    %cst_235 = arith.constant dense<0.000000e+00> : vector<1x32xf32>
    %676 = tpu.matmul %674, %673, %cst_235 {dimension_numbers = #tpu.dot_dimension_numbers<[1], [1], [0], [0], [0, 0, 1, 0], [], []>} : vector<1x16xf32>, vector<32x16xf32>, vector<1x32xf32> -> vector<1x32xf32>
    "tpu.trace_stop"() : () -> ()
    %cst_236 = arith.constant dense<0.000000e+00> : vector<1x32xf32>
    %677 = tpu.matmul %676, %642, %cst_236 {dimension_numbers = #tpu.dot_dimension_numbers<[1], [0], [0], [1], [0, 0, 1, 1], [], []>} : vector<1x32xf32>, vector<32x32xf32>, vector<1x32xf32> -> vector<1x32xf32>
    %678 = vector.broadcast %675 : vector<1x16xf32> to vector<32x16xf32>
    %679 = arith.mulf %673, %678 : vector<32x16xf32>
    %cst_237 = arith.constant dense<0.000000e+00> : vector<32xf32>
    %680 = vector.multi_reduction <add>, %679, %cst_237 [1] : vector<32x16xf32> to vector<32xf32>
    %681 = vector.shape_cast %680 : vector<32xf32> to vector<32x1xf32>
    %cst_238 = arith.constant dense<0.000000e+00> : vector<32x1xf32>
    %682 = tpu.matmul %643, %681, %cst_238 {dimension_numbers = #tpu.dot_dimension_numbers<[1], [0], [0], [1], [0, 0, 1, 1], [], []>} : vector<32x32xf32>, vector<32x1xf32>, vector<32x1xf32> -> vector<32x1xf32>
    %683 = vector.broadcast %682 : vector<32x1xf32> to vector<32x32xf32>
    %684 = vector.broadcast %677 : vector<1x32xf32> to vector<32x32xf32>
    %685 = arith.addf %683, %684 : vector<32x32xf32>
    %cst_239 = arith.constant 0.000000e+00 : f32
    %686 = vector.broadcast %cst_239 : f32 to vector<32x32xf32>
    %687 = arith.cmpf ogt, %685, %686 : vector<32x32xf32>
    %cst_240 = arith.constant 2.000000e-01 : f32
    %688 = vector.broadcast %cst_240 : f32 to vector<32x32xf32>
    %689 = arith.mulf %688, %685 : vector<32x32xf32>
    %690 = arith.select %687, %685, %689 : vector<32x32xi1>, vector<32x32xf32>
    %cst_241 = arith.constant -1.000000e+30 : f32
    %691 = vector.broadcast %cst_241 : f32 to vector<32x32xf32>
    %692 = arith.select %645, %690, %691 : vector<32x32xi1>, vector<32x32xf32>
    %cst_242 = arith.constant dense<0xFF800000> : vector<32xf32>
    %693 = vector.multi_reduction <maximumf>, %692, %cst_242 [1] : vector<32x32xf32> to vector<32xf32>
    %694 = vector.shape_cast %693 : vector<32xf32> to vector<32x1xf32>
    %695 = vector.broadcast %694 : vector<32x1xf32> to vector<32x32xf32>
    %696 = arith.subf %692, %695 : vector<32x32xf32>
    %697 = math.exp %696 : vector<32x32xf32>
    %698 = arith.mulf %697, %641 : vector<32x32xf32>
    %cst_243 = arith.constant dense<0.000000e+00> : vector<32xf32>
    %699 = vector.multi_reduction <add>, %698, %cst_243 [1] : vector<32x32xf32> to vector<32xf32>
    %700 = vector.shape_cast %699 : vector<32xf32> to vector<32x1xf32>
    %701 = tpu.reciprocal %700 {approx = true} : vector<32x1xf32> -> vector<32x1xf32>
    %702 = vector.broadcast %701 : vector<32x1xf32> to vector<32x32xf32>
    %703 = arith.mulf %698, %702 : vector<32x32xf32>
    %cst_244 = arith.constant dense<0.000000e+00> : vector<32x16xf32>
    %704 = tpu.matmul %703, %673, %cst_244 {dimension_numbers = #tpu.dot_dimension_numbers<[1], [0], [0], [1], [0, 0, 1, 1], [], []>} : vector<32x32xf32>, vector<32x16xf32>, vector<32x16xf32> -> vector<32x16xf32>
    %705 = arith.addf %672, %704 : vector<32x16xf32>
    %706 = vector.extract_strided_slice %671 {offsets = [0, 16], sizes = [32, 16], strides = [1, 1]} : vector<32x48xf32> to vector<32x16xf32>
    %707 = vector.extract_strided_slice %162 {offsets = [25, 0], sizes = [1, 16], strides = [1, 1]} : vector<64x16xf32> to vector<1x16xf32>
    %708 = vector.extract_strided_slice %162 {offsets = [28, 0], sizes = [1, 16], strides = [1, 1]} : vector<64x16xf32> to vector<1x16xf32>
    "tpu.trace_start"() <{level = 10 : i32, message = "hg,ng->hn"}> : () -> ()
    %cst_245 = arith.constant dense<0.000000e+00> : vector<1x32xf32>
    %709 = tpu.matmul %707, %706, %cst_245 {dimension_numbers = #tpu.dot_dimension_numbers<[1], [1], [0], [0], [0, 0, 1, 0], [], []>} : vector<1x16xf32>, vector<32x16xf32>, vector<1x32xf32> -> vector<1x32xf32>
    "tpu.trace_stop"() : () -> ()
    %cst_246 = arith.constant dense<0.000000e+00> : vector<1x32xf32>
    %710 = tpu.matmul %709, %642, %cst_246 {dimension_numbers = #tpu.dot_dimension_numbers<[1], [0], [0], [1], [0, 0, 1, 1], [], []>} : vector<1x32xf32>, vector<32x32xf32>, vector<1x32xf32> -> vector<1x32xf32>
    %711 = vector.broadcast %708 : vector<1x16xf32> to vector<32x16xf32>
    %712 = arith.mulf %706, %711 : vector<32x16xf32>
    %cst_247 = arith.constant dense<0.000000e+00> : vector<32xf32>
    %713 = vector.multi_reduction <add>, %712, %cst_247 [1] : vector<32x16xf32> to vector<32xf32>
    %714 = vector.shape_cast %713 : vector<32xf32> to vector<32x1xf32>
    %cst_248 = arith.constant dense<0.000000e+00> : vector<32x1xf32>
    %715 = tpu.matmul %643, %714, %cst_248 {dimension_numbers = #tpu.dot_dimension_numbers<[1], [0], [0], [1], [0, 0, 1, 1], [], []>} : vector<32x32xf32>, vector<32x1xf32>, vector<32x1xf32> -> vector<32x1xf32>
    %716 = vector.broadcast %715 : vector<32x1xf32> to vector<32x32xf32>
    %717 = vector.broadcast %710 : vector<1x32xf32> to vector<32x32xf32>
    %718 = arith.addf %716, %717 : vector<32x32xf32>
    %cst_249 = arith.constant 0.000000e+00 : f32
    %719 = vector.broadcast %cst_249 : f32 to vector<32x32xf32>
    %720 = arith.cmpf ogt, %718, %719 : vector<32x32xf32>
    %cst_250 = arith.constant 2.000000e-01 : f32
    %721 = vector.broadcast %cst_250 : f32 to vector<32x32xf32>
    %722 = arith.mulf %721, %718 : vector<32x32xf32>
    %723 = arith.select %720, %718, %722 : vector<32x32xi1>, vector<32x32xf32>
    %cst_251 = arith.constant -1.000000e+30 : f32
    %724 = vector.broadcast %cst_251 : f32 to vector<32x32xf32>
    %725 = arith.select %645, %723, %724 : vector<32x32xi1>, vector<32x32xf32>
    %cst_252 = arith.constant dense<0xFF800000> : vector<32xf32>
    %726 = vector.multi_reduction <maximumf>, %725, %cst_252 [1] : vector<32x32xf32> to vector<32xf32>
    %727 = vector.shape_cast %726 : vector<32xf32> to vector<32x1xf32>
    %728 = vector.broadcast %727 : vector<32x1xf32> to vector<32x32xf32>
    %729 = arith.subf %725, %728 : vector<32x32xf32>
    %730 = math.exp %729 : vector<32x32xf32>
    %731 = arith.mulf %730, %641 : vector<32x32xf32>
    %cst_253 = arith.constant dense<0.000000e+00> : vector<32xf32>
    %732 = vector.multi_reduction <add>, %731, %cst_253 [1] : vector<32x32xf32> to vector<32xf32>
    %733 = vector.shape_cast %732 : vector<32xf32> to vector<32x1xf32>
    %734 = tpu.reciprocal %733 {approx = true} : vector<32x1xf32> -> vector<32x1xf32>
    %735 = vector.broadcast %734 : vector<32x1xf32> to vector<32x32xf32>
    %736 = arith.mulf %731, %735 : vector<32x32xf32>
    %cst_254 = arith.constant dense<0.000000e+00> : vector<32x16xf32>
    %737 = tpu.matmul %736, %706, %cst_254 {dimension_numbers = #tpu.dot_dimension_numbers<[1], [0], [0], [1], [0, 0, 1, 1], [], []>} : vector<32x32xf32>, vector<32x16xf32>, vector<32x16xf32> -> vector<32x16xf32>
    %738 = arith.addf %705, %737 : vector<32x16xf32>
    %739 = vector.extract_strided_slice %671 {offsets = [0, 32], sizes = [32, 16], strides = [1, 1]} : vector<32x48xf32> to vector<32x16xf32>
    %740 = vector.extract_strided_slice %162 {offsets = [26, 0], sizes = [1, 16], strides = [1, 1]} : vector<64x16xf32> to vector<1x16xf32>
    %741 = vector.extract_strided_slice %162 {offsets = [29, 0], sizes = [1, 16], strides = [1, 1]} : vector<64x16xf32> to vector<1x16xf32>
    "tpu.trace_start"() <{level = 10 : i32, message = "hg,ng->hn"}> : () -> ()
    %cst_255 = arith.constant dense<0.000000e+00> : vector<1x32xf32>
    %742 = tpu.matmul %740, %739, %cst_255 {dimension_numbers = #tpu.dot_dimension_numbers<[1], [1], [0], [0], [0, 0, 1, 0], [], []>} : vector<1x16xf32>, vector<32x16xf32>, vector<1x32xf32> -> vector<1x32xf32>
    "tpu.trace_stop"() : () -> ()
    %cst_256 = arith.constant dense<0.000000e+00> : vector<1x32xf32>
    %743 = tpu.matmul %742, %642, %cst_256 {dimension_numbers = #tpu.dot_dimension_numbers<[1], [0], [0], [1], [0, 0, 1, 1], [], []>} : vector<1x32xf32>, vector<32x32xf32>, vector<1x32xf32> -> vector<1x32xf32>
    %744 = vector.broadcast %741 : vector<1x16xf32> to vector<32x16xf32>
    %745 = arith.mulf %739, %744 : vector<32x16xf32>
    %cst_257 = arith.constant dense<0.000000e+00> : vector<32xf32>
    %746 = vector.multi_reduction <add>, %745, %cst_257 [1] : vector<32x16xf32> to vector<32xf32>
    %747 = vector.shape_cast %746 : vector<32xf32> to vector<32x1xf32>
    %cst_258 = arith.constant dense<0.000000e+00> : vector<32x1xf32>
    %748 = tpu.matmul %643, %747, %cst_258 {dimension_numbers = #tpu.dot_dimension_numbers<[1], [0], [0], [1], [0, 0, 1, 1], [], []>} : vector<32x32xf32>, vector<32x1xf32>, vector<32x1xf32> -> vector<32x1xf32>
    %749 = vector.broadcast %748 : vector<32x1xf32> to vector<32x32xf32>
    %750 = vector.broadcast %743 : vector<1x32xf32> to vector<32x32xf32>
    %751 = arith.addf %749, %750 : vector<32x32xf32>
    %cst_259 = arith.constant 0.000000e+00 : f32
    %752 = vector.broadcast %cst_259 : f32 to vector<32x32xf32>
    %753 = arith.cmpf ogt, %751, %752 : vector<32x32xf32>
    %cst_260 = arith.constant 2.000000e-01 : f32
    %754 = vector.broadcast %cst_260 : f32 to vector<32x32xf32>
    %755 = arith.mulf %754, %751 : vector<32x32xf32>
    %756 = arith.select %753, %751, %755 : vector<32x32xi1>, vector<32x32xf32>
    %cst_261 = arith.constant -1.000000e+30 : f32
    %757 = vector.broadcast %cst_261 : f32 to vector<32x32xf32>
    %758 = arith.select %645, %756, %757 : vector<32x32xi1>, vector<32x32xf32>
    %cst_262 = arith.constant dense<0xFF800000> : vector<32xf32>
    %759 = vector.multi_reduction <maximumf>, %758, %cst_262 [1] : vector<32x32xf32> to vector<32xf32>
    %760 = vector.shape_cast %759 : vector<32xf32> to vector<32x1xf32>
    %761 = vector.broadcast %760 : vector<32x1xf32> to vector<32x32xf32>
    %762 = arith.subf %758, %761 : vector<32x32xf32>
    %763 = math.exp %762 : vector<32x32xf32>
    %764 = arith.mulf %763, %641 : vector<32x32xf32>
    %cst_263 = arith.constant dense<0.000000e+00> : vector<32xf32>
    %765 = vector.multi_reduction <add>, %764, %cst_263 [1] : vector<32x32xf32> to vector<32xf32>
    %766 = vector.shape_cast %765 : vector<32xf32> to vector<32x1xf32>
    %767 = tpu.reciprocal %766 {approx = true} : vector<32x1xf32> -> vector<32x1xf32>
    %768 = vector.broadcast %767 : vector<32x1xf32> to vector<32x32xf32>
    %769 = arith.mulf %764, %768 : vector<32x32xf32>
    %cst_264 = arith.constant dense<0.000000e+00> : vector<32x16xf32>
    %770 = tpu.matmul %769, %739, %cst_264 {dimension_numbers = #tpu.dot_dimension_numbers<[1], [0], [0], [1], [0, 0, 1, 1], [], []>} : vector<32x32xf32>, vector<32x16xf32>, vector<32x16xf32> -> vector<32x16xf32>
    %771 = arith.addf %738, %770 : vector<32x16xf32>
    %772 = vector.extract_strided_slice %162 {offsets = [52, 0], sizes = [1, 16], strides = [1, 1]} : vector<64x16xf32> to vector<1x16xf32>
    %cst_265 = arith.constant 0.333333343 : f32
    %773 = vector.broadcast %cst_265 : f32 to vector<32x16xf32>
    %774 = arith.mulf %771, %773 : vector<32x16xf32>
    %775 = vector.broadcast %772 : vector<1x16xf32> to vector<32x16xf32>
    %776 = arith.addf %774, %775 : vector<32x16xf32>
    %777 = vector.extract_strided_slice %163 {offsets = [64, 0], sizes = [8, 16], strides = [1, 1]} : vector<128x16xf32> to vector<8x16xf32>
    %778 = vector.extract_strided_slice %162 {offsets = [60, 0], sizes = [1, 16], strides = [1, 1]} : vector<64x16xf32> to vector<1x16xf32>
    %cst_266 = arith.constant dense<0.000000e+00> : vector<32x8xf32>
    %779 = tpu.matmul %663, %154, %cst_266 {dimension_numbers = #tpu.dot_dimension_numbers<[1], [0], [0], [1], [0, 0, 1, 1], [], []>} : vector<32x32xf32>, vector<32x8xf32>, vector<32x8xf32> -> vector<32x8xf32>
    %cst_267 = arith.constant dense<0.000000e+00> : vector<32x16xf32>
    %780 = tpu.matmul %779, %777, %cst_267 {dimension_numbers = #tpu.dot_dimension_numbers<[1], [0], [0], [1], [0, 0, 1, 1], [], []>} : vector<32x8xf32>, vector<8x16xf32>, vector<32x16xf32> -> vector<32x16xf32>
    %781 = vector.broadcast %778 : vector<1x16xf32> to vector<32x16xf32>
    %782 = arith.addf %780, %781 : vector<32x16xf32>
    %cst_268 = arith.constant 5.000000e-01 : f32
    %783 = vector.broadcast %cst_268 : f32 to vector<32x16xf32>
    %784 = arith.mulf %783, %782 : vector<32x16xf32>
    %785 = math.tanh %784 : vector<32x16xf32>
    %cst_269 = arith.constant 1.000000e+00 : f32
    %786 = vector.broadcast %cst_269 : f32 to vector<32x16xf32>
    %787 = arith.addf %785, %786 : vector<32x16xf32>
    %cst_270 = arith.constant 5.000000e-01 : f32
    %788 = vector.broadcast %cst_270 : f32 to vector<32x16xf32>
    %789 = arith.mulf %788, %787 : vector<32x16xf32>
    %790 = math.tanh %776 : vector<32x16xf32>
    %791 = arith.mulf %790, %789 : vector<32x16xf32>
    %cst_271 = arith.constant 1.000000e+00 : f32
    %792 = vector.broadcast %cst_271 : f32 to vector<32x16xf32>
    %793 = arith.subf %792, %789 : vector<32x16xf32>
    %794 = arith.mulf %669, %793 : vector<32x16xf32>
    %795 = arith.addf %791, %794 : vector<32x16xf32>
    %796 = math.tanh %795 : vector<32x16xf32>
    %797 = vector.extract_strided_slice %161 {offsets = [80, 0], sizes = [16, 48], strides = [1, 1]} : vector<128x48xf32> to vector<16x48xf32>
    %cst_272 = arith.constant dense<0.000000e+00> : vector<32x48xf32>
    %798 = tpu.matmul %796, %797, %cst_272 {dimension_numbers = #tpu.dot_dimension_numbers<[1], [0], [0], [1], [0, 0, 1, 1], [], []>} : vector<32x16xf32>, vector<16x48xf32>, vector<32x48xf32> -> vector<32x48xf32>
    %cst_273 = arith.constant 0.000000e+00 : f32
    %799 = vector.broadcast %cst_273 : f32 to vector<32x16xf32>
    %800 = vector.extract_strided_slice %798 {offsets = [0, 0], sizes = [32, 16], strides = [1, 1]} : vector<32x48xf32> to vector<32x16xf32>
    %801 = vector.extract_strided_slice %162 {offsets = [30, 0], sizes = [1, 16], strides = [1, 1]} : vector<64x16xf32> to vector<1x16xf32>
    %802 = vector.extract_strided_slice %162 {offsets = [33, 0], sizes = [1, 16], strides = [1, 1]} : vector<64x16xf32> to vector<1x16xf32>
    "tpu.trace_start"() <{level = 10 : i32, message = "hg,ng->hn"}> : () -> ()
    %cst_274 = arith.constant dense<0.000000e+00> : vector<1x32xf32>
    %803 = tpu.matmul %801, %800, %cst_274 {dimension_numbers = #tpu.dot_dimension_numbers<[1], [1], [0], [0], [0, 0, 1, 0], [], []>} : vector<1x16xf32>, vector<32x16xf32>, vector<1x32xf32> -> vector<1x32xf32>
    "tpu.trace_stop"() : () -> ()
    %cst_275 = arith.constant dense<0.000000e+00> : vector<1x32xf32>
    %804 = tpu.matmul %803, %642, %cst_275 {dimension_numbers = #tpu.dot_dimension_numbers<[1], [0], [0], [1], [0, 0, 1, 1], [], []>} : vector<1x32xf32>, vector<32x32xf32>, vector<1x32xf32> -> vector<1x32xf32>
    %805 = vector.broadcast %802 : vector<1x16xf32> to vector<32x16xf32>
    %806 = arith.mulf %800, %805 : vector<32x16xf32>
    %cst_276 = arith.constant dense<0.000000e+00> : vector<32xf32>
    %807 = vector.multi_reduction <add>, %806, %cst_276 [1] : vector<32x16xf32> to vector<32xf32>
    %808 = vector.shape_cast %807 : vector<32xf32> to vector<32x1xf32>
    %cst_277 = arith.constant dense<0.000000e+00> : vector<32x1xf32>
    %809 = tpu.matmul %643, %808, %cst_277 {dimension_numbers = #tpu.dot_dimension_numbers<[1], [0], [0], [1], [0, 0, 1, 1], [], []>} : vector<32x32xf32>, vector<32x1xf32>, vector<32x1xf32> -> vector<32x1xf32>
    %810 = vector.broadcast %809 : vector<32x1xf32> to vector<32x32xf32>
    %811 = vector.broadcast %804 : vector<1x32xf32> to vector<32x32xf32>
    %812 = arith.addf %810, %811 : vector<32x32xf32>
    %cst_278 = arith.constant 0.000000e+00 : f32
    %813 = vector.broadcast %cst_278 : f32 to vector<32x32xf32>
    %814 = arith.cmpf ogt, %812, %813 : vector<32x32xf32>
    %cst_279 = arith.constant 2.000000e-01 : f32
    %815 = vector.broadcast %cst_279 : f32 to vector<32x32xf32>
    %816 = arith.mulf %815, %812 : vector<32x32xf32>
    %817 = arith.select %814, %812, %816 : vector<32x32xi1>, vector<32x32xf32>
    %cst_280 = arith.constant -1.000000e+30 : f32
    %818 = vector.broadcast %cst_280 : f32 to vector<32x32xf32>
    %819 = arith.select %645, %817, %818 : vector<32x32xi1>, vector<32x32xf32>
    %cst_281 = arith.constant dense<0xFF800000> : vector<32xf32>
    %820 = vector.multi_reduction <maximumf>, %819, %cst_281 [1] : vector<32x32xf32> to vector<32xf32>
    %821 = vector.shape_cast %820 : vector<32xf32> to vector<32x1xf32>
    %822 = vector.broadcast %821 : vector<32x1xf32> to vector<32x32xf32>
    %823 = arith.subf %819, %822 : vector<32x32xf32>
    %824 = math.exp %823 : vector<32x32xf32>
    %825 = arith.mulf %824, %641 : vector<32x32xf32>
    %cst_282 = arith.constant dense<0.000000e+00> : vector<32xf32>
    %826 = vector.multi_reduction <add>, %825, %cst_282 [1] : vector<32x32xf32> to vector<32xf32>
    %827 = vector.shape_cast %826 : vector<32xf32> to vector<32x1xf32>
    %828 = tpu.reciprocal %827 {approx = true} : vector<32x1xf32> -> vector<32x1xf32>
    %829 = vector.broadcast %828 : vector<32x1xf32> to vector<32x32xf32>
    %830 = arith.mulf %825, %829 : vector<32x32xf32>
    %cst_283 = arith.constant dense<0.000000e+00> : vector<32x16xf32>
    %831 = tpu.matmul %830, %800, %cst_283 {dimension_numbers = #tpu.dot_dimension_numbers<[1], [0], [0], [1], [0, 0, 1, 1], [], []>} : vector<32x32xf32>, vector<32x16xf32>, vector<32x16xf32> -> vector<32x16xf32>
    %832 = arith.addf %799, %831 : vector<32x16xf32>
    %833 = vector.extract_strided_slice %798 {offsets = [0, 16], sizes = [32, 16], strides = [1, 1]} : vector<32x48xf32> to vector<32x16xf32>
    %834 = vector.extract_strided_slice %162 {offsets = [31, 0], sizes = [1, 16], strides = [1, 1]} : vector<64x16xf32> to vector<1x16xf32>
    %835 = vector.extract_strided_slice %162 {offsets = [34, 0], sizes = [1, 16], strides = [1, 1]} : vector<64x16xf32> to vector<1x16xf32>
    "tpu.trace_start"() <{level = 10 : i32, message = "hg,ng->hn"}> : () -> ()
    %cst_284 = arith.constant dense<0.000000e+00> : vector<1x32xf32>
    %836 = tpu.matmul %834, %833, %cst_284 {dimension_numbers = #tpu.dot_dimension_numbers<[1], [1], [0], [0], [0, 0, 1, 0], [], []>} : vector<1x16xf32>, vector<32x16xf32>, vector<1x32xf32> -> vector<1x32xf32>
    "tpu.trace_stop"() : () -> ()
    %cst_285 = arith.constant dense<0.000000e+00> : vector<1x32xf32>
    %837 = tpu.matmul %836, %642, %cst_285 {dimension_numbers = #tpu.dot_dimension_numbers<[1], [0], [0], [1], [0, 0, 1, 1], [], []>} : vector<1x32xf32>, vector<32x32xf32>, vector<1x32xf32> -> vector<1x32xf32>
    %838 = vector.broadcast %835 : vector<1x16xf32> to vector<32x16xf32>
    %839 = arith.mulf %833, %838 : vector<32x16xf32>
    %cst_286 = arith.constant dense<0.000000e+00> : vector<32xf32>
    %840 = vector.multi_reduction <add>, %839, %cst_286 [1] : vector<32x16xf32> to vector<32xf32>
    %841 = vector.shape_cast %840 : vector<32xf32> to vector<32x1xf32>
    %cst_287 = arith.constant dense<0.000000e+00> : vector<32x1xf32>
    %842 = tpu.matmul %643, %841, %cst_287 {dimension_numbers = #tpu.dot_dimension_numbers<[1], [0], [0], [1], [0, 0, 1, 1], [], []>} : vector<32x32xf32>, vector<32x1xf32>, vector<32x1xf32> -> vector<32x1xf32>
    %843 = vector.broadcast %842 : vector<32x1xf32> to vector<32x32xf32>
    %844 = vector.broadcast %837 : vector<1x32xf32> to vector<32x32xf32>
    %845 = arith.addf %843, %844 : vector<32x32xf32>
    %cst_288 = arith.constant 0.000000e+00 : f32
    %846 = vector.broadcast %cst_288 : f32 to vector<32x32xf32>
    %847 = arith.cmpf ogt, %845, %846 : vector<32x32xf32>
    %cst_289 = arith.constant 2.000000e-01 : f32
    %848 = vector.broadcast %cst_289 : f32 to vector<32x32xf32>
    %849 = arith.mulf %848, %845 : vector<32x32xf32>
    %850 = arith.select %847, %845, %849 : vector<32x32xi1>, vector<32x32xf32>
    %cst_290 = arith.constant -1.000000e+30 : f32
    %851 = vector.broadcast %cst_290 : f32 to vector<32x32xf32>
    %852 = arith.select %645, %850, %851 : vector<32x32xi1>, vector<32x32xf32>
    %cst_291 = arith.constant dense<0xFF800000> : vector<32xf32>
    %853 = vector.multi_reduction <maximumf>, %852, %cst_291 [1] : vector<32x32xf32> to vector<32xf32>
    %854 = vector.shape_cast %853 : vector<32xf32> to vector<32x1xf32>
    %855 = vector.broadcast %854 : vector<32x1xf32> to vector<32x32xf32>
    %856 = arith.subf %852, %855 : vector<32x32xf32>
    %857 = math.exp %856 : vector<32x32xf32>
    %858 = arith.mulf %857, %641 : vector<32x32xf32>
    %cst_292 = arith.constant dense<0.000000e+00> : vector<32xf32>
    %859 = vector.multi_reduction <add>, %858, %cst_292 [1] : vector<32x32xf32> to vector<32xf32>
    %860 = vector.shape_cast %859 : vector<32xf32> to vector<32x1xf32>
    %861 = tpu.reciprocal %860 {approx = true} : vector<32x1xf32> -> vector<32x1xf32>
    %862 = vector.broadcast %861 : vector<32x1xf32> to vector<32x32xf32>
    %863 = arith.mulf %858, %862 : vector<32x32xf32>
    %cst_293 = arith.constant dense<0.000000e+00> : vector<32x16xf32>
    %864 = tpu.matmul %863, %833, %cst_293 {dimension_numbers = #tpu.dot_dimension_numbers<[1], [0], [0], [1], [0, 0, 1, 1], [], []>} : vector<32x32xf32>, vector<32x16xf32>, vector<32x16xf32> -> vector<32x16xf32>
    %865 = arith.addf %832, %864 : vector<32x16xf32>
    %866 = vector.extract_strided_slice %798 {offsets = [0, 32], sizes = [32, 16], strides = [1, 1]} : vector<32x48xf32> to vector<32x16xf32>
    %867 = vector.extract_strided_slice %162 {offsets = [32, 0], sizes = [1, 16], strides = [1, 1]} : vector<64x16xf32> to vector<1x16xf32>
    %868 = vector.extract_strided_slice %162 {offsets = [35, 0], sizes = [1, 16], strides = [1, 1]} : vector<64x16xf32> to vector<1x16xf32>
    "tpu.trace_start"() <{level = 10 : i32, message = "hg,ng->hn"}> : () -> ()
    %cst_294 = arith.constant dense<0.000000e+00> : vector<1x32xf32>
    %869 = tpu.matmul %867, %866, %cst_294 {dimension_numbers = #tpu.dot_dimension_numbers<[1], [1], [0], [0], [0, 0, 1, 0], [], []>} : vector<1x16xf32>, vector<32x16xf32>, vector<1x32xf32> -> vector<1x32xf32>
    "tpu.trace_stop"() : () -> ()
    %cst_295 = arith.constant dense<0.000000e+00> : vector<1x32xf32>
    %870 = tpu.matmul %869, %642, %cst_295 {dimension_numbers = #tpu.dot_dimension_numbers<[1], [0], [0], [1], [0, 0, 1, 1], [], []>} : vector<1x32xf32>, vector<32x32xf32>, vector<1x32xf32> -> vector<1x32xf32>
    %871 = vector.broadcast %868 : vector<1x16xf32> to vector<32x16xf32>
    %872 = arith.mulf %866, %871 : vector<32x16xf32>
    %cst_296 = arith.constant dense<0.000000e+00> : vector<32xf32>
    %873 = vector.multi_reduction <add>, %872, %cst_296 [1] : vector<32x16xf32> to vector<32xf32>
    %874 = vector.shape_cast %873 : vector<32xf32> to vector<32x1xf32>
    %cst_297 = arith.constant dense<0.000000e+00> : vector<32x1xf32>
    %875 = tpu.matmul %643, %874, %cst_297 {dimension_numbers = #tpu.dot_dimension_numbers<[1], [0], [0], [1], [0, 0, 1, 1], [], []>} : vector<32x32xf32>, vector<32x1xf32>, vector<32x1xf32> -> vector<32x1xf32>
    %876 = vector.broadcast %875 : vector<32x1xf32> to vector<32x32xf32>
    %877 = vector.broadcast %870 : vector<1x32xf32> to vector<32x32xf32>
    %878 = arith.addf %876, %877 : vector<32x32xf32>
    %cst_298 = arith.constant 0.000000e+00 : f32
    %879 = vector.broadcast %cst_298 : f32 to vector<32x32xf32>
    %880 = arith.cmpf ogt, %878, %879 : vector<32x32xf32>
    %cst_299 = arith.constant 2.000000e-01 : f32
    %881 = vector.broadcast %cst_299 : f32 to vector<32x32xf32>
    %882 = arith.mulf %881, %878 : vector<32x32xf32>
    %883 = arith.select %880, %878, %882 : vector<32x32xi1>, vector<32x32xf32>
    %cst_300 = arith.constant -1.000000e+30 : f32
    %884 = vector.broadcast %cst_300 : f32 to vector<32x32xf32>
    %885 = arith.select %645, %883, %884 : vector<32x32xi1>, vector<32x32xf32>
    %cst_301 = arith.constant dense<0xFF800000> : vector<32xf32>
    %886 = vector.multi_reduction <maximumf>, %885, %cst_301 [1] : vector<32x32xf32> to vector<32xf32>
    %887 = vector.shape_cast %886 : vector<32xf32> to vector<32x1xf32>
    %888 = vector.broadcast %887 : vector<32x1xf32> to vector<32x32xf32>
    %889 = arith.subf %885, %888 : vector<32x32xf32>
    %890 = math.exp %889 : vector<32x32xf32>
    %891 = arith.mulf %890, %641 : vector<32x32xf32>
    %cst_302 = arith.constant dense<0.000000e+00> : vector<32xf32>
    %892 = vector.multi_reduction <add>, %891, %cst_302 [1] : vector<32x32xf32> to vector<32xf32>
    %893 = vector.shape_cast %892 : vector<32xf32> to vector<32x1xf32>
    %894 = tpu.reciprocal %893 {approx = true} : vector<32x1xf32> -> vector<32x1xf32>
    %895 = vector.broadcast %894 : vector<32x1xf32> to vector<32x32xf32>
    %896 = arith.mulf %891, %895 : vector<32x32xf32>
    %cst_303 = arith.constant dense<0.000000e+00> : vector<32x16xf32>
    %897 = tpu.matmul %896, %866, %cst_303 {dimension_numbers = #tpu.dot_dimension_numbers<[1], [0], [0], [1], [0, 0, 1, 1], [], []>} : vector<32x32xf32>, vector<32x16xf32>, vector<32x16xf32> -> vector<32x16xf32>
    %898 = arith.addf %865, %897 : vector<32x16xf32>
    %899 = vector.extract_strided_slice %162 {offsets = [53, 0], sizes = [1, 16], strides = [1, 1]} : vector<64x16xf32> to vector<1x16xf32>
    %cst_304 = arith.constant 0.333333343 : f32
    %900 = vector.broadcast %cst_304 : f32 to vector<32x16xf32>
    %901 = arith.mulf %898, %900 : vector<32x16xf32>
    %902 = vector.broadcast %899 : vector<1x16xf32> to vector<32x16xf32>
    %903 = arith.addf %901, %902 : vector<32x16xf32>
    %904 = vector.extract_strided_slice %163 {offsets = [80, 0], sizes = [16, 16], strides = [1, 1]} : vector<128x16xf32> to vector<16x16xf32>
    %905 = vector.extract_strided_slice %162 {offsets = [61, 0], sizes = [1, 16], strides = [1, 1]} : vector<64x16xf32> to vector<1x16xf32>
    %cst_305 = arith.constant dense<0.000000e+00> : vector<32x16xf32>
    %906 = tpu.matmul %663, %796, %cst_305 {dimension_numbers = #tpu.dot_dimension_numbers<[1], [0], [0], [1], [0, 0, 1, 1], [], []>} : vector<32x32xf32>, vector<32x16xf32>, vector<32x16xf32> -> vector<32x16xf32>
    %cst_306 = arith.constant dense<0.000000e+00> : vector<32x16xf32>
    %907 = tpu.matmul %906, %904, %cst_306 {dimension_numbers = #tpu.dot_dimension_numbers<[1], [0], [0], [1], [0, 0, 1, 1], [], []>} : vector<32x16xf32>, vector<16x16xf32>, vector<32x16xf32> -> vector<32x16xf32>
    %908 = vector.broadcast %905 : vector<1x16xf32> to vector<32x16xf32>
    %909 = arith.addf %907, %908 : vector<32x16xf32>
    %cst_307 = arith.constant 5.000000e-01 : f32
    %910 = vector.broadcast %cst_307 : f32 to vector<32x16xf32>
    %911 = arith.mulf %910, %909 : vector<32x16xf32>
    %912 = math.tanh %911 : vector<32x16xf32>
    %cst_308 = arith.constant 1.000000e+00 : f32
    %913 = vector.broadcast %cst_308 : f32 to vector<32x16xf32>
    %914 = arith.addf %912, %913 : vector<32x16xf32>
    %cst_309 = arith.constant 5.000000e-01 : f32
    %915 = vector.broadcast %cst_309 : f32 to vector<32x16xf32>
    %916 = arith.mulf %915, %914 : vector<32x16xf32>
    %cst_310 = arith.constant 0.000000e+00 : f32
    %917 = vector.broadcast %cst_310 : f32 to vector<32x16xf32>
    %918 = arith.cmpf ogt, %903, %917 : vector<32x16xf32>
    %cst_311 = arith.constant 0.00999999977 : f32
    %919 = vector.broadcast %cst_311 : f32 to vector<32x16xf32>
    %920 = arith.mulf %919, %903 : vector<32x16xf32>
    %921 = arith.select %918, %903, %920 : vector<32x16xi1>, vector<32x16xf32>
    %922 = arith.mulf %921, %916 : vector<32x16xf32>
    %cst_312 = arith.constant 1.000000e+00 : f32
    %923 = vector.broadcast %cst_312 : f32 to vector<32x16xf32>
    %924 = arith.subf %923, %916 : vector<32x16xf32>
    %925 = arith.mulf %795, %924 : vector<32x16xf32>
    %926 = arith.addf %922, %925 : vector<32x16xf32>
    %cst_313 = arith.constant 0.000000e+00 : f32
    %927 = vector.broadcast %cst_313 : f32 to vector<32x16xf32>
    %928 = arith.maximumf %926, %927 : vector<32x16xf32>
    %929 = vector.extract_strided_slice %161 {offsets = [96, 0], sizes = [16, 48], strides = [1, 1]} : vector<128x48xf32> to vector<16x48xf32>
    %cst_314 = arith.constant dense<0.000000e+00> : vector<32x48xf32>
    %930 = tpu.matmul %928, %929, %cst_314 {dimension_numbers = #tpu.dot_dimension_numbers<[1], [0], [0], [1], [0, 0, 1, 1], [], []>} : vector<32x16xf32>, vector<16x48xf32>, vector<32x48xf32> -> vector<32x48xf32>
    %cst_315 = arith.constant 0.000000e+00 : f32
    %931 = vector.broadcast %cst_315 : f32 to vector<32x16xf32>
    %932 = vector.extract_strided_slice %930 {offsets = [0, 0], sizes = [32, 16], strides = [1, 1]} : vector<32x48xf32> to vector<32x16xf32>
    %933 = vector.extract_strided_slice %162 {offsets = [36, 0], sizes = [1, 16], strides = [1, 1]} : vector<64x16xf32> to vector<1x16xf32>
    %934 = vector.extract_strided_slice %162 {offsets = [39, 0], sizes = [1, 16], strides = [1, 1]} : vector<64x16xf32> to vector<1x16xf32>
    "tpu.trace_start"() <{level = 10 : i32, message = "hg,ng->hn"}> : () -> ()
    %cst_316 = arith.constant dense<0.000000e+00> : vector<1x32xf32>
    %935 = tpu.matmul %933, %932, %cst_316 {dimension_numbers = #tpu.dot_dimension_numbers<[1], [1], [0], [0], [0, 0, 1, 0], [], []>} : vector<1x16xf32>, vector<32x16xf32>, vector<1x32xf32> -> vector<1x32xf32>
    "tpu.trace_stop"() : () -> ()
    %cst_317 = arith.constant dense<0.000000e+00> : vector<1x32xf32>
    %936 = tpu.matmul %935, %642, %cst_317 {dimension_numbers = #tpu.dot_dimension_numbers<[1], [0], [0], [1], [0, 0, 1, 1], [], []>} : vector<1x32xf32>, vector<32x32xf32>, vector<1x32xf32> -> vector<1x32xf32>
    %937 = vector.broadcast %934 : vector<1x16xf32> to vector<32x16xf32>
    %938 = arith.mulf %932, %937 : vector<32x16xf32>
    %cst_318 = arith.constant dense<0.000000e+00> : vector<32xf32>
    %939 = vector.multi_reduction <add>, %938, %cst_318 [1] : vector<32x16xf32> to vector<32xf32>
    %940 = vector.shape_cast %939 : vector<32xf32> to vector<32x1xf32>
    %cst_319 = arith.constant dense<0.000000e+00> : vector<32x1xf32>
    %941 = tpu.matmul %643, %940, %cst_319 {dimension_numbers = #tpu.dot_dimension_numbers<[1], [0], [0], [1], [0, 0, 1, 1], [], []>} : vector<32x32xf32>, vector<32x1xf32>, vector<32x1xf32> -> vector<32x1xf32>
    %942 = vector.broadcast %941 : vector<32x1xf32> to vector<32x32xf32>
    %943 = vector.broadcast %936 : vector<1x32xf32> to vector<32x32xf32>
    %944 = arith.addf %942, %943 : vector<32x32xf32>
    %cst_320 = arith.constant 0.000000e+00 : f32
    %945 = vector.broadcast %cst_320 : f32 to vector<32x32xf32>
    %946 = arith.cmpf ogt, %944, %945 : vector<32x32xf32>
    %cst_321 = arith.constant 2.000000e-01 : f32
    %947 = vector.broadcast %cst_321 : f32 to vector<32x32xf32>
    %948 = arith.mulf %947, %944 : vector<32x32xf32>
    %949 = arith.select %946, %944, %948 : vector<32x32xi1>, vector<32x32xf32>
    %cst_322 = arith.constant -1.000000e+30 : f32
    %950 = vector.broadcast %cst_322 : f32 to vector<32x32xf32>
    %951 = arith.select %645, %949, %950 : vector<32x32xi1>, vector<32x32xf32>
    %cst_323 = arith.constant dense<0xFF800000> : vector<32xf32>
    %952 = vector.multi_reduction <maximumf>, %951, %cst_323 [1] : vector<32x32xf32> to vector<32xf32>
    %953 = vector.shape_cast %952 : vector<32xf32> to vector<32x1xf32>
    %954 = vector.broadcast %953 : vector<32x1xf32> to vector<32x32xf32>
    %955 = arith.subf %951, %954 : vector<32x32xf32>
    %956 = math.exp %955 : vector<32x32xf32>
    %957 = arith.mulf %956, %641 : vector<32x32xf32>
    %cst_324 = arith.constant dense<0.000000e+00> : vector<32xf32>
    %958 = vector.multi_reduction <add>, %957, %cst_324 [1] : vector<32x32xf32> to vector<32xf32>
    %959 = vector.shape_cast %958 : vector<32xf32> to vector<32x1xf32>
    %960 = tpu.reciprocal %959 {approx = true} : vector<32x1xf32> -> vector<32x1xf32>
    %961 = vector.broadcast %960 : vector<32x1xf32> to vector<32x32xf32>
    %962 = arith.mulf %957, %961 : vector<32x32xf32>
    %cst_325 = arith.constant dense<0.000000e+00> : vector<32x16xf32>
    %963 = tpu.matmul %962, %932, %cst_325 {dimension_numbers = #tpu.dot_dimension_numbers<[1], [0], [0], [1], [0, 0, 1, 1], [], []>} : vector<32x32xf32>, vector<32x16xf32>, vector<32x16xf32> -> vector<32x16xf32>
    %964 = arith.addf %931, %963 : vector<32x16xf32>
    %965 = vector.extract_strided_slice %930 {offsets = [0, 16], sizes = [32, 16], strides = [1, 1]} : vector<32x48xf32> to vector<32x16xf32>
    %966 = vector.extract_strided_slice %162 {offsets = [37, 0], sizes = [1, 16], strides = [1, 1]} : vector<64x16xf32> to vector<1x16xf32>
    %967 = vector.extract_strided_slice %162 {offsets = [40, 0], sizes = [1, 16], strides = [1, 1]} : vector<64x16xf32> to vector<1x16xf32>
    "tpu.trace_start"() <{level = 10 : i32, message = "hg,ng->hn"}> : () -> ()
    %cst_326 = arith.constant dense<0.000000e+00> : vector<1x32xf32>
    %968 = tpu.matmul %966, %965, %cst_326 {dimension_numbers = #tpu.dot_dimension_numbers<[1], [1], [0], [0], [0, 0, 1, 0], [], []>} : vector<1x16xf32>, vector<32x16xf32>, vector<1x32xf32> -> vector<1x32xf32>
    "tpu.trace_stop"() : () -> ()
    %cst_327 = arith.constant dense<0.000000e+00> : vector<1x32xf32>
    %969 = tpu.matmul %968, %642, %cst_327 {dimension_numbers = #tpu.dot_dimension_numbers<[1], [0], [0], [1], [0, 0, 1, 1], [], []>} : vector<1x32xf32>, vector<32x32xf32>, vector<1x32xf32> -> vector<1x32xf32>
    %970 = vector.broadcast %967 : vector<1x16xf32> to vector<32x16xf32>
    %971 = arith.mulf %965, %970 : vector<32x16xf32>
    %cst_328 = arith.constant dense<0.000000e+00> : vector<32xf32>
    %972 = vector.multi_reduction <add>, %971, %cst_328 [1] : vector<32x16xf32> to vector<32xf32>
    %973 = vector.shape_cast %972 : vector<32xf32> to vector<32x1xf32>
    %cst_329 = arith.constant dense<0.000000e+00> : vector<32x1xf32>
    %974 = tpu.matmul %643, %973, %cst_329 {dimension_numbers = #tpu.dot_dimension_numbers<[1], [0], [0], [1], [0, 0, 1, 1], [], []>} : vector<32x32xf32>, vector<32x1xf32>, vector<32x1xf32> -> vector<32x1xf32>
    %975 = vector.broadcast %974 : vector<32x1xf32> to vector<32x32xf32>
    %976 = vector.broadcast %969 : vector<1x32xf32> to vector<32x32xf32>
    %977 = arith.addf %975, %976 : vector<32x32xf32>
    %cst_330 = arith.constant 0.000000e+00 : f32
    %978 = vector.broadcast %cst_330 : f32 to vector<32x32xf32>
    %979 = arith.cmpf ogt, %977, %978 : vector<32x32xf32>
    %cst_331 = arith.constant 2.000000e-01 : f32
    %980 = vector.broadcast %cst_331 : f32 to vector<32x32xf32>
    %981 = arith.mulf %980, %977 : vector<32x32xf32>
    %982 = arith.select %979, %977, %981 : vector<32x32xi1>, vector<32x32xf32>
    %cst_332 = arith.constant -1.000000e+30 : f32
    %983 = vector.broadcast %cst_332 : f32 to vector<32x32xf32>
    %984 = arith.select %645, %982, %983 : vector<32x32xi1>, vector<32x32xf32>
    %cst_333 = arith.constant dense<0xFF800000> : vector<32xf32>
    %985 = vector.multi_reduction <maximumf>, %984, %cst_333 [1] : vector<32x32xf32> to vector<32xf32>
    %986 = vector.shape_cast %985 : vector<32xf32> to vector<32x1xf32>
    %987 = vector.broadcast %986 : vector<32x1xf32> to vector<32x32xf32>
    %988 = arith.subf %984, %987 : vector<32x32xf32>
    %989 = math.exp %988 : vector<32x32xf32>
    %990 = arith.mulf %989, %641 : vector<32x32xf32>
    %cst_334 = arith.constant dense<0.000000e+00> : vector<32xf32>
    %991 = vector.multi_reduction <add>, %990, %cst_334 [1] : vector<32x32xf32> to vector<32xf32>
    %992 = vector.shape_cast %991 : vector<32xf32> to vector<32x1xf32>
    %993 = tpu.reciprocal %992 {approx = true} : vector<32x1xf32> -> vector<32x1xf32>
    %994 = vector.broadcast %993 : vector<32x1xf32> to vector<32x32xf32>
    %995 = arith.mulf %990, %994 : vector<32x32xf32>
    %cst_335 = arith.constant dense<0.000000e+00> : vector<32x16xf32>
    %996 = tpu.matmul %995, %965, %cst_335 {dimension_numbers = #tpu.dot_dimension_numbers<[1], [0], [0], [1], [0, 0, 1, 1], [], []>} : vector<32x32xf32>, vector<32x16xf32>, vector<32x16xf32> -> vector<32x16xf32>
    %997 = arith.addf %964, %996 : vector<32x16xf32>
    %998 = vector.extract_strided_slice %930 {offsets = [0, 32], sizes = [32, 16], strides = [1, 1]} : vector<32x48xf32> to vector<32x16xf32>
    %999 = vector.extract_strided_slice %162 {offsets = [38, 0], sizes = [1, 16], strides = [1, 1]} : vector<64x16xf32> to vector<1x16xf32>
    %1000 = vector.extract_strided_slice %162 {offsets = [41, 0], sizes = [1, 16], strides = [1, 1]} : vector<64x16xf32> to vector<1x16xf32>
    "tpu.trace_start"() <{level = 10 : i32, message = "hg,ng->hn"}> : () -> ()
    %cst_336 = arith.constant dense<0.000000e+00> : vector<1x32xf32>
    %1001 = tpu.matmul %999, %998, %cst_336 {dimension_numbers = #tpu.dot_dimension_numbers<[1], [1], [0], [0], [0, 0, 1, 0], [], []>} : vector<1x16xf32>, vector<32x16xf32>, vector<1x32xf32> -> vector<1x32xf32>
    "tpu.trace_stop"() : () -> ()
    %cst_337 = arith.constant dense<0.000000e+00> : vector<1x32xf32>
    %1002 = tpu.matmul %1001, %642, %cst_337 {dimension_numbers = #tpu.dot_dimension_numbers<[1], [0], [0], [1], [0, 0, 1, 1], [], []>} : vector<1x32xf32>, vector<32x32xf32>, vector<1x32xf32> -> vector<1x32xf32>
    %1003 = vector.broadcast %1000 : vector<1x16xf32> to vector<32x16xf32>
    %1004 = arith.mulf %998, %1003 : vector<32x16xf32>
    %cst_338 = arith.constant dense<0.000000e+00> : vector<32xf32>
    %1005 = vector.multi_reduction <add>, %1004, %cst_338 [1] : vector<32x16xf32> to vector<32xf32>
    %1006 = vector.shape_cast %1005 : vector<32xf32> to vector<32x1xf32>
    %cst_339 = arith.constant dense<0.000000e+00> : vector<32x1xf32>
    %1007 = tpu.matmul %643, %1006, %cst_339 {dimension_numbers = #tpu.dot_dimension_numbers<[1], [0], [0], [1], [0, 0, 1, 1], [], []>} : vector<32x32xf32>, vector<32x1xf32>, vector<32x1xf32> -> vector<32x1xf32>
    %1008 = vector.broadcast %1007 : vector<32x1xf32> to vector<32x32xf32>
    %1009 = vector.broadcast %1002 : vector<1x32xf32> to vector<32x32xf32>
    %1010 = arith.addf %1008, %1009 : vector<32x32xf32>
    %cst_340 = arith.constant 0.000000e+00 : f32
    %1011 = vector.broadcast %cst_340 : f32 to vector<32x32xf32>
    %1012 = arith.cmpf ogt, %1010, %1011 : vector<32x32xf32>
    %cst_341 = arith.constant 2.000000e-01 : f32
    %1013 = vector.broadcast %cst_341 : f32 to vector<32x32xf32>
    %1014 = arith.mulf %1013, %1010 : vector<32x32xf32>
    %1015 = arith.select %1012, %1010, %1014 : vector<32x32xi1>, vector<32x32xf32>
    %cst_342 = arith.constant -1.000000e+30 : f32
    %1016 = vector.broadcast %cst_342 : f32 to vector<32x32xf32>
    %1017 = arith.select %645, %1015, %1016 : vector<32x32xi1>, vector<32x32xf32>
    %cst_343 = arith.constant dense<0xFF800000> : vector<32xf32>
    %1018 = vector.multi_reduction <maximumf>, %1017, %cst_343 [1] : vector<32x32xf32> to vector<32xf32>
    %1019 = vector.shape_cast %1018 : vector<32xf32> to vector<32x1xf32>
    %1020 = vector.broadcast %1019 : vector<32x1xf32> to vector<32x32xf32>
    %1021 = arith.subf %1017, %1020 : vector<32x32xf32>
    %1022 = math.exp %1021 : vector<32x32xf32>
    %1023 = arith.mulf %1022, %641 : vector<32x32xf32>
    %cst_344 = arith.constant dense<0.000000e+00> : vector<32xf32>
    %1024 = vector.multi_reduction <add>, %1023, %cst_344 [1] : vector<32x32xf32> to vector<32xf32>
    %1025 = vector.shape_cast %1024 : vector<32xf32> to vector<32x1xf32>
    %1026 = tpu.reciprocal %1025 {approx = true} : vector<32x1xf32> -> vector<32x1xf32>
    %1027 = vector.broadcast %1026 : vector<32x1xf32> to vector<32x32xf32>
    %1028 = arith.mulf %1023, %1027 : vector<32x32xf32>
    %cst_345 = arith.constant dense<0.000000e+00> : vector<32x16xf32>
    %1029 = tpu.matmul %1028, %998, %cst_345 {dimension_numbers = #tpu.dot_dimension_numbers<[1], [0], [0], [1], [0, 0, 1, 1], [], []>} : vector<32x32xf32>, vector<32x16xf32>, vector<32x16xf32> -> vector<32x16xf32>
    %1030 = arith.addf %997, %1029 : vector<32x16xf32>
    %1031 = vector.extract_strided_slice %162 {offsets = [54, 0], sizes = [1, 16], strides = [1, 1]} : vector<64x16xf32> to vector<1x16xf32>
    %cst_346 = arith.constant 0.333333343 : f32
    %1032 = vector.broadcast %cst_346 : f32 to vector<32x16xf32>
    %1033 = arith.mulf %1030, %1032 : vector<32x16xf32>
    %1034 = vector.broadcast %1031 : vector<1x16xf32> to vector<32x16xf32>
    %1035 = arith.addf %1033, %1034 : vector<32x16xf32>
    %1036 = vector.extract_strided_slice %163 {offsets = [96, 0], sizes = [16, 16], strides = [1, 1]} : vector<128x16xf32> to vector<16x16xf32>
    %1037 = vector.extract_strided_slice %162 {offsets = [62, 0], sizes = [1, 16], strides = [1, 1]} : vector<64x16xf32> to vector<1x16xf32>
    %cst_347 = arith.constant dense<0.000000e+00> : vector<32x16xf32>
    %1038 = tpu.matmul %663, %928, %cst_347 {dimension_numbers = #tpu.dot_dimension_numbers<[1], [0], [0], [1], [0, 0, 1, 1], [], []>} : vector<32x32xf32>, vector<32x16xf32>, vector<32x16xf32> -> vector<32x16xf32>
    %cst_348 = arith.constant dense<0.000000e+00> : vector<32x16xf32>
    %1039 = tpu.matmul %1038, %1036, %cst_348 {dimension_numbers = #tpu.dot_dimension_numbers<[1], [0], [0], [1], [0, 0, 1, 1], [], []>} : vector<32x16xf32>, vector<16x16xf32>, vector<32x16xf32> -> vector<32x16xf32>
    %1040 = vector.broadcast %1037 : vector<1x16xf32> to vector<32x16xf32>
    %1041 = arith.addf %1039, %1040 : vector<32x16xf32>
    %cst_349 = arith.constant 5.000000e-01 : f32
    %1042 = vector.broadcast %cst_349 : f32 to vector<32x16xf32>
    %1043 = arith.mulf %1042, %1041 : vector<32x16xf32>
    %1044 = math.tanh %1043 : vector<32x16xf32>
    %cst_350 = arith.constant 1.000000e+00 : f32
    %1045 = vector.broadcast %cst_350 : f32 to vector<32x16xf32>
    %1046 = arith.addf %1044, %1045 : vector<32x16xf32>
    %cst_351 = arith.constant 5.000000e-01 : f32
    %1047 = vector.broadcast %cst_351 : f32 to vector<32x16xf32>
    %1048 = arith.mulf %1047, %1046 : vector<32x16xf32>
    %cst_352 = arith.constant 0.000000e+00 : f32
    %1049 = vector.broadcast %cst_352 : f32 to vector<32x16xf32>
    %1050 = arith.maximumf %1035, %1049 : vector<32x16xf32>
    %1051 = arith.mulf %1050, %1048 : vector<32x16xf32>
    %cst_353 = arith.constant 1.000000e+00 : f32
    %1052 = vector.broadcast %cst_353 : f32 to vector<32x16xf32>
    %1053 = arith.subf %1052, %1048 : vector<32x16xf32>
    %1054 = arith.mulf %926, %1053 : vector<32x16xf32>
    %1055 = arith.addf %1051, %1054 : vector<32x16xf32>
    %cst_354 = arith.constant 0.000000e+00 : f32
    %1056 = vector.broadcast %cst_354 : f32 to vector<32x16xf32>
    %1057 = arith.maximumf %1055, %1056 : vector<32x16xf32>
    %1058 = vector.extract_strided_slice %161 {offsets = [112, 0], sizes = [16, 48], strides = [1, 1]} : vector<128x48xf32> to vector<16x48xf32>
    %cst_355 = arith.constant dense<0.000000e+00> : vector<32x48xf32>
    %1059 = tpu.matmul %1057, %1058, %cst_355 {dimension_numbers = #tpu.dot_dimension_numbers<[1], [0], [0], [1], [0, 0, 1, 1], [], []>} : vector<32x16xf32>, vector<16x48xf32>, vector<32x48xf32> -> vector<32x48xf32>
    %cst_356 = arith.constant 0.000000e+00 : f32
    %1060 = vector.broadcast %cst_356 : f32 to vector<32x16xf32>
    %1061 = vector.extract_strided_slice %1059 {offsets = [0, 0], sizes = [32, 16], strides = [1, 1]} : vector<32x48xf32> to vector<32x16xf32>
    %1062 = vector.extract_strided_slice %162 {offsets = [42, 0], sizes = [1, 16], strides = [1, 1]} : vector<64x16xf32> to vector<1x16xf32>
    %1063 = vector.extract_strided_slice %162 {offsets = [45, 0], sizes = [1, 16], strides = [1, 1]} : vector<64x16xf32> to vector<1x16xf32>
    "tpu.trace_start"() <{level = 10 : i32, message = "hg,ng->hn"}> : () -> ()
    %cst_357 = arith.constant dense<0.000000e+00> : vector<1x32xf32>
    %1064 = tpu.matmul %1062, %1061, %cst_357 {dimension_numbers = #tpu.dot_dimension_numbers<[1], [1], [0], [0], [0, 0, 1, 0], [], []>} : vector<1x16xf32>, vector<32x16xf32>, vector<1x32xf32> -> vector<1x32xf32>
    "tpu.trace_stop"() : () -> ()
    %cst_358 = arith.constant dense<0.000000e+00> : vector<1x32xf32>
    %1065 = tpu.matmul %1064, %642, %cst_358 {dimension_numbers = #tpu.dot_dimension_numbers<[1], [0], [0], [1], [0, 0, 1, 1], [], []>} : vector<1x32xf32>, vector<32x32xf32>, vector<1x32xf32> -> vector<1x32xf32>
    %1066 = vector.broadcast %1063 : vector<1x16xf32> to vector<32x16xf32>
    %1067 = arith.mulf %1061, %1066 : vector<32x16xf32>
    %cst_359 = arith.constant dense<0.000000e+00> : vector<32xf32>
    %1068 = vector.multi_reduction <add>, %1067, %cst_359 [1] : vector<32x16xf32> to vector<32xf32>
    %1069 = vector.shape_cast %1068 : vector<32xf32> to vector<32x1xf32>
    %cst_360 = arith.constant dense<0.000000e+00> : vector<32x1xf32>
    %1070 = tpu.matmul %643, %1069, %cst_360 {dimension_numbers = #tpu.dot_dimension_numbers<[1], [0], [0], [1], [0, 0, 1, 1], [], []>} : vector<32x32xf32>, vector<32x1xf32>, vector<32x1xf32> -> vector<32x1xf32>
    %1071 = vector.broadcast %1070 : vector<32x1xf32> to vector<32x32xf32>
    %1072 = vector.broadcast %1065 : vector<1x32xf32> to vector<32x32xf32>
    %1073 = arith.addf %1071, %1072 : vector<32x32xf32>
    %cst_361 = arith.constant 0.000000e+00 : f32
    %1074 = vector.broadcast %cst_361 : f32 to vector<32x32xf32>
    %1075 = arith.cmpf ogt, %1073, %1074 : vector<32x32xf32>
    %cst_362 = arith.constant 2.000000e-01 : f32
    %1076 = vector.broadcast %cst_362 : f32 to vector<32x32xf32>
    %1077 = arith.mulf %1076, %1073 : vector<32x32xf32>
    %1078 = arith.select %1075, %1073, %1077 : vector<32x32xi1>, vector<32x32xf32>
    %cst_363 = arith.constant -1.000000e+30 : f32
    %1079 = vector.broadcast %cst_363 : f32 to vector<32x32xf32>
    %1080 = arith.select %645, %1078, %1079 : vector<32x32xi1>, vector<32x32xf32>
    %cst_364 = arith.constant dense<0xFF800000> : vector<32xf32>
    %1081 = vector.multi_reduction <maximumf>, %1080, %cst_364 [1] : vector<32x32xf32> to vector<32xf32>
    %1082 = vector.shape_cast %1081 : vector<32xf32> to vector<32x1xf32>
    %1083 = vector.broadcast %1082 : vector<32x1xf32> to vector<32x32xf32>
    %1084 = arith.subf %1080, %1083 : vector<32x32xf32>
    %1085 = math.exp %1084 : vector<32x32xf32>
    %1086 = arith.mulf %1085, %641 : vector<32x32xf32>
    %cst_365 = arith.constant dense<0.000000e+00> : vector<32xf32>
    %1087 = vector.multi_reduction <add>, %1086, %cst_365 [1] : vector<32x32xf32> to vector<32xf32>
    %1088 = vector.shape_cast %1087 : vector<32xf32> to vector<32x1xf32>
    %1089 = tpu.reciprocal %1088 {approx = true} : vector<32x1xf32> -> vector<32x1xf32>
    %1090 = vector.broadcast %1089 : vector<32x1xf32> to vector<32x32xf32>
    %1091 = arith.mulf %1086, %1090 : vector<32x32xf32>
    %cst_366 = arith.constant dense<0.000000e+00> : vector<32x16xf32>
    %1092 = tpu.matmul %1091, %1061, %cst_366 {dimension_numbers = #tpu.dot_dimension_numbers<[1], [0], [0], [1], [0, 0, 1, 1], [], []>} : vector<32x32xf32>, vector<32x16xf32>, vector<32x16xf32> -> vector<32x16xf32>
    %1093 = arith.addf %1060, %1092 : vector<32x16xf32>
    %1094 = vector.extract_strided_slice %1059 {offsets = [0, 16], sizes = [32, 16], strides = [1, 1]} : vector<32x48xf32> to vector<32x16xf32>
    %1095 = vector.extract_strided_slice %162 {offsets = [43, 0], sizes = [1, 16], strides = [1, 1]} : vector<64x16xf32> to vector<1x16xf32>
    %1096 = vector.extract_strided_slice %162 {offsets = [46, 0], sizes = [1, 16], strides = [1, 1]} : vector<64x16xf32> to vector<1x16xf32>
    "tpu.trace_start"() <{level = 10 : i32, message = "hg,ng->hn"}> : () -> ()
    %cst_367 = arith.constant dense<0.000000e+00> : vector<1x32xf32>
    %1097 = tpu.matmul %1095, %1094, %cst_367 {dimension_numbers = #tpu.dot_dimension_numbers<[1], [1], [0], [0], [0, 0, 1, 0], [], []>} : vector<1x16xf32>, vector<32x16xf32>, vector<1x32xf32> -> vector<1x32xf32>
    "tpu.trace_stop"() : () -> ()
    %cst_368 = arith.constant dense<0.000000e+00> : vector<1x32xf32>
    %1098 = tpu.matmul %1097, %642, %cst_368 {dimension_numbers = #tpu.dot_dimension_numbers<[1], [0], [0], [1], [0, 0, 1, 1], [], []>} : vector<1x32xf32>, vector<32x32xf32>, vector<1x32xf32> -> vector<1x32xf32>
    %1099 = vector.broadcast %1096 : vector<1x16xf32> to vector<32x16xf32>
    %1100 = arith.mulf %1094, %1099 : vector<32x16xf32>
    %cst_369 = arith.constant dense<0.000000e+00> : vector<32xf32>
    %1101 = vector.multi_reduction <add>, %1100, %cst_369 [1] : vector<32x16xf32> to vector<32xf32>
    %1102 = vector.shape_cast %1101 : vector<32xf32> to vector<32x1xf32>
    %cst_370 = arith.constant dense<0.000000e+00> : vector<32x1xf32>
    %1103 = tpu.matmul %643, %1102, %cst_370 {dimension_numbers = #tpu.dot_dimension_numbers<[1], [0], [0], [1], [0, 0, 1, 1], [], []>} : vector<32x32xf32>, vector<32x1xf32>, vector<32x1xf32> -> vector<32x1xf32>
    %1104 = vector.broadcast %1103 : vector<32x1xf32> to vector<32x32xf32>
    %1105 = vector.broadcast %1098 : vector<1x32xf32> to vector<32x32xf32>
    %1106 = arith.addf %1104, %1105 : vector<32x32xf32>
    %cst_371 = arith.constant 0.000000e+00 : f32
    %1107 = vector.broadcast %cst_371 : f32 to vector<32x32xf32>
    %1108 = arith.cmpf ogt, %1106, %1107 : vector<32x32xf32>
    %cst_372 = arith.constant 2.000000e-01 : f32
    %1109 = vector.broadcast %cst_372 : f32 to vector<32x32xf32>
    %1110 = arith.mulf %1109, %1106 : vector<32x32xf32>
    %1111 = arith.select %1108, %1106, %1110 : vector<32x32xi1>, vector<32x32xf32>
    %cst_373 = arith.constant -1.000000e+30 : f32
    %1112 = vector.broadcast %cst_373 : f32 to vector<32x32xf32>
    %1113 = arith.select %645, %1111, %1112 : vector<32x32xi1>, vector<32x32xf32>
    %cst_374 = arith.constant dense<0xFF800000> : vector<32xf32>
    %1114 = vector.multi_reduction <maximumf>, %1113, %cst_374 [1] : vector<32x32xf32> to vector<32xf32>
    %1115 = vector.shape_cast %1114 : vector<32xf32> to vector<32x1xf32>
    %1116 = vector.broadcast %1115 : vector<32x1xf32> to vector<32x32xf32>
    %1117 = arith.subf %1113, %1116 : vector<32x32xf32>
    %1118 = math.exp %1117 : vector<32x32xf32>
    %1119 = arith.mulf %1118, %641 : vector<32x32xf32>
    %cst_375 = arith.constant dense<0.000000e+00> : vector<32xf32>
    %1120 = vector.multi_reduction <add>, %1119, %cst_375 [1] : vector<32x32xf32> to vector<32xf32>
    %1121 = vector.shape_cast %1120 : vector<32xf32> to vector<32x1xf32>
    %1122 = tpu.reciprocal %1121 {approx = true} : vector<32x1xf32> -> vector<32x1xf32>
    %1123 = vector.broadcast %1122 : vector<32x1xf32> to vector<32x32xf32>
    %1124 = arith.mulf %1119, %1123 : vector<32x32xf32>
    %cst_376 = arith.constant dense<0.000000e+00> : vector<32x16xf32>
    %1125 = tpu.matmul %1124, %1094, %cst_376 {dimension_numbers = #tpu.dot_dimension_numbers<[1], [0], [0], [1], [0, 0, 1, 1], [], []>} : vector<32x32xf32>, vector<32x16xf32>, vector<32x16xf32> -> vector<32x16xf32>
    %1126 = arith.addf %1093, %1125 : vector<32x16xf32>
    %1127 = vector.extract_strided_slice %1059 {offsets = [0, 32], sizes = [32, 16], strides = [1, 1]} : vector<32x48xf32> to vector<32x16xf32>
    %1128 = vector.extract_strided_slice %162 {offsets = [44, 0], sizes = [1, 16], strides = [1, 1]} : vector<64x16xf32> to vector<1x16xf32>
    %1129 = vector.extract_strided_slice %162 {offsets = [47, 0], sizes = [1, 16], strides = [1, 1]} : vector<64x16xf32> to vector<1x16xf32>
    "tpu.trace_start"() <{level = 10 : i32, message = "hg,ng->hn"}> : () -> ()
    %cst_377 = arith.constant dense<0.000000e+00> : vector<1x32xf32>
    %1130 = tpu.matmul %1128, %1127, %cst_377 {dimension_numbers = #tpu.dot_dimension_numbers<[1], [1], [0], [0], [0, 0, 1, 0], [], []>} : vector<1x16xf32>, vector<32x16xf32>, vector<1x32xf32> -> vector<1x32xf32>
    "tpu.trace_stop"() : () -> ()
    %cst_378 = arith.constant dense<0.000000e+00> : vector<1x32xf32>
    %1131 = tpu.matmul %1130, %642, %cst_378 {dimension_numbers = #tpu.dot_dimension_numbers<[1], [0], [0], [1], [0, 0, 1, 1], [], []>} : vector<1x32xf32>, vector<32x32xf32>, vector<1x32xf32> -> vector<1x32xf32>
    %1132 = vector.broadcast %1129 : vector<1x16xf32> to vector<32x16xf32>
    %1133 = arith.mulf %1127, %1132 : vector<32x16xf32>
    %cst_379 = arith.constant dense<0.000000e+00> : vector<32xf32>
    %1134 = vector.multi_reduction <add>, %1133, %cst_379 [1] : vector<32x16xf32> to vector<32xf32>
    %1135 = vector.shape_cast %1134 : vector<32xf32> to vector<32x1xf32>
    %cst_380 = arith.constant dense<0.000000e+00> : vector<32x1xf32>
    %1136 = tpu.matmul %643, %1135, %cst_380 {dimension_numbers = #tpu.dot_dimension_numbers<[1], [0], [0], [1], [0, 0, 1, 1], [], []>} : vector<32x32xf32>, vector<32x1xf32>, vector<32x1xf32> -> vector<32x1xf32>
    %1137 = vector.broadcast %1136 : vector<32x1xf32> to vector<32x32xf32>
    %1138 = vector.broadcast %1131 : vector<1x32xf32> to vector<32x32xf32>
    %1139 = arith.addf %1137, %1138 : vector<32x32xf32>
    %cst_381 = arith.constant 0.000000e+00 : f32
    %1140 = vector.broadcast %cst_381 : f32 to vector<32x32xf32>
    %1141 = arith.cmpf ogt, %1139, %1140 : vector<32x32xf32>
    %cst_382 = arith.constant 2.000000e-01 : f32
    %1142 = vector.broadcast %cst_382 : f32 to vector<32x32xf32>
    %1143 = arith.mulf %1142, %1139 : vector<32x32xf32>
    %1144 = arith.select %1141, %1139, %1143 : vector<32x32xi1>, vector<32x32xf32>
    %cst_383 = arith.constant -1.000000e+30 : f32
    %1145 = vector.broadcast %cst_383 : f32 to vector<32x32xf32>
    %1146 = arith.select %645, %1144, %1145 : vector<32x32xi1>, vector<32x32xf32>
    %cst_384 = arith.constant dense<0xFF800000> : vector<32xf32>
    %1147 = vector.multi_reduction <maximumf>, %1146, %cst_384 [1] : vector<32x32xf32> to vector<32xf32>
    %1148 = vector.shape_cast %1147 : vector<32xf32> to vector<32x1xf32>
    %1149 = vector.broadcast %1148 : vector<32x1xf32> to vector<32x32xf32>
    %1150 = arith.subf %1146, %1149 : vector<32x32xf32>
    %1151 = math.exp %1150 : vector<32x32xf32>
    %1152 = arith.mulf %1151, %641 : vector<32x32xf32>
    %cst_385 = arith.constant dense<0.000000e+00> : vector<32xf32>
    %1153 = vector.multi_reduction <add>, %1152, %cst_385 [1] : vector<32x32xf32> to vector<32xf32>
    %1154 = vector.shape_cast %1153 : vector<32xf32> to vector<32x1xf32>
    %1155 = tpu.reciprocal %1154 {approx = true} : vector<32x1xf32> -> vector<32x1xf32>
    %1156 = vector.broadcast %1155 : vector<32x1xf32> to vector<32x32xf32>
    %1157 = arith.mulf %1152, %1156 : vector<32x32xf32>
    %cst_386 = arith.constant dense<0.000000e+00> : vector<32x16xf32>
    %1158 = tpu.matmul %1157, %1127, %cst_386 {dimension_numbers = #tpu.dot_dimension_numbers<[1], [0], [0], [1], [0, 0, 1, 1], [], []>} : vector<32x32xf32>, vector<32x16xf32>, vector<32x16xf32> -> vector<32x16xf32>
    %1159 = arith.addf %1126, %1158 : vector<32x16xf32>
    %1160 = vector.extract_strided_slice %162 {offsets = [55, 0], sizes = [1, 16], strides = [1, 1]} : vector<64x16xf32> to vector<1x16xf32>
    %cst_387 = arith.constant 0.333333343 : f32
    %1161 = vector.broadcast %cst_387 : f32 to vector<32x16xf32>
    %1162 = arith.mulf %1159, %1161 : vector<32x16xf32>
    %1163 = vector.broadcast %1160 : vector<1x16xf32> to vector<32x16xf32>
    %1164 = arith.addf %1162, %1163 : vector<32x16xf32>
    %1165 = vector.extract_strided_slice %163 {offsets = [112, 0], sizes = [16, 16], strides = [1, 1]} : vector<128x16xf32> to vector<16x16xf32>
    %1166 = vector.extract_strided_slice %162 {offsets = [63, 0], sizes = [1, 16], strides = [1, 1]} : vector<64x16xf32> to vector<1x16xf32>
    %cst_388 = arith.constant dense<0.000000e+00> : vector<32x16xf32>
    %1167 = tpu.matmul %663, %1057, %cst_388 {dimension_numbers = #tpu.dot_dimension_numbers<[1], [0], [0], [1], [0, 0, 1, 1], [], []>} : vector<32x32xf32>, vector<32x16xf32>, vector<32x16xf32> -> vector<32x16xf32>
    %cst_389 = arith.constant dense<0.000000e+00> : vector<32x16xf32>
    %1168 = tpu.matmul %1167, %1165, %cst_389 {dimension_numbers = #tpu.dot_dimension_numbers<[1], [0], [0], [1], [0, 0, 1, 1], [], []>} : vector<32x16xf32>, vector<16x16xf32>, vector<32x16xf32> -> vector<32x16xf32>
    %1169 = vector.broadcast %1166 : vector<1x16xf32> to vector<32x16xf32>
    %1170 = arith.addf %1168, %1169 : vector<32x16xf32>
    %cst_390 = arith.constant 5.000000e-01 : f32
    %1171 = vector.broadcast %cst_390 : f32 to vector<32x16xf32>
    %1172 = arith.mulf %1171, %1170 : vector<32x16xf32>
    %1173 = math.tanh %1172 : vector<32x16xf32>
    %cst_391 = arith.constant 1.000000e+00 : f32
    %1174 = vector.broadcast %cst_391 : f32 to vector<32x16xf32>
    %1175 = arith.addf %1173, %1174 : vector<32x16xf32>
    %cst_392 = arith.constant 5.000000e-01 : f32
    %1176 = vector.broadcast %cst_392 : f32 to vector<32x16xf32>
    %1177 = arith.mulf %1176, %1175 : vector<32x16xf32>
    %cst_393 = arith.constant 0.000000e+00 : f32
    %1178 = vector.broadcast %cst_393 : f32 to vector<32x16xf32>
    %1179 = arith.maximumf %1164, %1178 : vector<32x16xf32>
    %1180 = arith.mulf %1179, %1177 : vector<32x16xf32>
    %cst_394 = arith.constant 1.000000e+00 : f32
    %1181 = vector.broadcast %cst_394 : f32 to vector<32x16xf32>
    %1182 = arith.subf %1181, %1177 : vector<32x16xf32>
    %1183 = arith.mulf %1055, %1182 : vector<32x16xf32>
    %1184 = arith.addf %1180, %1183 : vector<32x16xf32>
    %c0_395 = arith.constant 0 : index
    %c0_396 = arith.constant 0 : index
    %1185 = vector.load %arg19[%c0_395, %c0_396] : memref<49x4xf32, #tpu.memory_space<vmem>>, vector<49x4xf32>
    %1186 = vector.extract_strided_slice %1185 {offsets = [16, 0], sizes = [16, 4], strides = [1, 1]} : vector<49x4xf32> to vector<16x4xf32>
    %cst_397 = arith.constant dense<0.000000e+00> : vector<32x4xf32>
    %1187 = tpu.matmul %640, %1186, %cst_397 {dimension_numbers = #tpu.dot_dimension_numbers<[1], [0], [0], [1], [0, 0, 1, 1], [], []>} : vector<32x16xf32>, vector<16x4xf32>, vector<32x4xf32> -> vector<32x4xf32>
    %1188 = vector.extract_strided_slice %1185 {offsets = [32, 0], sizes = [16, 4], strides = [1, 1]} : vector<49x4xf32> to vector<16x4xf32>
    %cst_398 = arith.constant dense<0.000000e+00> : vector<32x4xf32>
    %1189 = tpu.matmul %1184, %1188, %cst_398 {dimension_numbers = #tpu.dot_dimension_numbers<[1], [0], [0], [1], [0, 0, 1, 1], [], []>} : vector<32x16xf32>, vector<16x4xf32>, vector<32x4xf32> -> vector<32x4xf32>
    %1190 = arith.addf %1187, %1189 : vector<32x4xf32>
    %1191 = vector.extract_strided_slice %1185 {offsets = [48, 0], sizes = [1, 4], strides = [1, 1]} : vector<49x4xf32> to vector<1x4xf32>
    %1192 = vector.broadcast %1191 : vector<1x4xf32> to vector<32x4xf32>
    %1193 = arith.addf %1190, %1192 : vector<32x4xf32>
    %1194 = vector.extract_strided_slice %1193 {offsets = [0, 0], sizes = [16, 4], strides = [1, 1]} : vector<32x4xf32> to vector<16x4xf32>
    %1195 = vector.extract_strided_slice %1185 {offsets = [0, 0], sizes = [16, 4], strides = [1, 1]} : vector<49x4xf32> to vector<16x4xf32>
    %cst_399 = arith.constant dense<0.000000e+00> : vector<16x4xf32>
    %1196 = tpu.matmul %125, %1195, %cst_399 {dimension_numbers = #tpu.dot_dimension_numbers<[1], [0], [0], [1], [0, 0, 1, 1], [], []>} : vector<16x16xf32>, vector<16x4xf32>, vector<16x4xf32> -> vector<16x4xf32>
    %1197 = arith.addf %1194, %1196 : vector<16x4xf32>
    %c0_400 = arith.constant 0 : index
    %c0_401 = arith.constant 0 : index
    %1198 = vector.load %arg20[%c0_400, %c0_401] : memref<32x4xf32, #tpu.memory_space<vmem>>, vector<16x4xf32>
    tpu.vector_store %arg20[%c0_400, %c0_401], %1197 {strides = array<i32>} : memref<32x4xf32, #tpu.memory_space<vmem>>, vector<16x4xf32>,
    %1199 = vector.extract_strided_slice %1193 {offsets = [16, 0], sizes = [16, 4], strides = [1, 1]} : vector<32x4xf32> to vector<16x4xf32>
    %1200 = vector.extract_strided_slice %1185 {offsets = [0, 0], sizes = [16, 4], strides = [1, 1]} : vector<49x4xf32> to vector<16x4xf32>
    %cst_402 = arith.constant dense<0.000000e+00> : vector<16x4xf32>
    %1201 = tpu.matmul %146, %1200, %cst_402 {dimension_numbers = #tpu.dot_dimension_numbers<[1], [0], [0], [1], [0, 0, 1, 1], [], []>} : vector<16x16xf32>, vector<16x4xf32>, vector<16x4xf32> -> vector<16x4xf32>
    %1202 = arith.addf %1199, %1201 : vector<16x4xf32>
    %c16 = arith.constant 16 : index
    %c0_403 = arith.constant 0 : index
    %1203 = vector.load %arg20[%c16, %c0_403] : memref<32x4xf32, #tpu.memory_space<vmem>>, vector<16x4xf32>
    tpu.vector_store %arg20[%c16, %c0_403], %1202 {strides = array<i32>} : memref<32x4xf32, #tpu.memory_space<vmem>>, vector<16x4xf32>,
    return
  }
}

</mosaic_0001>

<bundles_post_ra>
// kernel: staggcn_forward.1
= control target key start
LH: loop header
LB: loop body
LE: loop exit
PB: predicated region body
PF: predicated region fallthrough
CT: control target
= control target key end

     0   :  { %vm76_vm0 = vcmask 130048   ;;  %vm166_vm1 = vcmask 31744   ;;  %s21371_s25 = smov 108   ;;  %s21374_s27 = smov 120   ;;  %vm569_vm3 = vcmask 1043456   ;;  %vm1421_vm4 = vcmask 64512   ;;  %s24953_s3 = inlined_call_operand.vmem [shape: f32[16,64], index: 3, kind: input, shape index: {}]   ;;  %s24954_s0 = inlined_call_operand.vmem [shape: f32[16,16], index: 0, kind: input, shape index: {}]   ;;  %s24955_s4 = inlined_call_operand.vmem [shape: f32[1,64], index: 4, kind: input, shape index: {}]   ;;  %s24956_s2 = inlined_call_operand.vmem [shape: f32[16,16], index: 2, kind: input, shape index: {}]   ;;  %s24957_s5 = inlined_call_operand.vmem [shape: f32[48,32], index: 5, kind: input, shape index: {}]   ;;  %s24958_s12 = inlined_call_operand.vmem [shape: f32[32,16], index: 12, kind: input, shape index: {}]   ;;  %s24959_s6 = inlined_call_operand.vmem [shape: f32[3,32], index: 6, kind: input, shape index: {}]   ;;  %s24960_s7 = inlined_call_operand.vmem [shape: f32[33,16], index: 7, kind: input, shape index: {}]   ;;  %s24961_s10 = inlined_call_operand.vmem [shape: f32[32,16], index: 10, kind: input, shape index: {}]   ;;  %s24962_s9 = inlined_call_operand.vmem [shape: f32[32,12], index: 9, kind: input, shape index: {}]   ;;  %s24963_s8 = inlined_call_operand.vmem [shape: f32[9,8], index: 8, kind: input, shape index: {}]   ;;  %s24964_s1 = inlined_call_operand.vmem [shape: f32[32,8], index: 1, kind: input, shape index: {}]   ;;  %s24965_s13 = inlined_call_operand.vmem [shape: f32[16,32], index: 13, kind: input, shape index: {}]   ;;  %s24966_s15 = inlined_call_operand.vmem [shape: f32[32,16], index: 15, kind: input, shape index: {}]   ;;  %s24967_s16 = inlined_call_operand.vmem [shape: f32[128,48], index: 16, kind: input, shape index: {}]   ;;  %s24968_s17 = inlined_call_operand.vmem [shape: f32[64,16], index: 17, kind: input, shape index: {}]   ;;  %s24969_s11 = inlined_call_operand.vmem [shape: f32[192,32], index: 11, kind: input, shape index: {}]   ;;  %s24970_s14 = inlined_call_operand.vmem [shape: f32[32,32], index: 14, kind: input, shape index: {}]   ;;  %s24971_s18 = inlined_call_operand.vmem [shape: f32[128,16], index: 18, kind: input, shape index: {}]   ;;  %s24972_s19 = inlined_call_operand.vmem [shape: f32[49,4], index: 19, kind: input, shape index: {}]   ;;  %s24973_s20 = inlined_call_operand.vmem [shape: f32[32,4], index: 20, kind: output, shape index: {}]  }
   0x1   :  { %24987 = sst [smem:[#allocation9_spill]] %s24953_s3  ;;  %s21369_s3 = smov 112   ;;  %vm21540_vm2 = vmpackc.low %vm166_vm1, %vm166_vm1  ;;  %vm1509_vm5 = vcmask 261120   ;;  %vm21381_vm6 = vmmov 1   ;;  %vm2358_vm8 = vcmask 97280   ;;  %vm21383_vm9 = vmmov 0  }
   0x2   :  { %24988 = sst [smem:[#allocation10_spill]] %s24954_s0  ;;  %s24992_s23 = sld [smem:[#allocation9_spill]]  ;;  %vm21776_vm7 = vmpackc.low %vm569_vm3, %vm21381_vm6 }
   0x3   :  { %24989 = sst [smem:[#allocation11_spill]] %s24955_s4  ;;  %s24993_s26 = sld [smem:[#allocation10_spill]]  ;;  %vm21908_vm10 = vmpackc.low %vm76_vm0, %vm76_vm0 }
   0x4   :  { %24990 = sst [smem:[#allocation12_spill]] %s24956_s2  ;;  %s24994_s30 = sld [smem:[#allocation11_spill]] }
   0x5   :  { %24991 = sst [smem:[#allocation13_spill]] %s24957_s5  ;;  %s24997_s22 = sld [smem:[#allocation12_spill]] }
   0x6   :  { %s21370_s4 = smov 96   ;;  %s21372_s2 = smov 124  }
   0x7   :  { %s21375_s28 = smov 92   ;;  %s21376_s5 = smov 100  }
   0x8   :  { %v21496_v0 = vld [vmem:[%s24992_s23] sm:$0xff]  ;;  %v21501_v1 = vld [vmem:[%s24992_s23 + $0x8] sm:$0xff]  ;;  %s21377_s29 = smov 116   ;;  %s21379_s21 = smov 88  }
   0x9   :  { %v21506_v2 = vld [vmem:[%s24993_s26] sm:$0xff]  ;;  %v19632_v3 = vpack.c.bf16 %v21501_v1, %v21496_v0  ;;  %v21515_v4 = vld [vmem:[%s24993_s26 + $0x8] sm:$0xff]  ;;  %s21373_s26 = smov 104   ;;  %s21380_s0 = smov 84  }
   0xa   :  { %18003 = vmatprep.mubr.msk.f32.mxu0 %vm76_vm0, %v21506_v2  ;;  %v21522_v5 = vld [vmem:[%s24994_s30] ss:$0 sm:$0xff]  ;;  %s21378_s30 = smov 80   ;;  %s24998_s24 = sld [smem:[#allocation13_spill]] }
   0xb   :  { %19633 = vmatprep.subr.bf16.mxu0 %v19632_v3  ;;  %v21553_v16 = vld [vmem:[%s24997_s22 + $0x8] sm:$0xff]  ;;  %v21558_v17 = vld [vmem:[%s24997_s22] sm:$0xff] }
   0xc   :  { %19635 = vmatpush3.bf16.msra.mxu0 %v19632_v3 }
   0xf   :  { %18004 = vmatmul.mubr.msk.f32.vlgmr.msra.gmra.mrb[0].mxu0 %vm76_vm0, %v21515_v4 }
  0xe2   :  { %v18005_v6 = vpop.f32.mrb[0].mxu0 }
  0xe3   :  { %v21525_v7 = vadd.f32 %v18005_v6, %v21522_v5  ;;  %v149_v8 = vpop.f32.mrb[1].mxu0 }
  0xe4   :  { %v21528_v9 = vadd.f32 %v21522_v5, %v149_v8 }
  0xe6   :  { %18010 = vmatprep.mubr.msk.f32.mxu1 %vm166_vm1, %v21528_v9  ;;  %v21534_v10 = vpack.i.bf16 %v21525_v7, %v21528_v9 }
  0xe8   :  { %20618 = vrot.lane.b32.xlu0 %v21534_v10, %s21369_s3 }
 0x15a   :  { %v20619_v11 = vpop.permute.xlu0 %20618 }
 0x15b   :  { %v20621_v12 = vunpack.i.h.bf16 %v20619_v11  ;;  %v20620_v13 = vunpack.i.l.bf16 %v20619_v11 }
 0x15d   :  { %v19636_v15 = vpack.c.bf16 %v20621_v12, %v20620_v13 }
 0x15f   :  { %19638 = vmatprep.subr.msk.bf16.mxu1 %vm21540_vm2, %v19636_v15 }
 0x160   :  { %19641 = vmatpush3.bf16.xpose.msk.msra.mxu1 %vm21540_vm2, %v19636_v15 }
 0x167   :  { %18011 = vmatmul.mubr.msk.f32.vlgmr.msra.gmra.mrb[0].mxu1 %vm166_vm1, %v21525_v7 }
 0x23a   :  { %v18012_v18 = vpop.f32.mrb[0].mxu1 }
 0x23b   :  { %v247_v19 = vadd.f32 %v18012_v18, %v21553_v16  ;;  %v241_v20 = vpop.f32.mrb[1].mxu1 }
 0x23c   :  { %v242_v21 = vadd.f32 %v241_v20, %v21558_v17 }
 0x23d   :  { %v253_v22 = vsel %vm76_vm0, %v247_v19, -inf }
 0x23e   :  { %254 = vmax.xlane.f32.xlu1 %v253_v22  ;;  %v250_v23 = vsel %vm76_vm0, %v242_v21, -inf }
 0x23f   :  { %251 = vmax.xlane.f32.xlu0 %v250_v23 }
 0x24f   :  { %20623 = vrot.lane.b32.xlu1 %v21534_v10, %s21370_s4 }
 0x253   :  { %20628 = vrot.lane.b32.xlu1 %v21534_v10, %s21371_s25 }
 0x255   :  { %361 = vrot.lane.b32.xlu0 %v21525_v7, %s21372_s2 }
 0x2cb   :  { %v255_v24 = vpop.xlane.xlu1 %254 }
 0x2cc   :  { %v257_v25 = vsub.f32 %v247_v19, %v255_v24  ;;  %v252_v26 = vpop.xlane.xlu0 %251 }
 0x2cd   :  { %v256_v27 = vsub.f32 %v242_v21, %v252_v26 }
 0x2ce   :  { %v260_v28 = vmul.f32 1.442695, %v257_v25 }
 0x2cf   :  { %v258_v29 = vmul.f32 1.442695, %v256_v27  ;;  %v20624_v30 = vpop.permute.xlu1 %20623  ;;  %v560_v27 = vrot.slane %v21496_v0, 4 }
 0x2d0   :  { %20799 = vpow2.f32 %v260_v28  ;;  %v20626_v31 = vunpack.i.h.bf16 %v20624_v30  ;;  %v20625_v32 = vunpack.i.l.bf16 %v20624_v30  ;;  %v362_v53 = vpop.permute.xlu0 %361 }
 0x2d1   :  { %20801 = vpow2.f32 %v258_v29 }
 0x2d2   :  { %v19642_v33 = vpack.c.bf16 %v20626_v31, %v20625_v32 }
 0x2d3   :  { %v20629_v34 = vpop.permute.xlu1 %20628 }
 0x2d4   :  { %v20631_v35 = vunpack.i.h.bf16 %v20629_v34  ;;  %v20630_v36 = vunpack.i.l.bf16 %v20629_v34  ;;  %19643 = vmatprep.subr.bf16.mxu0 %v19642_v33 }
 0x2d5   :  { %19645 = vmatpush3.bf16.msra.mxu0 %v19642_v33 }
 0x2d6   :  { %v19646_v37 = vpack.c.bf16 %v20631_v35, %v20630_v36 }
 0x2d8   :  { %19648 = vmatprep.subr.msk.bf16.mxu0 %vm21540_vm2, %v19646_v37 }
 0x2da   :  { %v20800_v38 = vpop.eup %20799 }
 0x2db   :  { %v265_v39 = vsel %vm76_vm0, %v20800_v38, 0.0  ;;  %v20802_v40 = vpop.eup %20801 }
 0x2dc   :  { %266 = vadd.xlane.f32.xlu1 %v265_v39  ;;  %v262_v41 = vsel %vm76_vm0, %v20802_v40, 0.0 }
 0x2e0   :  { %263 = vadd.xlane.f32.xlu1 %v262_v41 }
 0x2f1   :  { %359 = vrot.lane.b32.xlu1 %v21528_v9, %s21372_s2  ;;  %s21385_s2 = smov 16  }
 0x2f5   :  { %20633 = vrot.lane.b32.xlu1 %v21534_v10, %s21373_s26 }
 0x2f9   :  { %732 = vrot.lane.b32.xlu1 %v21528_v9, %s21374_s27 }
 0x2fd   :  { %734 = vrot.lane.b32.xlu1 %v21525_v7, %s21374_s27 }
 0x369   :  { %v267_v42 = vpop.xlane.xlu1 %266 }
 0x36a   :  { %20803 = vrcp.f32 %v267_v42 }
 0x36d   :  { %v264_v43 = vpop.xlane.xlu1 %263 }
 0x36e   :  { %20805 = vrcp.f32 %v264_v43 }
 0x371   :  { %v360_v44 = vpop.permute.xlu1 %359 }
 0x374   :  { %v20804_v46 = vpop.eup %20803 }
 0x375   :  { %v20634_v45 = vpop.permute.xlu1 %20633  ;;  %v271_v51 = vmul.f32 %v20804_v46, %v20800_v38 }
 0x376   :  { %v20636_v48 = vunpack.i.h.bf16 %v20634_v45  ;;  %v20635_v49 = vunpack.i.l.bf16 %v20634_v45 }
 0x378   :  { %v20806_v47 = vpop.eup %20805  ;;  %v19656_v52 = vpack.c.bf16 %v20636_v48, %v20635_v49 }
 0x379   :  { %v270_v50 = vmul.f32 %v20806_v47, %v20802_v40  ;;  %v733_v54 = vpop.permute.xlu1 %732 }
 0x37b   :  { %18017 = vmatprep.mubr.msk.f32.mxu0 %vm76_vm0, %v270_v50 }
 0x37c   :  { %18018 = vmatmul.mubr.msk.f32.vlgmr.msra.gmra.mrb[2].mxu0 %vm76_vm0, %v271_v51 }
 0x37d   :  { %19651 = vmatpush3.bf16.xpose.msk.msra.mxu0 %vm21540_vm2, %v19646_v37  ;;  %18024 = vmatprep.mubr.msk.f32.mxu0 %vm166_vm1, %v360_v44  ;;  %v735_v55 = vpop.permute.xlu1 %734 }
 0x37e   :  { %19658 = vmatprep.subr.msk.bf16.mxu0 %vm21540_vm2, %v19656_v52 }
 0x384   :  { %18025 = vmatmul.mubr.msk.f32.vlgmr.msra.gmra.mrb[4].mxu0 %vm166_vm1, %v362_v53 }
 0x385   :  { %19661 = vmatpush3.bf16.xpose.msk.msra.mxu0 %vm21540_vm2, %v19656_v52  ;;  %18048 = vmatprep.mubr.msk.f32.mxu0 %vm166_vm1, %v733_v54 }
 0x38c   :  { %18049 = vmatmul.mubr.msk.f32.vlgmr.msra.gmra.mrb[6].mxu0 %vm166_vm1, %v735_v55 }
 0x44f   :  { %v21588_v56 = vpop.f32.mrb[2].mxu0 }
 0x450   :  { %v21590_v57 = vpop.f32.mrb[3].mxu0 }
 0x457   :  { %v18026_v58 = vpop.f32.mrb[4].mxu0 }
 0x458   :  { %v447_v59 = vadd.f32 %v18026_v58, %v21553_v16  ;;  %v441_v60 = vpop.f32.mrb[5].mxu0 }
 0x459   :  { %v442_v61 = vadd.f32 %v441_v60, %v21558_v17 }
 0x45a   :  { %v453_v62 = vsel %vm76_vm0, %v447_v59, -inf }
 0x45b   :  { %454 = vmax.xlane.f32.xlu0 %v453_v62  ;;  %v450_v63 = vsel %vm76_vm0, %v442_v61, -inf }
 0x45c   :  { %451 = vmax.xlane.f32.xlu1 %v450_v63 }
 0x45f   :  { %v18050_v3 = vpop.f32.mrb[6].mxu0 }
 0x460   :  { %v814_v6 = vpop.f32.mrb[7].mxu0  ;;  %v820_v25 = vadd.f32 %v18050_v3, %v21553_v16 }
 0x461   :  { %v815_v23 = vadd.f32 %v814_v6, %v21558_v17 }
 0x462   :  { %v826_v26 = vsel %vm76_vm0, %v820_v25, -inf }
 0x463   :  { %v823_v24 = vsel %vm76_vm0, %v815_v23, -inf }
 0x4e8   :  { %v455_v8 = vpop.xlane.xlu0 %454 }
 0x4e9   :  { %v457_v11 = vsub.f32 %v447_v59, %v455_v8  ;;  %v452_v12 = vpop.xlane.xlu1 %451 }
 0x4ea   :  { %v456_v13 = vsub.f32 %v442_v61, %v452_v12 }
 0x4eb   :  { %v460_v15 = vmul.f32 1.442695, %v457_v11 }
 0x4ec   :  { %v458_v18 = vmul.f32 1.442695, %v456_v13 }
 0x4ed   :  { %20807 = vpow2.f32 %v460_v15 }
 0x4ee   :  { %20809 = vpow2.f32 %v458_v18 }
 0x4f7   :  { %v20808_v19 = vpop.eup %20807 }
 0x4f8   :  { %v20810_v20 = vpop.eup %20809  ;;  %v465_v21 = vsel %vm76_vm0, %v20808_v19, 0.0 }
 0x4f9   :  { %466 = vadd.xlane.f32.xlu0 %v465_v21  ;;  %v462_v22 = vsel %vm76_vm0, %v20810_v20, 0.0 }
 0x4fa   :  { %463 = vadd.xlane.f32.xlu1 %v462_v22 }
 0x50b   :  { %20638 = vrot.lane.b32.xlu1 %v21534_v10, %s21375_s28 }
 0x50f   :  { %20643 = vrot.lane.b32.xlu0 %v21534_v10, %s21376_s5  ;;  %1020 = vrot.lane.b32.xlu1 %v21528_v9, %s21377_s29 }
 0x513   :  { %1022 = vrot.lane.b32.xlu1 %v21525_v7, %s21377_s29 }
 0x52e   :  { %824 = vmax.xlane.f32.xlu0 %v823_v24 }
 0x537   :  { %827 = vmax.xlane.f32.xlu1 %v826_v26 }
 0x548   :  { %561 = vrot.lane.b32.xlu1 %v560_v27, %s21378_s30 }
 0x54c   :  { %20648 = vrot.lane.b32.xlu1 %v21534_v10, %s21379_s21  ;;  %s21386_s21 = smov 32  }
 0x586   :  { %v467_v9 = vpop.xlane.xlu0 %466 }
 0x587   :  { %20811 = vrcp.f32 %v467_v9  ;;  %v464_v7 = vpop.xlane.xlu1 %463 }
 0x588   :  { %20813 = vrcp.f32 %v464_v7 }
 0x58a   :  { %v20644_v28 = vpop.permute.xlu0 %20643 }
 0x58b   :  { %v20646_v29 = vunpack.i.h.bf16 %v20644_v28  ;;  %v20645_v30 = vunpack.i.l.bf16 %v20644_v28  ;;  %v20639_v31 = vpop.permute.xlu1 %20638 }
 0x58c   :  { %v20641_v32 = vunpack.i.h.bf16 %v20639_v31  ;;  %v20640_v33 = vunpack.i.l.bf16 %v20639_v31 }
 0x58d   :  { %v19666_v34 = vpack.c.bf16 %v20646_v29, %v20645_v30 }
 0x58e   :  { %v19652_v35 = vpack.c.bf16 %v20641_v32, %v20640_v33 }
 0x58f   :  { %19668 = vmatprep.subr.msk.bf16.mxu0 %vm21540_vm2, %v19666_v34  ;;  %v1021_v36 = vpop.permute.xlu1 %1020 }
 0x590   :  { %19653 = vmatprep.subr.bf16.mxu1 %v19652_v35  ;;  %19671 = vmatpush3.bf16.xpose.msk.msra.mxu0 %vm21540_vm2, %v19666_v34 }
 0x591   :  { %v20812_v37 = vpop.eup %20811  ;;  %18067 = vmatprep.mubr.msk.f32.mxu0 %vm166_vm1, %v1021_v36  ;;  %19655 = vmatpush3.bf16.msra.mxu1 %v19652_v35 }
 0x592   :  { %v20814_v38 = vpop.eup %20813  ;;  %v471_v40 = vmul.f32 %v20812_v37, %v20808_v19  ;;  %v1323_v37 = vld [vmem:[%s24998_s24 + $0x10] sm:$0xff] }
 0x593   :  { %v470_v39 = vmul.f32 %v20814_v38, %v20810_v20  ;;  %v1023_v41 = vpop.permute.xlu1 %1022  ;;  %v1324_v38 = vld [vmem:[%s24998_s24 + $0x18] sm:$0xff] }
 0x595   :  { %18031 = vmatprep.mubr.msk.f32.mxu1 %vm76_vm0, %v470_v39  ;;  %v1325_v39 = vld [vmem:[%s24998_s24 + $0x20] sm:$0xff] }
 0x596   :  { %18032 = vmatmul.mubr.msk.f32.vlgmr.msra.gmra.mrb[2].mxu1 %vm76_vm0, %v471_v40  ;;  %v21665_v40 = vpack.c.bf16 %v1324_v38, %v1323_v37 }
 0x597   :  { %18068 = vmatmul.mubr.msk.f32.vlgmr.msra.gmra.mrb[8].mxu0 %vm166_vm1, %v1023_v41  ;;  %v1326_v41 = vld [vmem:[%s24998_s24 + $0x28] sm:$0xff] }
 0x5bb   :  { %v825_v42 = vpop.xlane.xlu0 %824 }
 0x5bc   :  { %v829_v43 = vsub.f32 %v815_v23, %v825_v42  ;;  %v21670_v42 = vpack.c.bf16 %v1326_v41, %v1325_v39  ;;  %v2310_v41 = vld [vmem:[%s24961_s10] sm:$0xff] }
 0x5be   :  { %v831_v14 = vmul.f32 1.442695, %v829_v43  ;;  %v21679_v43 = vld [vmem:[%s24958_s12] sm:$0xff] }
 0x5bf   :  { %18084 = vmatprep.mubr.msk.f32.mxu0 %vm76_vm0, %v21679_v43 }
 0x5c4   :  { %v828_v44 = vpop.xlane.xlu1 %827 }
 0x5c5   :  { %v830_v45 = vsub.f32 %v820_v25, %v828_v44  ;;  %v1220_v25 = vrot.slane %v21501_v1, 4 }
 0x5c7   :  { %v833_v46 = vmul.f32 1.442695, %v830_v45 }
 0x5c8   :  { %v562_v51 = vpop.permute.xlu1 %561 }
 0x5c9   :  { %20815 = vpow2.f32 %v833_v46  ;;  %18034 = vmatprep.subr.msk.mxu1 %vm569_vm3, %v562_v51 }
 0x5ca   :  { %20817 = vpow2.f32 %v831_v14  ;;  %18035 = vmatpush3.msk.msra.mxu1 %vm569_vm3, %v562_v51 }
 0x5cc   :  { %v20649_v53 = vpop.permute.xlu1 %20648 }
 0x5cd   :  { %v20651_v55 = vunpack.i.h.bf16 %v20649_v53  ;;  %v20650_v58 = vunpack.i.l.bf16 %v20649_v53 }
 0x5cf   :  { %v19662_v6 = vpack.c.bf16 %v20651_v55, %v20650_v58  ;;  %v1417_v55 = vlaneseq }
 0x5d1   :  { %v21709_v58 = vshrl.u32 %v1417_v55, 7 }
 0x5d3   :  { %v20816_v47 = vpop.eup %20815  ;;  %24999 = vst [vmem:[#allocation2_spill] sm:$0xff] %v21709_v58 }
 0x5d4   :  { %v838_v48 = vsel %vm76_vm0, %v20816_v47, 0.0  ;;  %v20818_v49 = vpop.eup %20817 }
 0x5d5   :  { %839 = vadd.xlane.f32.xlu0 %v838_v48  ;;  %v835_v50 = vsel %vm76_vm0, %v20818_v49, 0.0 }
 0x5d9   :  { %836 = vadd.xlane.f32.xlu0 %v835_v50 }
 0x5ef   :  { %647 = vrot.lane.b32.xlu0 %v21496_v0, %s21378_s30 }
 0x662   :  { %v840_v52 = vpop.xlane.xlu0 %839 }
 0x666   :  { %v837_v54 = vpop.xlane.xlu0 %836 }
 0x667   :  { %20819 = vrcp.f32 %v837_v54 }
 0x668   :  { %20821 = vrcp.f32 %v840_v52  ;;  %v21691_v52 = vld [vmem:[%s24958_s12 + $0x8] sm:$0xff] }
 0x669   :  { %v18033_v59 = vpop.f32.mrb[2].mxu1 }
 0x66a   :  { %v18069_v60 = vpop.f32.mrb[8].mxu0  ;;  %v648_v61 = vpop.permute.xlu0 %647 }
 0x66b   :  { %v1108_v62 = vadd.f32 %v18069_v60, %v21553_v16  ;;  %v550_v63 = vpop.f32.mrb[3].mxu1  ;;  %18039 = vmatprep.subr.msk.mxu1 %vm569_vm3, %v648_v61  ;;  %v1102_v3 = vpop.f32.mrb[9].mxu0  ;;  %v1327_v60 = vld [vmem:[%s24959_s6] sm:$0x7] }
 0x66c   :  { %18036 = vmatprep.mubr.msk.f32.mxu1 %vm166_vm1, %v550_v63  ;;  %v1103_v0 = vadd.f32 %v1102_v3, %v21558_v17 }
 0x66d   :  { %18037 = vmatmul.mubr.msk.f32.vlgmr.msra.gmra.mrb[4].mxu1 %vm166_vm1, %v18033_v59  ;;  %v1114_v8 = vsel %vm76_vm0, %v1108_v62, -inf  ;;  %v21712_v59 = vsub.s32 0, %v21709_v58 }
 0x66e   :  { %18040 = vmatpush3.msk.msra.mxu1 %vm569_vm3, %v648_v61  ;;  %18041 = vmatprep.mubr.msk.f32.mxu1 %vm166_vm1, %v21590_v57  ;;  %v1111_v16 = vsel %vm76_vm0, %v1103_v0, -inf }
 0x66f   :  { %19663 = vmatprep.subr.bf16.mxu1 %v19662_v6  ;;  %1115 = vmax.xlane.f32.xlu0 %v1114_v8  ;;  %v21718_v61 = vrot.slane %v1327_v60, %v21712_v59 }
 0x670   :  { %1112 = vmax.xlane.f32.xlu1 %v1111_v16 }
 0x671   :  { %v20820_v11 = vpop.eup %20819 }
 0x672   :  { %v843_v12 = vmul.f32 %v20820_v11, %v20818_v49  ;;  %v20822_v13 = vpop.eup %20821 }
 0x673   :  { %v844_v17 = vmul.f32 %v20822_v13, %v20816_v47  ;;  %v1329_v13 = vld [vmem:[%s24960_s7 + $0x8] sm:$0xff] }
 0x675   :  { %18042 = vmatmul.mubr.msk.f32.vlgmr.msra.gmra.mrb[4].mxu1 %vm166_vm1, %v21588_v56 }
 0x676   :  { %19665 = vmatpush3.bf16.msra.mxu1 %v19662_v6  ;;  %18055 = vmatprep.mubr.msk.f32.mxu1 %vm76_vm0, %v843_v12  ;;  %v1328_v12 = vld [vmem:[%s24960_s7] sm:$0xff] }
 0x679   :  { %18056 = vmatmul.mubr.msk.f32.vlgmr.msra.gmra.mrb[6].mxu1 %vm76_vm0, %v844_v17  ;;  %v19684_v17 = vpack.c.bf16 %v1329_v13, %v1328_v12 }
 0x6fc   :  { %v1116_v15 = vpop.xlane.xlu0 %1115 }
 0x6fd   :  { %v1118_v18 = vsub.f32 %v1108_v62, %v1116_v15  ;;  %v1113_v57 = vpop.xlane.xlu1 %1112  ;;  %v1330_v15 = vld [vmem:[%s24960_s7 + $0x10] sm:$0xff] }
 0x6fe   :  { %v1117_v19 = vsub.f32 %v1103_v0, %v1113_v57 }
 0x6ff   :  { %v1121_v20 = vmul.f32 1.442695, %v1118_v18  ;;  %v1331_v18 = vld [vmem:[%s24960_s7 + $0x18] sm:$0xff] }
 0x700   :  { %v1119_v21 = vmul.f32 1.442695, %v1117_v19  ;;  %v19688_v57 = vpack.c.bf16 %v1331_v18, %v1330_v15  ;;  %v21744_v19 = vsub.s32 1, %v21709_v58 }
 0x701   :  { %20823 = vpow2.f32 %v1121_v20  ;;  %v21747_v20 = vsub.s32 2, %v21709_v58 }
 0x702   :  { %20825 = vpow2.f32 %v1119_v21  ;;  %v1508_v21 = vrot.slane %v1327_v60, %v21744_v19 }
 0x70b   :  { %v20824_v22 = vpop.eup %20823 }
 0x70c   :  { %v20826_v23 = vpop.eup %20825  ;;  %v1126_v24 = vsel %vm76_vm0, %v20824_v22, 0.0 }
 0x70d   :  { %1127 = vadd.xlane.f32.xlu1 %v1126_v24  ;;  %v1123_v56 = vsel %vm76_vm0, %v20826_v23, 0.0 }
 0x70e   :  { %1124 = vadd.xlane.f32.xlu0 %v1123_v56 }
 0x71e   :  { %20653 = vrot.lane.b32.xlu1 %v21534_v10, %s21380_s0 }
 0x722   :  { %1221 = vrot.lane.b32.xlu1 %v1220_v25, %s21378_s30 }
 0x724   :  { %933 = vrot.lane.b32.xlu0 %v21501_v1, %s21378_s30 }
 0x728   :  { %1308 = vrot.lane.b32.xlu0 %v21522_v5, %s21378_s30 }
 0x74c   :  { %v18057_v26 = vpop.f32.mrb[6].mxu1 }
 0x74d   :  { %v923_v27 = vpop.f32.mrb[7].mxu1 }
 0x74e   :  { %18060 = vmatprep.mubr.msk.f32.mxu1 %vm166_vm1, %v923_v27 }
 0x79a   :  { %v1128_v9 = vpop.xlane.xlu1 %1127 }
 0x79b   :  { %20827 = vrcp.f32 %v1128_v9  ;;  %v1125_v7 = vpop.xlane.xlu0 %1124 }
 0x79c   :  { %20829 = vrcp.f32 %v1125_v7 }
 0x79e   :  { %v20654_v28 = vpop.permute.xlu1 %20653 }
 0x79f   :  { %v20656_v10 = vunpack.i.h.bf16 %v20654_v28  ;;  %v20655_v29 = vunpack.i.l.bf16 %v20654_v28  ;;  %v934_v30 = vpop.permute.xlu0 %933 }
 0x7a0   :  { %18058 = vmatprep.subr.msk.mxu1 %vm569_vm3, %v934_v30 }
 0x7a1   :  { %18059 = vmatpush3.msk.msra.mxu1 %vm569_vm3, %v934_v30  ;;  %v19672_v5 = vpack.c.bf16 %v20656_v10, %v20655_v29 }
 0x7a2   :  { %18061 = vmatmul.mubr.msk.f32.vlgmr.msra.gmra.mrb[4].mxu1 %vm166_vm1, %v18057_v26  ;;  %v1222_v1 = vpop.permute.xlu1 %1221 }
 0x7a3   :  { %19673 = vmatprep.subr.bf16.mxu1 %v19672_v5  ;;  %v1309_v44 = vpop.permute.xlu0 %1308 }
 0x7a4   :  { %19675 = vmatpush3.bf16.msra.mxu1 %v19672_v5 }
 0x7a5   :  { %v20828_v31 = vpop.eup %20827  ;;  %18077 = vmatprep.subr.msk.mxu1 %vm569_vm3, %v1222_v1 }
 0x7a6   :  { %v20830_v32 = vpop.eup %20829  ;;  %v1132_v34 = vmul.f32 %v20828_v31, %v20824_v22  ;;  %v1596_v22 = vrot.slane %v1327_v60, %v21747_v20  ;;  %v2306_v60 = vld [vmem:[%s24962_s9] sm:$0xff] }
 0x7a7   :  { %v1131_v33 = vmul.f32 %v20830_v32, %v20826_v23 }
 0x7a9   :  { %18074 = vmatprep.mubr.msk.f32.mxu1 %vm76_vm0, %v1131_v33 }
 0x7aa   :  { %18075 = vmatmul.mubr.msk.f32.vlgmr.msra.gmra.mrb[8].mxu1 %vm76_vm0, %v1132_v34 }
 0x7ab   :  { %18078 = vmatpush3.msk.msra.mxu1 %vm569_vm3, %v1222_v1 }
 0x7ac   :  { %19677 = vmatprep.subr.bf16.mxu1 %v21665_v40 }
 0x87d   :  { %v18076_v35 = vpop.f32.mrb[8].mxu1 }
 0x87e   :  { %v1211_v36 = vpop.f32.mrb[9].mxu1 }
 0x87f   :  { %18079 = vmatprep.mubr.msk.f32.mxu1 %vm166_vm1, %v1211_v36 }
 0x880   :  { %18080 = vmatmul.mubr.msk.f32.vlgmr.msra.gmra.mrb[4].mxu1 %vm166_vm1, %v18076_v35 }
 0x881   :  { %19679 = vmatpush3.bf16.msra.mxu1 %v21665_v40 }
 0x882   :  { %19681 = vmatprep.subr.bf16.mxu1 %v21670_v42 }
 0x885   :  { %19683 = vmatpush3.bf16.msra.mxu1 %v21670_v42 }
 0x953   :  { %v18081_v45 = vpop.f32.mrb[4].mxu1 }
 0x954   :  { %v1312_v14 = vadd.f32 %v18081_v45, %v1309_v44  ;;  %v1297_v46 = vpop.f32.mrb[5].mxu1  ;;  %v21326_v45 = vld [vmem:[%s24958_s12] sm:$0xff] }
 0x955   :  { %v1311_v47 = vadd.f32 %v1309_v44, %v1297_v46 }
 0x956   :  { %v1314_v48 = vadd.f32 %v1312_v14, %v21515_v4  ;;  %v21701_v4 = vld [vmem:[%s24998_s24 + $0x8] sm:$0xff] }
 0x957   :  { %v1313_v49 = vadd.f32 %v1311_v47, %v21506_v2  ;;  %v1321_v2 = vld [vmem:[%s24998_s24] sm:$0xff] }
 0x958   :  { %20831 = vtanh.f32 %v1314_v48 }
 0x959   :  { %20833 = vtanh.f32 %v1313_v49 }
 0x962   :  { %v20832_v50 = vpop.eup %20831 }
 0x963   :  { %v20834_v51 = vpop.eup %20833  ;;  %18119 = vmatprep.subr.msk.mxu1 %vm76_vm0, %v20832_v50 }
 0x964   :  { %18082 = vmatprep.subr.msk.mxu0 %vm76_vm0, %v20834_v51 }
 0x965   :  { %18083 = vmatpush3.xpose.msk.msra.mxu0 %vm76_vm0, %v20834_v51 }
 0x966   :  { %18087 = vmatprep.subr.mxu0 %v1321_v2 }
 0x968   :  { %18085 = vmatmul.mubr.msk.f32.vlgmr.msra.gmra.mrb[10].mxu0 %vm76_vm0, %v21691_v52 }
 0x969   :  { %18088 = vmatpush3.msra.mxu0 %v1321_v2 }
 0x96a   :  { %18103 = vmatprep.subr.mxu0 %v21701_v4 }
 0xa3b   :  { %v18086_v53 = vpop.f32.mrb[10].mxu0 }
 0xa3c   :  { %v1408_v54 = vpop.f32.mrb[11].mxu0 }
 0xa3d   :  { %18089 = vmatprep.mubr.msk.f32.mxu0 %vm1421_vm4, %v1408_v54 }
 0xa3e   :  { %18090 = vmatmul.mubr.msk.f32.vlgmr.msra.gmra.mrb[12].mxu0 %vm1421_vm4, %v18086_v53 }
 0xa3f   :  { %18105 = vmatprep.mubr.msk.f32.mxu0 %vm1421_vm4, %v1408_v54  ;;  %18104 = vmatpush3.msra.mxu0 %v21701_v4 }
 0xa40   :  { %19685 = vmatprep.subr.bf16.mxu0 %v19684_v17 }
 0xa42   :  { %18106 = vmatmul.mubr.msk.f32.vlgmr.msra.gmra.mrb[14].mxu0 %vm1421_vm4, %v18086_v53 }
 0xa43   :  { %19687 = vmatpush3.bf16.msra.mxu0 %v19684_v17 }
 0xa44   :  { %19689 = vmatprep.subr.bf16.mxu0 %v19688_v57 }
 0xa47   :  { %19691 = vmatpush3.bf16.msra.mxu0 %v19688_v57 }
 0xa48   :  { %19693 = vmatprep.subr.bf16.mxu0 %v21665_v40 }
 0xb11   :  { %v18091_v62 = vpop.f32.mrb[12].mxu0 }
 0xb12   :  { %v1500_v63 = vadd.f32 %v18091_v62, %v21718_v61  ;;  %v1494_v3 = vpop.f32.mrb[13].mxu0 }
 0xb13   :  { %v1495_v0 = vadd.f32 %v1494_v3, %v21718_v61 }
 0xb14   :  { %v1504_v16 = vmax.f32 %v1500_v63, 0.0 }
 0xb15   :  { %v1503_v6 = vmax.f32 %v1495_v0, 0.0  ;;  %v18107_v8 = vpop.f32.mrb[14].mxu0 }
 0xb16   :  { %v1663_v11 = vpop.f32.mrb[15].mxu0  ;;  %v1669_v26 = vadd.f32 %v18107_v8, %v1596_v22 }
 0xb17   :  { %18100 = vmatprep.mubr.msk.f32.mxu1 %vm1509_vm5, %v1503_v6  ;;  %v1664_v9 = vadd.f32 %v1663_v11, %v1596_v22 }
 0xb18   :  { %18101 = vmatmul.mubr.msk.f32.vlgmr.msra.gmra.mrb[10].mxu1 %vm1509_vm5, %v1504_v16 }
 0xb19   :  { %18120 = vmatpush3.xpose.msk.msra.mxu1 %vm76_vm0, %v20832_v50  ;;  %18121 = vmatprep.mubr.msk.f32.mxu1 %vm76_vm0, %v21679_v43 }
 0xb1a   :  { %18124 = vmatprep.subr.mxu1 %v1321_v2 }
 0xb1c   :  { %18122 = vmatmul.mubr.msk.f32.vlgmr.msra.gmra.mrb[12].mxu1 %vm76_vm0, %v21691_v52 }
 0xb1d   :  { %18125 = vmatpush3.msra.mxu1 %v1321_v2 }
 0xb1e   :  { %18140 = vmatprep.subr.mxu1 %v21701_v4 }
 0xbeb   :  { %v18102_v23 = vpop.f32.mrb[10].mxu1 }
 0xbec   :  { %v1588_v24 = vadd.f32 %v18102_v23, %v1508_v21  ;;  %v1582_v56 = vpop.f32.mrb[11].mxu1 }
 0xbed   :  { %v1583_v25 = vadd.f32 %v1582_v56, %v1508_v21  ;;  %v2169_v56 = vld [vmem:[%s24963_s8] sm:$0xff] }
 0xbee   :  { %v1592_v27 = vmax.f32 %v1588_v24, 0.0 }
 0xbef   :  { %v1591_v7 = vmax.f32 %v1583_v25, 0.0  ;;  %v18123_v28 = vpop.f32.mrb[12].mxu1  ;;  %v2165_v25 = vld [vmem:[%s24964_s1] sm:$0xff] }
 0xbf0   :  { %v1673_v10 = vadd.f32 %v1669_v26, %v1592_v27  ;;  %v1830_v29 = vpop.f32.mrb[13].mxu1  ;;  %v2166_v26 = vld [vmem:[%s24964_s1 + $0x8] sm:$0xff]  ;;  %v2167_v27 = vld [vmem:[%s24964_s1 + $0x10] sm:$0xff] }
 0xbf1   :  { %v1672_v30 = vadd.f32 %v1664_v9, %v1591_v7  ;;  %18126 = vmatprep.mubr.msk.f32.mxu1 %vm1421_vm4, %v1830_v29  ;;  %v2168_v9 = vld [vmem:[%s24964_s1 + $0x18] sm:$0xff]  ;;  %v2276_v7 = vld [vmem:[%s24965_s13] sm:$0xff] }
 0xbf2   :  { %18127 = vmatmul.mubr.msk.f32.vlgmr.msra.gmra.mrb[14].mxu1 %vm1421_vm4, %v18123_v28  ;;  %v1675_v1 = vmax.f32 %v1673_v10, 0.0 }
 0xbf3   :  { %v1674_v5 = vmax.f32 %v1672_v30, 0.0  ;;  %18142 = vmatprep.mubr.msk.f32.mxu1 %vm1421_vm4, %v1830_v29  ;;  %18141 = vmatpush3.msra.mxu1 %v21701_v4 }
 0xbf4   :  { %19701 = vmatprep.subr.bf16.mxu1 %v19684_v17 }
 0xbf5   :  { %18116 = vmatprep.mubr.msk.f32.mxu0 %vm1509_vm5, %v1674_v5 }
 0xbf6   :  { %18117 = vmatmul.mubr.msk.f32.vlgmr.msra.gmra.mrb[16].mxu0 %vm1509_vm5, %v1675_v1  ;;  %18143 = vmatmul.mubr.msk.f32.vlgmr.msra.gmra.mrb[16].mxu1 %vm1421_vm4, %v18123_v28  ;;  %v2277_v28 = vld [vmem:[%s24965_s13 + $0x8] sm:$0xff] }
 0xbf7   :  { %19695 = vmatpush3.bf16.msra.mxu0 %v21665_v40  ;;  %19703 = vmatpush3.bf16.msra.mxu1 %v19684_v17  ;;  %v21829_v10 = vpack.c.bf16 %v2277_v28, %v2276_v7 }
 0xbf8   :  { %19697 = vmatprep.subr.bf16.mxu0 %v21670_v42  ;;  %19705 = vmatprep.subr.bf16.mxu1 %v19688_v57 }
 0xbfb   :  { %19699 = vmatpush3.bf16.msra.mxu0 %v21670_v42  ;;  %19707 = vmatpush3.bf16.msra.mxu1 %v19688_v57  ;;  %v2311_v42 = vld [vmem:[%s24961_s10 + $0x8] sm:$0xff] }
 0xbfc   :  { %v19708_v44 = vpack.c.bf16 %v2311_v42, %v2310_v41  ;;  %18156 = vmatprep.subr.mxu0 %v2169_v56 }
 0xbfe   :  { %19710 = vmatprep.subr.msk.bf16.mxu1 %vm21776_vm7, %v19708_v44 }
 0xcc5   :  { %v18128_v31 = vpop.f32.mrb[14].mxu1 }
 0xcc6   :  { %v1917_v32 = vadd.f32 %v18128_v31, %v21718_v61  ;;  %v1911_v33 = vpop.f32.mrb[15].mxu1 }
 0xcc7   :  { %v1912_v34 = vadd.f32 %v1911_v33, %v21718_v61  ;;  %v2307_v61 = vld [vmem:[%s24962_s9 + $0x8] sm:$0xff]  ;;  %v2314_v33 = vld [vmem:[%s24966_s15] sm:$0xff] }
 0xcc8   :  { %v1921_v38 = vmax.f32 %v1917_v32, 0.0 }
 0xcc9   :  { %v1920_v35 = vmax.f32 %v1912_v34, 0.0  ;;  %v21763_v36 = vpop.f32.mrb[16].mxu0  ;;  %v18144_v37 = vpop.f32.mrb[16].mxu1  ;;  %v1319_v34 = vld [vmem:[%s24958_s12 + $0x10] sm:$0xff] }
 0xcca   :  { %25000 = vst [vmem:[#allocation3_spill] sm:$0xff] %v21763_v36  ;;  %v21765_v39 = vpop.f32.mrb[17].mxu0  ;;  %v2071_v40 = vpop.f32.mrb[17].mxu1  ;;  %v2077_v49 = vadd.f32 %v18144_v37, %v1596_v22  ;;  %v16662_v37 = vld [vmem:[%s24963_s8 + $0x8] ss:$0 sm:$0xff] }
 0xccb   :  { %25001 = vst [vmem:[#allocation4_spill] sm:$0xff] %v21765_v39  ;;  %18137 = vmatprep.mubr.msk.f32.mxu0 %vm1509_vm5, %v1920_v35  ;;  %v2072_v51 = vadd.f32 %v2071_v40, %v1596_v22  ;;  %v1320_v35 = vld [vmem:[%s24958_s12 + $0x18] sm:$0xff] }
 0xccc   :  { %18138 = vmatmul.mubr.msk.f32.vlgmr.msra.gmra.mrb[18].mxu0 %vm1509_vm5, %v1921_v38 }
 0xccd   :  { %18158 = vmatprep.mubr.msk.f32.mxu0 %vm1421_vm4, %v2165_v25  ;;  %18157 = vmatpush3.msra.mxu0 %v2169_v56 }
 0xcd0   :  { %18159 = vmatmul.mubr.msk.f32.vlgmr.msra.gmra.mrb[20].mxu0 %vm1421_vm4, %v2166_v26 }
 0xcd1   :  { %18161 = vmatprep.mubr.msk.f32.mxu0 %vm1421_vm4, %v2167_v27 }
 0xcd4   :  { %18162 = vmatmul.mubr.msk.f32.gmra.mrb[22].mxu0 %vm1421_vm4, %v2168_v9 }
 0xcd5   :  { %18175 = vmatprep.mubr.msk.f32.mxu0 %vm76_vm0, %v21679_v43 }
 0xd9f   :  { %v18139_v14 = vpop.f32.mrb[18].mxu0 }
 0xda0   :  { %v2000_v46 = vadd.f32 %v18139_v14, %v1508_v21  ;;  %v1994_v47 = vpop.f32.mrb[19].mxu0 }
 0xda1   :  { %v1995_v48 = vadd.f32 %v1994_v47, %v1508_v21 }
 0xda2   :  { %v2004_v50 = vmax.f32 %v2000_v46, 0.0 }
 0xda3   :  { %v2003_v2 = vmax.f32 %v1995_v48, 0.0  ;;  %v18160_v38 = vpop.f32.mrb[20].mxu0 }
 0xda4   :  { %v2081_v4 = vadd.f32 %v2077_v49, %v2004_v50  ;;  %v2259_v40 = vadd.f32 %v18160_v38, %v16662_v37  ;;  %v2253_v41 = vpop.f32.mrb[21].mxu0 }
 0xda5   :  { %v2080_v53 = vadd.f32 %v2072_v51, %v2003_v2  ;;  %v2254_v42 = vadd.f32 %v16662_v37, %v2253_v41  ;;  %v2318_v51 = vld [vmem:[%s24967_s16] sm:$0xff] }
 0xda6   :  { %v2083_v55 = vmax.f32 %v2081_v4, 0.0 }
 0xda7   :  { %v2082_v54 = vmax.f32 %v2080_v53, 0.0  ;;  %v18163_v14 = vpop.f32.mrb[22].mxu0 }
 0xda8   :  { %v2269_v46 = vadd.f32 %v18163_v14, %v16662_v37  ;;  %v2263_v47 = vpop.f32.mrb[23].mxu0 }
 0xda9   :  { %18153 = vmatprep.mubr.msk.f32.mxu1 %vm1509_vm5, %v2082_v54  ;;  %v2264_v48 = vadd.f32 %v16662_v37, %v2263_v47  ;;  %v21976_v37 = vsub.s32 3, %v21709_v58 }
 0xdaa   :  { %18154 = vmatmul.mubr.msk.f32.vlgmr.msra.gmra.mrb[18].mxu1 %vm1509_vm5, %v2083_v55  ;;  %v21855_v49 = vadd.f32 %v2269_v46, %v2168_v9 }
 0xdab   :  { %19713 = vmatpush3.bf16.msk.msra.mxu1 %vm21776_vm7, %v19708_v44  ;;  %18168 = vmatprep.mubr.msk.f32.mxu1 %vm2358_vm8, %v2306_v60  ;;  %v21849_v44 = vadd.f32 %v2259_v40, %v2166_v26  ;;  %v21859_v50 = vadd.f32 %v2264_v48, %v2167_v27 }
 0xdac   :  { %19719 = vmatprep.subr.bf16.mxu1 %v21829_v10 }
 0xdae   :  { %18169 = vmatmul.mubr.msk.f32.vlgmr.msra.gmra.mrb[20].mxu1 %vm2358_vm8, %v2307_v61 }
 0xdaf   :  { %19721 = vmatpush3.bf16.msra.mxu1 %v21829_v10 }
 0xdb0   :  { %18199 = vmatprep.subr.mxu1 %v2318_v51 }
 0xe7d   :  { %v21794_v62 = vpop.f32.mrb[18].mxu1 }
 0xe7e   :  { %25004 = vst [vmem:[#allocation5_spill] sm:$0xff] %v21794_v62  ;;  %v21796_v63 = vpop.f32.mrb[19].mxu1 }
 0xe7f   :  { %25005 = vst [vmem:[#allocation6_spill] sm:$0xff] %v21796_v63 }
 0xe81   :  { %v18170_v3 = vpop.f32.mrb[20].mxu1 }
 0xe82   :  { %v2444_v0 = vmax.f32 %v18170_v3, 0.0  ;;  %v2434_v6 = vpop.f32.mrb[21].mxu1 }
 0xe83   :  { %v2443_v8 = vmax.f32 %v2434_v6, 0.0  ;;  %v24978_v6 = vmov 0.0  }
 0xe84   :  { %v2448_v16 = vsel %vm76_vm0, %v2444_v0, -inf }
 0xe85   :  { %2449 = vmax.xlane.f32.xlu0 %v2448_v16  ;;  %v2445_v11 = vsel %vm76_vm0, %v2443_v8, -inf }
 0xe86   :  { %2446 = vmax.xlane.f32.xlu1 %v2445_v11 }
 0xf12   :  { %v2450_v12 = vpop.xlane.xlu0 %2449 }
 0xf13   :  { %v2452_v13 = vsub.f32 %v2444_v0, %v2450_v12  ;;  %v2447_v17 = vpop.xlane.xlu1 %2446  ;;  %v24980_v0 = vmov 0.0|0.0  }
 0xf14   :  { %v2451_v15 = vsub.f32 %v2443_v8, %v2447_v17 }
 0xf15   :  { %v2455_v18 = vmul.f32 1.442695, %v2452_v13 }
 0xf16   :  { %v2453_v57 = vmul.f32 1.442695, %v2451_v15 }
 0xf17   :  { %20835 = vpow2.f32 %v2455_v18 }
 0xf18   :  { %20837 = vpow2.f32 %v2453_v57 }
 0xf21   :  { %v20836_v21 = vpop.eup %20835 }
 0xf22   :  { %v20838_v22 = vpop.eup %20837  ;;  %v2460_v23 = vsel %vm76_vm0, %v20836_v21, 0.0 }
 0xf23   :  { %2461 = vadd.xlane.f32.xlu1 %v2460_v23  ;;  %v2457_v24 = vsel %vm76_vm0, %v20838_v22, 0.0 }
 0xf24   :  { %2458 = vadd.xlane.f32.xlu0 %v2457_v24 }
 0xfb0   :  { %v2462_v29 = vpop.xlane.xlu1 %2461 }
 0xfb1   :  { %20839 = vrcp.f32 %v2462_v29  ;;  %v2459_v30 = vpop.xlane.xlu0 %2458 }
 0xfb2   :  { %20841 = vrcp.f32 %v2459_v30 }
 0xfbb   :  { %v20840_v5 = vpop.eup %20839 }
 0xfbc   :  { %v20842_v43 = vpop.eup %20841  ;;  %v2466_v1 = vmul.f32 %v20840_v5, %v20836_v21 }
 0xfbd   :  { %v2465_v31 = vmul.f32 %v20842_v43, %v20838_v22  ;;  %v21928_v22 = vsub.s32 4, %v21709_v58 }
 0xfbf   :  { %v19714_v32 = vpack.c.bf16 %v2466_v1, %v2465_v31 }
 0xfc1   :  { %19715 = vmatprep.subr.bf16.mxu0 %v19714_v32 }
 0xfc2   :  { %19717 = vmatpush3.bf16.msra.mxu0 %v19714_v32 }
 0xfc3   :  { %18191 = vmatprep.subr.mxu0 %v2314_v33 }
 0xfc5   :  { %18176 = vmatmul.mubr.msk.f32.vlgmr.msra.gmra.mrb[24].mxu0 %vm76_vm0, %v21691_v52  ;;  %v21851_v52 = vadd.f32 %v2254_v42, %v2165_v25  ;;  %v21944_v25 = vld [vmem:[%s24968_s17] sm:$0xff] }
 0xfc6   :  { %18178 = vmatprep.mubr.msk.f32.mxu0 %vm76_vm0, %v1319_v34  ;;  %18192 = vmatpush3.msra.mxu0 %v2314_v33  ;;  %v3377_v26 = vrot.slane %v21944_v25, %v21928_v22  ;;  %v3006_v38 = vrot.slane %v21944_v25, %v21976_v37 }
 0xfc7   :  { %19722 = vmatprep.subr.bf16.mxu0 %v24980_v0 }
 0xfc9   :  { %18179 = vmatmul.mubr.msk.f32.gmra.mrb[26].mxu0 %vm76_vm0, %v1320_v35  ;;  %v3212_v35 = vrot.slane %v21944_v25, 1 }
 0xfca   :  { %18193 = vmatprep.mubr.msk.f32.mxu0 %vm1421_vm4, %v21851_v52 }
 0xfcd   :  { %18194 = vmatmul.mubr.msk.f32.vlgmr.msra.gmra.mrb[28].mxu0 %vm1421_vm4, %v21849_v44 }
 0xfce   :  { %18196 = vmatprep.mubr.msk.f32.mxu0 %vm1421_vm4, %v21859_v50 }
 0xfd1   :  { %18197 = vmatmul.mubr.msk.f32.gmra.mrb[30].mxu0 %vm1421_vm4, %v21855_v49 }
 0xfd2   :  { %18215 = vmatprep.mubr.msk.f32.mxu0 %vm21383_vm9, %v24978_v6 }
0x1098   :  { %v18177_v2 = vpop.f32.mrb[24].mxu0 }
0x1099   :  { %v2539_v4 = vpop.f32.mrb[25].mxu0 }
0x109a   :  { %18185 = vmatprep.mubr.msk.f32.mxu1 %vm76_vm0, %v2539_v4  ;;  %v2287_v4 = vld [vmem:[%s24969_s11 + $0x28] sm:$0xff] }
0x109b   :  { %18186 = vmatmul.mubr.msk.f32.vlgmr.msra.gmra.mrb[22].mxu1 %vm76_vm0, %v18177_v2  ;;  %v2286_v2 = vld [vmem:[%s24969_s11 + $0x20] sm:$0xff] }
0x109c   :  { %v18180_v53 = vpop.f32.mrb[26].mxu0  ;;  %18200 = vmatpush3.msra.mxu1 %v2318_v51 }
0x109d   :  { %v2549_v54 = vpop.f32.mrb[27].mxu0  ;;  %19730 = vmatprep.subr.bf16.mxu1 %v24980_v0 }
0x109e   :  { %18188 = vmatprep.mubr.msk.f32.mxu1 %vm76_vm0, %v2549_v54  ;;  %v2288_v54 = vld [vmem:[%s24969_s11 + $0x30] sm:$0xff] }
0x109f   :  { %18189 = vmatmul.mubr.msk.f32.gmra.mrb[24].mxu1 %vm76_vm0, %v18180_v53  ;;  %v21994_v53 = vpack.c.bf16 %v2287_v4, %v2286_v2 }
0x10a0   :  { %18201 = vmatprep.mubr.msk.f32.mxu1 %vm1421_vm4, %v21851_v52  ;;  %v21880_v55 = vpop.f32.mrb[28].mxu0 }
0x10a1   :  { %v21882_v60 = vpop.f32.mrb[29].mxu0 }
0x10a3   :  { %18202 = vmatmul.mubr.msk.f32.vlgmr.msra.gmra.mrb[26].mxu1 %vm1421_vm4, %v21849_v44 }
0x10a4   :  { %18204 = vmatprep.mubr.msk.f32.mxu1 %vm1421_vm4, %v21859_v50  ;;  %v21884_v61 = vpop.f32.mrb[30].mxu0  ;;  %19732 = vmatpush3.bf16.msra.mxu1 %v21994_v53 }
0x10a5   :  { %v21886_v3 = vpop.f32.mrb[31].mxu0  ;;  %19733 = vmatprep.subr.bf16.mxu1 %v24980_v0 }
0x10a7   :  { %18205 = vmatmul.mubr.msk.f32.gmra.mrb[28].mxu1 %vm1421_vm4, %v21855_v49 }
0x10a8   :  { %18226 = vmatprep.mubr.msk.f32.mxu1 %vm21383_vm9, %v24978_v6 }
0x116e   :  { %v21894_v8 = vpop.f32.mrb[22].mxu1 }
0x116f   :  { %v21896_v16 = vpop.f32.mrb[23].mxu1 }
0x1172   :  { %v21898_v11 = vpop.f32.mrb[24].mxu1 }
0x1173   :  { %v21900_v12 = vpop.f32.mrb[25].mxu1 }
0x1176   :  { %v21902_v13 = vpop.f32.mrb[26].mxu1 }
0x1177   :  { %v21904_v17 = vpop.f32.mrb[27].mxu1  ;;  %v3008_v14 = vmul.f32 %v21902_v13, %v3006_v38 }
0x1178   :  { %v21914_v18 = vpack.c.bf16 %v21902_v13, %v21904_v17  ;;  %v21918_v57 = vpack.i.bf16 %v21902_v13, %v21904_v17  ;;  %v3007_v40 = vmul.f32 %v3006_v38, %v21904_v17 }
0x1179   :  { %v3014_v48 = vsel %vm76_vm0, %v3008_v14, 0.0 }
0x117a   :  { %20658 = vrot.lane.b32.xlu0 %v21918_v57, %s21369_s3  ;;  %v21922_v21 = vpop.f32.mrb[28].mxu1  ;;  %19725 = vmatpush3.bf16.xpose.msk.msra.mxu0 %vm21908_vm10, %v21914_v18  ;;  %v3011_v41 = vsel %vm76_vm0, %v3007_v40, 0.0 }
0x117b   :  { %v21930_v23 = vpop.f32.mrb[29].mxu1  ;;  %19726 = vmatprep.subr.bf16.mxu0 %v24980_v0  ;;  %v3010_v47 = vmul.f32 %v21922_v21, %v3006_v38 }
0x117c   :  { %v21935_v24 = vpack.c.bf16 %v21922_v21, %v21930_v23  ;;  %v21939_v56 = vpack.i.bf16 %v21922_v21, %v21930_v23  ;;  %v3009_v42 = vmul.f32 %v3006_v38, %v21930_v23 }
0x117d   :  { %v3020_v51 = vsel %vm76_vm0, %v3010_v47, 0.0  ;;  %v22048_v47 = vld [vmem:[%s24969_s11 + $0x58] sm:$0xff] }
0x117e   :  { %20663 = vrot.lane.b32.xlu1 %v21939_v56, %s21369_s3  ;;  %v3017_v46 = vsel %vm76_vm0, %v3009_v42, 0.0 }
0x1182   :  { %3379 = vrot.lane.b32.xlu1 %v3377_v26, %s21385_s2  ;;  %19729 = vmatpush3.bf16.xpose.msk.msra.mxu0 %vm21908_vm10, %v21935_v24  ;;  %v2289_v26 = vld [vmem:[%s24969_s11 + $0x38] sm:$0xff] }
0x1183   :  { %19744 = vmatprep.subr.bf16.mxu0 %v24980_v0 }
0x1189   :  { %18216 = vmatmul.mubr.msk.f32.vlgmr.msra.gmra.mrb[32].mxu0 %vm76_vm0, %v21944_v25 }
0x118a   :  { %18251 = vmatprep.mubr.msk.f32.mxu0 %vm21383_vm9, %v24978_v6 }
0x11ec   :  { %v20659_v27 = vpop.permute.xlu0 %20658 }
0x11ed   :  { %v20661_v9 = vunpack.i.h.bf16 %v20659_v27  ;;  %v20660_v7 = vunpack.i.l.bf16 %v20659_v27  ;;  %v22004_v27 = vpack.c.bf16 %v2289_v26, %v2288_v54 }
0x11ef   :  { %v19745_v28 = vpack.c.bf16 %v20661_v9, %v20660_v7  ;;  %19735 = vmatpush3.bf16.msra.mxu1 %v22004_v27  ;;  %v22010_v9 = vld [vmem:[%s24969_s11 + $0x40] sm:$0xff] }
0x11f0   :  { %v20664_v29 = vpop.permute.xlu1 %20663 }
0x11f1   :  { %19747 = vmatpush3.bf16.xpose.msk.msra.mxu0 %vm21908_vm10, %v19745_v28  ;;  %v20666_v30 = vunpack.i.h.bf16 %v20664_v29  ;;  %v20665_v5 = vunpack.i.l.bf16 %v20664_v29 }
0x11f2   :  { %19748 = vmatprep.subr.bf16.mxu0 %v24980_v0 }
0x11f3   :  { %v19749_v32 = vpack.c.bf16 %v20666_v30, %v20665_v5 }
0x11f4   :  { %v3380_v43 = vpop.permute.xlu1 %3379 }
0x11f5   :  { %v3383_v1 = vmul.f32 %v21902_v13, %v3380_v43  ;;  %v3382_v31 = vmul.f32 %v3380_v43, %v21904_v17  ;;  %v3385_v33 = vmul.f32 %v21922_v21, %v3380_v43  ;;  %v3384_v34 = vmul.f32 %v3380_v43, %v21930_v23 }
0x11f7   :  { %3392 = vrot.lane.b32.xlu1 %v3383_v1, %s21369_s3  ;;  %3390 = vrot.lane.b32.xlu0 %v3382_v31, %s21369_s3 }
0x11f9   :  { %19751 = vmatpush3.bf16.xpose.msk.msra.mxu0 %vm21908_vm10, %v19749_v32 }
0x11fa   :  { %19767 = vmatprep.subr.bf16.mxu0 %v19745_v28 }
0x11fb   :  { %3396 = vrot.lane.b32.xlu1 %v3385_v33, %s21369_s3  ;;  %3394 = vrot.lane.b32.xlu0 %v3384_v34, %s21369_s3  ;;  %v22020_v34 = vsub.s32 5, %v21709_v58 }
0x1200   :  { %18252 = vmatmul.mubr.msk.f32.vlgmr.msra.gmra.mrb[34].mxu0 %vm76_vm0, %v3212_v35  ;;  %v3954_v35 = vrot.slane %v21944_v25, %v22020_v34 }
0x1201   :  { %19769 = vmatpush3.bf16.msra.mxu0 %v19745_v28 }
0x1202   :  { %19771 = vmatprep.subr.bf16.mxu0 %v19749_v32 }
0x1205   :  { %19773 = vmatpush3.bf16.msra.mxu0 %v19749_v32 }
0x1206   :  { %19775 = vmatprep.subr.bf16.mxu0 %v21914_v18 }
0x121a   :  { %3012 = vadd.xlane.f32.xlu0 %v3011_v41 }
0x121e   :  { %3018 = vadd.xlane.f32.xlu0 %v3017_v46 }
0x121f   :  { %3015 = vadd.xlane.f32.xlu1 %v3014_v48 }
0x1222   :  { %3021 = vadd.xlane.f32.xlu0 %v3020_v51 }
0x125c   :  { %v2926_v7 = vpop.f32.mrb[32].mxu0 }
0x125d   :  { %18227 = vmatmul.mubr.msk.f32.vlgmr.msra.gmra.mrb[30].mxu1 %vm1509_vm5, %v2926_v7  ;;  %v18217_v28 = vpop.f32.mrb[33].mxu0 }
0x125e   :  { %18237 = vmatprep.mubr.msk.f32.mxu1 %vm1509_vm5, %v22010_v9 }
0x1269   :  { %v3393_v29 = vpop.permute.xlu1 %3392  ;;  %v3391_v30 = vpop.permute.xlu0 %3390 }
0x126a   :  { %v3402_v5 = vsel %vm76_vm0, %v3391_v30, 0.0  ;;  %v3405_v43 = vsel %vm76_vm0, %v3393_v29, 0.0 }
0x126b   :  { %3403 = vadd.xlane.f32.xlu1 %v3402_v5  ;;  %3406 = vadd.xlane.f32.xlu0 %v3405_v43 }
0x126d   :  { %v3397_v1 = vpop.permute.xlu1 %3396  ;;  %v3395_v31 = vpop.permute.xlu0 %3394 }
0x126e   :  { %v3408_v32 = vsel %vm76_vm0, %v3395_v31, 0.0  ;;  %v3411_v33 = vsel %vm76_vm0, %v3397_v1, 0.0 }
0x126f   :  { %3409 = vadd.xlane.f32.xlu1 %v3408_v32  ;;  %3412 = vadd.xlane.f32.xlu0 %v3411_v33 }
0x1280   :  { %20668 = vrot.lane.b32.xlu1 %v21918_v57, %s21370_s4  ;;  %v22032_v57 = vld [vmem:[%s24969_s11 + $0x48] sm:$0xff] }
0x1284   :  { %3956 = vrot.lane.b32.xlu1 %v3954_v35, %s21386_s21  ;;  %v21387_v35 = vmov 0  }
0x1285   :  { %20673 = vrot.lane.b32.xlu0 %v21939_v56, %s21370_s4  ;;  %v22038_v56 = vld [vmem:[%s24969_s11 + $0x50] sm:$0xff]  ;;  %20678 = vset.pattern.permute.xlu1 %v21387_v35 }
0x1286   :  { %20677 = vset.pattern.permute.xlu0 %v21387_v35 }
0x12a7   :  { %v3013_v38 = vpop.xlane.xlu0 %3012 }
0x12ab   :  { %v3019_v40 = vpop.xlane.xlu0 %3018 }
0x12ac   :  { %v3016_v41 = vpop.xlane.xlu1 %3015 }
0x12ad   :  { %v19736_v42 = vpack.c.bf16 %v3016_v41, %v3013_v38 }
0x12af   :  { %19737 = vmatprep.subr.bf16.mxu1 %v19736_v42  ;;  %v3022_v14 = vpop.xlane.xlu0 %3021 }
0x12b0   :  { %v19740_v46 = vpack.c.bf16 %v3022_v14, %v3019_v40  ;;  %19739 = vmatpush3.bf16.msra.mxu1 %v19736_v42 }
0x12b2   :  { %19741 = vmatprep.subr.bf16.mxu1 %v19740_v46 }
0x12b4   :  { %19743 = vmatpush3.bf16.msra.mxu1 %v19740_v46 }
0x12b5   :  { %19752 = vmatprep.subr.bf16.mxu1 %v24980_v0 }
0x12b7   :  { %18238 = vmatmul.mubr.msk.f32.vlgmr.msra.gmra.mrb[32].mxu1 %vm1509_vm5, %v22032_v57 }
0x12b8   :  { %19754 = vmatpush3.bf16.msra.mxu1 %v21994_v53  ;;  %18240 = vmatprep.mubr.msk.f32.mxu1 %vm1509_vm5, %v22038_v56 }
0x12b9   :  { %19755 = vmatprep.subr.bf16.mxu1 %v24980_v0 }
0x12bb   :  { %18241 = vmatmul.mubr.msk.f32.gmra.mrb[34].mxu1 %vm1509_vm5, %v22048_v47 }
0x12bc   :  { %19757 = vmatpush3.bf16.msra.mxu1 %v22004_v27  ;;  %18262 = vmatprep.mubr.msk.f32.mxu1 %vm21383_vm9, %v24978_v6 }
0x12d3   :  { %v3297_v48 = vpop.f32.mrb[34].mxu0 }
0x12d4   :  { %18263 = vmatmul.mubr.msk.f32.vlgmr.msra.gmra.mrb[36].mxu1 %vm1509_vm5, %v3297_v48  ;;  %v18253_v51 = vpop.f32.mrb[35].mxu0 }
0x12d5   :  { %18273 = vmatprep.mubr.msk.f32.mxu1 %vm1509_vm5, %v22010_v9 }
0x12f8   :  { %v3404_v2 = vpop.xlane.xlu1 %3403  ;;  %v3407_v4 = vpop.xlane.xlu0 %3406 }
0x12f9   :  { %v19758_v54 = vpack.c.bf16 %v3407_v4, %v3404_v2 }
0x12fb   :  { %19759 = vmatprep.subr.bf16.mxu1 %v19758_v54 }
0x12fc   :  { %v3410_v26 = vpop.xlane.xlu1 %3409  ;;  %v3413_v7 = vpop.xlane.xlu0 %3412  ;;  %19761 = vmatpush3.bf16.msra.mxu1 %v19758_v54 }
0x12fd   :  { %v19762_v28 = vpack.c.bf16 %v3413_v7, %v3410_v26 }
0x12ff   :  { %19763 = vmatprep.subr.bf16.mxu1 %v19762_v28 }
0x1300   :  { %v20669_v29 = vpop.permute.xlu1 %20668  ;;  %19765 = vmatpush3.bf16.msra.mxu1 %v19762_v28  ;;  %v20674_v1 = vpop.permute.xlu0 %20673 }
0x1301   :  { %19782 = vmatprep.subr.bf16.mxu1 %v24980_v0  ;;  %v20671_v30 = vunpack.i.h.bf16 %v20669_v29  ;;  %v20670_v5 = vunpack.i.l.bf16 %v20669_v29  ;;  %v20676_v31 = vunpack.i.h.bf16 %v20674_v1  ;;  %v20675_v32 = vunpack.i.l.bf16 %v20674_v1 }
0x1302   :  { %v3789_v1 = vrot.slane %v21944_v25, 2 }
0x1303   :  { %18274 = vmatmul.mubr.msk.f32.vlgmr.msra.gmra.mrb[38].mxu1 %vm1509_vm5, %v22032_v57  ;;  %v22064_v43 = vpack.c.bf16 %v20671_v30, %v20670_v5  ;;  %v22074_v33 = vpack.c.bf16 %v20676_v31, %v20675_v32 }
0x1304   :  { %18276 = vmatprep.mubr.msk.f32.mxu1 %vm1509_vm5, %v22038_v56  ;;  %v3957_v7 = vpop.permute.xlu1 %3956 }
0x1305   :  { %v3959_v28 = vmul.f32 %v3957_v7, %v21904_v17  ;;  %v3961_v29 = vmul.f32 %v3957_v7, %v21930_v23  ;;  %v3960_v30 = vmul.f32 %v21902_v13, %v3957_v7  ;;  %v3962_v5 = vmul.f32 %v21922_v21, %v3957_v7  ;;  %v22095_v13 = vld [vmem:[%s24969_s11 + $0x8] sm:$0xff]  ;;  %v22100_v21 = vld [vmem:[%s24969_s11] sm:$0xff] }
0x1306   :  { %vm2355_vm11 = vcmp.gt.f32.partialorder %v22095_v13, 0.0  ;;  %vm2354_vm13 = vcmp.gt.f32.partialorder %v22100_v21, 0.0 }
0x1307   :  { %18277 = vmatmul.mubr.msk.f32.gmra.mrb[40].mxu1 %vm1509_vm5, %v22048_v47 }
0x1308   :  { %18315 = vmatprep.mubr.msk.f32.mxu1 %vm21383_vm9, %v24978_v6 }
0x1309   :  { %19785 = vmatpush3.bf16.xpose.msk.msra.mxu1 %vm21908_vm10, %v22064_v43 }
0x130a   :  { %19786 = vmatprep.subr.bf16.mxu1 %v24980_v0 }
0x1311   :  { %19789 = vmatpush3.bf16.xpose.msk.msra.mxu1 %vm21908_vm10, %v22074_v33 }
0x1318   :  { %18316 = vmatmul.mubr.msk.f32.vlgmr.msra.gmra.mrb[42].mxu1 %vm76_vm0, %v3789_v1 }
0x1319   :  { %18337 = vmatprep.mubr.msk.f32.mxu1 %vm1509_vm5, %v22010_v9 }
0x1330   :  { %v2999_v38 = vpop.f32.mrb[30].mxu1 }
0x1331   :  { %v18228_v40 = vpop.f32.mrb[31].mxu1  ;;  %v3143_v35 = vrot.slane %v2999_v38, %v21712_v59 }
0x138a   :  { %v18239_v41 = vpop.f32.mrb[32].mxu1 }
0x138b   :  { %v3101_v42 = vpop.f32.mrb[33].mxu1 }
0x138e   :  { %v18242_v14 = vpop.f32.mrb[34].mxu1 }
0x138f   :  { %v3111_v46 = vpop.f32.mrb[35].mxu1 }
0x13a7   :  { %v3370_v48 = vpop.f32.mrb[36].mxu1 }
0x13a8   :  { %v18264_v51 = vpop.f32.mrb[37].mxu1  ;;  %v3522_v17 = vrot.slane %v3370_v48, %v21712_v59  ;;  %v22108_v48 = vld [vmem:[%s24969_s11 + $0x10] sm:$0xff] }
0x13a9   :  { %vm2356_vm2 = vcmp.gt.f32.partialorder %v22108_v48, 0.0 }
0x13d6   :  { %v18275_v2 = vpop.f32.mrb[38].mxu1 }
0x13d7   :  { %3506 = vperm.xlu0 %20677, %v18275_v2   ;;  %v3480_v4 = vpop.f32.mrb[39].mxu1 }
0x13d8   :  { %3501 = vperm.xlu1 %20678, %v3480_v4  }
0x13da   :  { %v18278_v54 = vpop.f32.mrb[40].mxu1 }
0x13db   :  { %3122 = vperm.xlu0 %20677, %v3101_v42   ;;  %v3490_v26 = vpop.f32.mrb[41].mxu1 }
0x13dc   :  { %3511 = vperm.xlu1 %20678, %v3490_v26  }
0x13df   :  { %3132 = vperm.xlu0 %20677, %v3111_v46  }
0x13e0   :  { %3516 = vperm.xlu1 %20678, %v18278_v54  }
0x13e3   :  { %3967 = vrot.lane.b32.xlu0 %v3959_v28, %s21370_s4 }
0x13e4   :  { %3127 = vperm.xlu1 %20678, %v18239_v41  }
0x13e7   :  { %3971 = vrot.lane.b32.xlu0 %v3961_v29, %s21370_s4 }
0x13e8   :  { %3137 = vperm.xlu1 %20678, %v18242_v14  }
0x13ec   :  { %3969 = vrot.lane.b32.xlu1 %v3960_v30, %s21370_s4 }
0x13f0   :  { %3973 = vrot.lane.b32.xlu1 %v3962_v5, %s21370_s4 }
0x1456   :  { %v3507_v23 = vpop.permute.xlu0 %3506 }
0x1457   :  { %v3524_v31 = vadd.f32 %v3522_v17, %v3507_v23  ;;  %v3502_v32 = vpop.permute.xlu1 %3501  ;;  %v22126_v23 = vld [vmem:[%s24969_s11 + $0x18] sm:$0xff] }
0x1458   :  { %v3523_v25 = vadd.f32 %v3522_v17, %v3502_v32 }
0x1459   :  { %v3532_v40 = vmul.f32 0.2, %v3524_v31  ;;  %vm3528_vm12 = vcmp.gt.f32.partialorder %v3524_v31, 0.0 }
0x145a   :  { %v3531_v9 = vmul.f32 0.2, %v3523_v25  ;;  %v3123_v41 = vpop.permute.xlu0 %3122  ;;  %vm3527_vm14 = vcmp.gt.f32.partialorder %v3523_v25, 0.0 }
0x145b   :  { %v3144_v42 = vadd.f32 %v3143_v35, %v3123_v41  ;;  %v3512_v14 = vpop.permute.xlu1 %3511  ;;  %v3536_v46 = vsel %vm3528_vm12, %v3524_v31, %v3532_v40  ;;  %vm2357_vm12 = vcmp.gt.f32.partialorder %v22126_v23, 0.0 }
0x145c   :  { %v3525_v51 = vadd.f32 %v3522_v17, %v3512_v14  ;;  %v22112_v38 = vsel %vm2355_vm11, %v3536_v46, -1e+30  ;;  %v3535_v2 = vsel %vm3527_vm14, %v3523_v25, %v3531_v9 }
0x145d   :  { %v3152_v4 = vmul.f32 0.2, %v3144_v42  ;;  %v3546_v54 = vsel %vm1509_vm5, %v22112_v38, -inf  ;;  %v22118_v26 = vsel %vm2354_vm13, %v3535_v2, -1e+30  ;;  %vm3148_vm15 = vcmp.gt.f32.partialorder %v3144_v42, 0.0 }
0x145e   :  { %v3533_v7 = vmul.f32 0.2, %v3525_v51  ;;  %v3133_v28 = vpop.permute.xlu0 %3132  ;;  %3547 = vmax.xlane.f32.xlu1 %v3546_v54  ;;  %v3543_v29 = vsel %vm1509_vm5, %v22118_v26, -inf  ;;  %vm3529_vm3 = vcmp.gt.f32.partialorder %v3525_v51, 0.0 }
0x145f   :  { %v3146_v30 = vadd.f32 %v3143_v35, %v3133_v28  ;;  %3544 = vmax.xlane.f32.xlu0 %v3543_v29  ;;  %v3517_v5 = vpop.permute.xlu1 %3516  ;;  %v3156_v1 = vsel %vm3148_vm15, %v3144_v42, %v3152_v4 }
0x1460   :  { %v3526_v31 = vadd.f32 %v3522_v17, %v3517_v5  ;;  %v3160_v32 = vsel %vm2354_vm13, %v3156_v1, -1e+30  ;;  %v3537_v25 = vsel %vm3529_vm3, %v3525_v51, %v3533_v7 }
0x1461   :  { %v3154_v40 = vmul.f32 0.2, %v3146_v30  ;;  %v3164_v9 = vsel %vm1509_vm5, %v3160_v32, -inf  ;;  %v3541_v41 = vsel %vm2356_vm2, %v3537_v25, -1e+30  ;;  %vm3150_vm6 = vcmp.gt.f32.partialorder %v3146_v30, 0.0 }
0x1462   :  { %v3534_v14 = vmul.f32 0.2, %v3526_v31  ;;  %3165 = vmax.xlane.f32.xlu1 %v3164_v9  ;;  %v3549_v42 = vsel %vm1509_vm5, %v3541_v41, -inf  ;;  %vm3530_vm14 = vcmp.gt.f32.partialorder %v3526_v31, 0.0  ;;  %v3968_v2 = vpop.permute.xlu0 %3967 }
0x1463   :  { %3550 = vmax.xlane.f32.xlu0 %v3549_v42  ;;  %v3128_v17 = vpop.permute.xlu1 %3127  ;;  %v3158_v46 = vsel %vm3150_vm6, %v3146_v30, %v3154_v40  ;;  %v3979_v40 = vsel %vm76_vm0, %v3968_v2, 0.0 }
0x1464   :  { %v3145_v4 = vadd.f32 %v3143_v35, %v3128_v17  ;;  %v3162_v51 = vsel %vm2356_vm2, %v3158_v46, -1e+30  ;;  %v3538_v54 = vsel %vm3530_vm14, %v3526_v31, %v3534_v14 }
0x1465   :  { %v3170_v7 = vsel %vm1509_vm5, %v3162_v51, -inf  ;;  %v3542_v28 = vsel %vm2357_vm12, %v3538_v54, -1e+30 }
0x1466   :  { %v3153_v29 = vmul.f32 0.2, %v3145_v4  ;;  %3171 = vmax.xlane.f32.xlu1 %v3170_v7  ;;  %v3552_v5 = vsel %vm1509_vm5, %v3542_v28, -inf  ;;  %vm3149_vm15 = vcmp.gt.f32.partialorder %v3145_v4, 0.0  ;;  %v3972_v31 = vpop.permute.xlu0 %3971 }
0x1467   :  { %3553 = vmax.xlane.f32.xlu0 %v3552_v5  ;;  %v3138_v1 = vpop.permute.xlu1 %3137  ;;  %v3985_v54 = vsel %vm76_vm0, %v3972_v31, 0.0 }
0x1468   :  { %v3147_v25 = vadd.f32 %v3143_v35, %v3138_v1  ;;  %v3157_v30 = vsel %vm3149_vm15, %v3145_v4, %v3153_v29 }
0x1469   :  { %v3161_v9 = vsel %vm2355_vm11, %v3157_v30, -1e+30 }
0x146a   :  { %v3155_v14 = vmul.f32 0.2, %v3147_v25  ;;  %3980 = vadd.xlane.f32.xlu1 %v3979_v40  ;;  %v3167_v42 = vsel %vm1509_vm5, %v3161_v9, -inf  ;;  %vm3151_vm3 = vcmp.gt.f32.partialorder %v3147_v25, 0.0 }
0x146b   :  { %3168 = vmax.xlane.f32.xlu0 %v3167_v42  ;;  %v3970_v46 = vpop.permute.xlu1 %3969 }
0x146c   :  { %v3159_v17 = vsel %vm3151_vm3, %v3147_v25, %v3155_v14  ;;  %v3982_v4 = vsel %vm76_vm0, %v3970_v46, 0.0 }
0x146d   :  { %v3163_v35 = vsel %vm2357_vm12, %v3159_v17, -1e+30 }
0x146e   :  { %3986 = vadd.xlane.f32.xlu1 %v3985_v54  ;;  %v3173_v2 = vsel %vm1509_vm5, %v3163_v35, -inf }
0x146f   :  { %3174 = vmax.xlane.f32.xlu0 %v3173_v2  ;;  %v3974_v7 = vpop.permute.xlu1 %3973 }
0x1470   :  { %v3988_v29 = vsel %vm76_vm0, %v3974_v7, 0.0 }
0x1473   :  { %3983 = vadd.xlane.f32.xlu0 %v3982_v4 }
0x1477   :  { %3989 = vadd.xlane.f32.xlu0 %v3988_v29 }
0x14eb   :  { %v3548_v5 = vpop.xlane.xlu1 %3547 }
0x14ec   :  { %v3556_v1 = vsub.f32 %v22112_v38, %v3548_v5  ;;  %v3545_v25 = vpop.xlane.xlu0 %3544 }
0x14ed   :  { %v3555_v30 = vsub.f32 %v22118_v26, %v3545_v25 }
0x14ee   :  { %v3561_v40 = vmul.f32 1.442695, %v3556_v1 }
0x14ef   :  { %v3559_v31 = vmul.f32 1.442695, %v3555_v30  ;;  %v3166_v14 = vpop.xlane.xlu1 %3165 }
0x14f0   :  { %20843 = vpow2.f32 %v3561_v40  ;;  %v3176_v42 = vsub.f32 %v3160_v32, %v3166_v14  ;;  %v3551_v17 = vpop.xlane.xlu0 %3550 }
0x14f1   :  { %20845 = vpow2.f32 %v3559_v31  ;;  %v3557_v54 = vsub.f32 %v3541_v41, %v3551_v17 }
0x14f2   :  { %v3180_v46 = vmul.f32 1.442695, %v3176_v42 }
0x14f3   :  { %v3563_v2 = vmul.f32 1.442695, %v3557_v54  ;;  %v3172_v4 = vpop.xlane.xlu1 %3171 }
0x14f4   :  { %20847 = vpow2.f32 %v3180_v46  ;;  %v3178_v7 = vsub.f32 %v3162_v51, %v3172_v4  ;;  %v3554_v29 = vpop.xlane.xlu0 %3553 }
0x14f5   :  { %20849 = vpow2.f32 %v3563_v2  ;;  %v3558_v6 = vsub.f32 %v3542_v28, %v3554_v29 }
0x14f6   :  { %v3184_v38 = vmul.f32 1.442695, %v3178_v7 }
0x14f7   :  { %v3565_v5 = vmul.f32 1.442695, %v3558_v6  ;;  %v3981_v14 = vpop.xlane.xlu1 %3980 }
0x14f8   :  { %20851 = vpow2.f32 %v3184_v38  ;;  %v3169_v26 = vpop.xlane.xlu0 %3168 }
0x14f9   :  { %20853 = vpow2.f32 %v3565_v5  ;;  %v3177_v1 = vsub.f32 %v3161_v9, %v3169_v26 }
0x14fa   :  { %v20844_v25 = vpop.eup %20843 }
0x14fb   :  { %v20846_v30 = vpop.eup %20845  ;;  %v3182_v32 = vmul.f32 1.442695, %v3177_v1  ;;  %v22154_v40 = vmul.f32 %v20844_v25, %v22095_v13  ;;  %v3987_v38 = vpop.xlane.xlu1 %3986 }
0x14fc   :  { %v3175_v41 = vpop.xlane.xlu0 %3174  ;;  %v22157_v31 = vmul.f32 %v20846_v30, %v22100_v21 }
0x14fd   :  { %20855 = vpow2.f32 %v3182_v32  ;;  %v3179_v51 = vsub.f32 %v3163_v35, %v3175_v41  ;;  %v3574_v28 = vsel %vm1509_vm5, %v22154_v40, 0.0 }
0x14fe   :  { %v20848_v6 = vpop.eup %20847  ;;  %3575 = vadd.xlane.f32.xlu0 %v3574_v28  ;;  %v3571_v9 = vsel %vm1509_vm5, %v22157_v31, 0.0 }
0x14ff   :  { %v20850_v42 = vpop.eup %20849  ;;  %v3186_v17 = vmul.f32 1.442695, %v3179_v51  ;;  %3572 = vadd.xlane.f32.xlu1 %v3571_v9  ;;  %v22169_v7 = vmul.f32 %v20848_v6, %v22100_v21 }
0x1500   :  { %v3984_v54 = vpop.xlane.xlu0 %3983  ;;  %v22164_v46 = vmul.f32 %v20850_v42, %v22108_v48 }
0x1501   :  { %20857 = vpow2.f32 %v3186_v17  ;;  %v19796_v2 = vpack.c.bf16 %v3984_v54, %v3981_v14  ;;  %v3192_v30 = vsel %vm1509_vm5, %v22169_v7, 0.0  ;;  %v22195_v17 = vpack.c.bf16 %v21849_v44, %v21851_v52 }
0x1502   :  { %v20852_v4 = vpop.eup %20851  ;;  %v3577_v35 = vsel %vm1509_vm5, %v22164_v46, 0.0 }
0x1503   :  { %v20854_v29 = vpop.eup %20853  ;;  %3578 = vadd.xlane.f32.xlu1 %v3577_v35  ;;  %19797 = vmatprep.subr.bf16.mxu1 %v19796_v2  ;;  %v22176_v32 = vmul.f32 %v20852_v4, %v22108_v48 }
0x1504   :  { %v3990_v5 = vpop.xlane.xlu0 %3989  ;;  %19799 = vmatpush3.bf16.msra.mxu1 %v19796_v2  ;;  %v3570_v26 = vmul.f32 %v20854_v29, %v22126_v23 }
0x1505   :  { %v19800_v1 = vpack.c.bf16 %v3990_v5, %v3987_v38  ;;  %v3198_v6 = vsel %vm1509_vm5, %v22176_v32, 0.0 }
0x1506   :  { %v3580_v25 = vsel %vm1509_vm5, %v3570_v26, 0.0 }
0x1507   :  { %v20856_v41 = vpop.eup %20855  ;;  %3581 = vadd.xlane.f32.xlu0 %v3580_v25  ;;  %3193 = vadd.xlane.f32.xlu1 %v3192_v30 }
0x1508   :  { %19801 = vmatprep.subr.bf16.mxu1 %v19800_v1  ;;  %v3189_v51 = vmul.f32 %v20856_v41, %v22095_v13 }
0x1509   :  { %19803 = vmatpush3.bf16.msra.mxu1 %v19800_v1 }
0x150a   :  { %19805 = vmatprep.subr.bf16.mxu1 %v22064_v43  ;;  %v3195_v28 = vsel %vm1509_vm5, %v3189_v51, 0.0 }
0x150b   :  { %v20858_v14 = vpop.eup %20857  ;;  %3196 = vadd.xlane.f32.xlu0 %v3195_v28  ;;  %3199 = vadd.xlane.f32.xlu1 %v3198_v6 }
0x150c   :  { %18338 = vmatmul.mubr.msk.f32.vlgmr.msra.gmra.mrb[44].mxu1 %vm1509_vm5, %v22032_v57  ;;  %v3191_v9 = vmul.f32 %v20858_v14, %v22126_v23  ;;  %v3874_v57 = vpop.f32.mrb[42].mxu1 }
0x150d   :  { %19807 = vmatpush3.bf16.msra.mxu1 %v22064_v43  ;;  %18340 = vmatprep.mubr.msk.f32.mxu1 %vm1509_vm5, %v22038_v56  ;;  %v18317_v43 = vpop.f32.mrb[43].mxu1 }
0x150e   :  { %19809 = vmatprep.subr.bf16.mxu1 %v22074_v33  ;;  %v3201_v42 = vsel %vm1509_vm5, %v3191_v9, 0.0 }
0x150f   :  { %3202 = vadd.xlane.f32.xlu0 %v3201_v42 }
0x1510   :  { %18341 = vmatmul.mubr.msk.f32.gmra.mrb[46].mxu1 %vm1509_vm5, %v22048_v47 }
0x1511   :  { %19811 = vmatpush3.bf16.msra.mxu1 %v22074_v33 }
0x1512   :  { %19813 = vmatprep.subr.bf16.mxu1 %v22195_v17 }
0x158b   :  { %v3576_v54 = vpop.xlane.xlu0 %3575 }
0x158c   :  { %20859 = vrcp.f32 %v3576_v54  ;;  %v3573_v56 = vpop.xlane.xlu1 %3572 }
0x158d   :  { %20861 = vrcp.f32 %v3573_v56 }
0x1590   :  { %v3579_v2 = vpop.xlane.xlu1 %3578 }
0x1591   :  { %20863 = vrcp.f32 %v3579_v2 }
0x1594   :  { %v3582_v4 = vpop.xlane.xlu0 %3581  ;;  %v3194_v35 = vpop.xlane.xlu1 %3193 }
0x1595   :  { %20865 = vrcp.f32 %v3582_v4 }
0x1596   :  { %v20860_v47 = vpop.eup %20859  ;;  %20867 = vrcp.f32 %v3194_v35 }
0x1597   :  { %v20862_v29 = vpop.eup %20861  ;;  %v3588_v1 = vmul.f32 %v20860_v47, %v22154_v40 }
0x1598   :  { %v3197_v38 = vpop.xlane.xlu0 %3196  ;;  %v3200_v5 = vpop.xlane.xlu1 %3199  ;;  %v3587_v33 = vmul.f32 %v20862_v29, %v22157_v31 }
0x1599   :  { %20869 = vrcp.f32 %v3197_v38 }
0x159a   :  { %20871 = vrcp.f32 %v3200_v5  ;;  %18287 = vmatprep.mubr.msk.f32.mxu0 %vm1509_vm5, %v3587_v33 }
0x159b   :  { %v20864_v25 = vpop.eup %20863  ;;  %18288 = vmatmul.mubr.msk.f32.vlgmr.msra.gmra.mrb[36].mxu0 %vm1509_vm5, %v3588_v1 }
0x159c   :  { %19777 = vmatpush3.bf16.msra.mxu0 %v21914_v18  ;;  %v3203_v30 = vpop.xlane.xlu0 %3202  ;;  %v3589_v41 = vmul.f32 %v20864_v25, %v22164_v46 }
0x159d   :  { %20873 = vrcp.f32 %v3203_v30  ;;  %19779 = vmatprep.subr.bf16.mxu0 %v21935_v24 }
0x159e   :  { %18290 = vmatprep.mubr.msk.f32.mxu0 %vm1509_vm5, %v3589_v41 }
0x159f   :  { %v20866_v31 = vpop.eup %20865 }
0x15a0   :  { %v20868_v28 = vpop.eup %20867  ;;  %19781 = vmatpush3.bf16.msra.mxu0 %v21935_v24  ;;  %v3590_v40 = vmul.f32 %v20866_v31, %v3570_v26 }
0x15a1   :  { %v3208_v6 = vmul.f32 %v20868_v28, %v22169_v7  ;;  %19790 = vmatprep.subr.bf16.mxu0 %v24980_v0  ;;  %v25008_v7 = vmov 0.0  }
0x15a2   :  { %18291 = vmatmul.mubr.msk.f32.gmra.mrb[38].mxu0 %vm1509_vm5, %v3590_v40 }
0x15a3   :  { %v20870_v18 = vpop.eup %20869  ;;  %18301 = vmatprep.mubr.msk.f32.mxu0 %vm1509_vm5, %v3208_v6 }
0x15a4   :  { %v20872_v46 = vpop.eup %20871  ;;  %v3209_v14 = vmul.f32 %v20870_v18, %v3189_v51 }
0x15a5   :  { %v3210_v42 = vmul.f32 %v20872_v46, %v22176_v32 }
0x15a6   :  { %18302 = vmatmul.mubr.msk.f32.vlgmr.msra.gmra.mrb[36].mxu0 %vm1509_vm5, %v3209_v14 }
0x15a7   :  { %v20874_v43 = vpop.eup %20873  ;;  %18304 = vmatprep.mubr.msk.f32.mxu0 %vm1509_vm5, %v3210_v42  ;;  %19792 = vmatpush3.bf16.msra.mxu0 %v21994_v53 }
0x15a8   :  { %v3211_v24 = vmul.f32 %v20874_v43, %v3191_v9  ;;  %19793 = vmatprep.subr.bf16.mxu0 %v24980_v0 }
0x15aa   :  { %18305 = vmatmul.mubr.msk.f32.gmra.mrb[38].mxu0 %vm1509_vm5, %v3211_v24 }
0x15ab   :  { %19795 = vmatpush3.bf16.msra.mxu0 %v22004_v27  ;;  %18326 = vmatprep.mubr.msk.f32.mxu0 %vm21383_vm9, %v25008_v7 }
0x15ae   :  { %18327 = vmatmul.mubr.msk.f32.vlgmr.msra.gmra.mrb[40].mxu0 %vm1509_vm5, %v3874_v57 }
0x15df   :  { %v18339_v26 = vpop.f32.mrb[44].mxu1 }
0x15e0   :  { %4083 = vperm.xlu0 %20677, %v18339_v26   ;;  %v4057_v32 = vpop.f32.mrb[45].mxu1 }
0x15e1   :  { %4078 = vperm.xlu1 %20678, %v4057_v32  }
0x15e3   :  { %v18342_v51 = vpop.f32.mrb[46].mxu1 }
0x15e4   :  { %v4067_v54 = vpop.f32.mrb[47].mxu1 }
0x15e5   :  { %4088 = vperm.xlu1 %20678, %v4067_v54  }
0x15e9   :  { %4093 = vperm.xlu1 %20678, %v18342_v51  }
0x165f   :  { %v4084_v5 = vpop.permute.xlu0 %4083 }
0x1660   :  { %v4079_v9 = vpop.permute.xlu1 %4078 }
0x1664   :  { %v4089_v4 = vpop.permute.xlu1 %4088 }
0x1668   :  { %v4094_v33 = vpop.permute.xlu1 %4093 }
0x1679   :  { %v22222_v56 = vpop.f32.mrb[36].mxu0 }
0x167a   :  { %v22224_v2 = vpop.f32.mrb[37].mxu0 }
0x167d   :  { %v22226_v35 = vpop.f32.mrb[38].mxu0 }
0x167e   :  { %v22228_v47 = vpop.f32.mrb[39].mxu0 }
0x1681   :  { %v3947_v29 = vpop.f32.mrb[40].mxu0 }
0x1682   :  { %v4099_v57 = vrot.slane %v3947_v29, %v21712_v59  ;;  %v18328_v38 = vpop.f32.mrb[41].mxu0 }
0x1684   :  { %v4101_v1 = vadd.f32 %v4099_v57, %v4084_v5  ;;  %v4100_v25 = vadd.f32 %v4099_v57, %v4079_v9  ;;  %v4102_v30 = vadd.f32 %v4099_v57, %v4089_v4  ;;  %v4103_v41 = vadd.f32 %v4099_v57, %v4094_v33 }
0x1686   :  { %vm4105_vm6 = vcmp.gt.f32.partialorder %v4101_v1, 0.0  ;;  %v4109_v31 = vmul.f32 0.2, %v4101_v1  ;;  %vm4104_vm14 = vcmp.gt.f32.partialorder %v4100_v25, 0.0  ;;  %v4108_v28 = vmul.f32 0.2, %v4100_v25 }
0x1687   :  { %vm4106_vm15 = vcmp.gt.f32.partialorder %v4102_v30, 0.0  ;;  %v4110_v40 = vmul.f32 0.2, %v4102_v30  ;;  %v4111_v46 = vmul.f32 0.2, %v4103_v41  ;;  %vm4107_vm3 = vcmp.gt.f32.partialorder %v4103_v41, 0.0 }
0x1688   :  { %v4113_v6 = vsel %vm4105_vm6, %v4101_v1, %v4109_v31  ;;  %v4112_v18 = vsel %vm4104_vm14, %v4100_v25, %v4108_v28 }
0x1689   :  { %v4117_v14 = vsel %vm2355_vm11, %v4113_v6, -1e+30  ;;  %v4116_v42 = vsel %vm2354_vm13, %v4112_v18, -1e+30  ;;  %v4114_v43 = vsel %vm4106_vm15, %v4102_v30, %v4110_v40  ;;  %v4115_v51 = vsel %vm4107_vm3, %v4103_v41, %v4111_v46 }
0x168a   :  { %v4123_v24 = vsel %vm1509_vm5, %v4117_v14, -inf  ;;  %v4120_v26 = vsel %vm1509_vm5, %v4116_v42, -inf  ;;  %v4118_v32 = vsel %vm2356_vm2, %v4114_v43, -1e+30  ;;  %v4119_v9 = vsel %vm2357_vm12, %v4115_v51, -1e+30 }
0x168b   :  { %4124 = vmax.xlane.f32.xlu1 %v4123_v24  ;;  %4121 = vmax.xlane.f32.xlu0 %v4120_v26  ;;  %v4126_v54 = vsel %vm1509_vm5, %v4118_v32, -inf  ;;  %v4129_v4 = vsel %vm1509_vm5, %v4119_v9, -inf }
0x168f   :  { %4127 = vmax.xlane.f32.xlu0 %v4126_v54 }
0x1693   :  { %4130 = vmax.xlane.f32.xlu0 %v4129_v4 }
0x1718   :  { %v4125_v29 = vpop.xlane.xlu1 %4124  ;;  %v4122_v57 = vpop.xlane.xlu0 %4121 }
0x1719   :  { %v4133_v38 = vsub.f32 %v4117_v14, %v4125_v29  ;;  %v4132_v5 = vsub.f32 %v4116_v42, %v4122_v57 }
0x171b   :  { %v4138_v33 = vmul.f32 1.442695, %v4133_v38  ;;  %v4136_v1 = vmul.f32 1.442695, %v4132_v5 }
0x171c   :  { %v4128_v25 = vpop.xlane.xlu0 %4127 }
0x171d   :  { %20875 = vpow2.f32 %v4138_v33  ;;  %v4134_v30 = vsub.f32 %v4118_v32, %v4128_v25 }
0x171e   :  { %20877 = vpow2.f32 %v4136_v1 }
0x171f   :  { %v4140_v41 = vmul.f32 1.442695, %v4134_v30 }
0x1720   :  { %v4131_v31 = vpop.xlane.xlu0 %4130 }
0x1721   :  { %20879 = vpow2.f32 %v4140_v41  ;;  %v4135_v28 = vsub.f32 %v4119_v9, %v4131_v31  ;;  %v22255_v41 = vpack.c.bf16 %v21855_v49, %v21859_v50 }
0x1723   :  { %v4142_v40 = vmul.f32 1.442695, %v4135_v28  ;;  %25009 = vst [vmem:[#allocation7_spill] sm:$0xff] %v22255_v41  ;;  %v2278_v28 = vld [vmem:[%s24970_s14] sm:$0xff] }
0x1725   :  { %20881 = vpow2.f32 %v4142_v40 }
0x1727   :  { %v20876_v6 = vpop.eup %20875 }
0x1728   :  { %v20878_v18 = vpop.eup %20877  ;;  %v4145_v46 = vmul.f32 %v20876_v6, %v22095_v13 }
0x1729   :  { %v4144_v43 = vmul.f32 %v20878_v18, %v22100_v21  ;;  %v2279_v18 = vld [vmem:[%s24970_s14 + $0x8] sm:$0xff] }
0x172a   :  { %v4151_v14 = vsel %vm1509_vm5, %v4145_v46, 0.0 }
0x172b   :  { %v20880_v42 = vpop.eup %20879  ;;  %4152 = vadd.xlane.f32.xlu0 %v4151_v14  ;;  %v4148_v24 = vsel %vm1509_vm5, %v4144_v43, 0.0  ;;  %v22277_v14 = vmul.f32 %v21894_v8, %v2279_v18  ;;  %v2340_v8 = vld [vmem:[%s24971_s18] sm:$0xff] }
0x172c   :  { %4149 = vadd.xlane.f32.xlu1 %v4148_v24  ;;  %v4146_v26 = vmul.f32 %v20880_v42, %v22108_v48  ;;  %v2281_v42 = vld [vmem:[%s24970_s14 + $0x18] sm:$0xff]  ;;  %18371 = vmatprep.subr.mxu0 %v2340_v8 }
0x172d   :  { %v22290_v24 = vmul.f32 %v21898_v11, %v2281_v42  ;;  %18372 = vmatpush3.msra.mxu0 %v2340_v8 }
0x172e   :  { %v4154_v32 = vsel %vm1509_vm5, %v4146_v26, 0.0  ;;  %19824 = vmatprep.subr.bf16.mxu0 %v24980_v0 }
0x172f   :  { %v20882_v51 = vpop.eup %20881 }
0x1730   :  { %4155 = vadd.xlane.f32.xlu1 %v4154_v32  ;;  %v4147_v54 = vmul.f32 %v20882_v51, %v22126_v23  ;;  %v21329_v23 = vld [vmem:[%s24958_s12 + $0x18] sm:$0xff] }
0x1732   :  { %v4157_v9 = vsel %vm1509_vm5, %v4147_v54, 0.0 }
0x1733   :  { %4158 = vadd.xlane.f32.xlu0 %v4157_v9 }
0x17b8   :  { %v4153_v4 = vpop.xlane.xlu0 %4152 }
0x17b9   :  { %v4150_v29 = vpop.xlane.xlu1 %4149  ;;  %20883 = vrcp.f32 %v4153_v4 }
0x17ba   :  { %20885 = vrcp.f32 %v4150_v29 }
0x17bd   :  { %v4156_v57 = vpop.xlane.xlu1 %4155 }
0x17be   :  { %20887 = vrcp.f32 %v4156_v57 }
0x17c0   :  { %v4159_v38 = vpop.xlane.xlu0 %4158 }
0x17c1   :  { %20889 = vrcp.f32 %v4159_v38 }
0x17c3   :  { %v20884_v5 = vpop.eup %20883 }
0x17c4   :  { %v20886_v33 = vpop.eup %20885  ;;  %v4165_v1 = vmul.f32 %v20884_v5, %v4145_v46  ;;  %v22267_v46 = vmul.f32 %v21896_v16, %v2278_v28 }
0x17c5   :  { %v4164_v25 = vmul.f32 %v20886_v33, %v4144_v43  ;;  %v2280_v43 = vld [vmem:[%s24970_s14 + $0x10] sm:$0xff] }
0x17c6   :  { %v22283_v16 = vmul.f32 %v21900_v12, %v2280_v43  ;;  %v2338_v33 = vld [vmem:[%s24968_s17 + $0x30] sm:$0xff] }
0x17c7   :  { %18351 = vmatprep.mubr.msk.f32.mxu1 %vm1509_vm5, %v4164_v25 }
0x17c8   :  { %v20888_v30 = vpop.eup %20887  ;;  %18352 = vmatmul.mubr.msk.f32.vlgmr.msra.gmra.mrb[48].mxu1 %vm1509_vm5, %v4165_v1 }
0x17c9   :  { %19815 = vmatpush3.bf16.msra.mxu1 %v22195_v17  ;;  %v4166_v31 = vmul.f32 %v20888_v30, %v4146_v26  ;;  %v4280_v30 = vrot.slane %v2338_v33, %v21712_v59 }
0x17ca   :  { %19817 = vmatprep.subr.bf16.mxu1 %v22255_v41 }
0x17cb   :  { %v20890_v40 = vpop.eup %20889  ;;  %18354 = vmatprep.mubr.msk.f32.mxu1 %vm1509_vm5, %v4166_v31 }
0x17cc   :  { %v4167_v6 = vmul.f32 %v20890_v40, %v4147_v54 }
0x17cd   :  { %19819 = vmatpush3.bf16.msra.mxu1 %v22255_v41 }
0x17ce   :  { %18355 = vmatmul.mubr.msk.f32.gmra.mrb[50].mxu1 %vm1509_vm5, %v4167_v6 }
0x17cf   :  { %18365 = vmatprep.mubr.msk.f32.mxu1 %vm1509_vm5, %v22267_v46 }
0x17d2   :  { %18366 = vmatmul.mubr.msk.f32.vlgmr.msra.gmra.mrb[52].mxu1 %vm1509_vm5, %v22277_v14 }
0x17d3   :  { %18368 = vmatprep.mubr.msk.f32.mxu1 %vm1509_vm5, %v22283_v16 }
0x17d6   :  { %18369 = vmatmul.mubr.msk.f32.gmra.mrb[54].mxu1 %vm1509_vm5, %v22290_v24 }
0x189b   :  { %v18353_v12 = vpop.f32.mrb[48].mxu1 }
0x189c   :  { %v20524_v26 = vadd.f32 %v18353_v12, %v22222_v56  ;;  %v4250_v32 = vpop.f32.mrb[49].mxu1  ;;  %v2319_v56 = vld [vmem:[%s24967_s16 + $0x10] sm:$0xff] }
0x189d   :  { %v20525_v51 = vadd.f32 %v4250_v32, %v22224_v2  ;;  %v2320_v2 = vld [vmem:[%s24967_s16 + $0x18] sm:$0xff] }
0x189e   :  { %v4274_v25 = vmul.f32 0.33333334, %v20524_v26 }
0x189f   :  { %v4273_v31 = vmul.f32 0.33333334, %v20525_v51 }
0x18a0   :  { %v4282_v43 = vadd.f32 %v4280_v30, %v4274_v25 }
0x18a1   :  { %v18356_v54 = vpop.f32.mrb[50].mxu1  ;;  %v4281_v8 = vadd.f32 %v4280_v30, %v4273_v31 }
0x18a2   :  { %v20526_v11 = vadd.f32 %v18356_v54, %v22226_v35  ;;  %v4260_v9 = vpop.f32.mrb[51].mxu1  ;;  %v19820_v35 = vpack.c.bf16 %v2320_v2, %v2319_v56  ;;  %v2315_v2 = vld [vmem:[%s24966_s15 + $0x8] sm:$0xff] }
0x18a3   :  { %v20527_v4 = vadd.f32 %v4260_v9, %v22228_v47  ;;  %v2339_v47 = vld [vmem:[%s24968_s17 + $0x38] sm:$0xff] }
0x18a4   :  { %19821 = vmatprep.subr.bf16.mxu1 %v19820_v35  ;;  %v4385_v1 = vrot.slane %v2339_v47, %v21712_v59  ;;  %v4276_v54 = vmul.f32 0.33333334, %v20526_v11 }
0x18a5   :  { %v18367_v29 = vpop.f32.mrb[52].mxu1  ;;  %19823 = vmatpush3.bf16.msra.mxu1 %v19820_v35 }
0x18a6   :  { %v4363_v57 = vpop.f32.mrb[53].mxu1  ;;  %19832 = vmatprep.subr.bf16.mxu1 %v24980_v0 }
0x18a7   :  { %18373 = vmatprep.mubr.msk.f32.mxu0 %vm1421_vm4, %v4363_v57  ;;  %v4275_v57 = vmul.f32 0.33333334, %v20527_v4  ;;  %v2662_v4 = vrot.slane %v2315_v2, %v21712_v59 }
0x18a8   :  { %18374 = vmatmul.mubr.msk.f32.vlgmr.msra.gmra.mrb[42].mxu0 %vm1421_vm4, %v18367_v29 }
0x18a9   :  { %v18370_v38 = vpop.f32.mrb[54].mxu1  ;;  %v4283_v56 = vadd.f32 %v4280_v30, %v4275_v57 }
0x18aa   :  { %v4373_v5 = vpop.f32.mrb[55].mxu1 }
0x18ab   :  { %18376 = vmatprep.mubr.msk.f32.mxu0 %vm1421_vm4, %v4373_v5  ;;  %v4284_v5 = vadd.f32 %v4280_v30, %v4276_v54  ;;  %v2747_v30 = vadd.f32 %v21880_v55, %v2662_v4 }
0x18ac   :  { %18377 = vmatmul.mubr.msk.f32.gmra.mrb[44].mxu0 %vm1421_vm4, %v18370_v38 }
0x18ad   :  { %18397 = vmatprep.mubr.msk.f32.mxu0 %vm21383_vm9, %v25008_v7 }
0x197b   :  { %v18375_v28 = vpop.f32.mrb[42].mxu0 }
0x197c   :  { %v4470_v40 = vadd.f32 %v18375_v28, %v4385_v1  ;;  %v4464_v6 = vpop.f32.mrb[43].mxu0 }
0x197d   :  { %v4465_v18 = vadd.f32 %v4464_v6, %v4385_v1 }
0x197e   :  { %v4484_v42 = vmul.f32 0.5, %v4470_v40 }
0x197f   :  { %v4483_v12 = vmul.f32 0.5, %v4465_v18  ;;  %v18378_v32 = vpop.f32.mrb[44].mxu0 }
0x1980   :  { %20891 = vtanh.f32 %v4484_v42  ;;  %v4480_v9 = vadd.f32 %v18378_v32, %v4385_v1  ;;  %v4474_v29 = vpop.f32.mrb[45].mxu0 }
0x1981   :  { %20893 = vtanh.f32 %v4483_v12  ;;  %v4475_v38 = vadd.f32 %v4474_v29, %v4385_v1 }
0x1982   :  { %20895 = vtanh.f32 %v4282_v43  ;;  %v4486_v26 = vmul.f32 0.5, %v4480_v9 }
0x1983   :  { %20897 = vtanh.f32 %v4281_v8  ;;  %v4485_v51 = vmul.f32 0.5, %v4475_v38  ;;  %v2742_v8 = vadd.f32 %v21882_v60, %v2662_v4 }
0x1984   :  { %20899 = vtanh.f32 %v4486_v26 }
0x1985   :  { %20901 = vtanh.f32 %v4485_v51 }
0x1986   :  { %20903 = vtanh.f32 %v4284_v5  ;;  %v2757_v5 = vadd.f32 %v21884_v61, %v2662_v4 }
0x1987   :  { %20905 = vtanh.f32 %v4283_v56 }
0x198a   :  { %v20892_v11 = vpop.eup %20891 }
0x198b   :  { %v20894_v35 = vpop.eup %20893  ;;  %v4492_v47 = vadd.f32 1.0, %v20892_v11  ;;  %v2752_v11 = vadd.f32 %v21886_v3, %v2662_v4 }
0x198c   :  { %v20896_v33 = vpop.eup %20895  ;;  %v4491_v1 = vadd.f32 1.0, %v20894_v35 }
0x198d   :  { %v20898_v25 = vpop.eup %20897  ;;  %v4496_v31 = vmul.f32 0.5, %v4492_v47 }
0x198e   :  { %v20900_v28 = vpop.eup %20899  ;;  %v4495_v40 = vmul.f32 0.5, %v4491_v1 }
0x198f   :  { %v20902_v6 = vpop.eup %20901  ;;  %v4504_v18 = vmul.f32 %v20896_v33, %v4496_v31  ;;  %v4508_v43 = vsub.f32 1.0, %v4496_v31  ;;  %v4494_v42 = vadd.f32 1.0, %v20900_v28 }
0x1990   :  { %v4503_v12 = vmul.f32 %v20898_v25, %v4495_v40  ;;  %v4507_v32 = vsub.f32 1.0, %v4495_v40  ;;  %v4493_v54 = vadd.f32 1.0, %v20902_v6  ;;  %v20904_v57 = vpop.eup %20903 }
0x1991   :  { %v4512_v9 = vmul.f32 %v4508_v43, %v2747_v30  ;;  %v4498_v29 = vmul.f32 0.5, %v4494_v42  ;;  %v20906_v51 = vpop.eup %20905 }
0x1992   :  { %v4511_v38 = vmul.f32 %v4507_v32, %v2742_v8  ;;  %v4497_v26 = vmul.f32 0.5, %v4493_v54  ;;  %v22371_v8 = vld [vmem:[%s24968_s17 + $0x8] sm:$0xff] }
0x1993   :  { %v22330_v56 = vadd.f32 %v4512_v9, %v4504_v18  ;;  %v4506_v2 = vmul.f32 %v20904_v57, %v4498_v29  ;;  %v4510_v55 = vsub.f32 1.0, %v4498_v29  ;;  %v5140_v32 = vrot.slane %v22371_v8, %v21747_v20  ;;  %v21299_v57 = vld [vmem:[%s24968_s17] sm:$0xff] }
0x1994   :  { %v22333_v35 = vadd.f32 %v4511_v38, %v4503_v12  ;;  %v4505_v60 = vmul.f32 %v20906_v51, %v4497_v26  ;;  %v4509_v47 = vsub.f32 1.0, %v4497_v26  ;;  %v4620_v38 = vrot.slane %v21299_v57, 6 }
0x1995   :  { %20907 = vtanh.f32 %v22330_v56  ;;  %v4514_v33 = vmul.f32 %v4510_v55, %v2757_v5 }
0x1996   :  { %20909 = vtanh.f32 %v22333_v35  ;;  %v4513_v1 = vmul.f32 %v4509_v47, %v2752_v11 }
0x1997   :  { %v22337_v25 = vadd.f32 %v4514_v33, %v4506_v2 }
0x1998   :  { %v22339_v31 = vadd.f32 %v4513_v1, %v4505_v60 }
0x1999   :  { %20911 = vtanh.f32 %v22337_v25 }
0x199a   :  { %20913 = vtanh.f32 %v22339_v31 }
0x199f   :  { %v20908_v61 = vpop.eup %20907 }
0x19a0   :  { %v20910_v3 = vpop.eup %20909 }
0x19a1   :  { %18383 = vmatprep.mubr.msk.f32.mxu1 %vm76_vm0, %v20910_v3  ;;  %v22344_v4 = vpack.c.bf16 %v20908_v61, %v20910_v3 }
0x19a2   :  { %18384 = vmatmul.mubr.msk.f32.vlgmr.msra.gmra.mrb[56].mxu1 %vm76_vm0, %v20908_v61 }
0x19a3   :  { %v20912_v28 = vpop.eup %20911  ;;  %19834 = vmatpush3.bf16.msra.mxu1 %v21994_v53 }
0x19a4   :  { %v20914_v40 = vpop.eup %20913  ;;  %19835 = vmatprep.subr.bf16.mxu1 %v24980_v0 }
0x19a5   :  { %18386 = vmatprep.mubr.msk.f32.mxu1 %vm76_vm0, %v20914_v40  ;;  %v22350_v6 = vpack.c.bf16 %v20912_v28, %v20914_v40  ;;  %v4975_v40 = vrot.slane %v21299_v57, 7 }
0x19a6   :  { %18387 = vmatmul.mubr.msk.f32.gmra.mrb[58].mxu1 %vm76_vm0, %v20912_v28 }
0x19a7   :  { %19837 = vmatpush3.bf16.msra.mxu1 %v22004_v27  ;;  %18408 = vmatprep.mubr.msk.f32.mxu1 %vm21383_vm9, %v25008_v7 }
0x1a75   :  { %v22356_v30 = vpop.f32.mrb[56].mxu1 }
0x1a76   :  { %v22358_v18 = vpop.f32.mrb[57].mxu1 }
0x1a77   :  { %v22362_v43 = vpack.c.bf16 %v22356_v30, %v22358_v18  ;;  %v22366_v42 = vpack.i.bf16 %v22356_v30, %v22358_v18 }
0x1a79   :  { %20680 = vrot.lane.b32.xlu1 %v22366_v42, %s21369_s3  ;;  %v22375_v12 = vpop.f32.mrb[58].mxu1  ;;  %19827 = vmatpush3.bf16.xpose.msk.msra.mxu0 %vm21908_vm10, %v22362_v43 }
0x1a7a   :  { %v22382_v54 = vpop.f32.mrb[59].mxu1  ;;  %19828 = vmatprep.subr.bf16.mxu0 %v24980_v0 }
0x1a7b   :  { %v22387_v9 = vpack.c.bf16 %v22375_v12, %v22382_v54  ;;  %v22391_v29 = vpack.i.bf16 %v22375_v12, %v22382_v54 }
0x1a7d   :  { %5142 = vrot.lane.b32.xlu1 %v5140_v32, %s21385_s2  ;;  %20685 = vrot.lane.b32.xlu0 %v22391_v29, %s21369_s3  ;;  %v4781_v32 = vrot.slane %v22371_v8, %v21744_v19 }
0x1a81   :  { %19831 = vmatpush3.bf16.xpose.msk.msra.mxu0 %vm21908_vm10, %v22387_v9 }
0x1a82   :  { %19846 = vmatprep.subr.bf16.mxu0 %v24980_v0 }
0x1a88   :  { %18398 = vmatmul.mubr.msk.f32.vlgmr.msra.gmra.mrb[46].mxu0 %vm76_vm0, %v4620_v38  ;;  %v4783_v38 = vmul.f32 %v22356_v30, %v4781_v32 }
0x1a89   :  { %18433 = vmatprep.mubr.msk.f32.mxu0 %vm21383_vm9, %v25008_v7 }
0x1aeb   :  { %v20681_v26 = vpop.permute.xlu1 %20680 }
0x1aec   :  { %v20683_v51 = vunpack.i.h.bf16 %v20681_v26  ;;  %v20682_v5 = vunpack.i.l.bf16 %v20681_v26  ;;  %v4789_v26 = vsel %vm76_vm0, %v4783_v38, 0.0 }
0x1aee   :  { %v19847_v2 = vpack.c.bf16 %v20683_v51, %v20682_v5  ;;  %v4784_v51 = vmul.f32 %v4781_v32, %v22382_v54  ;;  %v4782_v5 = vmul.f32 %v4781_v32, %v22358_v18 }
0x1aef   :  { %v5143_v55 = vpop.permute.xlu1 %5142  ;;  %v20686_v11 = vpop.permute.xlu0 %20685 }
0x1af0   :  { %19849 = vmatpush3.bf16.xpose.msk.msra.mxu0 %vm21908_vm10, %v19847_v2  ;;  %v5145_v60 = vmul.f32 %v5143_v55, %v22358_v18  ;;  %v5146_v47 = vmul.f32 %v22356_v30, %v5143_v55  ;;  %v20688_v33 = vunpack.i.h.bf16 %v20686_v11  ;;  %v20687_v1 = vunpack.i.l.bf16 %v20686_v11 }
0x1af1   :  { %19850 = vmatprep.subr.bf16.mxu0 %v24980_v0  ;;  %v5148_v61 = vmul.f32 %v22375_v12, %v5143_v55  ;;  %v5147_v3 = vmul.f32 %v5143_v55, %v22382_v54  ;;  %v4792_v57 = vsel %vm76_vm0, %v4784_v51, 0.0  ;;  %v4785_v55 = vmul.f32 %v22375_v12, %v4781_v32 }
0x1af2   :  { %5153 = vrot.lane.b32.xlu1 %v5145_v60, %s21369_s3  ;;  %5155 = vrot.lane.b32.xlu0 %v5146_v47, %s21369_s3  ;;  %v19851_v28 = vpack.c.bf16 %v20688_v33, %v20687_v1  ;;  %v22435_v33 = vld [vmem:[%s24969_s11 + $0x40] sm:$0xff]  ;;  %v5717_v51 = vrot.slane %v22371_v8, %v21976_v37 }
0x1af3   :  { %v4795_v11 = vsel %vm76_vm0, %v4785_v55, 0.0 }
0x1af6   :  { %5159 = vrot.lane.b32.xlu0 %v5148_v61, %s21369_s3  ;;  %5157 = vrot.lane.b32.xlu1 %v5147_v3, %s21369_s3 }
0x1af8   :  { %19853 = vmatpush3.bf16.xpose.msk.msra.mxu0 %vm21908_vm10, %v19851_v28 }
0x1af9   :  { %19869 = vmatprep.subr.bf16.mxu0 %v19847_v2 }
0x1aff   :  { %18434 = vmatmul.mubr.msk.f32.vlgmr.msra.gmra.mrb[48].mxu0 %vm76_vm0, %v4975_v40 }
0x1b00   :  { %19871 = vmatpush3.bf16.msra.mxu0 %v19847_v2  ;;  %v4786_v2 = vsel %vm76_vm0, %v4782_v5, 0.0 }
0x1b01   :  { %19873 = vmatprep.subr.bf16.mxu0 %v19851_v28 }
0x1b04   :  { %19875 = vmatpush3.bf16.msra.mxu0 %v19851_v28 }
0x1b05   :  { %19877 = vmatprep.subr.bf16.mxu0 %v22362_v43 }
0x1b15   :  { %4790 = vadd.xlane.f32.xlu0 %v4789_v26 }
0x1b19   :  { %4793 = vadd.xlane.f32.xlu0 %v4792_v57 }
0x1b1a   :  { %4787 = vadd.xlane.f32.xlu1 %v4786_v2 }
0x1b1e   :  { %4796 = vadd.xlane.f32.xlu1 %v4795_v11 }
0x1b5b   :  { %v4701_v60 = vpop.f32.mrb[46].mxu0 }
0x1b5c   :  { %18409 = vmatmul.mubr.msk.f32.vlgmr.msra.gmra.mrb[60].mxu1 %vm1509_vm5, %v4701_v60  ;;  %v18399_v47 = vpop.f32.mrb[47].mxu0 }
0x1b5d   :  { %18419 = vmatprep.mubr.msk.f32.mxu1 %vm1509_vm5, %v22435_v33  ;;  %v22470_v47 = vld [vmem:[%s24969_s11 + $0x58] sm:$0xff] }
0x1b64   :  { %v5154_v1 = vpop.permute.xlu1 %5153  ;;  %v5156_v61 = vpop.permute.xlu0 %5155 }
0x1b65   :  { %v5168_v3 = vsel %vm76_vm0, %v5156_v61, 0.0  ;;  %v5165_v28 = vsel %vm76_vm0, %v5154_v1, 0.0 }
0x1b66   :  { %5169 = vadd.xlane.f32.xlu1 %v5168_v3  ;;  %5166 = vadd.xlane.f32.xlu0 %v5165_v28 }
0x1b68   :  { %v5160_v40 = vpop.permute.xlu0 %5159  ;;  %v5158_v32 = vpop.permute.xlu1 %5157 }
0x1b69   :  { %v5174_v38 = vsel %vm76_vm0, %v5160_v40, 0.0  ;;  %v5171_v26 = vsel %vm76_vm0, %v5158_v32, 0.0 }
0x1b6a   :  { %5175 = vadd.xlane.f32.xlu1 %v5174_v38  ;;  %5172 = vadd.xlane.f32.xlu0 %v5171_v26 }
0x1b7b   :  { %20695 = vrot.lane.b32.xlu1 %v22391_v29, %s21370_s4  ;;  %v22454_v29 = vld [vmem:[%s24969_s11 + $0x48] sm:$0xff] }
0x1b7f   :  { %5719 = vrot.lane.b32.xlu1 %v5717_v51, %s21386_s21 }
0x1b80   :  { %20690 = vrot.lane.b32.xlu0 %v22366_v42, %s21370_s4  ;;  %v22462_v42 = vld [vmem:[%s24969_s11 + $0x50] sm:$0xff] }
0x1ba2   :  { %v4791_v5 = vpop.xlane.xlu0 %4790 }
0x1ba6   :  { %v4794_v55 = vpop.xlane.xlu0 %4793 }
0x1ba7   :  { %v4788_v57 = vpop.xlane.xlu1 %4787 }
0x1ba8   :  { %v19838_v2 = vpack.c.bf16 %v4791_v5, %v4788_v57 }
0x1baa   :  { %19839 = vmatprep.subr.bf16.mxu1 %v19838_v2 }
0x1bab   :  { %v4797_v11 = vpop.xlane.xlu1 %4796  ;;  %19841 = vmatpush3.bf16.msra.mxu1 %v19838_v2 }
0x1bac   :  { %v19842_v60 = vpack.c.bf16 %v4797_v11, %v4794_v55 }
0x1bae   :  { %19843 = vmatprep.subr.bf16.mxu1 %v19842_v60 }
0x1baf   :  { %19845 = vmatpush3.bf16.msra.mxu1 %v19842_v60 }
0x1bb0   :  { %19854 = vmatprep.subr.bf16.mxu1 %v24980_v0 }
0x1bb2   :  { %18420 = vmatmul.mubr.msk.f32.vlgmr.msra.gmra.mrb[62].mxu1 %vm1509_vm5, %v22454_v29 }
0x1bb3   :  { %19856 = vmatpush3.bf16.msra.mxu1 %v21994_v53  ;;  %18422 = vmatprep.mubr.msk.f32.mxu1 %vm1509_vm5, %v22462_v42 }
0x1bb4   :  { %19857 = vmatprep.subr.bf16.mxu1 %v24980_v0 }
0x1bb6   :  { %18423 = vmatmul.mubr.msk.f32.gmra.mrb[64].mxu1 %vm1509_vm5, %v22470_v47 }
0x1bb7   :  { %19859 = vmatpush3.bf16.msra.mxu1 %v22004_v27  ;;  %18444 = vmatprep.mubr.msk.f32.mxu1 %vm21383_vm9, %v25008_v7 }
0x1bd2   :  { %v5060_v1 = vpop.f32.mrb[48].mxu0 }
0x1bd3   :  { %18445 = vmatmul.mubr.msk.f32.vlgmr.msra.gmra.mrb[66].mxu1 %vm1509_vm5, %v5060_v1  ;;  %v18435_v61 = vpop.f32.mrb[49].mxu0 }
0x1bd4   :  { %18455 = vmatprep.mubr.msk.f32.mxu1 %vm1509_vm5, %v22435_v33 }
0x1bf3   :  { %v5170_v3 = vpop.xlane.xlu1 %5169  ;;  %v5167_v28 = vpop.xlane.xlu0 %5166 }
0x1bf4   :  { %v19860_v40 = vpack.c.bf16 %v5170_v3, %v5167_v28 }
0x1bf6   :  { %19861 = vmatprep.subr.bf16.mxu1 %v19860_v40 }
0x1bf7   :  { %v5176_v32 = vpop.xlane.xlu1 %5175  ;;  %v5173_v38 = vpop.xlane.xlu0 %5172  ;;  %19863 = vmatpush3.bf16.msra.mxu1 %v19860_v40 }
0x1bf8   :  { %v19864_v26 = vpack.c.bf16 %v5176_v32, %v5173_v38 }
0x1bfa   :  { %19865 = vmatprep.subr.bf16.mxu1 %v19864_v26 }
0x1bfb   :  { %v20691_v51 = vpop.permute.xlu0 %20690  ;;  %19867 = vmatpush3.bf16.msra.mxu1 %v19864_v26  ;;  %v20696_v55 = vpop.permute.xlu1 %20695 }
0x1bfc   :  { %19884 = vmatprep.subr.bf16.mxu1 %v24980_v0  ;;  %v20693_v5 = vunpack.i.h.bf16 %v20691_v51  ;;  %v20692_v57 = vunpack.i.l.bf16 %v20691_v51  ;;  %v20698_v11 = vunpack.i.h.bf16 %v20696_v55  ;;  %v20697_v60 = vunpack.i.l.bf16 %v20696_v55 }
0x1bfe   :  { %18456 = vmatmul.mubr.msk.f32.vlgmr.msra.gmra.mrb[68].mxu1 %vm1509_vm5, %v22454_v29  ;;  %v22485_v2 = vpack.c.bf16 %v20693_v5, %v20692_v57  ;;  %v22495_v1 = vpack.c.bf16 %v20698_v11, %v20697_v60 }
0x1bff   :  { %18458 = vmatprep.mubr.msk.f32.mxu1 %vm1509_vm5, %v22462_v42 }
0x1c02   :  { %18459 = vmatmul.mubr.msk.f32.gmra.mrb[70].mxu1 %vm1509_vm5, %v22470_v47 }
0x1c03   :  { %18497 = vmatprep.mubr.msk.f32.mxu1 %vm21383_vm9, %v25008_v7 }
0x1c04   :  { %19887 = vmatpush3.bf16.xpose.msk.msra.mxu1 %vm21908_vm10, %v22485_v2 }
0x1c05   :  { %19888 = vmatprep.subr.bf16.mxu1 %v24980_v0 }
0x1c0c   :  { %19891 = vmatpush3.bf16.xpose.msk.msra.mxu1 %vm21908_vm10, %v22495_v1 }
0x1c13   :  { %18498 = vmatmul.mubr.msk.f32.vlgmr.msra.gmra.mrb[72].mxu1 %vm76_vm0, %v22371_v8  ;;  %v5720_v8 = vpop.permute.xlu1 %5719 }
0x1c14   :  { %18519 = vmatprep.mubr.msk.f32.mxu1 %vm1509_vm5, %v22435_v33  ;;  %v5723_v33 = vmul.f32 %v22356_v30, %v5720_v8  ;;  %v5722_v60 = vmul.f32 %v5720_v8, %v22358_v18 }
0x1c2f   :  { %v4774_v61 = vpop.f32.mrb[60].mxu1 }
0x1c30   :  { %v18410_v3 = vpop.f32.mrb[61].mxu1 }
0x1c31   :  { %v5725_v3 = vmul.f32 %v22375_v12, %v5720_v8 }
0x1c85   :  { %v18421_v28 = vpop.f32.mrb[62].mxu1 }
0x1c86   :  { %v4864_v40 = vpop.f32.mrb[63].mxu1 }
0x1c89   :  { %v18424_v32 = vpop.f32.mrb[64].mxu1 }
0x1c8a   :  { %v4874_v38 = vpop.f32.mrb[65].mxu1 }
0x1ca6   :  { %v5133_v26 = vpop.f32.mrb[66].mxu1 }
0x1ca7   :  { %v18446_v51 = vpop.f32.mrb[67].mxu1 }
0x1ca8   :  { %v5724_v51 = vmul.f32 %v5720_v8, %v22382_v54  ;;  %v4906_v54 = vrot.slane %v4774_v61, %v21712_v59 }
0x1cd1   :  { %v18457_v5 = vpop.f32.mrb[68].mxu1 }
0x1cd2   :  { %5269 = vperm.xlu1 %20678, %v18457_v5   ;;  %v5243_v57 = vpop.f32.mrb[69].mxu1 }
0x1cd3   :  { %5264 = vperm.xlu0 %20677, %v5243_v57  }
0x1cd5   :  { %v18460_v55 = vpop.f32.mrb[70].mxu1 }
0x1cd6   :  { %5279 = vperm.xlu1 %20678, %v18460_v55   ;;  %v5253_v11 = vpop.f32.mrb[71].mxu1 }
0x1cd7   :  { %5274 = vperm.xlu0 %20677, %v5253_v11  }
0x1cda   :  { %4890 = vperm.xlu1 %20678, %v18421_v28   ;;  %v5285_v28 = vrot.slane %v5133_v26, %v21712_v59 }
0x1cdb   :  { %4885 = vperm.xlu0 %20677, %v4864_v40  }
0x1cde   :  { %4900 = vperm.xlu1 %20678, %v18424_v32  }
0x1cdf   :  { %4895 = vperm.xlu0 %20677, %v4874_v38  }
0x1ce2   :  { %5732 = vrot.lane.b32.xlu1 %v5723_v33, %s21370_s4 }
0x1ce3   :  { %5730 = vrot.lane.b32.xlu0 %v5722_v60, %s21370_s4 }
0x1ce6   :  { %5736 = vrot.lane.b32.xlu1 %v5725_v3, %s21370_s4 }
0x1ce7   :  { %5734 = vrot.lane.b32.xlu0 %v5724_v51, %s21370_s4 }
0x1d51   :  { %v5270_v40 = vpop.permute.xlu1 %5269 }
0x1d52   :  { %v5287_v32 = vadd.f32 %v5285_v28, %v5270_v40  ;;  %v5265_v38 = vpop.permute.xlu0 %5264 }
0x1d53   :  { %v5286_v30 = vadd.f32 %v5285_v28, %v5265_v38 }
0x1d54   :  { %v5295_v5 = vmul.f32 0.2, %v5287_v32  ;;  %vm5291_vm6 = vcmp.gt.f32.partialorder %v5287_v32, 0.0 }
0x1d55   :  { %v5294_v18 = vmul.f32 0.2, %v5286_v30  ;;  %v5280_v57 = vpop.permute.xlu1 %5279  ;;  %vm5290_vm14 = vcmp.gt.f32.partialorder %v5286_v30, 0.0 }
0x1d56   :  { %v5289_v55 = vadd.f32 %v5285_v28, %v5280_v57  ;;  %v5275_v11 = vpop.permute.xlu0 %5274  ;;  %v5299_v12 = vsel %vm5291_vm6, %v5287_v32, %v5295_v5 }
0x1d57   :  { %v5288_v8 = vadd.f32 %v5285_v28, %v5275_v11  ;;  %v22516_v33 = vsel %vm2355_vm11, %v5299_v12, -1e+30  ;;  %v5298_v26 = vsel %vm5290_vm14, %v5286_v30, %v5294_v18 }
0x1d58   :  { %v5297_v60 = vmul.f32 0.2, %v5289_v55  ;;  %v5309_v3 = vsel %vm1509_vm5, %v22516_v33, -inf  ;;  %v22522_v51 = vsel %vm2354_vm13, %v5298_v26, -1e+30  ;;  %vm5293_vm15 = vcmp.gt.f32.partialorder %v5289_v55, 0.0 }
0x1d59   :  { %v5296_v40 = vmul.f32 0.2, %v5288_v8  ;;  %5310 = vmax.xlane.f32.xlu1 %v5309_v3  ;;  %v4891_v32 = vpop.permute.xlu1 %4890  ;;  %v5306_v61 = vsel %vm1509_vm5, %v22522_v51, -inf  ;;  %vm5292_vm3 = vcmp.gt.f32.partialorder %v5288_v8, 0.0 }
0x1d5a   :  { %v4908_v28 = vadd.f32 %v4906_v54, %v4891_v32  ;;  %5307 = vmax.xlane.f32.xlu0 %v5306_v61  ;;  %v4886_v38 = vpop.permute.xlu0 %4885  ;;  %v5301_v18 = vsel %vm5293_vm15, %v5289_v55, %v5297_v60 }
0x1d5b   :  { %v4907_v30 = vadd.f32 %v4906_v54, %v4886_v38  ;;  %v5300_v5 = vsel %vm5292_vm3, %v5288_v8, %v5296_v40  ;;  %v5305_v32 = vsel %vm2357_vm12, %v5301_v18, -1e+30 }
0x1d5c   :  { %v4916_v57 = vmul.f32 0.2, %v4908_v28  ;;  %v5304_v11 = vsel %vm2356_vm2, %v5300_v5, -1e+30  ;;  %vm4912_vm6 = vcmp.gt.f32.partialorder %v4908_v28, 0.0  ;;  %v5315_v5 = vsel %vm1509_vm5, %v5305_v32, -inf }
0x1d5d   :  { %v4915_v12 = vmul.f32 0.2, %v4907_v30  ;;  %v4901_v26 = vpop.permute.xlu1 %4900  ;;  %v5312_v3 = vsel %vm1509_vm5, %v5304_v11, -inf  ;;  %vm4911_vm14 = vcmp.gt.f32.partialorder %v4907_v30, 0.0 }
0x1d5e   :  { %v4910_v0 = vadd.f32 %v4906_v54, %v4901_v26  ;;  %5313 = vmax.xlane.f32.xlu0 %v5312_v3  ;;  %v4896_v62 = vpop.permute.xlu0 %4895  ;;  %v4920_v8 = vsel %vm4912_vm6, %v4908_v28, %v4916_v57 }
0x1d5f   :  { %v4909_v61 = vadd.f32 %v4906_v54, %v4896_v62  ;;  %v4919_v38 = vsel %vm4911_vm14, %v4907_v30, %v4915_v12  ;;  %v4924_v26 = vsel %vm2355_vm11, %v4920_v8, -1e+30 }
0x1d60   :  { %v4918_v55 = vmul.f32 0.2, %v4910_v0  ;;  %v4923_v60 = vsel %vm2354_vm13, %v4919_v38, -1e+30  ;;  %vm4914_vm15 = vcmp.gt.f32.partialorder %v4910_v0, 0.0  ;;  %v4930_v30 = vsel %vm1509_vm5, %v4924_v26, -inf }
0x1d61   :  { %v4917_v40 = vmul.f32 0.2, %v4909_v61  ;;  %v4927_v63 = vsel %vm1509_vm5, %v4923_v60, -inf  ;;  %vm4913_vm3 = vcmp.gt.f32.partialorder %v4909_v61, 0.0  ;;  %v5733_v3 = vpop.permute.xlu1 %5732 }
0x1d62   :  { %5316 = vmax.xlane.f32.xlu0 %v5315_v5  ;;  %4928 = vmax.xlane.f32.xlu1 %v4927_v63  ;;  %v4922_v62 = vsel %vm4914_vm15, %v4910_v0, %v4918_v55  ;;  %v5731_v54 = vpop.permute.xlu0 %5730  ;;  %v5745_v0 = vsel %vm76_vm0, %v5733_v3, 0.0 }
0x1d63   :  { %v4921_v18 = vsel %vm4913_vm3, %v4909_v61, %v4917_v40  ;;  %v4926_v12 = vsel %vm2357_vm12, %v4922_v62, -1e+30  ;;  %v5742_v38 = vsel %vm76_vm0, %v5731_v54, 0.0 }
0x1d64   :  { %v4925_v28 = vsel %vm2356_vm2, %v4921_v18, -1e+30  ;;  %v4936_v63 = vsel %vm1509_vm5, %v4926_v12, -inf }
0x1d65   :  { %v4933_v57 = vsel %vm1509_vm5, %v4925_v28, -inf  ;;  %v5737_v55 = vpop.permute.xlu1 %5736 }
0x1d66   :  { %4931 = vmax.xlane.f32.xlu0 %v4930_v30  ;;  %4934 = vmax.xlane.f32.xlu1 %v4933_v57  ;;  %v5735_v61 = vpop.permute.xlu0 %5734  ;;  %v5751_v40 = vsel %vm76_vm0, %v5737_v55, 0.0 }
0x1d67   :  { %v5748_v8 = vsel %vm76_vm0, %v5735_v61, 0.0 }
0x1d6a   :  { %4937 = vmax.xlane.f32.xlu0 %v4936_v63  ;;  %5743 = vadd.xlane.f32.xlu1 %v5742_v38 }
0x1d6e   :  { %5746 = vadd.xlane.f32.xlu0 %v5745_v0  ;;  %5749 = vadd.xlane.f32.xlu1 %v5748_v8 }
0x1d72   :  { %5752 = vadd.xlane.f32.xlu0 %v5751_v40 }
0x1de6   :  { %v5311_v5 = vpop.xlane.xlu1 %5310 }
0x1de7   :  { %v5319_v18 = vsub.f32 %v22516_v33, %v5311_v5  ;;  %v5308_v62 = vpop.xlane.xlu0 %5307 }
0x1de8   :  { %v5318_v30 = vsub.f32 %v22522_v51, %v5308_v62 }
0x1de9   :  { %v5324_v54 = vmul.f32 1.442695, %v5319_v18 }
0x1dea   :  { %v5322_v57 = vmul.f32 1.442695, %v5318_v30 }
0x1deb   :  { %20915 = vpow2.f32 %v5324_v54  ;;  %v5314_v63 = vpop.xlane.xlu0 %5313 }
0x1dec   :  { %20917 = vpow2.f32 %v5322_v57  ;;  %v5320_v3 = vsub.f32 %v5304_v11, %v5314_v63  ;;  %v22553_v11 = vld [vmem:[%s24969_s11 + $0x8] sm:$0xff] }
0x1dee   :  { %v5326_v38 = vmul.f32 1.442695, %v5320_v3 }
0x1def   :  { %v4929_v61 = vpop.xlane.xlu1 %4928  ;;  %v5317_v36 = vpop.xlane.xlu0 %5316 }
0x1df0   :  { %20919 = vpow2.f32 %v5326_v38  ;;  %v4939_v0 = vsub.f32 %v4923_v60, %v4929_v61  ;;  %v5321_v8 = vsub.f32 %v5305_v32, %v5317_v36  ;;  %v22561_v32 = vld [vmem:[%s24969_s11] sm:$0xff]  ;;  %v22573_v38 = vld [vmem:[%s24969_s11 + $0x10] sm:$0xff] }
0x1df2   :  { %v4943_v55 = vmul.f32 1.442695, %v4939_v0  ;;  %v5328_v40 = vmul.f32 1.442695, %v5321_v8 }
0x1df3   :  { %v4935_v39 = vpop.xlane.xlu1 %4934  ;;  %v4932_v41 = vpop.xlane.xlu0 %4931 }
0x1df4   :  { %20921 = vpow2.f32 %v4943_v55  ;;  %v4941_v33 = vsub.f32 %v4925_v28, %v4935_v39  ;;  %v4940_v5 = vsub.f32 %v4924_v26, %v4932_v41 }
0x1df5   :  { %v20916_v51 = vpop.eup %20915  ;;  %20923 = vpow2.f32 %v5328_v40 }
0x1df6   :  { %v20918_v18 = vpop.eup %20917  ;;  %v4947_v62 = vmul.f32 1.442695, %v4941_v33  ;;  %v4945_v30 = vmul.f32 1.442695, %v4940_v5  ;;  %v22556_v60 = vmul.f32 %v22553_v11, %v20916_v51 }
0x1df7   :  { %v4938_v36 = vpop.xlane.xlu0 %4937  ;;  %v22564_v39 = vmul.f32 %v22561_v32, %v20918_v18  ;;  %v5744_v28 = vpop.xlane.xlu1 %5743  ;;  %v22586_v18 = vld [vmem:[%s24969_s11 + $0x18] sm:$0xff] }
0x1df8   :  { %20925 = vpow2.f32 %v4947_v62  ;;  %v4942_v41 = vsub.f32 %v4926_v12, %v4938_v36  ;;  %v5337_v26 = vsel %vm1509_vm5, %v22556_v60, 0.0 }
0x1df9   :  { %20927 = vpow2.f32 %v4945_v30  ;;  %5338 = vadd.xlane.f32.xlu0 %v5337_v26  ;;  %v5334_v54 = vsel %vm1509_vm5, %v22564_v39, 0.0 }
0x1dfa   :  { %v20920_v57 = vpop.eup %20919  ;;  %v4949_v63 = vmul.f32 1.442695, %v4942_v41  ;;  %5335 = vadd.xlane.f32.xlu1 %v5334_v54 }
0x1dfb   :  { %v5747_v3 = vpop.xlane.xlu0 %5746  ;;  %v22576_v12 = vmul.f32 %v22573_v38, %v20920_v57  ;;  %v5750_v40 = vpop.xlane.xlu1 %5749 }
0x1dfc   :  { %20929 = vpow2.f32 %v4949_v63  ;;  %v19898_v61 = vpack.c.bf16 %v5747_v3, %v5744_v28 }
0x1dfd   :  { %v5340_v0 = vsel %vm1509_vm5, %v22576_v12, 0.0 }
0x1dfe   :  { %v20922_v8 = vpop.eup %20921  ;;  %5341 = vadd.xlane.f32.xlu1 %v5340_v0  ;;  %19899 = vmatprep.subr.bf16.mxu1 %v19898_v61 }
0x1dff   :  { %v20924_v55 = vpop.eup %20923  ;;  %19901 = vmatpush3.bf16.msra.mxu1 %v19898_v61  ;;  %v5753_v33 = vpop.xlane.xlu0 %5752  ;;  %v22581_v5 = vmul.f32 %v22561_v32, %v20922_v8 }
0x1e00   :  { %v19902_v51 = vpack.c.bf16 %v5753_v33, %v5750_v40  ;;  %v22589_v62 = vmul.f32 %v22586_v18, %v20924_v55 }
0x1e01   :  { %v4955_v30 = vsel %vm1509_vm5, %v22581_v5, 0.0 }
0x1e02   :  { %v20926_v36 = vpop.eup %20925  ;;  %4956 = vadd.xlane.f32.xlu1 %v4955_v30  ;;  %v5343_v41 = vsel %vm1509_vm5, %v22589_v62, 0.0  ;;  %19903 = vmatprep.subr.bf16.mxu1 %v19902_v51 }
0x1e03   :  { %v20928_v26 = vpop.eup %20927  ;;  %5344 = vadd.xlane.f32.xlu0 %v5343_v41  ;;  %19905 = vmatpush3.bf16.msra.mxu1 %v19902_v51  ;;  %v4953_v28 = vmul.f32 %v22573_v38, %v20926_v36 }
0x1e04   :  { %19915 = vmatprep.subr.bf16.mxu1 %v22344_v4  ;;  %v4952_v54 = vmul.f32 %v22553_v11, %v20928_v26 }
0x1e05   :  { %v4961_v57 = vsel %vm1509_vm5, %v4953_v28, 0.0 }
0x1e06   :  { %v20930_v63 = vpop.eup %20929  ;;  %4962 = vadd.xlane.f32.xlu1 %v4961_v57  ;;  %v4958_v3 = vsel %vm1509_vm5, %v4952_v54, 0.0  ;;  %18520 = vmatmul.mubr.msk.f32.vlgmr.msra.gmra.mrb[74].mxu1 %vm1509_vm5, %v22454_v29 }
0x1e07   :  { %4959 = vadd.xlane.f32.xlu0 %v4958_v3  ;;  %19917 = vmatpush3.bf16.msra.mxu1 %v22344_v4  ;;  %v4954_v61 = vmul.f32 %v22586_v18, %v20930_v63  ;;  %v5637_v4 = vpop.f32.mrb[72].mxu1 }
0x1e08   :  { %19919 = vmatprep.subr.bf16.mxu1 %v22350_v6  ;;  %18522 = vmatprep.mubr.msk.f32.mxu1 %vm1509_vm5, %v22462_v42  ;;  %v18499_v29 = vpop.f32.mrb[73].mxu1 }
0x1e09   :  { %v4964_v0 = vsel %vm1509_vm5, %v4954_v61, 0.0  ;;  %v25010_v29 = vmov 0.0|0.0  }
0x1e0a   :  { %18523 = vmatmul.mubr.msk.f32.gmra.mrb[76].mxu1 %vm1509_vm5, %v22470_v47 }
0x1e0b   :  { %4965 = vadd.xlane.f32.xlu0 %v4964_v0  ;;  %19921 = vmatpush3.bf16.msra.mxu1 %v22350_v6 }
0x1e0c   :  { %18547 = vmatprep.mubr.msk.f32.mxu1 %vm1509_vm5, %v22267_v46 }
0x1e0e   :  { %18548 = vmatmul.mubr.msk.f32.vlgmr.msra.gmra.mrb[78].mxu1 %vm1509_vm5, %v22277_v14 }
0x1e0f   :  { %18550 = vmatprep.mubr.msk.f32.mxu1 %vm1509_vm5, %v22283_v16 }
0x1e12   :  { %18551 = vmatmul.mubr.msk.f32.gmra.mrb[80].mxu1 %vm1509_vm5, %v22290_v24 }
0x1e86   :  { %v5339_v42 = vpop.xlane.xlu0 %5338 }
0x1e87   :  { %20931 = vrcp.f32 %v5339_v42  ;;  %v5336_v47 = vpop.xlane.xlu1 %5335 }
0x1e88   :  { %20933 = vrcp.f32 %v5336_v47 }
0x1e8b   :  { %v5342_v8 = vpop.xlane.xlu1 %5341 }
0x1e8c   :  { %20935 = vrcp.f32 %v5342_v8 }
0x1e8f   :  { %v4957_v6 = vpop.xlane.xlu1 %4956 }
0x1e90   :  { %20937 = vrcp.f32 %v4957_v6  ;;  %v5345_v55 = vpop.xlane.xlu0 %5344 }
0x1e91   :  { %v20932_v40 = vpop.eup %20931  ;;  %20939 = vrcp.f32 %v5345_v55 }
0x1e92   :  { %v20934_v33 = vpop.eup %20933  ;;  %v5351_v41 = vmul.f32 %v20932_v40, %v22556_v60 }
0x1e93   :  { %v4963_v51 = vpop.xlane.xlu1 %4962  ;;  %v5350_v30 = vmul.f32 %v20934_v33, %v22564_v39 }
0x1e94   :  { %20941 = vrcp.f32 %v4963_v51  ;;  %v4960_v36 = vpop.xlane.xlu0 %4959 }
0x1e95   :  { %20943 = vrcp.f32 %v4960_v36  ;;  %18469 = vmatprep.mubr.msk.f32.mxu0 %vm1509_vm5, %v5350_v30 }
0x1e96   :  { %v20936_v26 = vpop.eup %20935  ;;  %18470 = vmatmul.mubr.msk.f32.vlgmr.msra.gmra.mrb[50].mxu0 %vm1509_vm5, %v5351_v41 }
0x1e97   :  { %19879 = vmatpush3.bf16.msra.mxu0 %v22362_v43  ;;  %v5352_v57 = vmul.f32 %v20936_v26, %v22576_v12 }
0x1e98   :  { %19881 = vmatprep.subr.bf16.mxu0 %v22387_v9  ;;  %v4966_v63 = vpop.xlane.xlu0 %4965 }
0x1e99   :  { %20945 = vrcp.f32 %v4966_v63  ;;  %18472 = vmatprep.mubr.msk.f32.mxu0 %vm1509_vm5, %v5352_v57 }
0x1e9a   :  { %v20938_v39 = vpop.eup %20937 }
0x1e9b   :  { %v20940_v3 = vpop.eup %20939  ;;  %19883 = vmatpush3.bf16.msra.mxu0 %v22387_v9  ;;  %v4971_v60 = vmul.f32 %v20938_v39, %v22581_v5 }
0x1e9c   :  { %v5353_v0 = vmul.f32 %v20940_v3, %v22589_v62  ;;  %19892 = vmatprep.subr.bf16.mxu0 %v25010_v29 }
0x1e9e   :  { %v20942_v42 = vpop.eup %20941  ;;  %18473 = vmatmul.mubr.msk.f32.gmra.mrb[52].mxu0 %vm1509_vm5, %v5353_v0 }
0x1e9f   :  { %v20944_v43 = vpop.eup %20943  ;;  %18483 = vmatprep.mubr.msk.f32.mxu0 %vm1509_vm5, %v4971_v60  ;;  %v4973_v12 = vmul.f32 %v20942_v42, %v4953_v28 }
0x1ea0   :  { %v4972_v47 = vmul.f32 %v20944_v43, %v4952_v54 }
0x1ea2   :  { %18484 = vmatmul.mubr.msk.f32.vlgmr.msra.gmra.mrb[50].mxu0 %vm1509_vm5, %v4972_v47 }
0x1ea3   :  { %v20946_v8 = vpop.eup %20945  ;;  %19894 = vmatpush3.bf16.msra.mxu0 %v21994_v53  ;;  %18486 = vmatprep.mubr.msk.f32.mxu0 %vm1509_vm5, %v4973_v12 }
0x1ea4   :  { %19895 = vmatprep.subr.bf16.mxu0 %v25010_v29  ;;  %v4974_v9 = vmul.f32 %v20946_v8, %v4954_v61 }
0x1ea6   :  { %18487 = vmatmul.mubr.msk.f32.gmra.mrb[52].mxu0 %vm1509_vm5, %v4974_v9 }
0x1ea7   :  { %19897 = vmatpush3.bf16.msra.mxu0 %v22004_v27  ;;  %18508 = vmatprep.mubr.msk.f32.mxu0 %vm21383_vm9, %v25008_v7 }
0x1ea8   :  { %19907 = vmatprep.subr.bf16.mxu0 %v22485_v2 }
0x1eaa   :  { %18509 = vmatmul.mubr.msk.f32.vlgmr.msra.gmra.mrb[54].mxu0 %vm1509_vm5, %v5637_v4 }
0x1eab   :  { %19909 = vmatpush3.bf16.msra.mxu0 %v22485_v2 }
0x1eac   :  { %19911 = vmatprep.subr.bf16.mxu0 %v22495_v1 }
0x1eaf   :  { %19913 = vmatpush3.bf16.msra.mxu0 %v22495_v1 }
0x1ed9   :  { %v18521_v5 = vpop.f32.mrb[74].mxu1 }
0x1eda   :  { %5846 = vperm.xlu0 %20677, %v18521_v5   ;;  %v5820_v62 = vpop.f32.mrb[75].mxu1 }
0x1edb   :  { %5841 = vperm.xlu1 %20678, %v5820_v62  }
0x1edd   :  { %v18524_v28 = vpop.f32.mrb[76].mxu1 }
0x1ede   :  { %v5830_v54 = vpop.f32.mrb[77].mxu1 }
0x1edf   :  { %5851 = vperm.xlu1 %20678, %v5830_v54  }
0x1ee1   :  { %v22646_v61 = vpop.f32.mrb[78].mxu1 }
0x1ee2   :  { %v22648_v6 = vpop.f32.mrb[79].mxu1 }
0x1ee3   :  { %5856 = vperm.xlu1 %20678, %v18524_v28  }
0x1ee5   :  { %v22650_v55 = vpop.f32.mrb[80].mxu1 }
0x1ee6   :  { %v22652_v4 = vpop.f32.mrb[81].mxu1 }
0x1f59   :  { %v5847_v30 = vpop.permute.xlu0 %5846 }
0x1f5a   :  { %v5842_v2 = vpop.permute.xlu1 %5841 }
0x1f5e   :  { %v5852_v40 = vpop.permute.xlu1 %5851 }
0x1f62   :  { %v5857_v36 = vpop.permute.xlu1 %5856 }
0x1f7d   :  { %v5710_v33 = vpop.f32.mrb[54].mxu0 }
0x1f7e   :  { %v5862_v1 = vrot.slane %v5710_v33, %v21712_v59  ;;  %v18510_v51 = vpop.f32.mrb[55].mxu0 }
0x1f80   :  { %v5864_v41 = vadd.f32 %v5862_v1, %v5847_v30  ;;  %v5863_v26 = vadd.f32 %v5862_v1, %v5842_v2  ;;  %v5865_v57 = vadd.f32 %v5862_v1, %v5852_v40  ;;  %v5866_v63 = vadd.f32 %v5862_v1, %v5857_v36 }
0x1f82   :  { %vm5868_vm6 = vcmp.gt.f32.partialorder %v5864_v41, 0.0  ;;  %v5872_v39 = vmul.f32 0.2, %v5864_v41  ;;  %vm5867_vm14 = vcmp.gt.f32.partialorder %v5863_v26, 0.0  ;;  %v5871_v3 = vmul.f32 0.2, %v5863_v26 }
0x1f83   :  { %vm5869_vm15 = vcmp.gt.f32.partialorder %v5865_v57, 0.0  ;;  %v5873_v60 = vmul.f32 0.2, %v5865_v57  ;;  %v5874_v43 = vmul.f32 0.2, %v5866_v63  ;;  %vm5870_vm3 = vcmp.gt.f32.partialorder %v5866_v63, 0.0 }
0x1f84   :  { %v5876_v0 = vsel %vm5868_vm6, %v5864_v41, %v5872_v39  ;;  %v5875_v42 = vsel %vm5867_vm14, %v5863_v26, %v5871_v3 }
0x1f85   :  { %v5880_v12 = vsel %vm2355_vm11, %v5876_v0, -1e+30  ;;  %v5879_v47 = vsel %vm2354_vm13, %v5875_v42, -1e+30  ;;  %v5877_v8 = vsel %vm5869_vm15, %v5865_v57, %v5873_v60  ;;  %v5878_v28 = vsel %vm5870_vm3, %v5866_v63, %v5874_v43 }
0x1f86   :  { %v5886_v9 = vsel %vm1509_vm5, %v5880_v12, -inf  ;;  %v5883_v5 = vsel %vm1509_vm5, %v5879_v47, -inf  ;;  %v5881_v62 = vsel %vm2356_vm2, %v5877_v8, -1e+30  ;;  %v5882_v2 = vsel %vm2357_vm12, %v5878_v28, -1e+30 }
0x1f87   :  { %5887 = vmax.xlane.f32.xlu1 %v5886_v9  ;;  %5884 = vmax.xlane.f32.xlu0 %v5883_v5  ;;  %v5889_v54 = vsel %vm1509_vm5, %v5881_v62, -inf  ;;  %v5892_v40 = vsel %vm1509_vm5, %v5882_v2, -inf }
0x1f8b   :  { %5890 = vmax.xlane.f32.xlu0 %v5889_v54 }
0x1f8f   :  { %5893 = vmax.xlane.f32.xlu0 %v5892_v40 }
0x2014   :  { %v5888_v33 = vpop.xlane.xlu1 %5887  ;;  %v5885_v1 = vpop.xlane.xlu0 %5884 }
0x2015   :  { %v5896_v51 = vsub.f32 %v5880_v12, %v5888_v33  ;;  %v5895_v30 = vsub.f32 %v5879_v47, %v5885_v1 }
0x2017   :  { %v5901_v36 = vmul.f32 1.442695, %v5896_v51  ;;  %v5899_v41 = vmul.f32 1.442695, %v5895_v30 }
0x2018   :  { %v5891_v26 = vpop.xlane.xlu0 %5890 }
0x2019   :  { %20947 = vpow2.f32 %v5901_v36  ;;  %v5897_v57 = vsub.f32 %v5881_v62, %v5891_v26 }
0x201a   :  { %20949 = vpow2.f32 %v5899_v41 }
0x201b   :  { %v5903_v63 = vmul.f32 1.442695, %v5897_v57 }
0x201c   :  { %v5894_v39 = vpop.xlane.xlu0 %5893 }
0x201d   :  { %20951 = vpow2.f32 %v5903_v63  ;;  %v5898_v3 = vsub.f32 %v5882_v2, %v5894_v39 }
0x201f   :  { %v5905_v60 = vmul.f32 1.442695, %v5898_v3  ;;  %v2321_v3 = vld [vmem:[%s24967_s16 + $0x20] sm:$0xff] }
0x2021   :  { %20953 = vpow2.f32 %v5905_v60 }
0x2023   :  { %v20948_v0 = vpop.eup %20947 }
0x2024   :  { %v20950_v42 = vpop.eup %20949  ;;  %v5908_v43 = vmul.f32 %v22553_v11, %v20948_v0  ;;  %v2341_v11 = vld [vmem:[%s24971_s18 + $0x10] sm:$0xff] }
0x2025   :  { %v5907_v8 = vmul.f32 %v22561_v32, %v20950_v42  ;;  %v2342_v32 = vld [vmem:[%s24971_s18 + $0x18] sm:$0xff] }
0x2026   :  { %v5914_v12 = vsel %vm1509_vm5, %v5908_v43, 0.0  ;;  %v19922_v40 = vpack.c.bf16 %v2342_v32, %v2341_v11  ;;  %v21308_v42 = vld [vmem:[%s24968_s17 + $0x38] sm:$0xff]  ;;  %v21309_v32 = vld [vmem:[%s24968_s17 + $0x30] sm:$0xff] }
0x2027   :  { %v20952_v47 = vpop.eup %20951  ;;  %5915 = vadd.xlane.f32.xlu0 %v5914_v12  ;;  %v5911_v9 = vsel %vm1509_vm5, %v5907_v8, 0.0 }
0x2028   :  { %5912 = vadd.xlane.f32.xlu1 %v5911_v9  ;;  %v5909_v5 = vmul.f32 %v22573_v38, %v20952_v47  ;;  %19923 = vmatprep.subr.bf16.mxu0 %v19922_v40 }
0x202a   :  { %v5917_v62 = vsel %vm1509_vm5, %v5909_v5, 0.0 }
0x202b   :  { %v20954_v28 = vpop.eup %20953 }
0x202c   :  { %5918 = vadd.xlane.f32.xlu1 %v5917_v62  ;;  %v5910_v54 = vmul.f32 %v22586_v18, %v20954_v28 }
0x202e   :  { %v5920_v2 = vsel %vm1509_vm5, %v5910_v54, 0.0 }
0x202f   :  { %5921 = vadd.xlane.f32.xlu0 %v5920_v2 }
0x20b4   :  { %v5916_v38 = vpop.xlane.xlu0 %5915 }
0x20b5   :  { %v5913_v33 = vpop.xlane.xlu1 %5912  ;;  %20955 = vrcp.f32 %v5916_v38 }
0x20b6   :  { %20957 = vrcp.f32 %v5913_v33 }
0x20b9   :  { %v5919_v1 = vpop.xlane.xlu1 %5918 }
0x20ba   :  { %20959 = vrcp.f32 %v5919_v1 }
0x20bc   :  { %v5922_v18 = vpop.xlane.xlu0 %5921 }
0x20bd   :  { %20961 = vrcp.f32 %v5922_v18 }
0x20bf   :  { %v20956_v51 = vpop.eup %20955 }
0x20c0   :  { %v20958_v30 = vpop.eup %20957  ;;  %v5928_v36 = vmul.f32 %v20956_v51, %v5908_v43  ;;  %v6136_v43 = vrot.slane %v21308_v42, %v21744_v19 }
0x20c1   :  { %v5927_v41 = vmul.f32 %v20958_v30, %v5907_v8 }
0x20c3   :  { %18533 = vmatprep.mubr.msk.f32.mxu0 %vm1509_vm5, %v5927_v41 }
0x20c4   :  { %v20960_v26 = vpop.eup %20959  ;;  %18534 = vmatmul.mubr.msk.f32.vlgmr.msra.gmra.mrb[50].mxu0 %vm1509_vm5, %v5928_v36 }
0x20c5   :  { %v5929_v57 = vmul.f32 %v20960_v26, %v5909_v5  ;;  %19925 = vmatpush3.bf16.msra.mxu0 %v19922_v40  ;;  %v6043_v40 = vrot.slane %v21309_v32, %v21744_v19 }
0x20c6   :  { %19930 = vmatprep.subr.bf16.mxu0 %v25010_v29 }
0x20c7   :  { %v20962_v63 = vpop.eup %20961  ;;  %18536 = vmatprep.mubr.msk.f32.mxu0 %vm1509_vm5, %v5929_v57 }
0x20c8   :  { %v5930_v39 = vmul.f32 %v20962_v63, %v5910_v54 }
0x20ca   :  { %18537 = vmatmul.mubr.msk.f32.gmra.mrb[52].mxu0 %vm1509_vm5, %v5930_v39 }
0x20cb   :  { %18557 = vmatprep.mubr.msk.f32.mxu0 %vm76_vm0, %v22648_v6  ;;  %v2322_v6 = vld [vmem:[%s24967_s16 + $0x28] sm:$0xff] }
0x20cc   :  { %v19926_v60 = vpack.c.bf16 %v2322_v6, %v2321_v3 }
0x20ce   :  { %18558 = vmatmul.mubr.msk.f32.vlgmr.msra.gmra.mrb[56].mxu0 %vm76_vm0, %v22646_v61  ;;  %19927 = vmatprep.subr.bf16.mxu1 %v19926_v60 }
0x20cf   :  { %18560 = vmatprep.mubr.msk.f32.mxu0 %vm76_vm0, %v22652_v4  ;;  %19929 = vmatpush3.bf16.msra.mxu1 %v19926_v60 }
0x20d0   :  { %19938 = vmatprep.subr.bf16.mxu1 %v25010_v29 }
0x20d2   :  { %18561 = vmatmul.mubr.msk.f32.gmra.mrb[58].mxu0 %vm76_vm0, %v22650_v55 }
0x20d3   :  { %18581 = vmatprep.mubr.msk.f32.mxu0 %vm21383_vm9, %v25008_v7 }
0x2197   :  { %v18535_v61 = vpop.f32.mrb[50].mxu0 }
0x2198   :  { %v6013_v4 = vpop.f32.mrb[51].mxu0  ;;  %v6037_v11 = vmul.f32 0.33333334, %v18535_v61 }
0x2199   :  { %v6036_v33 = vmul.f32 0.33333334, %v6013_v4 }
0x219a   :  { %v6045_v51 = vadd.f32 %v6043_v40, %v6037_v11 }
0x219b   :  { %v6044_v30 = vadd.f32 %v6043_v40, %v6036_v33 }
0x219c   :  { %v6255_v26 = vmul.f32 0.01, %v6045_v51  ;;  %vm6251_vm6 = vcmp.gt.f32.partialorder %v6045_v51, 0.0 }
0x219d   :  { %v18538_v0 = vpop.f32.mrb[52].mxu0  ;;  %v6254_v63 = vmul.f32 0.01, %v6044_v30  ;;  %vm6250_vm14 = vcmp.gt.f32.partialorder %v6044_v30, 0.0 }
0x219e   :  { %v6023_v55 = vpop.f32.mrb[53].mxu0  ;;  %v6039_v36 = vmul.f32 0.33333334, %v18538_v0  ;;  %v6259_v42 = vsel %vm6251_vm6, %v6045_v51, %v6255_v26 }
0x219f   :  { %v6038_v41 = vmul.f32 0.33333334, %v6023_v55 }
0x21a0   :  { %v6047_v39 = vadd.f32 %v6043_v40, %v6039_v36 }
0x21a1   :  { %v18559_v8 = vpop.f32.mrb[56].mxu0  ;;  %v6046_v6 = vadd.f32 %v6043_v40, %v6038_v41 }
0x21a2   :  { %v6221_v12 = vadd.f32 %v18559_v8, %v6136_v43  ;;  %v6215_v47 = vpop.f32.mrb[57].mxu0  ;;  %v6258_v8 = vsel %vm6250_vm14, %v6044_v30, %v6254_v63  ;;  %vm6253_vm15 = vcmp.gt.f32.partialorder %v6047_v39, 0.0 }
0x21a3   :  { %v6216_v9 = vadd.f32 %v6215_v47, %v6136_v43  ;;  %v6256_v0 = vmul.f32 0.01, %v6046_v6  ;;  %vm6252_vm3 = vcmp.gt.f32.partialorder %v6046_v6, 0.0 }
0x21a4   :  { %v6235_v5 = vmul.f32 0.5, %v6221_v12  ;;  %v6257_v12 = vmul.f32 0.01, %v6047_v39 }
0x21a5   :  { %v6234_v62 = vmul.f32 0.5, %v6216_v9  ;;  %v18562_v28 = vpop.f32.mrb[58].mxu0 }
0x21a6   :  { %20963 = vtanh.f32 %v6235_v5  ;;  %v6231_v54 = vadd.f32 %v18562_v28, %v6136_v43  ;;  %v6225_v2 = vpop.f32.mrb[59].mxu0  ;;  %v6261_v40 = vsel %vm6253_vm15, %v6047_v39, %v6257_v12 }
0x21a7   :  { %20965 = vtanh.f32 %v6234_v62  ;;  %v6226_v38 = vadd.f32 %v6225_v2, %v6136_v43 }
0x21a8   :  { %v6237_v1 = vmul.f32 0.5, %v6231_v54 }
0x21a9   :  { %v6236_v18 = vmul.f32 0.5, %v6226_v38 }
0x21aa   :  { %20967 = vtanh.f32 %v6237_v1  ;;  %v6260_v1 = vsel %vm6252_vm3, %v6046_v6, %v6256_v0 }
0x21ab   :  { %20969 = vtanh.f32 %v6236_v18 }
0x21b0   :  { %v20964_v57 = vpop.eup %20963 }
0x21b1   :  { %v20966_v3 = vpop.eup %20965  ;;  %v6243_v60 = vadd.f32 1.0, %v20964_v57 }
0x21b2   :  { %v6242_v61 = vadd.f32 1.0, %v20966_v3 }
0x21b3   :  { %v6247_v4 = vmul.f32 0.5, %v6243_v60 }
0x21b4   :  { %v20968_v43 = vpop.eup %20967  ;;  %v6246_v47 = vmul.f32 0.5, %v6242_v61 }
0x21b5   :  { %v20970_v9 = vpop.eup %20969  ;;  %v6263_v55 = vmul.f32 %v6259_v42, %v6247_v4  ;;  %v6267_v5 = vsub.f32 1.0, %v6247_v4  ;;  %v6245_v62 = vadd.f32 1.0, %v20968_v43  ;;  %v22747_v4 = vld [vmem:[%s24968_s17 + $0x10] sm:$0xff] }
0x21b6   :  { %v6262_v28 = vmul.f32 %v6258_v8, %v6246_v47  ;;  %v6266_v54 = vsub.f32 1.0, %v6246_v47  ;;  %v6244_v2 = vadd.f32 1.0, %v20970_v9  ;;  %v6899_v47 = vrot.slane %v22747_v4, %v21712_v59 }
0x21b7   :  { %v6271_v11 = vmul.f32 %v6267_v5, %v22330_v56  ;;  %v6249_v32 = vmul.f32 0.5, %v6245_v62  ;;  %v22787_v5 = vld [vmem:[%s24968_s17 + $0x8] sm:$0xff] }
0x21b8   :  { %v6270_v38 = vmul.f32 %v6266_v54, %v22333_v35  ;;  %v6248_v33 = vmul.f32 0.5, %v6244_v2  ;;  %v6379_v62 = vrot.slane %v22787_v5, 4 }
0x21b9   :  { %v22713_v18 = vadd.f32 %v6271_v11, %v6263_v55  ;;  %v6265_v51 = vmul.f32 %v6261_v40, %v6249_v32  ;;  %v6269_v30 = vsub.f32 1.0, %v6249_v32 }
0x21ba   :  { %v22715_v36 = vadd.f32 %v6270_v38, %v6262_v28  ;;  %v6264_v41 = vmul.f32 %v6260_v1, %v6248_v33  ;;  %v6268_v26 = vsub.f32 1.0, %v6248_v33 }
0x21bb   :  { %v6279_v57 = vmax.f32 %v22713_v18, 0.0  ;;  %v6273_v63 = vmul.f32 %v6269_v30, %v22337_v25 }
0x21bc   :  { %v6272_v56 = vmul.f32 %v6268_v26, %v22339_v31  ;;  %v6278_v39 = vmax.f32 %v22715_v36, 0.0 }
0x21bd   :  { %v22721_v3 = vadd.f32 %v6273_v63, %v6265_v51  ;;  %v22810_v63 = vsub.s32 7, %v21709_v58 }
0x21be   :  { %v22723_v35 = vadd.f32 %v6272_v56, %v6264_v41  ;;  %18567 = vmatprep.mubr.msk.f32.mxu1 %vm76_vm0, %v6278_v39  ;;  %v22726_v6 = vpack.c.bf16 %v6279_v57, %v6278_v39 }
0x21bf   :  { %18568 = vmatmul.mubr.msk.f32.vlgmr.msra.gmra.mrb[82].mxu1 %vm76_vm0, %v6279_v57  ;;  %v6281_v60 = vmax.f32 %v22721_v3, 0.0  ;;  %v6734_v57 = vrot.slane %v22787_v5, 5  ;;  %25011 = vst [vmem:[#allocation8_spill] sm:$0xff] %v22810_v63  ;;  %v6540_v56 = vrot.slane %v22787_v5, %v22810_v63 }
0x21c0   :  { %v6280_v61 = vmax.f32 %v22723_v35, 0.0  ;;  %19940 = vmatpush3.bf16.msra.mxu1 %v21994_v53 }
0x21c1   :  { %19941 = vmatprep.subr.bf16.mxu1 %v25010_v29 }
0x21c2   :  { %18570 = vmatprep.mubr.msk.f32.mxu1 %vm76_vm0, %v6280_v61  ;;  %v22734_v25 = vpack.c.bf16 %v6281_v60, %v6280_v61 }
0x21c3   :  { %18571 = vmatmul.mubr.msk.f32.gmra.mrb[84].mxu1 %vm76_vm0, %v6281_v60 }
0x21c4   :  { %19943 = vmatpush3.bf16.msra.mxu1 %v22004_v27  ;;  %18592 = vmatprep.mubr.msk.f32.mxu1 %vm21383_vm9, %v25008_v7 }
0x2292   :  { %v22740_v31 = vpop.f32.mrb[82].mxu1 }
0x2293   :  { %v22742_v42 = vpop.f32.mrb[83].mxu1  ;;  %v6542_v39 = vmul.f32 %v22740_v31, %v6540_v56 }
0x2294   :  { %v22751_v43 = vpack.c.bf16 %v22740_v31, %v22742_v42  ;;  %v22755_v8 = vpack.i.bf16 %v22740_v31, %v22742_v42 }
0x2295   :  { %v6548_v60 = vsel %vm76_vm0, %v6542_v39, 0.0 }
0x2296   :  { %20700 = vrot.lane.b32.xlu1 %v22755_v8, %s21369_s3  ;;  %v22759_v12 = vpop.f32.mrb[84].mxu1  ;;  %19933 = vmatpush3.bf16.xpose.msk.msra.mxu0 %vm21908_vm10, %v22751_v43 }
0x2297   :  { %v22766_v9 = vpop.f32.mrb[85].mxu1  ;;  %19934 = vmatprep.subr.bf16.mxu0 %v25010_v29 }
0x2298   :  { %v22771_v0 = vpack.c.bf16 %v22759_v12, %v22766_v9  ;;  %v22775_v55 = vpack.i.bf16 %v22759_v12, %v22766_v9  ;;  %v6543_v61 = vmul.f32 %v6540_v56, %v22766_v9 }
0x229a   :  { %6901 = vrot.lane.b32.xlu1 %v6899_v47, %s21385_s2  ;;  %20705 = vrot.lane.b32.xlu0 %v22775_v55, %s21369_s3  ;;  %v6541_v47 = vmul.f32 %v6540_v56, %v22742_v42 }
0x229e   :  { %19937 = vmatpush3.bf16.xpose.msk.msra.mxu0 %vm21908_vm10, %v22771_v0 }
0x229f   :  { %19952 = vmatprep.subr.bf16.mxu0 %v25010_v29 }
0x22a5   :  { %18582 = vmatmul.mubr.msk.f32.vlgmr.msra.gmra.mrb[60].mxu0 %vm76_vm0, %v6379_v62  ;;  %v6551_v62 = vsel %vm76_vm0, %v6543_v61, 0.0 }
0x22a6   :  { %18617 = vmatprep.mubr.msk.f32.mxu0 %vm21383_vm9, %v25008_v7 }
0x2308   :  { %v20701_v28 = vpop.permute.xlu1 %20700 }
0x2309   :  { %v20703_v54 = vunpack.i.h.bf16 %v20701_v28  ;;  %v20702_v2 = vunpack.i.l.bf16 %v20701_v28  ;;  %v6545_v28 = vsel %vm76_vm0, %v6541_v47, 0.0 }
0x230b   :  { %v19953_v11 = vpack.c.bf16 %v20703_v54, %v20702_v2  ;;  %v6544_v54 = vmul.f32 %v22759_v12, %v6540_v56  ;;  %v7476_v56 = vrot.slane %v22747_v4, %v21744_v19  ;;  %v22845_v4 = vld [vmem:[%s24969_s11 + $0x48] sm:$0xff] }
0x230c   :  { %v6902_v32 = vpop.permute.xlu1 %6901  ;;  %v20706_v40 = vpop.permute.xlu0 %20705 }
0x230d   :  { %19955 = vmatpush3.bf16.xpose.msk.msra.mxu0 %vm21908_vm10, %v19953_v11  ;;  %v6904_v38 = vmul.f32 %v6902_v32, %v22742_v42  ;;  %v6905_v33 = vmul.f32 %v22740_v31, %v6902_v32  ;;  %v20708_v1 = vunpack.i.h.bf16 %v20706_v40  ;;  %v20707_v51 = vunpack.i.l.bf16 %v20706_v40  ;;  %v22826_v40 = vld [vmem:[%s24969_s11 + $0x40] sm:$0xff] }
0x230e   :  { %19956 = vmatprep.subr.bf16.mxu0 %v25010_v29  ;;  %v6907_v30 = vmul.f32 %v22759_v12, %v6902_v32  ;;  %v6906_v41 = vmul.f32 %v6902_v32, %v22766_v9  ;;  %v6554_v2 = vsel %vm76_vm0, %v6544_v54, 0.0 }
0x230f   :  { %6912 = vrot.lane.b32.xlu1 %v6904_v38, %s21369_s3  ;;  %6914 = vrot.lane.b32.xlu0 %v6905_v33, %s21369_s3  ;;  %v19957_v26 = vpack.c.bf16 %v20708_v1, %v20707_v51 }
0x2313   :  { %6918 = vrot.lane.b32.xlu0 %v6907_v30, %s21369_s3  ;;  %6916 = vrot.lane.b32.xlu1 %v6906_v41, %s21369_s3 }
0x2315   :  { %19959 = vmatpush3.bf16.xpose.msk.msra.mxu0 %vm21908_vm10, %v19957_v26 }
0x2316   :  { %19975 = vmatprep.subr.bf16.mxu0 %v19953_v11 }
0x231c   :  { %18618 = vmatmul.mubr.msk.f32.vlgmr.msra.gmra.mrb[62].mxu0 %vm76_vm0, %v6734_v57 }
0x231d   :  { %19977 = vmatpush3.bf16.msra.mxu0 %v19953_v11 }
0x231e   :  { %19979 = vmatprep.subr.bf16.mxu0 %v19957_v26 }
0x2321   :  { %19981 = vmatpush3.bf16.msra.mxu0 %v19957_v26 }
0x2322   :  { %19983 = vmatprep.subr.bf16.mxu0 %v22751_v43 }
0x2332   :  { %6549 = vadd.xlane.f32.xlu0 %v6548_v60 }
0x2336   :  { %6552 = vadd.xlane.f32.xlu0 %v6551_v62 }
0x2337   :  { %6546 = vadd.xlane.f32.xlu1 %v6545_v28 }
0x233b   :  { %6555 = vadd.xlane.f32.xlu1 %v6554_v2 }
0x2378   :  { %v6460_v11 = vpop.f32.mrb[60].mxu0 }
0x2379   :  { %18593 = vmatmul.mubr.msk.f32.vlgmr.msra.gmra.mrb[86].mxu1 %vm1509_vm5, %v6460_v11  ;;  %v18583_v32 = vpop.f32.mrb[61].mxu0 }
0x237a   :  { %18603 = vmatprep.mubr.msk.f32.mxu1 %vm1509_vm5, %v22826_v40 }
0x2381   :  { %v6913_v38 = vpop.permute.xlu1 %6912  ;;  %v6915_v33 = vpop.permute.xlu0 %6914 }
0x2382   :  { %v6927_v1 = vsel %vm76_vm0, %v6915_v33, 0.0  ;;  %v6924_v51 = vsel %vm76_vm0, %v6913_v38, 0.0 }
0x2383   :  { %6928 = vadd.xlane.f32.xlu1 %v6927_v1  ;;  %6925 = vadd.xlane.f32.xlu0 %v6924_v51 }
0x2385   :  { %v6919_v30 = vpop.permute.xlu0 %6918  ;;  %v6917_v41 = vpop.permute.xlu1 %6916 }
0x2386   :  { %v6933_v26 = vsel %vm76_vm0, %v6919_v30, 0.0  ;;  %v6930_v57 = vsel %vm76_vm0, %v6917_v41, 0.0 }
0x2387   :  { %6934 = vadd.xlane.f32.xlu1 %v6933_v26  ;;  %6931 = vadd.xlane.f32.xlu0 %v6930_v57 }
0x2398   :  { %20715 = vrot.lane.b32.xlu1 %v22775_v55, %s21370_s4  ;;  %v22861_v55 = vld [vmem:[%s24969_s11 + $0x58] sm:$0xff] }
0x239c   :  { %7478 = vrot.lane.b32.xlu1 %v7476_v56, %s21386_s21 }
0x239d   :  { %20710 = vrot.lane.b32.xlu0 %v22755_v8, %s21370_s4  ;;  %v22853_v8 = vld [vmem:[%s24969_s11 + $0x50] sm:$0xff] }
0x23bf   :  { %v6550_v39 = vpop.xlane.xlu0 %6549 }
0x23c3   :  { %v6553_v47 = vpop.xlane.xlu0 %6552 }
0x23c4   :  { %v6547_v60 = vpop.xlane.xlu1 %6546 }
0x23c5   :  { %v19944_v61 = vpack.c.bf16 %v6550_v39, %v6547_v60 }
0x23c7   :  { %19945 = vmatprep.subr.bf16.mxu1 %v19944_v61 }
0x23c8   :  { %v6556_v62 = vpop.xlane.xlu1 %6555  ;;  %19947 = vmatpush3.bf16.msra.mxu1 %v19944_v61 }
0x23c9   :  { %v19948_v28 = vpack.c.bf16 %v6556_v62, %v6553_v47 }
0x23cb   :  { %19949 = vmatprep.subr.bf16.mxu1 %v19948_v28 }
0x23cc   :  { %19951 = vmatpush3.bf16.msra.mxu1 %v19948_v28 }
0x23cd   :  { %19960 = vmatprep.subr.bf16.mxu1 %v25010_v29 }
0x23cf   :  { %18604 = vmatmul.mubr.msk.f32.vlgmr.msra.gmra.mrb[88].mxu1 %vm1509_vm5, %v22845_v4 }
0x23d0   :  { %19962 = vmatpush3.bf16.msra.mxu1 %v21994_v53  ;;  %18606 = vmatprep.mubr.msk.f32.mxu1 %vm1509_vm5, %v22853_v8 }
0x23d1   :  { %19963 = vmatprep.subr.bf16.mxu1 %v25010_v29 }
0x23d3   :  { %18607 = vmatmul.mubr.msk.f32.gmra.mrb[90].mxu1 %vm1509_vm5, %v22861_v55 }
0x23d4   :  { %19965 = vmatpush3.bf16.msra.mxu1 %v22004_v27  ;;  %18628 = vmatprep.mubr.msk.f32.mxu1 %vm21383_vm9, %v25008_v7 }
0x23ef   :  { %v6819_v54 = vpop.f32.mrb[62].mxu0 }
0x23f0   :  { %18629 = vmatmul.mubr.msk.f32.vlgmr.msra.gmra.mrb[92].mxu1 %vm1509_vm5, %v6819_v54  ;;  %v18619_v2 = vpop.f32.mrb[63].mxu0 }
0x23f1   :  { %18639 = vmatprep.mubr.msk.f32.mxu1 %vm1509_vm5, %v22826_v40 }
0x2410   :  { %v6929_v11 = vpop.xlane.xlu1 %6928  ;;  %v6926_v32 = vpop.xlane.xlu0 %6925 }
0x2411   :  { %v19966_v38 = vpack.c.bf16 %v6929_v11, %v6926_v32 }
0x2413   :  { %19967 = vmatprep.subr.bf16.mxu1 %v19966_v38 }
0x2414   :  { %v6935_v33 = vpop.xlane.xlu1 %6934  ;;  %v6932_v1 = vpop.xlane.xlu0 %6931  ;;  %19969 = vmatpush3.bf16.msra.mxu1 %v19966_v38 }
0x2415   :  { %v19970_v51 = vpack.c.bf16 %v6935_v33, %v6932_v1 }
0x2417   :  { %19971 = vmatprep.subr.bf16.mxu1 %v19970_v51 }
0x2418   :  { %v20711_v30 = vpop.permute.xlu0 %20710  ;;  %19973 = vmatpush3.bf16.msra.mxu1 %v19970_v51  ;;  %v20716_v56 = vpop.permute.xlu1 %20715 }
0x2419   :  { %19990 = vmatprep.subr.bf16.mxu1 %v25010_v29  ;;  %v20713_v41 = vunpack.i.h.bf16 %v20711_v30  ;;  %v20712_v26 = vunpack.i.l.bf16 %v20711_v30  ;;  %v20718_v39 = vunpack.i.h.bf16 %v20716_v56  ;;  %v20717_v60 = vunpack.i.l.bf16 %v20716_v56 }
0x241b   :  { %18640 = vmatmul.mubr.msk.f32.vlgmr.msra.gmra.mrb[94].mxu1 %vm1509_vm5, %v22845_v4  ;;  %v22876_v57 = vpack.c.bf16 %v20713_v41, %v20712_v26  ;;  %v22886_v61 = vpack.c.bf16 %v20718_v39, %v20717_v60 }
0x241c   :  { %18642 = vmatprep.mubr.msk.f32.mxu1 %vm1509_vm5, %v22853_v8  ;;  %v7479_v41 = vpop.permute.xlu1 %7478 }
0x241d   :  { %v7482_v26 = vmul.f32 %v22740_v31, %v7479_v41  ;;  %v7481_v56 = vmul.f32 %v7479_v41, %v22742_v42  ;;  %v7484_v39 = vmul.f32 %v22759_v12, %v7479_v41  ;;  %v7483_v60 = vmul.f32 %v7479_v41, %v22766_v9 }
0x241f   :  { %18643 = vmatmul.mubr.msk.f32.gmra.mrb[96].mxu1 %vm1509_vm5, %v22861_v55 }
0x2420   :  { %18681 = vmatprep.mubr.msk.f32.mxu1 %vm21383_vm9, %v25008_v7 }
0x2421   :  { %19993 = vmatpush3.bf16.xpose.msk.msra.mxu1 %vm21908_vm10, %v22876_v57 }
0x2422   :  { %19994 = vmatprep.subr.bf16.mxu1 %v25010_v29 }
0x2429   :  { %19997 = vmatpush3.bf16.xpose.msk.msra.mxu1 %vm21908_vm10, %v22886_v61 }
0x244c   :  { %v6533_v47 = vpop.f32.mrb[86].mxu1 }
0x244d   :  { %v18594_v62 = vpop.f32.mrb[87].mxu1 }
0x244e   :  { %v7311_v62 = vrot.slane %v22787_v5, 6  ;;  %v6665_v5 = vrot.slane %v6533_v47, %v21712_v59 }
0x2450   :  { %18682 = vmatmul.mubr.msk.f32.vlgmr.msra.gmra.mrb[98].mxu1 %vm76_vm0, %v7311_v62 }
0x2451   :  { %18703 = vmatprep.mubr.msk.f32.mxu1 %vm1509_vm5, %v22826_v40 }
0x24a2   :  { %v18605_v28 = vpop.f32.mrb[88].mxu1 }
0x24a3   :  { %v6623_v54 = vpop.f32.mrb[89].mxu1 }
0x24a6   :  { %v18608_v2 = vpop.f32.mrb[90].mxu1 }
0x24a7   :  { %v6633_v11 = vpop.f32.mrb[91].mxu1 }
0x24c3   :  { %v6892_v32 = vpop.f32.mrb[92].mxu1 }
0x24c4   :  { %v18630_v38 = vpop.f32.mrb[93].mxu1  ;;  %v7044_v31 = vrot.slane %v6892_v32, %v21712_v59 }
0x24ee   :  { %v18641_v33 = vpop.f32.mrb[94].mxu1 }
0x24ef   :  { %7028 = vperm.xlu1 %20678, %v18641_v33   ;;  %v7002_v1 = vpop.f32.mrb[95].mxu1 }
0x24f0   :  { %7023 = vperm.xlu0 %20677, %v7002_v1  }
0x24f2   :  { %v18644_v51 = vpop.f32.mrb[96].mxu1 }
0x24f3   :  { %7038 = vperm.xlu1 %20678, %v18644_v51   ;;  %v7012_v30 = vpop.f32.mrb[97].mxu1 }
0x24f4   :  { %7033 = vperm.xlu0 %20677, %v7012_v30  }
0x24f7   :  { %6649 = vperm.xlu1 %20678, %v18605_v28  }
0x24f8   :  { %6644 = vperm.xlu0 %20677, %v6623_v54  }
0x24fb   :  { %6659 = vperm.xlu1 %20678, %v18608_v2  }
0x24fc   :  { %6654 = vperm.xlu0 %20677, %v6633_v11  }
0x24ff   :  { %7491 = vrot.lane.b32.xlu1 %v7482_v26, %s21370_s4 }
0x2500   :  { %7489 = vrot.lane.b32.xlu0 %v7481_v56, %s21370_s4 }
0x2503   :  { %7495 = vrot.lane.b32.xlu1 %v7484_v39, %s21370_s4 }
0x2504   :  { %7493 = vrot.lane.b32.xlu0 %v7483_v60, %s21370_s4 }
0x256e   :  { %v7029_v42 = vpop.permute.xlu1 %7028 }
0x256f   :  { %v7046_v28 = vadd.f32 %v7044_v31, %v7029_v42  ;;  %v7024_v54 = vpop.permute.xlu0 %7023 }
0x2570   :  { %v7045_v2 = vadd.f32 %v7044_v31, %v7024_v54 }
0x2571   :  { %v7054_v12 = vmul.f32 0.2, %v7046_v28  ;;  %vm7050_vm6 = vcmp.gt.f32.partialorder %v7046_v28, 0.0 }
0x2572   :  { %v7053_v9 = vmul.f32 0.2, %v7045_v2  ;;  %v7039_v11 = vpop.permute.xlu1 %7038  ;;  %vm7049_vm14 = vcmp.gt.f32.partialorder %v7045_v2, 0.0 }
0x2573   :  { %v7048_v38 = vadd.f32 %v7044_v31, %v7039_v11  ;;  %v7034_v33 = vpop.permute.xlu0 %7033  ;;  %v7058_v1 = vsel %vm7050_vm6, %v7046_v28, %v7054_v12 }
0x2574   :  { %v7047_v51 = vadd.f32 %v7044_v31, %v7034_v33  ;;  %v22907_v40 = vsel %vm2355_vm11, %v7058_v1, -1e+30  ;;  %v7057_v32 = vsel %vm7049_vm14, %v7045_v2, %v7053_v9 }
0x2575   :  { %v7056_v30 = vmul.f32 0.2, %v7048_v38  ;;  %v7068_v41 = vsel %vm1509_vm5, %v22907_v40, -inf  ;;  %v22913_v26 = vsel %vm2354_vm13, %v7057_v32, -1e+30  ;;  %vm7052_vm15 = vcmp.gt.f32.partialorder %v7048_v38, 0.0 }
0x2576   :  { %v7055_v56 = vmul.f32 0.2, %v7047_v51  ;;  %7069 = vmax.xlane.f32.xlu1 %v7068_v41  ;;  %v6650_v39 = vpop.permute.xlu1 %6649  ;;  %v7065_v47 = vsel %vm1509_vm5, %v22913_v26, -inf  ;;  %vm7051_vm3 = vcmp.gt.f32.partialorder %v7047_v51, 0.0 }
0x2577   :  { %v6667_v60 = vadd.f32 %v6665_v5, %v6650_v39  ;;  %7066 = vmax.xlane.f32.xlu0 %v7065_v47  ;;  %v6645_v62 = vpop.permute.xlu0 %6644  ;;  %v7060_v28 = vsel %vm7052_vm15, %v7048_v38, %v7056_v30 }
0x2578   :  { %v6666_v31 = vadd.f32 %v6665_v5, %v6645_v62  ;;  %v7059_v42 = vsel %vm7051_vm3, %v7047_v51, %v7055_v56  ;;  %v7064_v32 = vsel %vm2357_vm12, %v7060_v28, -1e+30 }
0x2579   :  { %v6675_v54 = vmul.f32 0.2, %v6667_v60  ;;  %v7063_v2 = vsel %vm2356_vm2, %v7059_v42, -1e+30  ;;  %vm6671_vm6 = vcmp.gt.f32.partialorder %v6667_v60, 0.0  ;;  %v7074_v47 = vsel %vm1509_vm5, %v7064_v32, -inf }
0x257a   :  { %v6674_v12 = vmul.f32 0.2, %v6666_v31  ;;  %v6660_v9 = vpop.permute.xlu1 %6659  ;;  %v7071_v11 = vsel %vm1509_vm5, %v7063_v2, -inf  ;;  %vm6670_vm14 = vcmp.gt.f32.partialorder %v6666_v31, 0.0 }
0x257b   :  { %v6669_v33 = vadd.f32 %v6665_v5, %v6660_v9  ;;  %7072 = vmax.xlane.f32.xlu0 %v7071_v11  ;;  %v6655_v1 = vpop.permute.xlu0 %6654  ;;  %v6679_v51 = vsel %vm6671_vm6, %v6667_v60, %v6675_v54 }
0x257c   :  { %v6668_v41 = vadd.f32 %v6665_v5, %v6655_v1  ;;  %v6678_v39 = vsel %vm6670_vm14, %v6666_v31, %v6674_v12  ;;  %v6683_v42 = vsel %vm2355_vm11, %v6679_v51, -1e+30 }
0x257d   :  { %v6677_v38 = vmul.f32 0.2, %v6669_v33  ;;  %v6682_v30 = vsel %vm2354_vm13, %v6678_v39, -1e+30  ;;  %vm6673_vm15 = vcmp.gt.f32.partialorder %v6669_v33, 0.0  ;;  %v6689_v54 = vsel %vm1509_vm5, %v6683_v42, -inf }
0x257e   :  { %v6676_v56 = vmul.f32 0.2, %v6668_v41  ;;  %v6686_v62 = vsel %vm1509_vm5, %v6682_v30, -inf  ;;  %vm6672_vm3 = vcmp.gt.f32.partialorder %v6668_v41, 0.0  ;;  %v7492_v11 = vpop.permute.xlu1 %7491 }
0x257f   :  { %7075 = vmax.xlane.f32.xlu0 %v7074_v47  ;;  %6687 = vmax.xlane.f32.xlu1 %v6686_v62  ;;  %v6681_v5 = vsel %vm6673_vm15, %v6669_v33, %v6677_v38  ;;  %v7490_v31 = vpop.permute.xlu0 %7489  ;;  %v7504_v33 = vsel %vm76_vm0, %v7492_v11, 0.0 }
0x2580   :  { %v6680_v28 = vsel %vm6672_vm3, %v6668_v41, %v6676_v56  ;;  %v6685_v9 = vsel %vm2357_vm12, %v6681_v5, -1e+30  ;;  %v7501_v39 = vsel %vm76_vm0, %v7490_v31, 0.0 }
0x2581   :  { %v6684_v60 = vsel %vm2356_vm2, %v6680_v28, -1e+30  ;;  %v6695_v1 = vsel %vm1509_vm5, %v6685_v9, -inf }
0x2582   :  { %v6692_v12 = vsel %vm1509_vm5, %v6684_v60, -inf  ;;  %v7496_v38 = vpop.permute.xlu1 %7495 }
0x2583   :  { %6690 = vmax.xlane.f32.xlu0 %v6689_v54  ;;  %6693 = vmax.xlane.f32.xlu1 %v6692_v12  ;;  %v7494_v41 = vpop.permute.xlu0 %7493  ;;  %v7510_v56 = vsel %vm76_vm0, %v7496_v38, 0.0 }
0x2584   :  { %v7507_v51 = vsel %vm76_vm0, %v7494_v41, 0.0 }
0x2587   :  { %6696 = vmax.xlane.f32.xlu0 %v6695_v1  ;;  %7502 = vadd.xlane.f32.xlu1 %v7501_v39 }
0x258b   :  { %7505 = vadd.xlane.f32.xlu0 %v7504_v33  ;;  %7508 = vadd.xlane.f32.xlu1 %v7507_v51 }
0x258f   :  { %7511 = vadd.xlane.f32.xlu0 %v7510_v56 }
0x2603   :  { %v7070_v47 = vpop.xlane.xlu1 %7069 }
0x2604   :  { %v7078_v62 = vsub.f32 %v22907_v40, %v7070_v47  ;;  %v7067_v28 = vpop.xlane.xlu0 %7066 }
0x2605   :  { %v7077_v5 = vsub.f32 %v22913_v26, %v7067_v28 }
0x2606   :  { %v7083_v31 = vmul.f32 1.442695, %v7078_v62 }
0x2607   :  { %v7081_v54 = vmul.f32 1.442695, %v7077_v5 }
0x2608   :  { %20971 = vpow2.f32 %v7083_v31  ;;  %v7073_v12 = vpop.xlane.xlu0 %7072  ;;  %v22952_v31 = vld [vmem:[%s24969_s11] sm:$0xff] }
0x2609   :  { %20973 = vpow2.f32 %v7081_v54  ;;  %v7079_v11 = vsub.f32 %v7063_v2, %v7073_v12  ;;  %v22944_v2 = vld [vmem:[%s24969_s11 + $0x8] sm:$0xff] }
0x260b   :  { %v7085_v1 = vmul.f32 1.442695, %v7079_v11 }
0x260c   :  { %v6688_v39 = vpop.xlane.xlu1 %6687  ;;  %v7076_v41 = vpop.xlane.xlu0 %7075 }
0x260d   :  { %20975 = vpow2.f32 %v7085_v1  ;;  %v6698_v33 = vsub.f32 %v6682_v30, %v6688_v39  ;;  %v7080_v51 = vsub.f32 %v7064_v32, %v7076_v41  ;;  %v22964_v39 = vld [vmem:[%s24969_s11 + $0x10] sm:$0xff] }
0x260f   :  { %v6702_v38 = vmul.f32 1.442695, %v6698_v33  ;;  %v7087_v56 = vmul.f32 1.442695, %v7080_v51 }
0x2610   :  { %v6694_v58 = vpop.xlane.xlu1 %6693  ;;  %v6691_v63 = vpop.xlane.xlu0 %6690 }
0x2611   :  { %20977 = vpow2.f32 %v6702_v38  ;;  %v6700_v40 = vsub.f32 %v6684_v60, %v6694_v58  ;;  %v6699_v47 = vsub.f32 %v6683_v42, %v6691_v63 }
0x2612   :  { %v20972_v26 = vpop.eup %20971  ;;  %20979 = vpow2.f32 %v7087_v56 }
0x2613   :  { %v20974_v62 = vpop.eup %20973  ;;  %v6706_v28 = vmul.f32 1.442695, %v6700_v40  ;;  %v6704_v5 = vmul.f32 1.442695, %v6699_v47  ;;  %v22947_v30 = vmul.f32 %v22944_v2, %v20972_v26 }
0x2614   :  { %v6697_v32 = vpop.xlane.xlu0 %6696  ;;  %v22955_v58 = vmul.f32 %v22952_v31, %v20974_v62  ;;  %v7503_v60 = vpop.xlane.xlu1 %7502  ;;  %v22977_v62 = vld [vmem:[%s24969_s11 + $0x18] sm:$0xff] }
0x2615   :  { %20981 = vpow2.f32 %v6706_v28  ;;  %v6701_v63 = vsub.f32 %v6685_v9, %v6697_v32  ;;  %v7096_v42 = vsel %vm1509_vm5, %v22947_v30, 0.0 }
0x2616   :  { %20983 = vpow2.f32 %v6704_v5  ;;  %7097 = vadd.xlane.f32.xlu0 %v7096_v42  ;;  %v7093_v54 = vsel %vm1509_vm5, %v22955_v58, 0.0 }
0x2617   :  { %v20976_v12 = vpop.eup %20975  ;;  %v6708_v11 = vmul.f32 1.442695, %v6701_v63  ;;  %7094 = vadd.xlane.f32.xlu1 %v7093_v54 }
0x2618   :  { %v7506_v1 = vpop.xlane.xlu0 %7505  ;;  %v22967_v9 = vmul.f32 %v22964_v39, %v20976_v12  ;;  %v7509_v56 = vpop.xlane.xlu1 %7508 }
0x2619   :  { %20985 = vpow2.f32 %v6708_v11  ;;  %v20004_v41 = vpack.c.bf16 %v7506_v1, %v7503_v60 }
0x261a   :  { %v7099_v33 = vsel %vm1509_vm5, %v22967_v9, 0.0 }
0x261b   :  { %v20978_v51 = vpop.eup %20977  ;;  %7100 = vadd.xlane.f32.xlu1 %v7099_v33  ;;  %20005 = vmatprep.subr.bf16.mxu1 %v20004_v41 }
0x261c   :  { %v20980_v38 = vpop.eup %20979  ;;  %20007 = vmatpush3.bf16.msra.mxu1 %v20004_v41  ;;  %v7512_v40 = vpop.xlane.xlu0 %7511  ;;  %v22972_v47 = vmul.f32 %v22952_v31, %v20978_v51 }
0x261d   :  { %v20008_v26 = vpack.c.bf16 %v7512_v40, %v7509_v56  ;;  %v22980_v28 = vmul.f32 %v22977_v62, %v20980_v38 }
0x261e   :  { %v6714_v5 = vsel %vm1509_vm5, %v22972_v47, 0.0 }
0x261f   :  { %v20982_v32 = vpop.eup %20981  ;;  %6715 = vadd.xlane.f32.xlu1 %v6714_v5  ;;  %v7102_v63 = vsel %vm1509_vm5, %v22980_v28, 0.0  ;;  %20009 = vmatprep.subr.bf16.mxu1 %v20008_v26 }
0x2620   :  { %v20984_v42 = vpop.eup %20983  ;;  %7103 = vadd.xlane.f32.xlu0 %v7102_v63  ;;  %20011 = vmatpush3.bf16.msra.mxu1 %v20008_v26  ;;  %v6712_v60 = vmul.f32 %v22964_v39, %v20982_v32 }
0x2621   :  { %20021 = vmatprep.subr.bf16.mxu1 %v22726_v6  ;;  %v6711_v54 = vmul.f32 %v22944_v2, %v20984_v42 }
0x2622   :  { %v6720_v12 = vsel %vm1509_vm5, %v6712_v60, 0.0 }
0x2623   :  { %v20986_v11 = vpop.eup %20985  ;;  %6721 = vadd.xlane.f32.xlu1 %v6720_v12  ;;  %v6717_v1 = vsel %vm1509_vm5, %v6711_v54, 0.0  ;;  %18704 = vmatmul.mubr.msk.f32.vlgmr.msra.gmra.mrb[100].mxu1 %vm1509_vm5, %v22845_v4 }
0x2624   :  { %6718 = vadd.xlane.f32.xlu0 %v6717_v1  ;;  %20023 = vmatpush3.bf16.msra.mxu1 %v22726_v6  ;;  %v6713_v41 = vmul.f32 %v22977_v62, %v20986_v11  ;;  %v7396_v6 = vpop.f32.mrb[98].mxu1 }
0x2625   :  { %20025 = vmatprep.subr.bf16.mxu1 %v22734_v25  ;;  %18706 = vmatprep.mubr.msk.f32.mxu1 %vm1509_vm5, %v22853_v8  ;;  %v18683_v4 = vpop.f32.mrb[99].mxu1 }
0x2626   :  { %v6723_v33 = vsel %vm1509_vm5, %v6713_v41, 0.0 }
0x2627   :  { %18707 = vmatmul.mubr.msk.f32.gmra.mrb[102].mxu1 %vm1509_vm5, %v22861_v55 }
0x2628   :  { %6724 = vadd.xlane.f32.xlu0 %v6723_v33  ;;  %20027 = vmatpush3.bf16.msra.mxu1 %v22734_v25 }
0x2629   :  { %18731 = vmatprep.mubr.msk.f32.mxu1 %vm1509_vm5, %v22267_v46 }
0x262b   :  { %18732 = vmatmul.mubr.msk.f32.vlgmr.msra.gmra.mrb[104].mxu1 %vm1509_vm5, %v22277_v14 }
0x262c   :  { %18734 = vmatprep.mubr.msk.f32.mxu1 %vm1509_vm5, %v22283_v16 }
0x262f   :  { %18735 = vmatmul.mubr.msk.f32.gmra.mrb[106].mxu1 %vm1509_vm5, %v22290_v24 }
0x26a3   :  { %v7098_v8 = vpop.xlane.xlu0 %7097 }
0x26a4   :  { %20987 = vrcp.f32 %v7098_v8  ;;  %v7095_v55 = vpop.xlane.xlu1 %7094 }
0x26a5   :  { %20989 = vrcp.f32 %v7095_v55 }
0x26a8   :  { %v7101_v51 = vpop.xlane.xlu1 %7100 }
0x26a9   :  { %20991 = vrcp.f32 %v7101_v51 }
0x26ac   :  { %v6716_v25 = vpop.xlane.xlu1 %6715 }
0x26ad   :  { %20993 = vrcp.f32 %v6716_v25  ;;  %v7104_v38 = vpop.xlane.xlu0 %7103 }
0x26ae   :  { %v20988_v56 = vpop.eup %20987  ;;  %20995 = vrcp.f32 %v7104_v38 }
0x26af   :  { %v20990_v40 = vpop.eup %20989  ;;  %v7110_v63 = vmul.f32 %v20988_v56, %v22947_v30 }
0x26b0   :  { %v6722_v26 = vpop.xlane.xlu1 %6721  ;;  %v7109_v5 = vmul.f32 %v20990_v40, %v22955_v58 }
0x26b1   :  { %20997 = vrcp.f32 %v6722_v26  ;;  %v6719_v32 = vpop.xlane.xlu0 %6718 }
0x26b2   :  { %20999 = vrcp.f32 %v6719_v32  ;;  %18653 = vmatprep.mubr.msk.f32.mxu0 %vm1509_vm5, %v7109_v5 }
0x26b3   :  { %v20992_v42 = vpop.eup %20991  ;;  %18654 = vmatmul.mubr.msk.f32.vlgmr.msra.gmra.mrb[64].mxu0 %vm1509_vm5, %v7110_v63 }
0x26b4   :  { %19985 = vmatpush3.bf16.msra.mxu0 %v22751_v43  ;;  %v7111_v12 = vmul.f32 %v20992_v42, %v22967_v9 }
0x26b5   :  { %19987 = vmatprep.subr.bf16.mxu0 %v22771_v0  ;;  %v6725_v11 = vpop.xlane.xlu0 %6724 }
0x26b6   :  { %21001 = vrcp.f32 %v6725_v11  ;;  %18656 = vmatprep.mubr.msk.f32.mxu0 %vm1509_vm5, %v7111_v12 }
0x26b7   :  { %v20994_v58 = vpop.eup %20993 }
0x26b8   :  { %v20996_v1 = vpop.eup %20995  ;;  %19989 = vmatpush3.bf16.msra.mxu0 %v22771_v0  ;;  %v6730_v30 = vmul.f32 %v20994_v58, %v22972_v47 }
0x26b9   :  { %v7112_v33 = vmul.f32 %v20996_v1, %v22980_v28  ;;  %19998 = vmatprep.subr.bf16.mxu0 %v25010_v29 }
0x26bb   :  { %v20998_v4 = vpop.eup %20997  ;;  %18657 = vmatmul.mubr.msk.f32.gmra.mrb[66].mxu0 %vm1509_vm5, %v7112_v33 }
0x26bc   :  { %v21000_v43 = vpop.eup %20999  ;;  %18667 = vmatprep.mubr.msk.f32.mxu0 %vm1509_vm5, %v6730_v30  ;;  %v6732_v9 = vmul.f32 %v20998_v4, %v6712_v60 }
0x26bd   :  { %v6731_v8 = vmul.f32 %v21000_v43, %v6711_v54 }
0x26bf   :  { %18668 = vmatmul.mubr.msk.f32.vlgmr.msra.gmra.mrb[64].mxu0 %vm1509_vm5, %v6731_v8 }
0x26c0   :  { %v21002_v55 = vpop.eup %21001  ;;  %20000 = vmatpush3.bf16.msra.mxu0 %v21994_v53  ;;  %18670 = vmatprep.mubr.msk.f32.mxu0 %vm1509_vm5, %v6732_v9 }
0x26c1   :  { %20001 = vmatprep.subr.bf16.mxu0 %v25010_v29  ;;  %v6733_v0 = vmul.f32 %v21002_v55, %v6713_v41 }
0x26c3   :  { %18671 = vmatmul.mubr.msk.f32.gmra.mrb[66].mxu0 %vm1509_vm5, %v6733_v0 }
0x26c4   :  { %20003 = vmatpush3.bf16.msra.mxu0 %v22004_v27  ;;  %18692 = vmatprep.mubr.msk.f32.mxu0 %vm21383_vm9, %v25008_v7 }
0x26c5   :  { %20013 = vmatprep.subr.bf16.mxu0 %v22876_v57 }
0x26c7   :  { %18693 = vmatmul.mubr.msk.f32.vlgmr.msra.gmra.mrb[68].mxu0 %vm1509_vm5, %v7396_v6 }
0x26c8   :  { %20015 = vmatpush3.bf16.msra.mxu0 %v22876_v57 }
0x26c9   :  { %20017 = vmatprep.subr.bf16.mxu0 %v22886_v61 }
0x26cc   :  { %20019 = vmatpush3.bf16.msra.mxu0 %v22886_v61 }
0x26f6   :  { %v18705_v47 = vpop.f32.mrb[100].mxu1 }
0x26f7   :  { %7605 = vperm.xlu0 %20677, %v18705_v47   ;;  %v7579_v28 = vpop.f32.mrb[101].mxu1 }
0x26f8   :  { %7600 = vperm.xlu1 %20678, %v7579_v28  }
0x26fa   :  { %v18708_v60 = vpop.f32.mrb[102].mxu1 }
0x26fb   :  { %v7589_v54 = vpop.f32.mrb[103].mxu1 }
0x26fc   :  { %7610 = vperm.xlu1 %20678, %v7589_v54  }
0x26fe   :  { %v23037_v41 = vpop.f32.mrb[104].mxu1 }
0x26ff   :  { %v23039_v51 = vpop.f32.mrb[105].mxu1 }
0x2700   :  { %7615 = vperm.xlu1 %20678, %v18708_v60  }
0x2702   :  { %v23041_v25 = vpop.f32.mrb[106].mxu1 }
0x2703   :  { %v23043_v6 = vpop.f32.mrb[107].mxu1 }
0x2776   :  { %v7606_v26 = vpop.permute.xlu0 %7605 }
0x2777   :  { %v7601_v57 = vpop.permute.xlu1 %7600 }
0x277b   :  { %v7611_v38 = vpop.permute.xlu1 %7610 }
0x277f   :  { %v7616_v5 = vpop.permute.xlu1 %7615 }
0x279a   :  { %v7469_v56 = vpop.f32.mrb[68].mxu0 }
0x279b   :  { %v7621_v61 = vrot.slane %v7469_v56, %v21712_v59  ;;  %v18694_v40 = vpop.f32.mrb[69].mxu0 }
0x279d   :  { %v7623_v32 = vadd.f32 %v7621_v61, %v7606_v26  ;;  %v7622_v63 = vadd.f32 %v7621_v61, %v7601_v57  ;;  %v7624_v42 = vadd.f32 %v7621_v61, %v7611_v38  ;;  %v7625_v12 = vadd.f32 %v7621_v61, %v7616_v5 }
0x279f   :  { %vm7627_vm6 = vcmp.gt.f32.partialorder %v7623_v32, 0.0  ;;  %v7631_v11 = vmul.f32 0.2, %v7623_v32  ;;  %vm7626_vm14 = vcmp.gt.f32.partialorder %v7622_v63, 0.0  ;;  %v7630_v58 = vmul.f32 0.2, %v7622_v63 }
0x27a0   :  { %vm7628_vm15 = vcmp.gt.f32.partialorder %v7624_v42, 0.0  ;;  %v7632_v1 = vmul.f32 0.2, %v7624_v42  ;;  %v7633_v4 = vmul.f32 0.2, %v7625_v12  ;;  %vm7629_vm3 = vcmp.gt.f32.partialorder %v7625_v12, 0.0 }
0x27a1   :  { %v7635_v30 = vsel %vm7627_vm6, %v7623_v32, %v7631_v11  ;;  %v7634_v33 = vsel %vm7626_vm14, %v7622_v63, %v7630_v58 }
0x27a2   :  { %v7639_v43 = vsel %vm2355_vm11, %v7635_v30, -1e+30  ;;  %v7638_v9 = vsel %vm2354_vm13, %v7634_v33, -1e+30  ;;  %v7636_v8 = vsel %vm7628_vm15, %v7624_v42, %v7632_v1  ;;  %v7637_v28 = vsel %vm7629_vm3, %v7625_v12, %v7633_v4 }
0x27a3   :  { %v7645_v55 = vsel %vm1509_vm5, %v7639_v43, -inf  ;;  %v7642_v0 = vsel %vm1509_vm5, %v7638_v9, -inf  ;;  %v7640_v47 = vsel %vm2356_vm2, %v7636_v8, -1e+30  ;;  %v7641_v54 = vsel %vm2357_vm12, %v7637_v28, -1e+30 }
0x27a4   :  { %7646 = vmax.xlane.f32.xlu1 %v7645_v55  ;;  %7643 = vmax.xlane.f32.xlu0 %v7642_v0  ;;  %v7648_v60 = vsel %vm1509_vm5, %v7640_v47, -inf  ;;  %v7651_v57 = vsel %vm1509_vm5, %v7641_v54, -inf }
0x27a8   :  { %7649 = vmax.xlane.f32.xlu0 %v7648_v60 }
0x27ac   :  { %7652 = vmax.xlane.f32.xlu0 %v7651_v57  ;;  %v2344_v57 = vld [vmem:[%s24971_s18 + $0x28] sm:$0xff] }
0x2831   :  { %v7647_v38 = vpop.xlane.xlu1 %7646  ;;  %v7644_v56 = vpop.xlane.xlu0 %7643 }
0x2832   :  { %v7655_v61 = vsub.f32 %v7639_v43, %v7647_v38  ;;  %v7654_v40 = vsub.f32 %v7638_v9, %v7644_v56 }
0x2834   :  { %v7660_v26 = vmul.f32 1.442695, %v7655_v61  ;;  %v7658_v5 = vmul.f32 1.442695, %v7654_v40 }
0x2835   :  { %v7650_v32 = vpop.xlane.xlu0 %7649 }
0x2836   :  { %21003 = vpow2.f32 %v7660_v26  ;;  %v7656_v63 = vsub.f32 %v7640_v47, %v7650_v32 }
0x2837   :  { %21005 = vpow2.f32 %v7658_v5 }
0x2838   :  { %v7662_v42 = vmul.f32 1.442695, %v7656_v63 }
0x2839   :  { %v7653_v12 = vpop.xlane.xlu0 %7652 }
0x283a   :  { %21007 = vpow2.f32 %v7662_v42  ;;  %v7657_v11 = vsub.f32 %v7641_v54, %v7653_v12  ;;  %v2343_v54 = vld [vmem:[%s24971_s18 + $0x20] sm:$0xff] }
0x283b   :  { %v20028_v38 = vpack.c.bf16 %v2344_v57, %v2343_v54 }
0x283c   :  { %v7664_v58 = vmul.f32 1.442695, %v7657_v11 }
0x283d   :  { %20029 = vmatprep.subr.bf16.mxu0 %v20028_v38 }
0x283e   :  { %21009 = vpow2.f32 %v7664_v58 }
0x2840   :  { %v21004_v1 = vpop.eup %21003 }
0x2841   :  { %v21006_v30 = vpop.eup %21005  ;;  %v7667_v33 = vmul.f32 %v22944_v2, %v21004_v1 }
0x2842   :  { %v7666_v4 = vmul.f32 %v22952_v31, %v21006_v30  ;;  %v2323_v30 = vld [vmem:[%s24967_s16 + $0x30] sm:$0xff] }
0x2843   :  { %v7673_v43 = vsel %vm1509_vm5, %v7667_v33, 0.0 }
0x2844   :  { %v21008_v9 = vpop.eup %21007  ;;  %7674 = vadd.xlane.f32.xlu0 %v7673_v43  ;;  %v7670_v8 = vsel %vm1509_vm5, %v7666_v4, 0.0  ;;  %v23097_v43 = vld [vmem:[%s24968_s17 + $0x38] sm:$0xff] }
0x2845   :  { %7671 = vadd.xlane.f32.xlu1 %v7670_v8  ;;  %v7668_v55 = vmul.f32 %v22964_v39, %v21008_v9  ;;  %v7895_v9 = vrot.slane %v23097_v43, %v21747_v20 }
0x2847   :  { %v7676_v0 = vsel %vm1509_vm5, %v7668_v55, 0.0 }
0x2848   :  { %v21010_v47 = vpop.eup %21009 }
0x2849   :  { %7677 = vadd.xlane.f32.xlu1 %v7676_v0  ;;  %v7669_v28 = vmul.f32 %v22977_v62, %v21010_v47 }
0x284b   :  { %v7679_v60 = vsel %vm1509_vm5, %v7669_v28, 0.0 }
0x284c   :  { %7680 = vadd.xlane.f32.xlu0 %v7679_v60 }
0x28d1   :  { %v7675_v56 = vpop.xlane.xlu0 %7674 }
0x28d2   :  { %v7672_v61 = vpop.xlane.xlu1 %7671  ;;  %21011 = vrcp.f32 %v7675_v56 }
0x28d3   :  { %21013 = vrcp.f32 %v7672_v61 }
0x28d6   :  { %v7678_v40 = vpop.xlane.xlu1 %7677 }
0x28d7   :  { %21015 = vrcp.f32 %v7678_v40 }
0x28d9   :  { %v7681_v26 = vpop.xlane.xlu0 %7680 }
0x28da   :  { %21017 = vrcp.f32 %v7681_v26 }
0x28dc   :  { %v21012_v5 = vpop.eup %21011 }
0x28dd   :  { %v21014_v32 = vpop.eup %21013  ;;  %v7687_v63 = vmul.f32 %v21012_v5, %v7667_v33  ;;  %v23104_v5 = vld [vmem:[%s24968_s17 + $0x30] sm:$0xff] }
0x28de   :  { %v7686_v42 = vmul.f32 %v21014_v32, %v7666_v4  ;;  %v7802_v32 = vrot.slane %v23104_v5, %v21747_v20 }
0x28e0   :  { %18717 = vmatprep.mubr.msk.f32.mxu0 %vm1509_vm5, %v7686_v42 }
0x28e1   :  { %v21016_v12 = vpop.eup %21015  ;;  %18718 = vmatmul.mubr.msk.f32.vlgmr.msra.gmra.mrb[64].mxu0 %vm1509_vm5, %v7687_v63 }
0x28e2   :  { %v7688_v11 = vmul.f32 %v21016_v12, %v7668_v55  ;;  %20031 = vmatpush3.bf16.msra.mxu0 %v20028_v38 }
0x28e3   :  { %20036 = vmatprep.subr.bf16.mxu0 %v25010_v29 }
0x28e4   :  { %v21018_v58 = vpop.eup %21017  ;;  %18720 = vmatprep.mubr.msk.f32.mxu0 %vm1509_vm5, %v7688_v11 }
0x28e5   :  { %v7689_v1 = vmul.f32 %v21018_v58, %v7669_v28 }
0x28e7   :  { %18721 = vmatmul.mubr.msk.f32.gmra.mrb[66].mxu0 %vm1509_vm5, %v7689_v1 }
0x28e8   :  { %18741 = vmatprep.mubr.msk.f32.mxu0 %vm76_vm0, %v23039_v51  ;;  %v2324_v51 = vld [vmem:[%s24967_s16 + $0x38] sm:$0xff] }
0x28e9   :  { %v20032_v33 = vpack.c.bf16 %v2324_v51, %v2323_v30 }
0x28eb   :  { %18742 = vmatmul.mubr.msk.f32.vlgmr.msra.gmra.mrb[70].mxu0 %vm76_vm0, %v23037_v41  ;;  %20033 = vmatprep.subr.bf16.mxu1 %v20032_v33 }
0x28ec   :  { %18744 = vmatprep.mubr.msk.f32.mxu0 %vm76_vm0, %v23043_v6  ;;  %20035 = vmatpush3.bf16.msra.mxu1 %v20032_v33 }
0x28ed   :  { %20044 = vmatprep.subr.bf16.mxu1 %v25010_v29 }
0x28ef   :  { %18745 = vmatmul.mubr.msk.f32.gmra.mrb[72].mxu0 %vm76_vm0, %v23041_v25 }
0x28f0   :  { %18765 = vmatprep.mubr.msk.f32.mxu0 %vm21383_vm9, %v25008_v7 }
0x29b4   :  { %v18719_v41 = vpop.f32.mrb[64].mxu0 }
0x29b5   :  { %v7772_v6 = vpop.f32.mrb[65].mxu0  ;;  %v7796_v26 = vmul.f32 0.33333334, %v18719_v41 }
0x29b6   :  { %v7795_v63 = vmul.f32 0.33333334, %v7772_v6 }
0x29b7   :  { %v7804_v42 = vadd.f32 %v7802_v32, %v7796_v26 }
0x29b8   :  { %v7803_v58 = vadd.f32 %v7802_v32, %v7795_v63 }
0x29ba   :  { %v18722_v4 = vpop.f32.mrb[66].mxu0 }
0x29bb   :  { %v7782_v25 = vpop.f32.mrb[67].mxu0  ;;  %v7798_v12 = vmul.f32 0.33333334, %v18722_v4 }
0x29bc   :  { %v7797_v1 = vmul.f32 0.33333334, %v7782_v25 }
0x29bd   :  { %v7806_v41 = vadd.f32 %v7802_v32, %v7798_v12 }
0x29be   :  { %v18743_v8 = vpop.f32.mrb[70].mxu0 }
0x29bf   :  { %v7980_v55 = vadd.f32 %v18743_v8, %v7895_v9  ;;  %v7974_v0 = vpop.f32.mrb[71].mxu0 }
0x29c0   :  { %v7975_v47 = vadd.f32 %v7974_v0, %v7895_v9  ;;  %v8009_v0 = vmax.f32 %v7803_v58, 0.0 }
0x29c1   :  { %v7994_v28 = vmul.f32 0.5, %v7980_v55 }
0x29c2   :  { %v7993_v60 = vmul.f32 0.5, %v7975_v47  ;;  %v18746_v54 = vpop.f32.mrb[72].mxu0  ;;  %v7805_v47 = vadd.f32 %v7802_v32, %v7797_v1 }
0x29c3   :  { %21019 = vtanh.f32 %v7994_v28  ;;  %v7990_v57 = vadd.f32 %v18746_v54, %v7895_v9  ;;  %v7984_v38 = vpop.f32.mrb[73].mxu0 }
0x29c4   :  { %21021 = vtanh.f32 %v7993_v60  ;;  %v7985_v56 = vadd.f32 %v7984_v38, %v7895_v9  ;;  %v8010_v9 = vmax.f32 %v7804_v42, 0.0  ;;  %v8011_v26 = vmax.f32 %v7805_v47, 0.0 }
0x29c5   :  { %v7996_v61 = vmul.f32 0.5, %v7990_v57 }
0x29c6   :  { %v7995_v40 = vmul.f32 0.5, %v7985_v56 }
0x29c7   :  { %21023 = vtanh.f32 %v7996_v61  ;;  %v8012_v61 = vmax.f32 %v7806_v41, 0.0 }
0x29c8   :  { %21025 = vtanh.f32 %v7995_v40 }
0x29cd   :  { %v21020_v11 = vpop.eup %21019 }
0x29ce   :  { %v21022_v30 = vpop.eup %21021  ;;  %v8002_v51 = vadd.f32 1.0, %v21020_v11 }
0x29cf   :  { %v8001_v33 = vadd.f32 1.0, %v21022_v30 }
0x29d0   :  { %v8006_v8 = vmul.f32 0.5, %v8002_v51 }
0x29d1   :  { %v21024_v55 = vpop.eup %21023  ;;  %v8005_v28 = vmul.f32 0.5, %v8001_v33 }
0x29d2   :  { %v21026_v60 = vpop.eup %21025  ;;  %v8014_v54 = vmul.f32 %v8010_v9, %v8006_v8  ;;  %v8018_v57 = vsub.f32 1.0, %v8006_v8  ;;  %v8004_v38 = vadd.f32 1.0, %v21024_v55 }
0x29d3   :  { %v8013_v6 = vmul.f32 %v8009_v0, %v8005_v28  ;;  %v8017_v56 = vsub.f32 1.0, %v8005_v28  ;;  %v8003_v4 = vadd.f32 1.0, %v21026_v60 }
0x29d4   :  { %v8022_v25 = vmul.f32 %v8018_v57, %v22713_v18  ;;  %v8008_v40 = vmul.f32 0.5, %v8004_v38 }
0x29d5   :  { %v8021_v63 = vmul.f32 %v8017_v56, %v22715_v36  ;;  %v8007_v42 = vmul.f32 0.5, %v8003_v4 }
0x29d6   :  { %v23110_v12 = vadd.f32 %v8022_v25, %v8014_v54  ;;  %v8016_v11 = vmul.f32 %v8012_v61, %v8008_v40  ;;  %v8020_v32 = vsub.f32 1.0, %v8008_v40 }
0x29d7   :  { %v23112_v58 = vadd.f32 %v8021_v63, %v8013_v6  ;;  %v8015_v1 = vmul.f32 %v8011_v26, %v8007_v42  ;;  %v8019_v30 = vsub.f32 1.0, %v8007_v42 }
0x29d8   :  { %v8030_v51 = vmax.f32 %v23110_v12, 0.0  ;;  %v8024_v33 = vmul.f32 %v8020_v32, %v22721_v3 }
0x29d9   :  { %v8023_v9 = vmul.f32 %v8019_v30, %v22723_v35  ;;  %v8029_v18 = vmax.f32 %v23112_v58, 0.0  ;;  %v21321_v35 = vld [vmem:[%s24968_s17 + $0x10] sm:$0xff] }
0x29da   :  { %v23118_v41 = vadd.f32 %v8024_v33, %v8016_v11  ;;  %v8292_v47 = vrot.slane %v21321_v35, %v22020_v34  ;;  %v8131_v63 = vrot.slane %v21321_v35, 2  ;;  %v21323_v35 = vld [vmem:[%s24969_s11 + $0x48] sm:$0xff] }
0x29db   :  { %v23120_v36 = vadd.f32 %v8023_v9, %v8015_v1  ;;  %18751 = vmatprep.mubr.msk.f32.mxu1 %vm76_vm0, %v8029_v18  ;;  %v20066_v8 = vpack.c.bf16 %v8030_v51, %v8029_v18  ;;  %v21322_v18 = vld [vmem:[%s24969_s11 + $0x40] sm:$0xff] }
0x29dc   :  { %18752 = vmatmul.mubr.msk.f32.vlgmr.msra.gmra.mrb[108].mxu1 %vm76_vm0, %v8030_v51  ;;  %v8032_v55 = vmax.f32 %v23118_v41, 0.0 }
0x29dd   :  { %v8031_v0 = vmax.f32 %v23120_v36, 0.0  ;;  %20046 = vmatpush3.bf16.msra.mxu1 %v21994_v53 }
0x29de   :  { %20047 = vmatprep.subr.bf16.mxu1 %v25010_v29 }
0x29df   :  { %18754 = vmatprep.mubr.msk.f32.mxu1 %vm76_vm0, %v8031_v0  ;;  %v20070_v3 = vpack.c.bf16 %v8032_v55, %v8031_v0  ;;  %v2313_v0 = vld [vmem:[%s24961_s10 + $0x18] sm:$0xff] }
0x29e0   :  { %18755 = vmatmul.mubr.msk.f32.gmra.mrb[110].mxu1 %vm76_vm0, %v8032_v55  ;;  %v2312_v55 = vld [vmem:[%s24961_s10 + $0x10] sm:$0xff] }
0x29e1   :  { %20049 = vmatpush3.bf16.msra.mxu1 %v22004_v27  ;;  %18776 = vmatprep.mubr.msk.f32.mxu1 %vm21383_vm9, %v25008_v7 }
0x2aaf   :  { %v18753_v28 = vpop.f32.mrb[108].mxu1 }
0x2ab0   :  { %v8294_v53 = vmul.f32 %v18753_v28, %v8292_v47  ;;  %v8111_v60 = vpop.f32.mrb[109].mxu1 }
0x2ab1   :  { %v20037_v54 = vpack.c.bf16 %v18753_v28, %v8111_v60  ;;  %v8293_v57 = vmul.f32 %v8292_v47, %v8111_v60  ;;  %v20078_v28 = vpack.c.bf16 %v2313_v0, %v2312_v55 }
0x2ab2   :  { %v8300_v38 = vsel %vm76_vm0, %v8294_v53, 0.0  ;;  %v21325_v53 = vld [vmem:[%s24969_s11 + $0x58] sm:$0xff] }
0x2ab3   :  { %8301 = vadd.xlane.f32.xlu0 %v8300_v38  ;;  %v18756_v6 = vpop.f32.mrb[110].mxu1  ;;  %20039 = vmatpush3.bf16.xpose.msk.msra.mxu0 %vm21908_vm10, %v20037_v54  ;;  %v8297_v27 = vsel %vm76_vm0, %v8293_v57, 0.0 }
0x2ab4   :  { %v8296_v56 = vmul.f32 %v18756_v6, %v8292_v47  ;;  %8298 = vadd.xlane.f32.xlu1 %v8297_v27  ;;  %v8121_v4 = vpop.f32.mrb[111].mxu1  ;;  %20040 = vmatprep.subr.bf16.mxu0 %v25010_v29 }
0x2ab5   :  { %v20041_v61 = vpack.c.bf16 %v18756_v6, %v8121_v4  ;;  %v8295_v25 = vmul.f32 %v8292_v47, %v8121_v4  ;;  %v21324_v47 = vld [vmem:[%s24969_s11 + $0x50] sm:$0xff] }
0x2ab6   :  { %v8306_v40 = vsel %vm76_vm0, %v8296_v56, 0.0 }
0x2ab7   :  { %8307 = vadd.xlane.f32.xlu0 %v8306_v40  ;;  %v8303_v26 = vsel %vm76_vm0, %v8295_v25, 0.0 }
0x2ab8   :  { %8304 = vadd.xlane.f32.xlu1 %v8303_v26 }
0x2abb   :  { %20043 = vmatpush3.bf16.xpose.msk.msra.mxu0 %vm21908_vm10, %v20041_v61 }
0x2abc   :  { %20059 = vmatprep.subr.bf16.mxu0 %v20037_v54 }
0x2ac2   :  { %18766 = vmatmul.mubr.msk.f32.vlgmr.msra.gmra.mrb[74].mxu0 %vm76_vm0, %v8131_v63 }
0x2ac3   :  { %20061 = vmatpush3.bf16.msra.mxu0 %v20037_v54 }
0x2ac4   :  { %20063 = vmatprep.subr.bf16.mxu0 %v20041_v61 }
0x2ac7   :  { %20065 = vmatpush3.bf16.msra.mxu0 %v20041_v61 }
0x2b40   :  { %v8302_v42 = vpop.xlane.xlu0 %8301 }
0x2b41   :  { %v8299_v11 = vpop.xlane.xlu1 %8298 }
0x2b42   :  { %v20050_v32 = vpack.c.bf16 %v8302_v42, %v8299_v11 }
0x2b44   :  { %20051 = vmatprep.subr.bf16.mxu1 %v20050_v32  ;;  %v8308_v1 = vpop.xlane.xlu0 %8307 }
0x2b45   :  { %v8305_v30 = vpop.xlane.xlu1 %8304 }
0x2b46   :  { %v20054_v33 = vpack.c.bf16 %v8308_v1, %v8305_v30 }
0x2b95   :  { %v8212_v51 = vpop.f32.mrb[74].mxu0 }
0x2b96   :  { %18777 = vmatmul.mubr.msk.f32.vlgmr.msra.gmra.mrb[112].mxu1 %vm1509_vm5, %v8212_v51  ;;  %v18767_v9 = vpop.f32.mrb[75].mxu0 }
0x2b97   :  { %20053 = vmatpush3.bf16.msra.mxu1 %v20050_v32  ;;  %18787 = vmatprep.mubr.msk.f32.mxu1 %vm1509_vm5, %v21322_v18 }
0x2b98   :  { %20055 = vmatprep.subr.bf16.mxu1 %v20054_v33 }
0x2b9b   :  { %20057 = vmatpush3.bf16.msra.mxu1 %v20054_v33 }
0x2b9c   :  { %20067 = vmatprep.subr.bf16.mxu1 %v20066_v8 }
0x2b9e   :  { %18788 = vmatmul.mubr.msk.f32.vlgmr.msra.gmra.mrb[114].mxu1 %vm1509_vm5, %v21323_v35 }
0x2b9f   :  { %20069 = vmatpush3.bf16.msra.mxu1 %v20066_v8  ;;  %18790 = vmatprep.mubr.msk.f32.mxu1 %vm1509_vm5, %v21324_v47  ;;  %v2308_v8 = vld [vmem:[%s24962_s9 + $0x10] sm:$0xff] }
0x2ba0   :  { %20071 = vmatprep.subr.bf16.mxu1 %v20070_v3 }
0x2ba2   :  { %18791 = vmatmul.mubr.msk.f32.gmra.mrb[116].mxu1 %vm1509_vm5, %v21325_v53 }
0x2ba3   :  { %20073 = vmatpush3.bf16.msra.mxu1 %v20070_v3  ;;  %18815 = vmatprep.mubr.msk.f32.mxu1 %vm1509_vm5, %v22267_v46  ;;  %v2309_v46 = vld [vmem:[%s24962_s9 + $0x18] sm:$0xff] }
0x2ba4   :  { %20080 = vmatprep.subr.msk.bf16.mxu1 %vm21776_vm7, %v20078_v28 }
0x2ba6   :  { %18816 = vmatmul.mubr.msk.f32.vlgmr.msra.gmra.mrb[118].mxu1 %vm1509_vm5, %v22277_v14 }
0x2ba7   :  { %18818 = vmatprep.mubr.msk.f32.mxu1 %vm1509_vm5, %v22283_v16  ;;  %20083 = vmatpush3.bf16.msk.msra.mxu1 %vm21776_vm7, %v20078_v28 }
0x2baa   :  { %18819 = vmatmul.mubr.msk.f32.gmra.mrb[120].mxu1 %vm1509_vm5, %v22290_v24 }
0x2bab   :  { %18835 = vmatprep.mubr.msk.f32.mxu1 %vm2358_vm8, %v2308_v8 }
0x2bae   :  { %18836 = vmatmul.mubr.msk.f32.vlgmr.msra.gmra.mrb[122].mxu1 %vm2358_vm8, %v2309_v46 }
0x2baf   :  { %18842 = vmatprep.mubr.msk.f32.mxu1 %vm76_vm0, %v21326_v45 }
0x2c69   :  { %v8285_v14 = vpop.f32.mrb[112].mxu1 }
0x2c6a   :  { %v18778_v16 = vpop.f32.mrb[113].mxu1  ;;  %v8417_v35 = vrot.slane %v8285_v14, %v21712_v59 }
0x2c71   :  { %v18789_v3 = vpop.f32.mrb[114].mxu1 }
0x2c72   :  { %v8375_v60 = vpop.f32.mrb[115].mxu1 }
0x2c75   :  { %v18792_v54 = vpop.f32.mrb[116].mxu1 }
0x2c76   :  { %v8385_v24 = vpop.f32.mrb[117].mxu1 }
0x2c79   :  { %v23194_v57 = vpop.f32.mrb[118].mxu1 }
0x2c7a   :  { %v23196_v38 = vpop.f32.mrb[119].mxu1 }
0x2c7d   :  { %v23198_v6 = vpop.f32.mrb[120].mxu1 }
0x2c7e   :  { %v23200_v27 = vpop.f32.mrb[121].mxu1 }
0x2c81   :  { %v18837_v56 = vpop.f32.mrb[122].mxu1 }
0x2c82   :  { %v8898_v4 = vmax.f32 %v18837_v56, 0.0  ;;  %v8888_v61 = vpop.f32.mrb[123].mxu1 }
0x2c83   :  { %v8897_v25 = vmax.f32 %v8888_v61, 0.0 }
0x2c84   :  { %v8902_v40 = vsel %vm76_vm0, %v8898_v4, -inf }
0x2c85   :  { %8903 = vmax.xlane.f32.xlu0 %v8902_v40  ;;  %v8899_v26 = vsel %vm76_vm0, %v8897_v25, -inf }
0x2c86   :  { %8900 = vmax.xlane.f32.xlu1 %v8899_v26 }
0x2d12   :  { %v8904_v63 = vpop.xlane.xlu0 %8903 }
0x2d13   :  { %v8906_v42 = vsub.f32 %v8898_v4, %v8904_v63  ;;  %v8901_v11 = vpop.xlane.xlu1 %8900 }
0x2d14   :  { %v8905_v32 = vsub.f32 %v8897_v25, %v8901_v11 }
0x2d15   :  { %v8909_v1 = vmul.f32 1.442695, %v8906_v42 }
0x2d16   :  { %v8907_v30 = vmul.f32 1.442695, %v8905_v32 }
0x2d17   :  { %21027 = vpow2.f32 %v8909_v1 }
0x2d18   :  { %21029 = vpow2.f32 %v8907_v30 }
0x2d21   :  { %v21028_v51 = vpop.eup %21027 }
0x2d22   :  { %v21030_v33 = vpop.eup %21029  ;;  %v8914_v9 = vsel %vm76_vm0, %v21028_v51, 0.0 }
0x2d23   :  { %8915 = vadd.xlane.f32.xlu0 %v8914_v9  ;;  %v8911_v18 = vsel %vm76_vm0, %v21030_v33, 0.0 }
0x2d24   :  { %8912 = vadd.xlane.f32.xlu1 %v8911_v18  ;;  %v21327_v18 = vld [vmem:[%s24958_s12 + $0x8] sm:$0xff] }
0x2d35   :  { %8396 = vperm.xlu1 %20678, %v8375_v60  }
0x2d39   :  { %8401 = vperm.xlu0 %20677, %v18789_v3   ;;  %8406 = vperm.xlu1 %20678, %v8385_v24  }
0x2d3d   :  { %8411 = vperm.xlu1 %20678, %v18792_v54  }
0x2db0   :  { %v8916_v55 = vpop.xlane.xlu0 %8915 }
0x2db1   :  { %21031 = vrcp.f32 %v8916_v55  ;;  %v8913_v0 = vpop.xlane.xlu1 %8912  ;;  %v21328_v55 = vld [vmem:[%s24958_s12 + $0x10] sm:$0xff] }
0x2db2   :  { %21033 = vrcp.f32 %v8913_v0 }
0x2db5   :  { %v8397_v47 = vpop.permute.xlu1 %8396 }
0x2db6   :  { %v8418_v28 = vadd.f32 %v8417_v35, %v8397_v47 }
0x2db8   :  { %v8426_v53 = vmul.f32 0.2, %v8418_v28  ;;  %v8402_v8 = vpop.permute.xlu0 %8401  ;;  %vm8422_vm7 = vcmp.gt.f32.partialorder %v8418_v28, 0.0 }
0x2db9   :  { %v8419_v46 = vadd.f32 %v8417_v35, %v8402_v8  ;;  %v8407_v45 = vpop.permute.xlu1 %8406 }
0x2dba   :  { %v8420_v16 = vadd.f32 %v8417_v35, %v8407_v45  ;;  %v8430_v56 = vsel %vm8422_vm7, %v8418_v28, %v8426_v53 }
0x2dbb   :  { %v21032_v4 = vpop.eup %21031  ;;  %v8427_v60 = vmul.f32 0.2, %v8419_v46  ;;  %v8434_v3 = vsel %vm2354_vm13, %v8430_v56, -1e+30  ;;  %vm8423_vm8 = vcmp.gt.f32.partialorder %v8419_v46, 0.0 }
0x2dbc   :  { %v21034_v54 = vpop.eup %21033  ;;  %v8428_v24 = vmul.f32 0.2, %v8420_v16  ;;  %v8438_v61 = vsel %vm1509_vm5, %v8434_v3, -inf  ;;  %v8920_v14 = vmul.f32 %v21032_v4, %v21028_v51  ;;  %vm8424_vm6 = vcmp.gt.f32.partialorder %v8420_v16, 0.0 }
0x2dbd   :  { %8439 = vmax.xlane.f32.xlu0 %v8438_v61  ;;  %v8412_v25 = vpop.permute.xlu1 %8411  ;;  %v8431_v40 = vsel %vm8423_vm8, %v8419_v46, %v8427_v60  ;;  %v8919_v26 = vmul.f32 %v21034_v54, %v21030_v33  ;;  %v2316_v33 = vld [vmem:[%s24966_s15 + $0x10] sm:$0xff] }
0x2dbe   :  { %v8421_v63 = vadd.f32 %v8417_v35, %v8412_v25  ;;  %v8435_v42 = vsel %vm2355_vm11, %v8431_v40, -1e+30  ;;  %v8432_v11 = vsel %vm8424_vm6, %v8420_v16, %v8428_v24 }
0x2dbf   :  { %v8441_v32 = vsel %vm1509_vm5, %v8435_v42, -inf  ;;  %v20084_v21 = vpack.c.bf16 %v8920_v14, %v8919_v26  ;;  %v8436_v1 = vsel %vm2356_vm2, %v8432_v11, -1e+30 }
0x2dc0   :  { %v8429_v30 = vmul.f32 0.2, %v8421_v63  ;;  %8442 = vmax.xlane.f32.xlu1 %v8441_v32  ;;  %v8444_v51 = vsel %vm1509_vm5, %v8436_v1, -inf  ;;  %vm8425_vm13 = vcmp.gt.f32.partialorder %v8421_v63, 0.0  ;;  %v2345_v32 = vld [vmem:[%s24971_s18 + $0x30] sm:$0xff] }
0x2dc1   :  { %20085 = vmatprep.subr.bf16.mxu1 %v20084_v21  ;;  %8445 = vmax.xlane.f32.xlu0 %v8444_v51 }
0x2dc2   :  { %20087 = vmatpush3.bf16.msra.mxu1 %v20084_v21  ;;  %v8433_v13 = vsel %vm8425_vm13, %v8421_v63, %v8429_v30 }
0x2dc3   :  { %v8437_v9 = vsel %vm2357_vm12, %v8433_v13, -1e+30  ;;  %18858 = vmatprep.subr.mxu1 %v2316_v33 }
0x2dc4   :  { %v8447_v48 = vsel %vm1509_vm5, %v8437_v9, -inf }
0x2dc5   :  { %18843 = vmatmul.mubr.msk.f32.vlgmr.msra.gmra.mrb[124].mxu1 %vm76_vm0, %v21327_v18  ;;  %8448 = vmax.xlane.f32.xlu0 %v8447_v48 }
0x2dc6   :  { %18845 = vmatprep.mubr.msk.f32.mxu1 %vm76_vm0, %v21328_v55  ;;  %18859 = vmatpush3.msra.mxu1 %v2316_v33 }
0x2dc7   :  { %20092 = vmatprep.subr.bf16.mxu1 %v25010_v29 }
0x2dc9   :  { %18846 = vmatmul.mubr.msk.f32.gmra.mrb[126].mxu1 %vm76_vm0, %v21329_v23 }
0x2dca   :  { %18860 = vmatprep.mubr.msk.f32.mxu1 %vm1421_vm4, %v21851_v52 }
0x2dcd   :  { %18861 = vmatmul.mubr.msk.f32.vlgmr.msra.gmra.mrb[128].mxu1 %vm1421_vm4, %v21849_v44 }
0x2dce   :  { %18863 = vmatprep.mubr.msk.f32.mxu1 %vm1421_vm4, %v21859_v50 }
0x2dd1   :  { %18864 = vmatmul.mubr.msk.f32.gmra.mrb[130].mxu1 %vm1421_vm4, %v21855_v49 }
0x2dd2   :  { %18882 = vmatprep.mubr.msk.f32.mxu1 %vm21383_vm9, %v25008_v7 }
0x2e4a   :  { %v8440_v0 = vpop.xlane.xlu0 %8439 }
0x2e4b   :  { %v8450_v35 = vsub.f32 %v8434_v3, %v8440_v0 }
0x2e4d   :  { %v8454_v47 = vmul.f32 1.442695, %v8450_v35  ;;  %v8443_v28 = vpop.xlane.xlu1 %8442 }
0x2e4e   :  { %v8451_v53 = vsub.f32 %v8435_v42, %v8443_v28  ;;  %v8446_v8 = vpop.xlane.xlu0 %8445 }
0x2e4f   :  { %21035 = vpow2.f32 %v8454_v47  ;;  %v8452_v46 = vsub.f32 %v8436_v1, %v8446_v8 }
0x2e50   :  { %v8456_v45 = vmul.f32 1.442695, %v8451_v53 }
0x2e51   :  { %v8458_v16 = vmul.f32 1.442695, %v8452_v46 }
0x2e52   :  { %21037 = vpow2.f32 %v8456_v45  ;;  %v8449_v56 = vpop.xlane.xlu0 %8448 }
0x2e53   :  { %21039 = vpow2.f32 %v8458_v16  ;;  %v8453_v4 = vsub.f32 %v8437_v9, %v8449_v56  ;;  %v2325_v16 = vld [vmem:[%s24967_s16 + $0x40] sm:$0xff] }
0x2e55   :  { %v8460_v60 = vmul.f32 1.442695, %v8453_v4 }
0x2e57   :  { %21041 = vpow2.f32 %v8460_v60 }
0x2e59   :  { %v21036_v54 = vpop.eup %21035 }
0x2e5a   :  { %v8462_v24 = vmul.f32 %v22952_v31, %v21036_v54 }
0x2e5c   :  { %v21038_v61 = vpop.eup %21037  ;;  %v8466_v3 = vsel %vm1509_vm5, %v8462_v24, 0.0 }
0x2e5d   :  { %v21040_v14 = vpop.eup %21039  ;;  %8467 = vadd.xlane.f32.xlu1 %v8466_v3  ;;  %v8463_v25 = vmul.f32 %v22944_v2, %v21038_v61  ;;  %v2346_v2 = vld [vmem:[%s24971_s18 + $0x38] sm:$0xff] }
0x2e5e   :  { %v8464_v40 = vmul.f32 %v22964_v39, %v21040_v14  ;;  %v20074_v39 = vpack.c.bf16 %v2346_v2, %v2345_v32 }
0x2e5f   :  { %v8469_v26 = vsel %vm1509_vm5, %v8463_v25, 0.0 }
0x2e60   :  { %8470 = vadd.xlane.f32.xlu0 %v8469_v26  ;;  %v8472_v63 = vsel %vm1509_vm5, %v8464_v40, 0.0  ;;  %20075 = vmatprep.subr.bf16.mxu0 %v20074_v39 }
0x2e61   :  { %v21042_v42 = vpop.eup %21041  ;;  %8473 = vadd.xlane.f32.xlu1 %v8472_v63 }
0x2e62   :  { %v8465_v11 = vmul.f32 %v22977_v62, %v21042_v42 }
0x2e64   :  { %v8475_v31 = vsel %vm1509_vm5, %v8465_v11, 0.0 }
0x2e65   :  { %8476 = vadd.xlane.f32.xlu0 %v8475_v31 }
0x2e98   :  { %v18844_v21 = vpop.f32.mrb[124].mxu1 }
0x2e99   :  { %v8987_v1 = vpop.f32.mrb[125].mxu1 }
0x2e9c   :  { %v18847_v30 = vpop.f32.mrb[126].mxu1 }
0x2e9d   :  { %v8997_v51 = vpop.f32.mrb[127].mxu1 }
0x2ea0   :  { %v23259_v33 = vpop.f32.mrb[128].mxu1 }
0x2ea1   :  { %v23261_v62 = vpop.f32.mrb[129].mxu1 }
0x2ea4   :  { %v23263_v13 = vpop.f32.mrb[130].mxu1 }
0x2ea5   :  { %v23265_v9 = vpop.f32.mrb[131].mxu1 }
0x2eea   :  { %v8468_v48 = vpop.xlane.xlu1 %8467 }
0x2eeb   :  { %21043 = vrcp.f32 %v8468_v48 }
0x2eed   :  { %v8471_v18 = vpop.xlane.xlu0 %8470 }
0x2eee   :  { %21045 = vrcp.f32 %v8471_v18  ;;  %v8474_v55 = vpop.xlane.xlu1 %8473 }
0x2eef   :  { %21047 = vrcp.f32 %v8474_v55 }
0x2ef2   :  { %v8477_v23 = vpop.xlane.xlu0 %8476 }
0x2ef3   :  { %21049 = vrcp.f32 %v8477_v23 }
0x2ef5   :  { %v21044_v0 = vpop.eup %21043 }
0x2ef6   :  { %v8482_v35 = vmul.f32 %v21044_v0, %v8462_v24 }
0x2ef8   :  { %v21046_v47 = vpop.eup %21045  ;;  %18801 = vmatprep.mubr.msk.f32.mxu0 %vm1509_vm5, %v8482_v35 }
0x2ef9   :  { %v21048_v28 = vpop.eup %21047  ;;  %v8483_v53 = vmul.f32 %v21046_v47, %v8463_v25  ;;  %v23326_v47 = vld [vmem:[%s24968_s17 + $0x18] sm:$0xff] }
0x2efa   :  { %v8484_v8 = vmul.f32 %v21048_v28, %v8464_v40 }
0x2efb   :  { %18802 = vmatmul.mubr.msk.f32.vlgmr.msra.gmra.mrb[76].mxu0 %vm1509_vm5, %v8483_v53 }
0x2efc   :  { %18804 = vmatprep.mubr.msk.f32.mxu0 %vm1509_vm5, %v8484_v8  ;;  %20077 = vmatpush3.bf16.msra.mxu0 %v20074_v39 }
0x2efd   :  { %v21050_v46 = vpop.eup %21049  ;;  %20089 = vmatprep.subr.bf16.mxu0 %v21829_v10 }
0x2efe   :  { %v8485_v45 = vmul.f32 %v21050_v46, %v8465_v11 }
0x2f00   :  { %18805 = vmatmul.mubr.msk.f32.gmra.mrb[78].mxu0 %vm1509_vm5, %v8485_v45 }
0x2f01   :  { %18825 = vmatprep.mubr.msk.f32.mxu0 %vm76_vm0, %v23196_v38 }
0x2f04   :  { %18826 = vmatmul.mubr.msk.f32.vlgmr.msra.gmra.mrb[80].mxu0 %vm76_vm0, %v23194_v57 }
0x2f05   :  { %18828 = vmatprep.mubr.msk.f32.mxu0 %vm76_vm0, %v23200_v27  ;;  %20091 = vmatpush3.bf16.msra.mxu0 %v21829_v10  ;;  %v8675_v27 = vrot.slane %v23097_v43, %v21976_v37  ;;  %v8489_v43 = vrot.slane %v23104_v5, %v21976_v37 }
0x2f06   :  { %18866 = vmatprep.subr.mxu0 %v2325_v16 }
0x2f08   :  { %18829 = vmatmul.mubr.msk.f32.gmra.mrb[82].mxu0 %vm76_vm0, %v23198_v6 }
0x2f09   :  { %18852 = vmatprep.mubr.msk.f32.mxu0 %vm76_vm0, %v8987_v1 }
0x2f0c   :  { %18853 = vmatmul.mubr.msk.f32.vlgmr.msra.gmra.mrb[84].mxu0 %vm76_vm0, %v18844_v21 }
0x2f0d   :  { %18855 = vmatprep.mubr.msk.f32.mxu0 %vm76_vm0, %v8997_v51  ;;  %18867 = vmatpush3.msra.mxu0 %v2325_v16  ;;  %v9813_v16 = vrot.slane %v23326_v47, %v21928_v22 }
0x2f0e   :  { %20100 = vmatprep.subr.bf16.mxu0 %v25010_v29 }
0x2f10   :  { %18856 = vmatmul.mubr.msk.f32.gmra.mrb[86].mxu0 %vm76_vm0, %v18847_v30 }
0x2f11   :  { %18868 = vmatprep.mubr.msk.f32.mxu0 %vm1421_vm4, %v21851_v52 }
0x2f14   :  { %18869 = vmatmul.mubr.msk.f32.vlgmr.msra.gmra.mrb[88].mxu0 %vm1421_vm4, %v21849_v44 }
0x2f15   :  { %18871 = vmatprep.mubr.msk.f32.mxu0 %vm1421_vm4, %v21859_v50 }
0x2f18   :  { %18872 = vmatmul.mubr.msk.f32.gmra.mrb[90].mxu0 %vm1421_vm4, %v21855_v49 }
0x2f19   :  { %18893 = vmatprep.mubr.msk.f32.mxu0 %vm21383_vm9, %v25008_v7 }
0x2fce   :  { %v18803_v10 = vpop.f32.mrb[76].mxu0 }
0x2fcf   :  { %v8568_v57 = vpop.f32.mrb[77].mxu0  ;;  %v8574_v42 = vadd.f32 %v18803_v10, %v8489_v43 }
0x2fd0   :  { %v8569_v31 = vadd.f32 %v8568_v57, %v8489_v43 }
0x2fd1   :  { %v8790_v51 = vmax.f32 %v8574_v42, 0.0 }
0x2fd2   :  { %v8789_v23 = vmax.f32 %v8569_v31, 0.0 }
0x2fd3   :  { %v18806_v38 = vpop.f32.mrb[78].mxu0 }
0x2fd4   :  { %v8578_v6 = vpop.f32.mrb[79].mxu0  ;;  %v8584_v21 = vadd.f32 %v18806_v38, %v8489_v43 }
0x2fd5   :  { %v8579_v0 = vadd.f32 %v8578_v6, %v8489_v43 }
0x2fd6   :  { %v8792_v10 = vmax.f32 %v8584_v21, 0.0 }
0x2fd7   :  { %v18827_v52 = vpop.f32.mrb[80].mxu0 }
0x2fd8   :  { %v8760_v56 = vadd.f32 %v18827_v52, %v8675_v27  ;;  %v8754_v4 = vpop.f32.mrb[81].mxu0 }
0x2fd9   :  { %v8755_v44 = vadd.f32 %v8754_v4, %v8675_v27 }
0x2fda   :  { %v8774_v60 = vmul.f32 0.5, %v8760_v56 }
0x2fdb   :  { %v8773_v54 = vmul.f32 0.5, %v8755_v44  ;;  %v18830_v50 = vpop.f32.mrb[82].mxu0 }
0x2fdc   :  { %21051 = vtanh.f32 %v8774_v60  ;;  %v8770_v24 = vadd.f32 %v18830_v50, %v8675_v27  ;;  %v8764_v49 = vpop.f32.mrb[83].mxu0  ;;  %v8791_v60 = vmax.f32 %v8579_v0, 0.0 }
0x2fdd   :  { %21053 = vtanh.f32 %v8773_v54  ;;  %v8765_v61 = vadd.f32 %v8764_v49, %v8675_v27 }
0x2fde   :  { %v8776_v3 = vmul.f32 0.5, %v8770_v24 }
0x2fdf   :  { %v8775_v14 = vmul.f32 0.5, %v8765_v61  ;;  %v23301_v25 = vpop.f32.mrb[84].mxu0 }
0x2fe0   :  { %21055 = vtanh.f32 %v8776_v3  ;;  %v23303_v40 = vpop.f32.mrb[85].mxu0 }
0x2fe1   :  { %21057 = vtanh.f32 %v8775_v14 }
0x2fe3   :  { %v23307_v26 = vpop.f32.mrb[86].mxu0 }
0x2fe4   :  { %v23309_v63 = vpop.f32.mrb[87].mxu0 }
0x2fe6   :  { %v21052_v11 = vpop.eup %21051 }
0x2fe7   :  { %v21054_v32 = vpop.eup %21053  ;;  %v8782_v2 = vadd.f32 1.0, %v21052_v11  ;;  %v23311_v39 = vpop.f32.mrb[88].mxu0 }
0x2fe8   :  { %v8781_v1 = vadd.f32 1.0, %v21054_v32  ;;  %v23313_v30 = vpop.f32.mrb[89].mxu0 }
0x2fe9   :  { %v8786_v48 = vmul.f32 0.5, %v8782_v2  ;;  %v23317_v5 = vpack.c.bf16 %v23311_v39, %v23313_v30  ;;  %v23321_v18 = vpack.i.bf16 %v23311_v39, %v23313_v30 }
0x2fea   :  { %v21056_v55 = vpop.eup %21055  ;;  %v8785_v35 = vmul.f32 0.5, %v8781_v1 }
0x2feb   :  { %v21058_v28 = vpop.eup %21057  ;;  %v8794_v53 = vmul.f32 %v8790_v51, %v8786_v48  ;;  %v8798_v8 = vsub.f32 1.0, %v8786_v48  ;;  %v8784_v46 = vadd.f32 1.0, %v21056_v55  ;;  %20720 = vrot.lane.b32.xlu1 %v23321_v18, %s21369_s3  ;;  %v23330_v45 = vpop.f32.mrb[90].mxu0  ;;  %20095 = vmatpush3.bf16.xpose.msk.msra.mxu1 %vm21908_vm10, %v23317_v5 }
0x2fec   :  { %v8793_v57 = vmul.f32 %v8789_v23, %v8785_v35  ;;  %v8797_v38 = vsub.f32 1.0, %v8785_v35  ;;  %v8783_v6 = vadd.f32 1.0, %v21058_v28  ;;  %v23337_v27 = vpop.f32.mrb[91].mxu0  ;;  %20096 = vmatprep.subr.bf16.mxu1 %v25010_v29  ;;  %v9648_v28 = vrot.slane %v23326_v47, 1 }
0x2fed   :  { %v8802_v52 = vmul.f32 %v8798_v8, %v23110_v12  ;;  %v8788_v56 = vmul.f32 0.5, %v8784_v46  ;;  %v23343_v4 = vpack.c.bf16 %v23330_v45, %v23337_v27  ;;  %v23347_v44 = vpack.i.bf16 %v23330_v45, %v23337_v27 }
0x2fee   :  { %v8801_v54 = vmul.f32 %v8797_v38, %v23112_v58  ;;  %v8787_v50 = vmul.f32 0.5, %v8783_v6 }
0x2fef   :  { %v23350_v24 = vadd.f32 %v8802_v52, %v8794_v53  ;;  %v8796_v49 = vmul.f32 %v8792_v10, %v8788_v56  ;;  %v8800_v61 = vsub.f32 1.0, %v8788_v56  ;;  %9815 = vrot.lane.b32.xlu1 %v9813_v16, %s21385_s2  ;;  %20725 = vrot.lane.b32.xlu0 %v23347_v44, %s21369_s3  ;;  %v9442_v53 = vrot.slane %v23326_v47, %v21976_v37  ;;  %v2298_v56 = vld [vmem:[%s24969_s11 + $0x80] sm:$0xff] }
0x2ff0   :  { %v8795_v12 = vmul.f32 %v8791_v60, %v8787_v50  ;;  %v8799_v3 = vsub.f32 1.0, %v8787_v50  ;;  %v23356_v43 = vadd.f32 %v8801_v54, %v8793_v57  ;;  %v2299_v60 = vld [vmem:[%s24969_s11 + $0x88] sm:$0xff]  ;;  %v2300_v50 = vld [vmem:[%s24969_s11 + $0x90] sm:$0xff] }
0x2ff1   :  { %v8804_v14 = vmul.f32 %v8800_v61, %v23118_v41  ;;  %v9444_v8 = vmul.f32 %v23311_v39, %v9442_v53  ;;  %v9445_v16 = vmul.f32 %v9442_v53, %v23337_v27  ;;  %v9443_v10 = vmul.f32 %v9442_v53, %v23313_v30 }
0x2ff2   :  { %v8803_v42 = vmul.f32 %v8799_v3, %v23120_v36  ;;  %v9446_v6 = vmul.f32 %v23330_v45, %v9442_v53  ;;  %v23403_v54 = vpack.c.bf16 %v2299_v60, %v2298_v56  ;;  %v23454_v53 = vld [vmem:[%s24969_s11 + $0xb8] sm:$0xff] }
0x2ff3   :  { %20099 = vmatpush3.bf16.xpose.msk.msra.mxu1 %vm21908_vm10, %v23343_v4  ;;  %v23362_v58 = vadd.f32 %v8804_v14, %v8796_v49  ;;  %v9450_v46 = vsel %vm76_vm0, %v9444_v8, 0.0  ;;  %v9453_v57 = vsel %vm76_vm0, %v9445_v16, 0.0  ;;  %v9447_v38 = vsel %vm76_vm0, %v9443_v10, 0.0  ;;  %v2301_v49 = vld [vmem:[%s24969_s11 + $0x98] sm:$0xff] }
0x2ff4   :  { %20114 = vmatprep.subr.bf16.mxu1 %v25010_v29  ;;  %v23365_v11 = vadd.f32 %v8803_v42, %v8795_v12  ;;  %v9456_v52 = vsel %vm76_vm0, %v9446_v6, 0.0  ;;  %20102 = vmatpush3.bf16.msra.mxu0 %v23403_v54  ;;  %v23413_v61 = vpack.c.bf16 %v2301_v49, %v2300_v50  ;;  %v23419_v12 = vld [vmem:[%s24969_s11 + $0xa0] sm:$0xff] }
0x2ff5   :  { %20103 = vmatprep.subr.bf16.mxu0 %v25010_v29 }
0x2ff8   :  { %20105 = vmatpush3.bf16.msra.mxu0 %v23413_v61 }
0x2ffa   :  { %18883 = vmatmul.mubr.msk.f32.vlgmr.msra.gmra.mrb[132].mxu1 %vm76_vm0, %v23326_v47 }
0x2ffb   :  { %18918 = vmatprep.mubr.msk.f32.mxu1 %vm21383_vm9, %v25008_v7 }
0x305d   :  { %v20721_v41 = vpop.permute.xlu1 %20720 }
0x305e   :  { %v20723_v31 = vunpack.i.h.bf16 %v20721_v41  ;;  %v20722_v32 = vunpack.i.l.bf16 %v20721_v41 }
0x3060   :  { %v20115_v36 = vpack.c.bf16 %v20723_v31, %v20722_v32 }
0x3061   :  { %v9816_v2 = vpop.permute.xlu1 %9815  ;;  %v20726_v21 = vpop.permute.xlu0 %20725 }
0x3062   :  { %20117 = vmatpush3.bf16.xpose.msk.msra.mxu1 %vm21908_vm10, %v20115_v36  ;;  %v9818_v1 = vmul.f32 %v9816_v2, %v23313_v30  ;;  %v9819_v51 = vmul.f32 %v23311_v39, %v9816_v2  ;;  %v20728_v48 = vunpack.i.h.bf16 %v20726_v21  ;;  %v20727_v55 = vunpack.i.l.bf16 %v20726_v21 }
0x3063   :  { %20118 = vmatprep.subr.bf16.mxu1 %v25010_v29  ;;  %v9821_v23 = vmul.f32 %v23330_v45, %v9816_v2  ;;  %v9820_v0 = vmul.f32 %v9816_v2, %v23337_v27 }
0x3064   :  { %9826 = vrot.lane.b32.xlu1 %v9818_v1, %s21369_s3  ;;  %9828 = vrot.lane.b32.xlu0 %v9819_v51, %s21369_s3  ;;  %v20119_v35 = vpack.c.bf16 %v20728_v48, %v20727_v55  ;;  %v10390_v51 = vrot.slane %v23326_v47, %v22020_v34 }
0x3068   :  { %9832 = vrot.lane.b32.xlu0 %v9821_v23, %s21369_s3  ;;  %9830 = vrot.lane.b32.xlu1 %v9820_v0, %s21369_s3 }
0x306a   :  { %20121 = vmatpush3.bf16.xpose.msk.msra.mxu1 %vm21908_vm10, %v20119_v35 }
0x306b   :  { %20137 = vmatprep.subr.bf16.mxu1 %v20115_v36 }
0x3071   :  { %18919 = vmatmul.mubr.msk.f32.vlgmr.msra.gmra.mrb[134].mxu1 %vm76_vm0, %v9648_v28 }
0x3072   :  { %20139 = vmatpush3.bf16.msra.mxu1 %v20115_v36 }
0x3073   :  { %20141 = vmatprep.subr.bf16.mxu1 %v20119_v35 }
0x3076   :  { %20143 = vmatpush3.bf16.msra.mxu1 %v20119_v35 }
0x3077   :  { %20145 = vmatprep.subr.bf16.mxu1 %v23317_v5 }
0x3087   :  { %9451 = vadd.xlane.f32.xlu0 %v9450_v46 }
0x308b   :  { %9454 = vadd.xlane.f32.xlu0 %v9453_v57 }
0x308c   :  { %9448 = vadd.xlane.f32.xlu1 %v9447_v38 }
0x3090   :  { %9457 = vadd.xlane.f32.xlu1 %v9456_v52 }
0x30cd   :  { %v9362_v3 = vpop.f32.mrb[132].mxu1 }
0x30ce   :  { %18894 = vmatmul.mubr.msk.f32.vlgmr.msra.gmra.mrb[92].mxu0 %vm1509_vm5, %v9362_v3  ;;  %v18884_v14 = vpop.f32.mrb[133].mxu1 }
0x30cf   :  { %18904 = vmatprep.mubr.msk.f32.mxu0 %vm1509_vm5, %v23419_v12 }
0x30d6   :  { %v9827_v42 = vpop.permute.xlu1 %9826  ;;  %v9829_v41 = vpop.permute.xlu0 %9828 }
0x30d7   :  { %v9841_v31 = vsel %vm76_vm0, %v9829_v41, 0.0  ;;  %v9838_v32 = vsel %vm76_vm0, %v9827_v42, 0.0 }
0x30d8   :  { %9842 = vadd.xlane.f32.xlu1 %v9841_v31  ;;  %9839 = vadd.xlane.f32.xlu0 %v9838_v32 }
0x30da   :  { %v9833_v36 = vpop.permute.xlu0 %9832  ;;  %v9831_v2 = vpop.permute.xlu1 %9830 }
0x30db   :  { %v9847_v21 = vsel %vm76_vm0, %v9833_v36, 0.0  ;;  %v9844_v1 = vsel %vm76_vm0, %v9831_v2, 0.0 }
0x30dc   :  { %9848 = vadd.xlane.f32.xlu1 %v9847_v21  ;;  %9845 = vadd.xlane.f32.xlu0 %v9844_v1 }
0x30ed   :  { %20735 = vrot.lane.b32.xlu1 %v23347_v44, %s21370_s4  ;;  %v23438_v44 = vld [vmem:[%s24969_s11 + $0xa8] sm:$0xff] }
0x30f1   :  { %10392 = vrot.lane.b32.xlu1 %v10390_v51, %s21386_s21 }
0x30f2   :  { %20730 = vrot.lane.b32.xlu0 %v23321_v18, %s21370_s4  ;;  %v23444_v18 = vld [vmem:[%s24969_s11 + $0xb0] sm:$0xff] }
0x3114   :  { %v9452_v48 = vpop.xlane.xlu0 %9451 }
0x3118   :  { %v9455_v0 = vpop.xlane.xlu0 %9454 }
0x3119   :  { %v9449_v55 = vpop.xlane.xlu1 %9448 }
0x311a   :  { %v20106_v23 = vpack.c.bf16 %v9452_v48, %v9449_v55 }
0x311c   :  { %20107 = vmatprep.subr.bf16.mxu0 %v20106_v23 }
0x311d   :  { %v9458_v35 = vpop.xlane.xlu1 %9457  ;;  %20109 = vmatpush3.bf16.msra.mxu0 %v20106_v23 }
0x311e   :  { %v20110_v28 = vpack.c.bf16 %v9458_v35, %v9455_v0 }
0x3120   :  { %20111 = vmatprep.subr.bf16.mxu0 %v20110_v28 }
0x3121   :  { %20113 = vmatpush3.bf16.msra.mxu0 %v20110_v28 }
0x3122   :  { %20122 = vmatprep.subr.bf16.mxu0 %v25010_v29 }
0x3124   :  { %18905 = vmatmul.mubr.msk.f32.vlgmr.msra.gmra.mrb[94].mxu0 %vm1509_vm5, %v23438_v44 }
0x3125   :  { %20124 = vmatpush3.bf16.msra.mxu0 %v23403_v54  ;;  %18907 = vmatprep.mubr.msk.f32.mxu0 %vm1509_vm5, %v23444_v18 }
0x3126   :  { %20125 = vmatprep.subr.bf16.mxu0 %v25010_v29 }
0x3128   :  { %18908 = vmatmul.mubr.msk.f32.gmra.mrb[96].mxu0 %vm1509_vm5, %v23454_v53 }
0x3129   :  { %20127 = vmatpush3.bf16.msra.mxu0 %v23413_v61  ;;  %18929 = vmatprep.mubr.msk.f32.mxu0 %vm21383_vm9, %v25008_v7 }
0x3144   :  { %v9733_v8 = vpop.f32.mrb[134].mxu1 }
0x3145   :  { %18930 = vmatmul.mubr.msk.f32.vlgmr.msra.gmra.mrb[98].mxu0 %vm1509_vm5, %v9733_v8  ;;  %v18920_v46 = vpop.f32.mrb[135].mxu1 }
0x3146   :  { %18940 = vmatprep.mubr.msk.f32.mxu0 %vm1509_vm5, %v23419_v12 }
0x3165   :  { %v9843_v16 = vpop.xlane.xlu1 %9842  ;;  %v9840_v10 = vpop.xlane.xlu0 %9839 }
0x3166   :  { %v20128_v57 = vpack.c.bf16 %v9843_v16, %v9840_v10 }
0x3168   :  { %20129 = vmatprep.subr.bf16.mxu0 %v20128_v57 }
0x3169   :  { %v9849_v38 = vpop.xlane.xlu1 %9848  ;;  %v9846_v6 = vpop.xlane.xlu0 %9845  ;;  %20131 = vmatpush3.bf16.msra.mxu0 %v20128_v57  ;;  %v10225_v57 = vrot.slane %v23326_v47, 2 }
0x316a   :  { %v20132_v52 = vpack.c.bf16 %v9849_v38, %v9846_v6  ;;  %v23506_v6 = vld [vmem:[%s24969_s11 + $0x60] sm:$0xff] }
0x316b   :  { %vm8809_vm12 = vcmp.gt.f32.partialorder %v23506_v6, 0.0 }
0x316c   :  { %20133 = vmatprep.subr.bf16.mxu0 %v20132_v52 }
0x316d   :  { %v20731_v56 = vpop.permute.xlu0 %20730  ;;  %20135 = vmatpush3.bf16.msra.mxu0 %v20132_v52  ;;  %v20736_v3 = vpop.permute.xlu1 %20735 }
0x316e   :  { %20152 = vmatprep.subr.bf16.mxu0 %v25010_v29  ;;  %v20733_v60 = vunpack.i.h.bf16 %v20731_v56  ;;  %v20732_v50 = vunpack.i.l.bf16 %v20731_v56  ;;  %v20738_v14 = vunpack.i.h.bf16 %v20736_v3  ;;  %v20737_v42 = vunpack.i.l.bf16 %v20736_v3 }
0x3170   :  { %18941 = vmatmul.mubr.msk.f32.vlgmr.msra.gmra.mrb[100].mxu0 %vm1509_vm5, %v23438_v44  ;;  %v23470_v49 = vpack.c.bf16 %v20733_v60, %v20732_v50  ;;  %v23480_v41 = vpack.c.bf16 %v20738_v14, %v20737_v42  ;;  %v23513_v14 = vld [vmem:[%s24969_s11 + $0x70] sm:$0xff] }
0x3171   :  { %18943 = vmatprep.mubr.msk.f32.mxu0 %vm1509_vm5, %v23444_v18  ;;  %v10393_v28 = vpop.permute.xlu1 %10392  ;;  %vm8811_vm3 = vcmp.gt.f32.partialorder %v23513_v14, 0.0 }
0x3172   :  { %v10396_v8 = vmul.f32 %v23311_v39, %v10393_v28  ;;  %v10395_v46 = vmul.f32 %v10393_v28, %v23313_v30  ;;  %v10398_v16 = vmul.f32 %v23330_v45, %v10393_v28  ;;  %v10397_v10 = vmul.f32 %v10393_v28, %v23337_v27  ;;  %v23501_v45 = vld [vmem:[%s24969_s11 + $0x68] sm:$0xff] }
0x3173   :  { %vm8810_vm11 = vcmp.gt.f32.partialorder %v23501_v45, 0.0 }
0x3174   :  { %18944 = vmatmul.mubr.msk.f32.gmra.mrb[102].mxu0 %vm1509_vm5, %v23454_v53 }
0x3175   :  { %18982 = vmatprep.mubr.msk.f32.mxu0 %vm21383_vm9, %v25008_v7 }
0x3176   :  { %20155 = vmatpush3.bf16.xpose.msk.msra.mxu0 %vm21908_vm10, %v23470_v49 }
0x3177   :  { %20156 = vmatprep.subr.bf16.mxu0 %v25010_v29 }
0x317e   :  { %20159 = vmatpush3.bf16.xpose.msk.msra.mxu0 %vm21908_vm10, %v23480_v41 }
0x3185   :  { %18983 = vmatmul.mubr.msk.f32.vlgmr.msra.gmra.mrb[104].mxu0 %vm76_vm0, %v10225_v57 }
0x3186   :  { %19004 = vmatprep.mubr.msk.f32.mxu0 %vm1509_vm5, %v23419_v12 }
0x31a1   :  { %v9435_v31 = vpop.f32.mrb[92].mxu0 }
0x31a2   :  { %v18895_v32 = vpop.f32.mrb[93].mxu0  ;;  %v9579_v42 = vrot.slane %v9435_v31, %v21712_v59 }
0x31f7   :  { %v18906_v36 = vpop.f32.mrb[94].mxu0 }
0x31f8   :  { %v9537_v2 = vpop.f32.mrb[95].mxu0 }
0x31fb   :  { %v18909_v21 = vpop.f32.mrb[96].mxu0 }
0x31fc   :  { %v9547_v1 = vpop.f32.mrb[97].mxu0 }
0x3218   :  { %v9806_v51 = vpop.f32.mrb[98].mxu0 }
0x3219   :  { %v18931_v48 = vpop.f32.mrb[99].mxu0  ;;  %v9958_v39 = vrot.slane %v9806_v51, %v21712_v59 }
0x3243   :  { %v18942_v55 = vpop.f32.mrb[100].mxu0 }
0x3244   :  { %9942 = vperm.xlu1 %20678, %v18942_v55   ;;  %v9916_v23 = vpop.f32.mrb[101].mxu0 }
0x3245   :  { %9937 = vperm.xlu0 %20677, %v9916_v23  }
0x3247   :  { %v18945_v0 = vpop.f32.mrb[102].mxu0 }
0x3248   :  { %9952 = vperm.xlu1 %20678, %v18945_v0   ;;  %v9926_v35 = vpop.f32.mrb[103].mxu0 }
0x3249   :  { %9947 = vperm.xlu0 %20677, %v9926_v35  }
0x324c   :  { %9563 = vperm.xlu1 %20678, %v18906_v36  }
0x324d   :  { %9558 = vperm.xlu0 %20677, %v9537_v2  }
0x3250   :  { %9573 = vperm.xlu1 %20678, %v18909_v21   ;;  %v23523_v21 = vld [vmem:[%s24969_s11 + $0x78] sm:$0xff] }
0x3251   :  { %9568 = vperm.xlu0 %20677, %v9547_v1   ;;  %vm8812_vm8 = vcmp.gt.f32.partialorder %v23523_v21, 0.0 }
0x3254   :  { %10405 = vrot.lane.b32.xlu1 %v10396_v8, %s21370_s4 }
0x3255   :  { %10403 = vrot.lane.b32.xlu0 %v10395_v46, %s21370_s4 }
0x3258   :  { %10409 = vrot.lane.b32.xlu1 %v10398_v16, %s21370_s4 }
0x3259   :  { %10407 = vrot.lane.b32.xlu0 %v10397_v10, %s21370_s4 }
0x32c3   :  { %v9943_v30 = vpop.permute.xlu1 %9942 }
0x32c4   :  { %v9960_v27 = vadd.f32 %v9958_v39, %v9943_v30  ;;  %v9938_v38 = vpop.permute.xlu0 %9937 }
0x32c5   :  { %v9959_v47 = vadd.f32 %v9958_v39, %v9938_v38 }
0x32c6   :  { %v9968_v52 = vmul.f32 0.2, %v9960_v27  ;;  %vm9964_vm2 = vcmp.gt.f32.partialorder %v9960_v27, 0.0 }
0x32c7   :  { %v9967_v12 = vmul.f32 0.2, %v9959_v47  ;;  %v9953_v56 = vpop.permute.xlu1 %9952  ;;  %vm9963_vm14 = vcmp.gt.f32.partialorder %v9959_v47, 0.0 }
0x32c8   :  { %v9962_v60 = vadd.f32 %v9958_v39, %v9953_v56  ;;  %v9948_v50 = vpop.permute.xlu0 %9947  ;;  %v9972_v3 = vsel %vm9964_vm2, %v9960_v27, %v9968_v52 }
0x32c9   :  { %v9961_v32 = vadd.f32 %v9958_v39, %v9948_v50  ;;  %v23518_v36 = vsel %vm8810_vm11, %v9972_v3, -1e+30  ;;  %v9971_v2 = vsel %vm9963_vm14, %v9959_v47, %v9967_v12 }
0x32ca   :  { %v9970_v1 = vmul.f32 0.2, %v9962_v60  ;;  %v9982_v51 = vsel %vm1509_vm5, %v23518_v36, -inf  ;;  %v23529_v48 = vsel %vm8809_vm12, %v9971_v2, -1e+30  ;;  %vm9966_vm15 = vcmp.gt.f32.partialorder %v9962_v60, 0.0 }
0x32cb   :  { %v9969_v31 = vmul.f32 0.2, %v9961_v32  ;;  %9983 = vmax.xlane.f32.xlu1 %v9982_v51  ;;  %v9564_v55 = vpop.permute.xlu1 %9563  ;;  %v9979_v23 = vsel %vm1509_vm5, %v23529_v48, -inf  ;;  %vm9965_vm7 = vcmp.gt.f32.partialorder %v9961_v32, 0.0 }
0x32cc   :  { %v9581_v0 = vadd.f32 %v9579_v42, %v9564_v55  ;;  %9980 = vmax.xlane.f32.xlu0 %v9979_v23  ;;  %v9559_v35 = vpop.permute.xlu0 %9558  ;;  %v9974_v46 = vsel %vm9966_vm15, %v9962_v60, %v9970_v1 }
0x32cd   :  { %v9580_v28 = vadd.f32 %v9579_v42, %v9559_v35  ;;  %v9973_v8 = vsel %vm9965_vm7, %v9961_v32, %v9969_v31  ;;  %v9978_v47 = vsel %vm8812_vm8, %v9974_v46, -1e+30 }
0x32ce   :  { %v9589_v16 = vmul.f32 0.2, %v9581_v0  ;;  %v9977_v10 = vsel %vm8811_vm3, %v9973_v8, -1e+30  ;;  %vm9585_vm6 = vcmp.gt.f32.partialorder %v9581_v0, 0.0  ;;  %v9988_v32 = vsel %vm1509_vm5, %v9978_v47, -inf }
0x32cf   :  { %v9588_v57 = vmul.f32 0.2, %v9580_v28  ;;  %v9574_v39 = vpop.permute.xlu1 %9573  ;;  %v9985_v30 = vsel %vm1509_vm5, %v9977_v10, -inf  ;;  %vm9584_vm13 = vcmp.gt.f32.partialorder %v9580_v28, 0.0 }
0x32d0   :  { %v9583_v27 = vadd.f32 %v9579_v42, %v9574_v39  ;;  %9986 = vmax.xlane.f32.xlu0 %v9985_v30  ;;  %v9569_v38 = vpop.permute.xlu0 %9568  ;;  %v9593_v56 = vsel %vm9585_vm6, %v9581_v0, %v9589_v16 }
0x32d1   :  { %v9582_v52 = vadd.f32 %v9579_v42, %v9569_v38  ;;  %v9592_v12 = vsel %vm9584_vm13, %v9580_v28, %v9588_v57  ;;  %v9597_v1 = vsel %vm8810_vm11, %v9593_v56, -1e+30 }
0x32d2   :  { %v9591_v60 = vmul.f32 0.2, %v9583_v27  ;;  %v9596_v50 = vsel %vm8809_vm12, %v9592_v12, -1e+30  ;;  %vm9587_vm2 = vcmp.gt.f32.partialorder %v9583_v27, 0.0  ;;  %v9603_v23 = vsel %vm1509_vm5, %v9597_v1, -inf }
0x32d3   :  { %v9590_v3 = vmul.f32 0.2, %v9582_v52  ;;  %v9600_v2 = vsel %vm1509_vm5, %v9596_v50, -inf  ;;  %vm9586_vm14 = vcmp.gt.f32.partialorder %v9582_v52, 0.0  ;;  %v10406_v28 = vpop.permute.xlu1 %10405 }
0x32d4   :  { %9989 = vmax.xlane.f32.xlu0 %v9988_v32  ;;  %9601 = vmax.xlane.f32.xlu1 %v9600_v2  ;;  %v9595_v42 = vsel %vm9587_vm2, %v9583_v27, %v9591_v60  ;;  %v10404_v31 = vpop.permute.xlu0 %10403  ;;  %v10418_v57 = vsel %vm76_vm0, %v10406_v28, 0.0 }
0x32d5   :  { %v9594_v51 = vsel %vm9586_vm14, %v9582_v52, %v9590_v3  ;;  %v9599_v35 = vsel %vm8812_vm8, %v9595_v42, -1e+30  ;;  %v10415_v46 = vsel %vm76_vm0, %v10404_v31, 0.0 }
0x32d6   :  { %v9598_v55 = vsel %vm8811_vm3, %v9594_v51, -1e+30  ;;  %v9609_v8 = vsel %vm1509_vm5, %v9599_v35, -inf }
0x32d7   :  { %v9606_v0 = vsel %vm1509_vm5, %v9598_v55, -inf  ;;  %v10410_v30 = vpop.permute.xlu1 %10409 }
0x32d8   :  { %9604 = vmax.xlane.f32.xlu0 %v9603_v23  ;;  %9607 = vmax.xlane.f32.xlu1 %v9606_v0  ;;  %v10408_v16 = vpop.permute.xlu0 %10407  ;;  %v10424_v27 = vsel %vm76_vm0, %v10410_v30, 0.0 }
0x32d9   :  { %v10421_v39 = vsel %vm76_vm0, %v10408_v16, 0.0 }
0x32dc   :  { %9610 = vmax.xlane.f32.xlu0 %v9609_v8  ;;  %10416 = vadd.xlane.f32.xlu1 %v10415_v46 }
0x32e0   :  { %10419 = vadd.xlane.f32.xlu0 %v10418_v57  ;;  %10422 = vadd.xlane.f32.xlu1 %v10421_v39 }
0x32e4   :  { %10425 = vadd.xlane.f32.xlu0 %v10424_v27 }
0x3358   :  { %v9984_v38 = vpop.xlane.xlu1 %9983 }
0x3359   :  { %v9992_v52 = vsub.f32 %v23518_v36, %v9984_v38  ;;  %v9981_v12 = vpop.xlane.xlu0 %9980 }
0x335a   :  { %v9991_v56 = vsub.f32 %v23529_v48, %v9981_v12 }
0x335b   :  { %v9997_v60 = vmul.f32 1.442695, %v9992_v52 }
0x335c   :  { %v9995_v3 = vmul.f32 1.442695, %v9991_v56 }
0x335d   :  { %21059 = vpow2.f32 %v9997_v60  ;;  %v9987_v32 = vpop.xlane.xlu0 %9986 }
0x335e   :  { %21061 = vpow2.f32 %v9995_v3  ;;  %v9993_v2 = vsub.f32 %v9977_v10, %v9987_v32 }
0x3360   :  { %v9999_v51 = vmul.f32 1.442695, %v9993_v2 }
0x3361   :  { %v9602_v42 = vpop.xlane.xlu1 %9601  ;;  %v9990_v31 = vpop.xlane.xlu0 %9989 }
0x3362   :  { %21063 = vpow2.f32 %v9999_v51  ;;  %v9612_v23 = vsub.f32 %v9596_v50, %v9602_v42  ;;  %v9994_v0 = vsub.f32 %v9978_v47, %v9990_v31 }
0x3364   :  { %v9616_v28 = vmul.f32 1.442695, %v9612_v23  ;;  %v10001_v8 = vmul.f32 1.442695, %v9994_v0 }
0x3365   :  { %v9608_v46 = vpop.xlane.xlu1 %9607  ;;  %v9605_v16 = vpop.xlane.xlu0 %9604 }
0x3366   :  { %21065 = vpow2.f32 %v9616_v28  ;;  %v9614_v36 = vsub.f32 %v9598_v55, %v9608_v46  ;;  %v9613_v57 = vsub.f32 %v9597_v1, %v9605_v16 }
0x3367   :  { %v21060_v48 = vpop.eup %21059  ;;  %21067 = vpow2.f32 %v10001_v8 }
0x3368   :  { %v21062_v39 = vpop.eup %21061  ;;  %v9620_v30 = vmul.f32 1.442695, %v9614_v36  ;;  %v9618_v27 = vmul.f32 1.442695, %v9613_v57  ;;  %v23560_v10 = vmul.f32 %v21060_v48, %v23501_v45 }
0x3369   :  { %v9611_v38 = vpop.xlane.xlu0 %9610  ;;  %v23563_v52 = vmul.f32 %v21062_v39, %v23506_v6  ;;  %v10417_v55 = vpop.xlane.xlu1 %10416 }
0x336a   :  { %21069 = vpow2.f32 %v9620_v30  ;;  %v9615_v47 = vsub.f32 %v9599_v35, %v9611_v38  ;;  %v10010_v50 = vsel %vm1509_vm5, %v23560_v10, 0.0 }
0x336b   :  { %21071 = vpow2.f32 %v9618_v27  ;;  %10011 = vadd.xlane.f32.xlu0 %v10010_v50  ;;  %v10007_v1 = vsel %vm1509_vm5, %v23563_v52, 0.0 }
0x336c   :  { %v21064_v12 = vpop.eup %21063  ;;  %v9622_v56 = vmul.f32 1.442695, %v9615_v47  ;;  %10008 = vadd.xlane.f32.xlu1 %v10007_v1  ;;  %v25012_v47 = vld [vmem:[#allocation7_spill] sm:$0xff] }
0x336d   :  { %v10420_v60 = vpop.xlane.xlu0 %10419  ;;  %v23570_v3 = vmul.f32 %v21064_v12, %v23513_v14  ;;  %v10423_v42 = vpop.xlane.xlu1 %10422 }
0x336e   :  { %21073 = vpow2.f32 %v9622_v56  ;;  %v20166_v32 = vpack.c.bf16 %v10420_v60, %v10417_v55  ;;  %v21330_v55 = vld [vmem:[%s24970_s14] sm:$0xff]  ;;  %v10310_v12 = vpop.f32.mrb[104].mxu0 }
0x336f   :  { %v10013_v35 = vsel %vm1509_vm5, %v23570_v3, 0.0  ;;  %v18984_v56 = vpop.f32.mrb[105].mxu0 }
0x3370   :  { %v21066_v2 = vpop.eup %21065  ;;  %10014 = vadd.xlane.f32.xlu1 %v10013_v35  ;;  %20167 = vmatprep.subr.bf16.mxu0 %v20166_v32 }
0x3371   :  { %v21068_v51 = vpop.eup %21067  ;;  %20169 = vmatpush3.bf16.msra.mxu0 %v20166_v32  ;;  %v10426_v31 = vpop.xlane.xlu0 %10425  ;;  %v23575_v23 = vmul.f32 %v21066_v2, %v23506_v6 }
0x3372   :  { %v20170_v0 = vpack.c.bf16 %v10426_v31, %v10423_v42  ;;  %v23578_v28 = vmul.f32 %v21068_v51, %v23523_v21 }
0x3373   :  { %v9628_v8 = vsel %vm1509_vm5, %v23575_v23, 0.0 }
0x3374   :  { %v21070_v46 = vpop.eup %21069  ;;  %9629 = vadd.xlane.f32.xlu1 %v9628_v8  ;;  %v10016_v16 = vsel %vm1509_vm5, %v23578_v28, 0.0  ;;  %20171 = vmatprep.subr.bf16.mxu0 %v20170_v0 }
0x3375   :  { %v21072_v36 = vpop.eup %21071  ;;  %10017 = vadd.xlane.f32.xlu0 %v10016_v16  ;;  %20173 = vmatpush3.bf16.msra.mxu0 %v20170_v0  ;;  %v23585_v57 = vmul.f32 %v21070_v46, %v23513_v14 }
0x3376   :  { %20183 = vmatprep.subr.bf16.mxu0 %v22195_v17  ;;  %v23589_v48 = vmul.f32 %v21072_v36, %v23501_v45 }
0x3377   :  { %v9634_v39 = vsel %vm1509_vm5, %v23585_v57, 0.0 }
0x3378   :  { %v21074_v30 = vpop.eup %21073  ;;  %9635 = vadd.xlane.f32.xlu1 %v9634_v39  ;;  %v9631_v27 = vsel %vm1509_vm5, %v23589_v48, 0.0  ;;  %19005 = vmatmul.mubr.msk.f32.vlgmr.msra.gmra.mrb[106].mxu0 %vm1509_vm5, %v23438_v44  ;;  %v23610_v44 = vmul.f32 %v21330_v55, %v23303_v40  ;;  %v21332_v40 = vld [vmem:[%s24970_s14 + $0x10] sm:$0xff] }
0x3379   :  { %9632 = vadd.xlane.f32.xlu0 %v9631_v27  ;;  %20185 = vmatpush3.bf16.msra.mxu0 %v22195_v17  ;;  %v23599_v38 = vmul.f32 %v21074_v30, %v23523_v21  ;;  %v21331_v17 = vld [vmem:[%s24970_s14 + $0x8] sm:$0xff]  ;;  %v23627_v1 = vmul.f32 %v21332_v40, %v23309_v63 }
0x337a   :  { %20187 = vmatprep.subr.bf16.mxu0 %v25012_v47  ;;  %19007 = vmatprep.mubr.msk.f32.mxu0 %vm1509_vm5, %v23444_v18  ;;  %v23619_v18 = vmul.f32 %v21331_v17, %v23301_v25  ;;  %v21333_v25 = vld [vmem:[%s24970_s14 + $0x18] sm:$0xff] }
0x337b   :  { %v9637_v50 = vsel %vm1509_vm5, %v23599_v38, 0.0 }
0x337c   :  { %19008 = vmatmul.mubr.msk.f32.gmra.mrb[108].mxu0 %vm1509_vm5, %v23454_v53  ;;  %v23637_v53 = vmul.f32 %v21333_v25, %v23307_v26 }
0x337d   :  { %9638 = vadd.xlane.f32.xlu0 %v9637_v50  ;;  %20189 = vmatpush3.bf16.msra.mxu0 %v25012_v47 }
0x337e   :  { %19032 = vmatprep.mubr.msk.f32.mxu0 %vm1509_vm5, %v23610_v44 }
0x3380   :  { %19033 = vmatmul.mubr.msk.f32.vlgmr.msra.gmra.mrb[110].mxu0 %vm1509_vm5, %v23619_v18 }
0x3381   :  { %19035 = vmatprep.mubr.msk.f32.mxu0 %vm1509_vm5, %v23627_v1 }
0x3384   :  { %19036 = vmatmul.mubr.msk.f32.gmra.mrb[112].mxu0 %vm1509_vm5, %v23637_v53 }
0x33f8   :  { %v10012_v63 = vpop.xlane.xlu0 %10011 }
0x33f9   :  { %21075 = vrcp.f32 %v10012_v63  ;;  %v10009_v60 = vpop.xlane.xlu1 %10008 }
0x33fa   :  { %21077 = vrcp.f32 %v10009_v60 }
0x33fd   :  { %v10015_v32 = vpop.xlane.xlu1 %10014 }
0x33fe   :  { %21079 = vrcp.f32 %v10015_v32 }
0x3401   :  { %v9630_v35 = vpop.xlane.xlu1 %9629 }
0x3402   :  { %21081 = vrcp.f32 %v9630_v35  ;;  %v10018_v2 = vpop.xlane.xlu0 %10017 }
0x3403   :  { %v21076_v51 = vpop.eup %21075  ;;  %21083 = vrcp.f32 %v10018_v2 }
0x3404   :  { %v21078_v42 = vpop.eup %21077  ;;  %v10024_v8 = vmul.f32 %v21076_v51, %v23560_v10 }
0x3405   :  { %v9636_v31 = vpop.xlane.xlu1 %9635  ;;  %v10023_v26 = vmul.f32 %v21078_v42, %v23563_v52 }
0x3406   :  { %21085 = vrcp.f32 %v9636_v31  ;;  %v9633_v0 = vpop.xlane.xlu0 %9632 }
0x3407   :  { %21087 = vrcp.f32 %v9633_v0  ;;  %18954 = vmatprep.mubr.msk.f32.mxu1 %vm1509_vm5, %v10023_v26 }
0x3408   :  { %v21080_v46 = vpop.eup %21079  ;;  %18955 = vmatmul.mubr.msk.f32.vlgmr.msra.gmra.mrb[136].mxu1 %vm1509_vm5, %v10024_v8 }
0x3409   :  { %20147 = vmatpush3.bf16.msra.mxu1 %v23317_v5  ;;  %v10025_v16 = vmul.f32 %v21080_v46, %v23570_v3 }
0x340a   :  { %20149 = vmatprep.subr.bf16.mxu1 %v23343_v4  ;;  %v9639_v36 = vpop.xlane.xlu0 %9638 }
0x340b   :  { %21089 = vrcp.f32 %v9639_v36  ;;  %18957 = vmatprep.mubr.msk.f32.mxu1 %vm1509_vm5, %v10025_v16 }
0x340c   :  { %v21082_v52 = vpop.eup %21081 }
0x340d   :  { %v21084_v39 = vpop.eup %21083  ;;  %20151 = vmatpush3.bf16.msra.mxu1 %v23343_v4  ;;  %v9644_v10 = vmul.f32 %v21082_v52, %v23575_v23 }
0x340e   :  { %v10026_v30 = vmul.f32 %v21084_v39, %v23578_v28  ;;  %20160 = vmatprep.subr.bf16.mxu1 %v25010_v29 }
0x3410   :  { %v21086_v27 = vpop.eup %21085  ;;  %18958 = vmatmul.mubr.msk.f32.gmra.mrb[138].mxu1 %vm1509_vm5, %v10026_v30 }
0x3411   :  { %v21088_v5 = vpop.eup %21087  ;;  %18968 = vmatprep.mubr.msk.f32.mxu1 %vm1509_vm5, %v9644_v10  ;;  %v9646_v3 = vmul.f32 %v21086_v27, %v23585_v57 }
0x3412   :  { %v9645_v47 = vmul.f32 %v21088_v5, %v23589_v48 }
0x3414   :  { %18969 = vmatmul.mubr.msk.f32.vlgmr.msra.gmra.mrb[136].mxu1 %vm1509_vm5, %v9645_v47 }
0x3415   :  { %v21090_v50 = vpop.eup %21089  ;;  %20162 = vmatpush3.bf16.msra.mxu1 %v23403_v54  ;;  %18971 = vmatprep.mubr.msk.f32.mxu1 %vm1509_vm5, %v9646_v3 }
0x3416   :  { %20163 = vmatprep.subr.bf16.mxu1 %v25010_v29  ;;  %v9647_v4 = vmul.f32 %v21090_v50, %v23599_v38 }
0x3418   :  { %18972 = vmatmul.mubr.msk.f32.gmra.mrb[138].mxu1 %vm1509_vm5, %v9647_v4 }
0x3419   :  { %20165 = vmatpush3.bf16.msra.mxu1 %v23413_v61  ;;  %18993 = vmatprep.mubr.msk.f32.mxu1 %vm21383_vm9, %v25008_v7 }
0x341a   :  { %20175 = vmatprep.subr.bf16.mxu1 %v23470_v49 }
0x341c   :  { %18994 = vmatmul.mubr.msk.f32.vlgmr.msra.gmra.mrb[140].mxu1 %vm1509_vm5, %v10310_v12 }
0x341d   :  { %20177 = vmatpush3.bf16.msra.mxu1 %v23470_v49 }
0x341e   :  { %20179 = vmatprep.subr.bf16.mxu1 %v23480_v41 }
0x3421   :  { %20181 = vmatpush3.bf16.msra.mxu1 %v23480_v41 }
0x344b   :  { %v19006_v23 = vpop.f32.mrb[106].mxu0 }
0x344c   :  { %10519 = vperm.xlu0 %20677, %v19006_v23   ;;  %v10493_v28 = vpop.f32.mrb[107].mxu0 }
0x344d   :  { %10514 = vperm.xlu1 %20678, %v10493_v28  }
0x344f   :  { %v19009_v57 = vpop.f32.mrb[108].mxu0 }
0x3450   :  { %v10503_v48 = vpop.f32.mrb[109].mxu0 }
0x3451   :  { %10524 = vperm.xlu1 %20678, %v10503_v48  }
0x3453   :  { %v23671_v38 = vpop.f32.mrb[110].mxu0 }
0x3454   :  { %v23673_v55 = vpop.f32.mrb[111].mxu0 }
0x3455   :  { %10529 = vperm.xlu1 %20678, %v19009_v57  }
0x3457   :  { %v23675_v17 = vpop.f32.mrb[112].mxu0 }
0x3458   :  { %v23677_v40 = vpop.f32.mrb[113].mxu0 }
0x34cb   :  { %v10520_v63 = vpop.permute.xlu0 %10519 }
0x34cc   :  { %v10515_v49 = vpop.permute.xlu1 %10514 }
0x34d0   :  { %v10525_v25 = vpop.permute.xlu1 %10524 }
0x34d4   :  { %v10530_v60 = vpop.permute.xlu1 %10529 }
0x34ef   :  { %v10383_v12 = vpop.f32.mrb[140].mxu1 }
0x34f0   :  { %v10535_v41 = vrot.slane %v10383_v12, %v21712_v59  ;;  %v18995_v56 = vpop.f32.mrb[141].mxu1 }
0x34f2   :  { %v10537_v32 = vadd.f32 %v10535_v41, %v10520_v63  ;;  %v10536_v35 = vadd.f32 %v10535_v41, %v10515_v49  ;;  %v10538_v2 = vadd.f32 %v10535_v41, %v10525_v25  ;;  %v10539_v51 = vadd.f32 %v10535_v41, %v10530_v60 }
0x34f4   :  { %vm10541_vm15 = vcmp.gt.f32.partialorder %v10537_v32, 0.0  ;;  %v10545_v42 = vmul.f32 0.2, %v10537_v32  ;;  %vm10540_vm7 = vcmp.gt.f32.partialorder %v10536_v35, 0.0  ;;  %v10544_v31 = vmul.f32 0.2, %v10536_v35 }
0x34f5   :  { %vm10542_vm6 = vcmp.gt.f32.partialorder %v10538_v2, 0.0  ;;  %v10546_v26 = vmul.f32 0.2, %v10538_v2  ;;  %v10547_v46 = vmul.f32 0.2, %v10539_v51  ;;  %vm10543_vm13 = vcmp.gt.f32.partialorder %v10539_v51, 0.0 }
0x34f6   :  { %v10549_v0 = vsel %vm10541_vm15, %v10537_v32, %v10545_v42  ;;  %v10548_v8 = vsel %vm10540_vm7, %v10536_v35, %v10544_v31 }
0x34f7   :  { %v10553_v16 = vsel %vm8810_vm11, %v10549_v0, -1e+30  ;;  %v10552_v36 = vsel %vm8809_vm12, %v10548_v8, -1e+30  ;;  %v10550_v52 = vsel %vm10542_vm6, %v10538_v2, %v10546_v26  ;;  %v10551_v27 = vsel %vm10543_vm13, %v10539_v51, %v10547_v46 }
0x34f8   :  { %v10559_v39 = vsel %vm1509_vm5, %v10553_v16, -inf  ;;  %v10556_v10 = vsel %vm1509_vm5, %v10552_v36, -inf  ;;  %v10554_v30 = vsel %vm8811_vm3, %v10550_v52, -1e+30  ;;  %v10555_v3 = vsel %vm8812_vm8, %v10551_v27, -1e+30 }
0x34f9   :  { %10560 = vmax.xlane.f32.xlu1 %v10559_v39  ;;  %10557 = vmax.xlane.f32.xlu0 %v10556_v10  ;;  %v10562_v5 = vsel %vm1509_vm5, %v10554_v30, -inf  ;;  %v10565_v47 = vsel %vm1509_vm5, %v10555_v3, -inf }
0x34fd   :  { %10563 = vmax.xlane.f32.xlu0 %v10562_v5 }
0x3501   :  { %10566 = vmax.xlane.f32.xlu0 %v10565_v47 }
0x3586   :  { %v10561_v50 = vpop.xlane.xlu1 %10560  ;;  %v10558_v4 = vpop.xlane.xlu0 %10557 }
0x3587   :  { %v10569_v23 = vsub.f32 %v10553_v16, %v10561_v50  ;;  %v10568_v28 = vsub.f32 %v10552_v36, %v10558_v4  ;;  %v2347_v36 = vld [vmem:[%s24971_s18 + $0x40] sm:$0xff] }
0x3588   :  { %19038 = vmatprep.subr.mxu1 %v2347_v36 }
0x3589   :  { %v10574_v57 = vmul.f32 1.442695, %v10569_v23  ;;  %v10572_v48 = vmul.f32 1.442695, %v10568_v28 }
0x358a   :  { %v10564_v49 = vpop.xlane.xlu0 %10563 }
0x358b   :  { %21091 = vpow2.f32 %v10574_v57  ;;  %v10570_v25 = vsub.f32 %v10554_v30, %v10564_v49  ;;  %v2326_v57 = vld [vmem:[%s24967_s16 + $0x50] sm:$0xff] }
0x358c   :  { %21093 = vpow2.f32 %v10572_v48 }
0x358d   :  { %v10576_v12 = vmul.f32 1.442695, %v10570_v25  ;;  %v21334_v25 = vld [vmem:[%s24968_s17 + $0x38] sm:$0xff] }
0x358e   :  { %v10567_v41 = vpop.xlane.xlu0 %10566 }
0x358f   :  { %21095 = vpow2.f32 %v10576_v12  ;;  %v10571_v56 = vsub.f32 %v10555_v3, %v10567_v41  ;;  %v10821_v12 = vrot.slane %v21334_v25, %v21928_v22 }
0x3591   :  { %v10578_v63 = vmul.f32 1.442695, %v10571_v56  ;;  %v21335_v56 = vld [vmem:[%s24968_s17 + $0x30] sm:$0xff] }
0x3593   :  { %21097 = vpow2.f32 %v10578_v63  ;;  %v10716_v63 = vrot.slane %v21335_v56, %v21928_v22 }
0x3595   :  { %v21092_v60 = vpop.eup %21091 }
0x3596   :  { %v21094_v32 = vpop.eup %21093  ;;  %v10581_v35 = vmul.f32 %v21092_v60, %v23501_v45 }
0x3597   :  { %v10580_v2 = vmul.f32 %v21094_v32, %v23506_v6 }
0x3598   :  { %v10587_v51 = vsel %vm1509_vm5, %v10581_v35, 0.0 }
0x3599   :  { %v21096_v42 = vpop.eup %21095  ;;  %10588 = vadd.xlane.f32.xlu0 %v10587_v51  ;;  %v10584_v31 = vsel %vm1509_vm5, %v10580_v2, 0.0 }
0x359a   :  { %10585 = vadd.xlane.f32.xlu1 %v10584_v31  ;;  %v10582_v26 = vmul.f32 %v21096_v42, %v23513_v14 }
0x359c   :  { %v10590_v0 = vsel %vm1509_vm5, %v10582_v26, 0.0 }
0x359d   :  { %v21098_v8 = vpop.eup %21097 }
0x359e   :  { %10591 = vadd.xlane.f32.xlu1 %v10590_v0  ;;  %v10583_v46 = vmul.f32 %v21098_v8, %v23523_v21 }
0x35a0   :  { %v10593_v16 = vsel %vm1509_vm5, %v10583_v46, 0.0 }
0x35a1   :  { %10594 = vadd.xlane.f32.xlu0 %v10593_v16 }
0x3626   :  { %v10589_v52 = vpop.xlane.xlu0 %10588 }
0x3627   :  { %v10586_v39 = vpop.xlane.xlu1 %10585  ;;  %21099 = vrcp.f32 %v10589_v52 }
0x3628   :  { %21101 = vrcp.f32 %v10586_v39 }
0x362b   :  { %v10592_v10 = vpop.xlane.xlu1 %10591 }
0x362c   :  { %21103 = vrcp.f32 %v10592_v10 }
0x362e   :  { %v10595_v30 = vpop.xlane.xlu0 %10594 }
0x362f   :  { %21105 = vrcp.f32 %v10595_v30 }
0x3631   :  { %v21100_v27 = vpop.eup %21099 }
0x3632   :  { %v21102_v5 = vpop.eup %21101  ;;  %v10601_v3 = vmul.f32 %v21100_v27, %v10581_v35 }
0x3633   :  { %v10600_v47 = vmul.f32 %v21102_v5, %v10580_v2  ;;  %v2317_v5 = vld [vmem:[%s24966_s15 + $0x18] sm:$0xff] }
0x3635   :  { %19018 = vmatprep.mubr.msk.f32.mxu1 %vm1509_vm5, %v10600_v47 }
0x3636   :  { %v21104_v50 = vpop.eup %21103  ;;  %19019 = vmatmul.mubr.msk.f32.vlgmr.msra.gmra.mrb[136].mxu1 %vm1509_vm5, %v10601_v3 }
0x3637   :  { %v10602_v4 = vmul.f32 %v21104_v50, %v10582_v26  ;;  %19039 = vmatpush3.msra.mxu1 %v2347_v36  ;;  %v9110_v50 = vrot.slane %v2317_v5, %v21712_v59 }
0x3638   :  { %20194 = vmatprep.subr.bf16.mxu1 %v25010_v29 }
0x3639   :  { %v21106_v23 = vpop.eup %21105  ;;  %19021 = vmatprep.mubr.msk.f32.mxu1 %vm1509_vm5, %v10602_v4 }
0x363a   :  { %v10603_v28 = vmul.f32 %v21106_v23, %v10583_v46 }
0x363c   :  { %19022 = vmatmul.mubr.msk.f32.gmra.mrb[138].mxu1 %vm1509_vm5, %v10603_v28 }
0x363d   :  { %19040 = vmatprep.mubr.msk.f32.mxu1 %vm1421_vm4, %v23673_v55  ;;  %v2327_v55 = vld [vmem:[%s24967_s16 + $0x58] sm:$0xff] }
0x363e   :  { %v20190_v48 = vpack.c.bf16 %v2327_v55, %v2326_v57 }
0x3640   :  { %19041 = vmatmul.mubr.msk.f32.vlgmr.msra.gmra.mrb[142].mxu1 %vm1421_vm4, %v23671_v38  ;;  %20191 = vmatprep.subr.bf16.mxu0 %v20190_v48 }
0x3641   :  { %19043 = vmatprep.mubr.msk.f32.mxu1 %vm1421_vm4, %v23677_v40  ;;  %20193 = vmatpush3.bf16.msra.mxu0 %v20190_v48 }
0x3642   :  { %20202 = vmatprep.subr.bf16.mxu0 %v25010_v29 }
0x3644   :  { %19044 = vmatmul.mubr.msk.f32.gmra.mrb[144].mxu1 %vm1421_vm4, %v23675_v17 }
0x3645   :  { %19064 = vmatprep.mubr.msk.f32.mxu1 %vm21383_vm9, %v25008_v7 }
0x3709   :  { %v19020_v38 = vpop.f32.mrb[136].mxu1 }
0x370a   :  { %v10686_v40 = vpop.f32.mrb[137].mxu1  ;;  %v10710_v41 = vmul.f32 0.33333334, %v19020_v38 }
0x370b   :  { %v10709_v60 = vmul.f32 0.33333334, %v10686_v40 }
0x370c   :  { %v10718_v42 = vadd.f32 %v10716_v63, %v10710_v41  ;;  %v9178_v41 = vadd.f32 %v23261_v62, %v9110_v50 }
0x370d   :  { %v10717_v26 = vadd.f32 %v10716_v63, %v10709_v60 }
0x370f   :  { %v19023_v49 = vpop.f32.mrb[138].mxu1 }
0x3710   :  { %v10696_v17 = vpop.f32.mrb[139].mxu1  ;;  %v10712_v46 = vmul.f32 0.33333334, %v19023_v49  ;;  %v9183_v49 = vadd.f32 %v23259_v33, %v9110_v50 }
0x3711   :  { %v10711_v52 = vmul.f32 0.33333334, %v10696_v17 }
0x3712   :  { %v10720_v30 = vadd.f32 %v10716_v63, %v10712_v46  ;;  %v9188_v46 = vadd.f32 %v23265_v9, %v9110_v50 }
0x3713   :  { %v19042_v32 = vpop.f32.mrb[142].mxu1  ;;  %v10719_v27 = vadd.f32 %v10716_v63, %v10711_v52 }
0x3714   :  { %v10906_v35 = vadd.f32 %v19042_v32, %v10821_v12  ;;  %v10900_v2 = vpop.f32.mrb[143].mxu1 }
0x3715   :  { %v10901_v51 = vadd.f32 %v10900_v2, %v10821_v12 }
0x3716   :  { %v10920_v31 = vmul.f32 0.5, %v10906_v35 }
0x3717   :  { %v10919_v0 = vmul.f32 0.5, %v10901_v51  ;;  %v19045_v8 = vpop.f32.mrb[144].mxu1 }
0x3718   :  { %21107 = vtanh.f32 %v10920_v31  ;;  %v10916_v16 = vadd.f32 %v19045_v8, %v10821_v12  ;;  %v10910_v36 = vpop.f32.mrb[145].mxu1 }
0x3719   :  { %21109 = vtanh.f32 %v10919_v0  ;;  %v10911_v39 = vadd.f32 %v10910_v36, %v10821_v12 }
0x371a   :  { %21111 = vtanh.f32 %v10718_v42  ;;  %v10922_v10 = vmul.f32 0.5, %v10916_v16 }
0x371b   :  { %21113 = vtanh.f32 %v10717_v26  ;;  %v10921_v22 = vmul.f32 0.5, %v10911_v39  ;;  %v9193_v26 = vadd.f32 %v23263_v13, %v9110_v50 }
0x371c   :  { %21115 = vtanh.f32 %v10922_v10 }
0x371d   :  { %21117 = vtanh.f32 %v10921_v22 }
0x371e   :  { %21119 = vtanh.f32 %v10720_v30 }
0x371f   :  { %21121 = vtanh.f32 %v10719_v27 }
0x3722   :  { %v21108_v3 = vpop.eup %21107 }
0x3723   :  { %v21110_v47 = vpop.eup %21109  ;;  %v10928_v4 = vadd.f32 1.0, %v21108_v3 }
0x3724   :  { %v21112_v23 = vpop.eup %21111  ;;  %v10927_v28 = vadd.f32 1.0, %v21110_v47 }
0x3725   :  { %v21114_v57 = vpop.eup %21113  ;;  %v10932_v55 = vmul.f32 0.5, %v10928_v4 }
0x3726   :  { %v21116_v48 = vpop.eup %21115  ;;  %v10931_v38 = vmul.f32 0.5, %v10927_v28  ;;  %v23781_v28 = vld [vmem:[%s24968_s17 + $0x20] sm:$0xff] }
0x3727   :  { %v21118_v40 = vpop.eup %21117  ;;  %v10940_v17 = vmul.f32 %v21112_v23, %v10932_v55  ;;  %v10944_v25 = vsub.f32 1.0, %v10932_v55  ;;  %v10930_v12 = vadd.f32 1.0, %v21116_v48  ;;  %v11576_v55 = vrot.slane %v23781_v28, %v21747_v20  ;;  %v21336_v20 = vld [vmem:[%s24968_s17 + $0x18] sm:$0xff] }
0x3728   :  { %v10939_v56 = vmul.f32 %v21114_v57, %v10931_v38  ;;  %v10943_v63 = vsub.f32 1.0, %v10931_v38  ;;  %v10929_v60 = vadd.f32 1.0, %v21118_v40  ;;  %v21120_v2 = vpop.eup %21119 }
0x3729   :  { %v10948_v32 = vmul.f32 %v10944_v25, %v9183_v49  ;;  %v10934_v35 = vmul.f32 0.5, %v10930_v12  ;;  %v21122_v31 = vpop.eup %21121  ;;  %v11056_v49 = vrot.slane %v21336_v20, 6 }
0x372a   :  { %v10947_v51 = vmul.f32 %v10943_v63, %v9178_v41  ;;  %v10933_v42 = vmul.f32 0.5, %v10929_v60 }
0x372b   :  { %v23740_v0 = vadd.f32 %v10948_v32, %v10940_v17  ;;  %v10942_v8 = vmul.f32 %v21120_v2, %v10934_v35  ;;  %v10946_v33 = vsub.f32 1.0, %v10934_v35 }
0x372c   :  { %v23743_v16 = vadd.f32 %v10947_v51, %v10939_v56  ;;  %v10941_v62 = vmul.f32 %v21122_v31, %v10933_v42  ;;  %v10945_v36 = vsub.f32 1.0, %v10933_v42 }
0x372d   :  { %21123 = vtanh.f32 %v23740_v0  ;;  %v10950_v52 = vmul.f32 %v10946_v33, %v9193_v26  ;;  %v11411_v26 = vrot.slane %v21336_v20, 7 }
0x372e   :  { %21125 = vtanh.f32 %v23743_v16  ;;  %v10949_v39 = vmul.f32 %v10945_v36, %v9188_v46 }
0x372f   :  { %v23747_v10 = vadd.f32 %v10950_v52, %v10942_v8  ;;  %v11217_v8 = vrot.slane %v23781_v28, %v21744_v19 }
0x3730   :  { %v23749_v22 = vadd.f32 %v10949_v39, %v10941_v62 }
0x3731   :  { %21127 = vtanh.f32 %v23747_v10 }
0x3732   :  { %21129 = vtanh.f32 %v23749_v22 }
0x3737   :  { %v21124_v13 = vpop.eup %21123 }
0x3738   :  { %v21126_v9 = vpop.eup %21125 }
0x3739   :  { %19050 = vmatprep.mubr.msk.f32.mxu0 %vm76_vm0, %v21126_v9  ;;  %v23754_v30 = vpack.c.bf16 %v21124_v13, %v21126_v9 }
0x373a   :  { %19051 = vmatmul.mubr.msk.f32.vlgmr.msra.gmra.mrb[114].mxu0 %vm76_vm0, %v21124_v13 }
0x373b   :  { %v21128_v27 = vpop.eup %21127  ;;  %20204 = vmatpush3.bf16.msra.mxu0 %v23403_v54 }
0x373c   :  { %v21130_v5 = vpop.eup %21129  ;;  %20205 = vmatprep.subr.bf16.mxu0 %v25010_v29 }
0x373d   :  { %19053 = vmatprep.mubr.msk.f32.mxu0 %vm76_vm0, %v21130_v5  ;;  %v23760_v3 = vpack.c.bf16 %v21128_v27, %v21130_v5 }
0x373e   :  { %19054 = vmatmul.mubr.msk.f32.gmra.mrb[116].mxu0 %vm76_vm0, %v21128_v27 }
0x373f   :  { %20207 = vmatpush3.bf16.msra.mxu0 %v23413_v61  ;;  %19075 = vmatprep.mubr.msk.f32.mxu0 %vm21383_vm9, %v25008_v7 }
0x380d   :  { %v23766_v47 = vpop.f32.mrb[114].mxu0 }
0x380e   :  { %v23768_v50 = vpop.f32.mrb[115].mxu0  ;;  %v11219_v33 = vmul.f32 %v23766_v47, %v11217_v8 }
0x380f   :  { %v23772_v4 = vpack.c.bf16 %v23766_v47, %v23768_v50  ;;  %v23776_v23 = vpack.i.bf16 %v23766_v47, %v23768_v50  ;;  %v11218_v36 = vmul.f32 %v11217_v8, %v23768_v50 }
0x3810   :  { %v11225_v46 = vsel %vm76_vm0, %v11219_v33, 0.0 }
0x3811   :  { %20740 = vrot.lane.b32.xlu1 %v23776_v23, %s21369_s3  ;;  %v23785_v57 = vpop.f32.mrb[116].mxu0  ;;  %20197 = vmatpush3.bf16.xpose.msk.msra.mxu1 %vm21908_vm10, %v23772_v4  ;;  %v11222_v39 = vsel %vm76_vm0, %v11218_v36, 0.0 }
0x3812   :  { %v23792_v48 = vpop.f32.mrb[117].mxu0  ;;  %20198 = vmatprep.subr.bf16.mxu1 %v25010_v29  ;;  %v11221_v13 = vmul.f32 %v23785_v57, %v11217_v8 }
0x3813   :  { %v23797_v38 = vpack.c.bf16 %v23785_v57, %v23792_v48  ;;  %v23801_v40 = vpack.i.bf16 %v23785_v57, %v23792_v48  ;;  %v11220_v62 = vmul.f32 %v11217_v8, %v23792_v48 }
0x3814   :  { %v11231_v9 = vsel %vm76_vm0, %v11221_v13, 0.0 }
0x3815   :  { %11578 = vrot.lane.b32.xlu1 %v11576_v55, %s21385_s2  ;;  %20745 = vrot.lane.b32.xlu0 %v23801_v40, %s21369_s3  ;;  %v11228_v52 = vsel %vm76_vm0, %v11220_v62, 0.0  ;;  %v23845_v55 = vld [vmem:[%s24969_s11 + $0xa0] sm:$0xff] }
0x3819   :  { %20201 = vmatpush3.bf16.xpose.msk.msra.mxu1 %vm21908_vm10, %v23797_v38 }
0x381a   :  { %20216 = vmatprep.subr.bf16.mxu1 %v25010_v29 }
0x3820   :  { %19065 = vmatmul.mubr.msk.f32.vlgmr.msra.gmra.mrb[146].mxu1 %vm76_vm0, %v11056_v49 }
0x3821   :  { %19100 = vmatprep.mubr.msk.f32.mxu1 %vm21383_vm9, %v25008_v7 }
0x3883   :  { %v20741_v17 = vpop.permute.xlu1 %20740 }
0x3884   :  { %v20743_v25 = vunpack.i.h.bf16 %v20741_v17  ;;  %v20742_v12 = vunpack.i.l.bf16 %v20741_v17 }
0x3886   :  { %v20217_v41 = vpack.c.bf16 %v20743_v25, %v20742_v12 }
0x3887   :  { %v11579_v56 = vpop.permute.xlu1 %11578  ;;  %v20746_v63 = vpop.permute.xlu0 %20745 }
0x3888   :  { %20219 = vmatpush3.bf16.xpose.msk.msra.mxu1 %vm21908_vm10, %v20217_v41  ;;  %v11581_v60 = vmul.f32 %v11579_v56, %v23768_v50  ;;  %v11582_v32 = vmul.f32 %v23766_v47, %v11579_v56  ;;  %v20748_v35 = vunpack.i.h.bf16 %v20746_v63  ;;  %v20747_v2 = vunpack.i.l.bf16 %v20746_v63 }
0x3889   :  { %20220 = vmatprep.subr.bf16.mxu1 %v25010_v29  ;;  %v11584_v51 = vmul.f32 %v23785_v57, %v11579_v56  ;;  %v11583_v42 = vmul.f32 %v11579_v56, %v23792_v48 }
0x388a   :  { %11589 = vrot.lane.b32.xlu1 %v11581_v60, %s21369_s3  ;;  %11591 = vrot.lane.b32.xlu0 %v11582_v32, %s21369_s3  ;;  %v20221_v31 = vpack.c.bf16 %v20748_v35, %v20747_v2  ;;  %v12153_v60 = vrot.slane %v23781_v28, %v21976_v37  ;;  %v23864_v37 = vld [vmem:[%s24969_s11 + $0xa8] sm:$0xff] }
0x388e   :  { %11595 = vrot.lane.b32.xlu0 %v11584_v51, %s21369_s3  ;;  %11593 = vrot.lane.b32.xlu1 %v11583_v42, %s21369_s3 }
0x3890   :  { %20223 = vmatpush3.bf16.xpose.msk.msra.mxu1 %vm21908_vm10, %v20221_v31 }
0x3891   :  { %20239 = vmatprep.subr.bf16.mxu1 %v20217_v41 }
0x3897   :  { %19101 = vmatmul.mubr.msk.f32.vlgmr.msra.gmra.mrb[148].mxu1 %vm76_vm0, %v11411_v26 }
0x3898   :  { %20241 = vmatpush3.bf16.msra.mxu1 %v20217_v41 }
0x3899   :  { %20243 = vmatprep.subr.bf16.mxu1 %v20221_v31 }
0x389c   :  { %20245 = vmatpush3.bf16.msra.mxu1 %v20221_v31 }
0x389d   :  { %20247 = vmatprep.subr.bf16.mxu1 %v23772_v4 }
0x38ad   :  { %11226 = vadd.xlane.f32.xlu0 %v11225_v46 }
0x38b1   :  { %11229 = vadd.xlane.f32.xlu0 %v11228_v52 }
0x38b2   :  { %11223 = vadd.xlane.f32.xlu1 %v11222_v39 }
0x38b6   :  { %11232 = vadd.xlane.f32.xlu1 %v11231_v9 }
0x38f3   :  { %v11137_v27 = vpop.f32.mrb[146].mxu1 }
0x38f4   :  { %19076 = vmatmul.mubr.msk.f32.vlgmr.msra.gmra.mrb[118].mxu0 %vm1509_vm5, %v11137_v27  ;;  %v19066_v5 = vpop.f32.mrb[147].mxu1 }
0x38f5   :  { %19086 = vmatprep.mubr.msk.f32.mxu0 %vm1509_vm5, %v23845_v55 }
0x38fc   :  { %v11590_v20 = vpop.permute.xlu1 %11589  ;;  %v11592_v49 = vpop.permute.xlu0 %11591 }
0x38fd   :  { %v11604_v17 = vsel %vm76_vm0, %v11592_v49, 0.0  ;;  %v11601_v25 = vsel %vm76_vm0, %v11590_v20, 0.0 }
0x38fe   :  { %11605 = vadd.xlane.f32.xlu1 %v11604_v17  ;;  %11602 = vadd.xlane.f32.xlu0 %v11601_v25 }
0x3900   :  { %v11596_v12 = vpop.permute.xlu0 %11595  ;;  %v11594_v41 = vpop.permute.xlu1 %11593 }
0x3901   :  { %v11610_v56 = vsel %vm76_vm0, %v11596_v12, 0.0  ;;  %v11607_v63 = vsel %vm76_vm0, %v11594_v41, 0.0 }
0x3902   :  { %11611 = vadd.xlane.f32.xlu1 %v11610_v56  ;;  %11608 = vadd.xlane.f32.xlu0 %v11607_v63 }
0x3913   :  { %20755 = vrot.lane.b32.xlu1 %v23801_v40, %s21370_s4  ;;  %v23880_v40 = vld [vmem:[%s24969_s11 + $0xb8] sm:$0xff] }
0x3917   :  { %12155 = vrot.lane.b32.xlu1 %v12153_v60, %s21386_s21 }
0x3918   :  { %20750 = vrot.lane.b32.xlu0 %v23776_v23, %s21370_s4  ;;  %v23872_v23 = vld [vmem:[%s24969_s11 + $0xb0] sm:$0xff] }
0x393a   :  { %v11227_v32 = vpop.xlane.xlu0 %11226 }
0x393e   :  { %v11230_v51 = vpop.xlane.xlu0 %11229 }
0x393f   :  { %v11224_v35 = vpop.xlane.xlu1 %11223 }
0x3940   :  { %v20208_v2 = vpack.c.bf16 %v11227_v32, %v11224_v35 }
0x3942   :  { %20209 = vmatprep.subr.bf16.mxu0 %v20208_v2 }
0x3943   :  { %v11233_v42 = vpop.xlane.xlu1 %11232  ;;  %20211 = vmatpush3.bf16.msra.mxu0 %v20208_v2 }
0x3944   :  { %v20212_v31 = vpack.c.bf16 %v11233_v42, %v11230_v51 }
0x3946   :  { %20213 = vmatprep.subr.bf16.mxu0 %v20212_v31 }
0x3947   :  { %20215 = vmatpush3.bf16.msra.mxu0 %v20212_v31 }
0x3948   :  { %20224 = vmatprep.subr.bf16.mxu0 %v25010_v29 }
0x394a   :  { %19087 = vmatmul.mubr.msk.f32.vlgmr.msra.gmra.mrb[120].mxu0 %vm1509_vm5, %v23864_v37 }
0x394b   :  { %20226 = vmatpush3.bf16.msra.mxu0 %v23403_v54  ;;  %19089 = vmatprep.mubr.msk.f32.mxu0 %vm1509_vm5, %v23872_v23 }
0x394c   :  { %20227 = vmatprep.subr.bf16.mxu0 %v25010_v29 }
0x394e   :  { %19090 = vmatmul.mubr.msk.f32.gmra.mrb[122].mxu0 %vm1509_vm5, %v23880_v40 }
0x394f   :  { %20229 = vmatpush3.bf16.msra.mxu0 %v23413_v61  ;;  %19111 = vmatprep.mubr.msk.f32.mxu0 %vm21383_vm9, %v25008_v7 }
0x396a   :  { %v11496_v26 = vpop.f32.mrb[148].mxu1 }
0x396b   :  { %19112 = vmatmul.mubr.msk.f32.vlgmr.msra.gmra.mrb[124].mxu0 %vm1509_vm5, %v11496_v26  ;;  %v19102_v8 = vpop.f32.mrb[149].mxu1 }
0x396c   :  { %19122 = vmatprep.mubr.msk.f32.mxu0 %vm1509_vm5, %v23845_v55 }
0x398b   :  { %v11606_v33 = vpop.xlane.xlu1 %11605  ;;  %v11603_v46 = vpop.xlane.xlu0 %11602 }
0x398c   :  { %v20230_v62 = vpack.c.bf16 %v11606_v33, %v11603_v46 }
0x398e   :  { %20231 = vmatprep.subr.bf16.mxu0 %v20230_v62 }
0x398f   :  { %v11612_v36 = vpop.xlane.xlu1 %11611  ;;  %v11609_v52 = vpop.xlane.xlu0 %11608  ;;  %20233 = vmatpush3.bf16.msra.mxu0 %v20230_v62 }
0x3990   :  { %v20234_v39 = vpack.c.bf16 %v11612_v36, %v11609_v52 }
0x3992   :  { %20235 = vmatprep.subr.bf16.mxu0 %v20234_v39 }
0x3993   :  { %v20751_v13 = vpop.permute.xlu0 %20750  ;;  %20237 = vmatpush3.bf16.msra.mxu0 %v20234_v39  ;;  %v20756_v20 = vpop.permute.xlu1 %20755 }
0x3994   :  { %20254 = vmatprep.subr.bf16.mxu0 %v25010_v29  ;;  %v20753_v9 = vunpack.i.h.bf16 %v20751_v13  ;;  %v20752_v27 = vunpack.i.l.bf16 %v20751_v13  ;;  %v20758_v49 = vunpack.i.h.bf16 %v20756_v20  ;;  %v20757_v17 = vunpack.i.l.bf16 %v20756_v20 }
0x3996   :  { %19123 = vmatmul.mubr.msk.f32.vlgmr.msra.gmra.mrb[126].mxu0 %vm1509_vm5, %v23864_v37  ;;  %v23895_v5 = vpack.c.bf16 %v20753_v9, %v20752_v27  ;;  %v23905_v25 = vpack.c.bf16 %v20758_v49, %v20757_v17 }
0x3997   :  { %19125 = vmatprep.mubr.msk.f32.mxu0 %vm1509_vm5, %v23872_v23 }
0x399a   :  { %19126 = vmatmul.mubr.msk.f32.gmra.mrb[128].mxu0 %vm1509_vm5, %v23880_v40 }
0x399b   :  { %19164 = vmatprep.mubr.msk.f32.mxu0 %vm21383_vm9, %v25008_v7 }
0x399c   :  { %20257 = vmatpush3.bf16.xpose.msk.msra.mxu0 %vm21908_vm10, %v23895_v5 }
0x399d   :  { %20258 = vmatprep.subr.bf16.mxu0 %v25010_v29 }
0x39a4   :  { %20261 = vmatpush3.bf16.xpose.msk.msra.mxu0 %vm21908_vm10, %v23905_v25 }
0x39ab   :  { %19165 = vmatmul.mubr.msk.f32.vlgmr.msra.gmra.mrb[130].mxu0 %vm76_vm0, %v23781_v28  ;;  %v12156_v28 = vpop.permute.xlu1 %12155 }
0x39ac   :  { %19186 = vmatprep.mubr.msk.f32.mxu0 %vm1509_vm5, %v23845_v55  ;;  %v12159_v55 = vmul.f32 %v23766_v47, %v12156_v28  ;;  %v12158_v8 = vmul.f32 %v12156_v28, %v23768_v50  ;;  %v12161_v33 = vmul.f32 %v23785_v57, %v12156_v28  ;;  %v12160_v46 = vmul.f32 %v12156_v28, %v23792_v48 }
0x39c7   :  { %v11210_v12 = vpop.f32.mrb[118].mxu0 }
0x39c8   :  { %v19077_v41 = vpop.f32.mrb[119].mxu0  ;;  %v11342_v48 = vrot.slane %v11210_v12, %v21712_v59 }
0x3a1d   :  { %v19088_v56 = vpop.f32.mrb[120].mxu0 }
0x3a1e   :  { %v11300_v63 = vpop.f32.mrb[121].mxu0 }
0x3a21   :  { %v19091_v60 = vpop.f32.mrb[122].mxu0 }
0x3a22   :  { %v11310_v32 = vpop.f32.mrb[123].mxu0 }
0x3a3e   :  { %v11569_v35 = vpop.f32.mrb[124].mxu0 }
0x3a3f   :  { %v19113_v2 = vpop.f32.mrb[125].mxu0  ;;  %v11721_v62 = vrot.slane %v11569_v35, %v21712_v59 }
0x3a69   :  { %v19124_v51 = vpop.f32.mrb[126].mxu0 }
0x3a6a   :  { %11705 = vperm.xlu1 %20678, %v19124_v51   ;;  %v11679_v42 = vpop.f32.mrb[127].mxu0 }
0x3a6b   :  { %11700 = vperm.xlu0 %20677, %v11679_v42  }
0x3a6d   :  { %v19127_v31 = vpop.f32.mrb[128].mxu0 }
0x3a6e   :  { %11715 = vperm.xlu1 %20678, %v19127_v31   ;;  %v11689_v26 = vpop.f32.mrb[129].mxu0 }
0x3a6f   :  { %11710 = vperm.xlu0 %20677, %v11689_v26  }
0x3a72   :  { %11326 = vperm.xlu1 %20678, %v19088_v56  }
0x3a73   :  { %11321 = vperm.xlu0 %20677, %v11300_v63  }
0x3a76   :  { %11336 = vperm.xlu1 %20678, %v19091_v60  }
0x3a77   :  { %11331 = vperm.xlu0 %20677, %v11310_v32  }
0x3a7a   :  { %12168 = vrot.lane.b32.xlu1 %v12159_v55, %s21370_s4 }
0x3a7b   :  { %12166 = vrot.lane.b32.xlu0 %v12158_v8, %s21370_s4 }
0x3a7e   :  { %12172 = vrot.lane.b32.xlu1 %v12161_v33, %s21370_s4 }
0x3a7f   :  { %12170 = vrot.lane.b32.xlu0 %v12160_v46, %s21370_s4 }
0x3ae9   :  { %v11706_v36 = vpop.permute.xlu1 %11705 }
0x3aea   :  { %v11723_v52 = vadd.f32 %v11721_v62, %v11706_v36  ;;  %v11701_v39 = vpop.permute.xlu0 %11700 }
0x3aeb   :  { %v11722_v47 = vadd.f32 %v11721_v62, %v11701_v39 }
0x3aec   :  { %v11731_v13 = vmul.f32 0.2, %v11723_v52  ;;  %vm11727_vm4 = vcmp.gt.f32.partialorder %v11723_v52, 0.0 }
0x3aed   :  { %v11730_v50 = vmul.f32 0.2, %v11722_v47  ;;  %v11716_v9 = vpop.permute.xlu1 %11715  ;;  %vm11726_vm2 = vcmp.gt.f32.partialorder %v11722_v47, 0.0 }
0x3aee   :  { %v11725_v27 = vadd.f32 %v11721_v62, %v11716_v9  ;;  %v11711_v20 = vpop.permute.xlu0 %11710  ;;  %v11735_v57 = vsel %vm11727_vm4, %v11723_v52, %v11731_v13 }
0x3aef   :  { %v11724_v49 = vadd.f32 %v11721_v62, %v11711_v20  ;;  %v23926_v17 = vsel %vm8810_vm11, %v11735_v57, -1e+30  ;;  %v11734_v41 = vsel %vm11726_vm2, %v11722_v47, %v11730_v50 }
0x3af0   :  { %v11733_v56 = vmul.f32 0.2, %v11725_v27  ;;  %v11745_v63 = vsel %vm1509_vm5, %v23926_v17, -inf  ;;  %v23932_v60 = vsel %vm8809_vm12, %v11734_v41, -1e+30  ;;  %vm11729_vm14 = vcmp.gt.f32.partialorder %v11725_v27, 0.0 }
0x3af1   :  { %v11732_v32 = vmul.f32 0.2, %v11724_v49  ;;  %11746 = vmax.xlane.f32.xlu1 %v11745_v63  ;;  %v11327_v35 = vpop.permute.xlu1 %11326  ;;  %v11742_v12 = vsel %vm1509_vm5, %v23932_v60, -inf  ;;  %vm11728_vm15 = vcmp.gt.f32.partialorder %v11724_v49, 0.0 }
0x3af2   :  { %v11344_v2 = vadd.f32 %v11342_v48, %v11327_v35  ;;  %11743 = vmax.xlane.f32.xlu0 %v11742_v12  ;;  %v11322_v51 = vpop.permute.xlu0 %11321  ;;  %v11737_v26 = vsel %vm11729_vm14, %v11725_v27, %v11733_v56 }
0x3af3   :  { %v11343_v42 = vadd.f32 %v11342_v48, %v11322_v51  ;;  %v11736_v31 = vsel %vm11728_vm15, %v11724_v49, %v11732_v32  ;;  %v11741_v52 = vsel %vm8812_vm8, %v11737_v26, -1e+30 }
0x3af4   :  { %v11352_v28 = vmul.f32 0.2, %v11344_v2  ;;  %v11740_v55 = vsel %vm8811_vm3, %v11736_v31, -1e+30  ;;  %vm11348_vm7 = vcmp.gt.f32.partialorder %v11344_v2, 0.0  ;;  %v11751_v20 = vsel %vm1509_vm5, %v11741_v52, -inf }
0x3af5   :  { %v11351_v8 = vmul.f32 0.2, %v11343_v42  ;;  %v11337_v33 = vpop.permute.xlu1 %11336  ;;  %v11748_v46 = vsel %vm1509_vm5, %v11740_v55, -inf  ;;  %vm11347_vm6 = vcmp.gt.f32.partialorder %v11343_v42, 0.0 }
0x3af6   :  { %v11346_v62 = vadd.f32 %v11342_v48, %v11337_v33  ;;  %11749 = vmax.xlane.f32.xlu0 %v11748_v46  ;;  %v11332_v36 = vpop.permute.xlu0 %11331  ;;  %v11356_v13 = vsel %vm11348_vm7, %v11344_v2, %v11352_v28 }
0x3af7   :  { %v11345_v39 = vadd.f32 %v11342_v48, %v11332_v36  ;;  %v11355_v47 = vsel %vm11347_vm6, %v11343_v42, %v11351_v8  ;;  %v11360_v49 = vsel %vm8810_vm11, %v11356_v13, -1e+30 }
0x3af8   :  { %v11354_v50 = vmul.f32 0.2, %v11346_v62  ;;  %v11359_v9 = vsel %vm8809_vm12, %v11355_v47, -1e+30  ;;  %vm11350_vm13 = vcmp.gt.f32.partialorder %v11346_v62, 0.0  ;;  %v11366_v32 = vsel %vm1509_vm5, %v11360_v49, -inf }
0x3af9   :  { %v11353_v27 = vmul.f32 0.2, %v11345_v39  ;;  %v11363_v57 = vsel %vm1509_vm5, %v11359_v9, -inf  ;;  %vm11349_vm4 = vcmp.gt.f32.partialorder %v11345_v39, 0.0  ;;  %v12169_v2 = vpop.permute.xlu1 %12168 }
0x3afa   :  { %11752 = vmax.xlane.f32.xlu0 %v11751_v20  ;;  %11364 = vmax.xlane.f32.xlu1 %v11363_v57  ;;  %v11358_v48 = vsel %vm11350_vm13, %v11346_v62, %v11354_v50  ;;  %v12167_v56 = vpop.permute.xlu0 %12166  ;;  %v12181_v26 = vsel %vm76_vm0, %v12169_v2, 0.0 }
0x3afb   :  { %v11357_v41 = vsel %vm11349_vm4, %v11345_v39, %v11353_v27  ;;  %v11362_v12 = vsel %vm8812_vm8, %v11358_v48, -1e+30  ;;  %v12178_v42 = vsel %vm76_vm0, %v12167_v56, 0.0 }
0x3afc   :  { %v11361_v63 = vsel %vm8811_vm3, %v11357_v41, -1e+30  ;;  %v11372_v51 = vsel %vm1509_vm5, %v11362_v12, -inf }
0x3afd   :  { %v11369_v35 = vsel %vm1509_vm5, %v11361_v63, -inf  ;;  %v12173_v8 = vpop.permute.xlu1 %12172 }
0x3afe   :  { %11367 = vmax.xlane.f32.xlu0 %v11366_v32  ;;  %11370 = vmax.xlane.f32.xlu1 %v11369_v35  ;;  %v12171_v31 = vpop.permute.xlu0 %12170  ;;  %v12187_v33 = vsel %vm76_vm0, %v12173_v8, 0.0  ;;  %v23971_v8 = vld [vmem:[%s24969_s11 + $0x60] sm:$0xff] }
0x3aff   :  { %v12184_v28 = vsel %vm76_vm0, %v12171_v31, 0.0 }
0x3b02   :  { %11373 = vmax.xlane.f32.xlu0 %v11372_v51  ;;  %12179 = vadd.xlane.f32.xlu1 %v12178_v42 }
0x3b06   :  { %12182 = vadd.xlane.f32.xlu0 %v12181_v26  ;;  %12185 = vadd.xlane.f32.xlu1 %v12184_v28 }
0x3b0a   :  { %12188 = vadd.xlane.f32.xlu0 %v12187_v33 }
0x3b7e   :  { %v11747_v46 = vpop.xlane.xlu1 %11746 }
0x3b7f   :  { %v11755_v62 = vsub.f32 %v23926_v17, %v11747_v46  ;;  %v11744_v36 = vpop.xlane.xlu0 %11743 }
0x3b80   :  { %v11754_v39 = vsub.f32 %v23932_v60, %v11744_v36 }
0x3b81   :  { %v11760_v47 = vmul.f32 1.442695, %v11755_v62 }
0x3b82   :  { %v11758_v13 = vmul.f32 1.442695, %v11754_v39 }
0x3b83   :  { %21131 = vpow2.f32 %v11760_v47  ;;  %v11750_v50 = vpop.xlane.xlu0 %11749 }
0x3b84   :  { %21133 = vpow2.f32 %v11758_v13  ;;  %v11756_v27 = vsub.f32 %v11740_v55, %v11750_v50  ;;  %v23963_v55 = vld [vmem:[%s24969_s11 + $0x68] sm:$0xff]  ;;  %v23983_v13 = vld [vmem:[%s24969_s11 + $0x70] sm:$0xff] }
0x3b86   :  { %v11762_v20 = vmul.f32 1.442695, %v11756_v27 }
0x3b87   :  { %v11365_v57 = vpop.xlane.xlu1 %11364  ;;  %v11753_v41 = vpop.xlane.xlu0 %11752 }
0x3b88   :  { %21135 = vpow2.f32 %v11762_v20  ;;  %v11375_v48 = vsub.f32 %v11359_v9, %v11365_v57  ;;  %v11757_v56 = vsub.f32 %v11741_v52, %v11753_v41 }
0x3b8a   :  { %v11379_v32 = vmul.f32 1.442695, %v11375_v48  ;;  %v11764_v35 = vmul.f32 1.442695, %v11757_v56 }
0x3b8b   :  { %v11371_v2 = vpop.xlane.xlu1 %11370  ;;  %v11368_v51 = vpop.xlane.xlu0 %11367 }
0x3b8c   :  { %21137 = vpow2.f32 %v11379_v32  ;;  %v11377_v17 = vsub.f32 %v11361_v63, %v11371_v2  ;;  %v11376_v42 = vsub.f32 %v11360_v49, %v11368_v51 }
0x3b8d   :  { %v21132_v60 = vpop.eup %21131  ;;  %21139 = vpow2.f32 %v11764_v35  ;;  %v23996_v35 = vld [vmem:[%s24969_s11 + $0x78] sm:$0xff] }
0x3b8e   :  { %v21134_v31 = vpop.eup %21133  ;;  %v11383_v26 = vmul.f32 1.442695, %v11377_v17  ;;  %v11381_v28 = vmul.f32 1.442695, %v11376_v42  ;;  %v23966_v9 = vmul.f32 %v23963_v55, %v21132_v60 }
0x3b8f   :  { %v11374_v52 = vpop.xlane.xlu0 %11373  ;;  %v23974_v49 = vmul.f32 %v23971_v8, %v21134_v31  ;;  %v12180_v46 = vpop.xlane.xlu1 %12179 }
0x3b90   :  { %21141 = vpow2.f32 %v11383_v26  ;;  %v11378_v63 = vsub.f32 %v11362_v12, %v11374_v52  ;;  %v11773_v33 = vsel %vm1509_vm5, %v23966_v9, 0.0 }
0x3b91   :  { %21143 = vpow2.f32 %v11381_v28  ;;  %11774 = vadd.xlane.f32.xlu0 %v11773_v33  ;;  %v11770_v62 = vsel %vm1509_vm5, %v23974_v49, 0.0 }
0x3b92   :  { %v21136_v36 = vpop.eup %21135  ;;  %v11385_v39 = vmul.f32 1.442695, %v11378_v63  ;;  %11771 = vadd.xlane.f32.xlu1 %v11770_v62 }
0x3b93   :  { %v12183_v47 = vpop.xlane.xlu0 %12182  ;;  %v23986_v12 = vmul.f32 %v23983_v13, %v21136_v36  ;;  %v12186_v41 = vpop.xlane.xlu1 %12185 }
0x3b94   :  { %21145 = vpow2.f32 %v11385_v39  ;;  %v20268_v50 = vpack.c.bf16 %v12183_v47, %v12180_v46 }
0x3b95   :  { %v11776_v27 = vsel %vm1509_vm5, %v23986_v12, 0.0 }
0x3b96   :  { %v21138_v20 = vpop.eup %21137  ;;  %11777 = vadd.xlane.f32.xlu1 %v11776_v27  ;;  %20269 = vmatprep.subr.bf16.mxu0 %v20268_v50 }
0x3b97   :  { %v21140_v57 = vpop.eup %21139  ;;  %20271 = vmatpush3.bf16.msra.mxu0 %v20268_v50  ;;  %v12189_v48 = vpop.xlane.xlu0 %12188  ;;  %v23991_v56 = vmul.f32 %v23971_v8, %v21138_v20 }
0x3b98   :  { %v20272_v32 = vpack.c.bf16 %v12189_v48, %v12186_v41  ;;  %v23999_v2 = vmul.f32 %v23996_v35, %v21140_v57 }
0x3b99   :  { %v11391_v51 = vsel %vm1509_vm5, %v23991_v56, 0.0 }
0x3b9a   :  { %v21142_v17 = vpop.eup %21141  ;;  %11392 = vadd.xlane.f32.xlu1 %v11391_v51  ;;  %v11779_v42 = vsel %vm1509_vm5, %v23999_v2, 0.0  ;;  %20273 = vmatprep.subr.bf16.mxu0 %v20272_v32 }
0x3b9b   :  { %v21144_v60 = vpop.eup %21143  ;;  %11780 = vadd.xlane.f32.xlu0 %v11779_v42  ;;  %20275 = vmatpush3.bf16.msra.mxu0 %v20272_v32  ;;  %v11389_v31 = vmul.f32 %v23983_v13, %v21142_v17 }
0x3b9c   :  { %20285 = vmatprep.subr.bf16.mxu0 %v23754_v30  ;;  %v11388_v26 = vmul.f32 %v23963_v55, %v21144_v60 }
0x3b9d   :  { %v11397_v28 = vsel %vm1509_vm5, %v11389_v31, 0.0 }
0x3b9e   :  { %v21146_v52 = vpop.eup %21145  ;;  %11398 = vadd.xlane.f32.xlu1 %v11397_v28  ;;  %v11394_v63 = vsel %vm1509_vm5, %v11388_v26, 0.0  ;;  %19187 = vmatmul.mubr.msk.f32.vlgmr.msra.gmra.mrb[132].mxu0 %vm1509_vm5, %v23864_v37 }
0x3b9f   :  { %11395 = vadd.xlane.f32.xlu0 %v11394_v63  ;;  %20287 = vmatpush3.bf16.msra.mxu0 %v23754_v30  ;;  %v11390_v33 = vmul.f32 %v23996_v35, %v21146_v52  ;;  %v12073_v30 = vpop.f32.mrb[130].mxu0 }
0x3ba0   :  { %20289 = vmatprep.subr.bf16.mxu0 %v23760_v3  ;;  %19189 = vmatprep.mubr.msk.f32.mxu0 %vm1509_vm5, %v23872_v23  ;;  %v19166_v37 = vpop.f32.mrb[131].mxu0 }
0x3ba1   :  { %v11400_v46 = vsel %vm1509_vm5, %v11390_v33, 0.0 }
0x3ba2   :  { %19190 = vmatmul.mubr.msk.f32.gmra.mrb[134].mxu0 %vm1509_vm5, %v23880_v40 }
0x3ba3   :  { %11401 = vadd.xlane.f32.xlu0 %v11400_v46  ;;  %20291 = vmatpush3.bf16.msra.mxu0 %v23760_v3 }
0x3ba4   :  { %19214 = vmatprep.mubr.msk.f32.mxu0 %vm1509_vm5, %v23610_v44 }
0x3ba6   :  { %19215 = vmatmul.mubr.msk.f32.vlgmr.msra.gmra.mrb[136].mxu0 %vm1509_vm5, %v23619_v18 }
0x3ba7   :  { %19217 = vmatprep.mubr.msk.f32.mxu0 %vm1509_vm5, %v23627_v1 }
0x3baa   :  { %19218 = vmatmul.mubr.msk.f32.gmra.mrb[138].mxu0 %vm1509_vm5, %v23637_v53 }
0x3c1e   :  { %v11775_v23 = vpop.xlane.xlu0 %11774 }
0x3c1f   :  { %21147 = vrcp.f32 %v11775_v23  ;;  %v11772_v40 = vpop.xlane.xlu1 %11771 }
0x3c20   :  { %21149 = vrcp.f32 %v11772_v40 }
0x3c23   :  { %v11778_v62 = vpop.xlane.xlu1 %11777 }
0x3c24   :  { %21151 = vrcp.f32 %v11778_v62 }
0x3c27   :  { %v11393_v3 = vpop.xlane.xlu1 %11392 }
0x3c28   :  { %21153 = vrcp.f32 %v11393_v3  ;;  %v11781_v36 = vpop.xlane.xlu0 %11780 }
0x3c29   :  { %v21148_v39 = vpop.eup %21147  ;;  %21155 = vrcp.f32 %v11781_v36 }
0x3c2a   :  { %v21150_v47 = vpop.eup %21149  ;;  %v11787_v57 = vmul.f32 %v21148_v39, %v23966_v9 }
0x3c2b   :  { %v11399_v50 = vpop.xlane.xlu1 %11398  ;;  %v11786_v27 = vmul.f32 %v21150_v47, %v23974_v49 }
0x3c2c   :  { %21157 = vrcp.f32 %v11399_v50  ;;  %v11396_v20 = vpop.xlane.xlu0 %11395 }
0x3c2d   :  { %21159 = vrcp.f32 %v11396_v20  ;;  %19136 = vmatprep.mubr.msk.f32.mxu1 %vm1509_vm5, %v11786_v27 }
0x3c2e   :  { %v21152_v41 = vpop.eup %21151  ;;  %19137 = vmatmul.mubr.msk.f32.vlgmr.msra.gmra.mrb[150].mxu1 %vm1509_vm5, %v11787_v57 }
0x3c2f   :  { %20249 = vmatpush3.bf16.msra.mxu1 %v23772_v4  ;;  %v11788_v48 = vmul.f32 %v21152_v41, %v23986_v12 }
0x3c30   :  { %20251 = vmatprep.subr.bf16.mxu1 %v23797_v38  ;;  %v11402_v32 = vpop.xlane.xlu0 %11401 }
0x3c31   :  { %21161 = vrcp.f32 %v11402_v32  ;;  %19139 = vmatprep.mubr.msk.f32.mxu1 %vm1509_vm5, %v11788_v48 }
0x3c32   :  { %v21154_v49 = vpop.eup %21153 }
0x3c33   :  { %v21156_v51 = vpop.eup %21155  ;;  %20253 = vmatpush3.bf16.msra.mxu1 %v23797_v38  ;;  %v11407_v9 = vmul.f32 %v21154_v49, %v23991_v56 }
0x3c34   :  { %v11789_v17 = vmul.f32 %v21156_v51, %v23999_v2  ;;  %20262 = vmatprep.subr.bf16.mxu1 %v25010_v29 }
0x3c36   :  { %v21158_v42 = vpop.eup %21157  ;;  %19140 = vmatmul.mubr.msk.f32.gmra.mrb[152].mxu1 %vm1509_vm5, %v11789_v17 }
0x3c37   :  { %v21160_v4 = vpop.eup %21159  ;;  %19150 = vmatprep.mubr.msk.f32.mxu1 %vm1509_vm5, %v11407_v9  ;;  %v11409_v12 = vmul.f32 %v21158_v42, %v11389_v31 }
0x3c38   :  { %v11408_v60 = vmul.f32 %v21160_v4, %v11388_v26 }
0x3c3a   :  { %19151 = vmatmul.mubr.msk.f32.vlgmr.msra.gmra.mrb[150].mxu1 %vm1509_vm5, %v11408_v60 }
0x3c3b   :  { %v21162_v28 = vpop.eup %21161  ;;  %20264 = vmatpush3.bf16.msra.mxu1 %v23403_v54  ;;  %19153 = vmatprep.mubr.msk.f32.mxu1 %vm1509_vm5, %v11409_v12 }
0x3c3c   :  { %20265 = vmatprep.subr.bf16.mxu1 %v25010_v29  ;;  %v11410_v38 = vmul.f32 %v21162_v28, %v11390_v33 }
0x3c3e   :  { %19154 = vmatmul.mubr.msk.f32.gmra.mrb[152].mxu1 %vm1509_vm5, %v11410_v38 }
0x3c3f   :  { %20267 = vmatpush3.bf16.msra.mxu1 %v23413_v61  ;;  %19175 = vmatprep.mubr.msk.f32.mxu1 %vm21383_vm9, %v25008_v7 }
0x3c40   :  { %20277 = vmatprep.subr.bf16.mxu1 %v23895_v5 }
0x3c42   :  { %19176 = vmatmul.mubr.msk.f32.vlgmr.msra.gmra.mrb[154].mxu1 %vm1509_vm5, %v12073_v30 }
0x3c43   :  { %20279 = vmatpush3.bf16.msra.mxu1 %v23895_v5 }
0x3c44   :  { %20281 = vmatprep.subr.bf16.mxu1 %v23905_v25 }
0x3c47   :  { %20283 = vmatpush3.bf16.msra.mxu1 %v23905_v25 }
0x3c71   :  { %v19188_v56 = vpop.f32.mrb[132].mxu0 }
0x3c72   :  { %12282 = vperm.xlu0 %20677, %v19188_v56   ;;  %v12256_v2 = vpop.f32.mrb[133].mxu0 }
0x3c73   :  { %12277 = vperm.xlu1 %20678, %v12256_v2  }
0x3c75   :  { %v19191_v31 = vpop.f32.mrb[134].mxu0 }
0x3c76   :  { %v12266_v26 = vpop.f32.mrb[135].mxu0 }
0x3c77   :  { %12287 = vperm.xlu1 %20678, %v12266_v26  }
0x3c79   :  { %v24056_v52 = vpop.f32.mrb[136].mxu0 }
0x3c7a   :  { %v24058_v63 = vpop.f32.mrb[137].mxu0 }
0x3c7b   :  { %12292 = vperm.xlu1 %20678, %v19191_v31  }
0x3c7d   :  { %v24060_v33 = vpop.f32.mrb[138].mxu0 }
0x3c7e   :  { %v24062_v46 = vpop.f32.mrb[139].mxu0 }
0x3cf1   :  { %v12283_v40 = vpop.permute.xlu0 %12282 }
0x3cf2   :  { %v12278_v5 = vpop.permute.xlu1 %12277 }
0x3cf6   :  { %v12288_v30 = vpop.permute.xlu1 %12287 }
0x3cfa   :  { %v12293_v62 = vpop.permute.xlu1 %12292 }
0x3d15   :  { %v12146_v37 = vpop.f32.mrb[154].mxu1 }
0x3d16   :  { %v12298_v25 = vrot.slane %v12146_v37, %v21712_v59  ;;  %v19177_v23 = vpop.f32.mrb[155].mxu1 }
0x3d18   :  { %v12300_v3 = vadd.f32 %v12298_v25, %v12283_v40  ;;  %v12299_v36 = vadd.f32 %v12298_v25, %v12278_v5  ;;  %v12301_v39 = vadd.f32 %v12298_v25, %v12288_v30  ;;  %v12302_v47 = vadd.f32 %v12298_v25, %v12293_v62 }
0x3d1a   :  { %vm12304_vm2 = vcmp.gt.f32.partialorder %v12300_v3, 0.0  ;;  %v12308_v50 = vmul.f32 0.2, %v12300_v3  ;;  %vm12303_vm14 = vcmp.gt.f32.partialorder %v12299_v36, 0.0  ;;  %v12307_v27 = vmul.f32 0.2, %v12299_v36 }
0x3d1b   :  { %vm12305_vm15 = vcmp.gt.f32.partialorder %v12301_v39, 0.0  ;;  %v12309_v20 = vmul.f32 0.2, %v12301_v39  ;;  %v12310_v48 = vmul.f32 0.2, %v12302_v47  ;;  %vm12306_vm7 = vcmp.gt.f32.partialorder %v12302_v47, 0.0 }
0x3d1c   :  { %v12312_v57 = vsel %vm12304_vm2, %v12300_v3, %v12308_v50  ;;  %v12311_v41 = vsel %vm12303_vm14, %v12299_v36, %v12307_v27 }
0x3d1d   :  { %v12316_v32 = vsel %vm8810_vm11, %v12312_v57, -1e+30  ;;  %v12315_v49 = vsel %vm8809_vm12, %v12311_v41, -1e+30  ;;  %v12313_v51 = vsel %vm12305_vm15, %v12301_v39, %v12309_v20  ;;  %v12314_v4 = vsel %vm12306_vm7, %v12302_v47, %v12310_v48 }
0x3d1e   :  { %v12322_v9 = vsel %vm1509_vm5, %v12316_v32, -inf  ;;  %v12319_v17 = vsel %vm1509_vm5, %v12315_v49, -inf  ;;  %v12317_v42 = vsel %vm8811_vm3, %v12313_v51, -1e+30  ;;  %v12318_v60 = vsel %vm8812_vm8, %v12314_v4, -1e+30 }
0x3d1f   :  { %12323 = vmax.xlane.f32.xlu1 %v12322_v9  ;;  %12320 = vmax.xlane.f32.xlu0 %v12319_v17  ;;  %v12325_v12 = vsel %vm1509_vm5, %v12317_v42, -inf  ;;  %v12328_v28 = vsel %vm1509_vm5, %v12318_v60, -inf }
0x3d23   :  { %12326 = vmax.xlane.f32.xlu0 %v12325_v12 }
0x3d27   :  { %12329 = vmax.xlane.f32.xlu0 %v12328_v28 }
0x3dac   :  { %v12324_v38 = vpop.xlane.xlu1 %12323  ;;  %v12321_v56 = vpop.xlane.xlu0 %12320 }
0x3dad   :  { %v12332_v2 = vsub.f32 %v12316_v32, %v12324_v38  ;;  %v12331_v31 = vsub.f32 %v12315_v49, %v12321_v56 }
0x3daf   :  { %v12337_v26 = vmul.f32 1.442695, %v12332_v2  ;;  %v12335_v5 = vmul.f32 1.442695, %v12331_v31  ;;  %v2328_v31 = vld [vmem:[%s24967_s16 + $0x60] sm:$0xff] }
0x3db0   :  { %v12327_v30 = vpop.xlane.xlu0 %12326 }
0x3db1   :  { %21163 = vpow2.f32 %v12337_v26  ;;  %v12333_v37 = vsub.f32 %v12317_v42, %v12327_v30  ;;  %v21345_v30 = vld [vmem:[%s24968_s17 + $0x38] sm:$0xff] }
0x3db2   :  { %21165 = vpow2.f32 %v12335_v5 }
0x3db3   :  { %v12339_v25 = vmul.f32 1.442695, %v12333_v37  ;;  %v12572_v37 = vrot.slane %v21345_v30, %v22020_v34 }
0x3db4   :  { %v12330_v23 = vpop.xlane.xlu0 %12329 }
0x3db5   :  { %21167 = vpow2.f32 %v12339_v25  ;;  %v12334_v40 = vsub.f32 %v12318_v60, %v12330_v23 }
0x3db7   :  { %v12341_v62 = vmul.f32 1.442695, %v12334_v40 }
0x3db9   :  { %21169 = vpow2.f32 %v12341_v62 }
0x3dbb   :  { %v21164_v3 = vpop.eup %21163 }
0x3dbc   :  { %v21166_v36 = vpop.eup %21165  ;;  %v12344_v39 = vmul.f32 %v23963_v55, %v21164_v3  ;;  %v2348_v55 = vld [vmem:[%s24971_s18 + $0x50] sm:$0xff] }
0x3dbd   :  { %v12343_v47 = vmul.f32 %v23971_v8, %v21166_v36  ;;  %v2349_v8 = vld [vmem:[%s24971_s18 + $0x58] sm:$0xff] }
0x3dbe   :  { %v12350_v50 = vsel %vm1509_vm5, %v12344_v39, 0.0  ;;  %v20292_v51 = vpack.c.bf16 %v2349_v8, %v2348_v55 }
0x3dbf   :  { %v21168_v27 = vpop.eup %21167  ;;  %12351 = vadd.xlane.f32.xlu0 %v12350_v50  ;;  %v12347_v20 = vsel %vm1509_vm5, %v12343_v47, 0.0 }
0x3dc0   :  { %12348 = vadd.xlane.f32.xlu1 %v12347_v20  ;;  %v12345_v57 = vmul.f32 %v23983_v13, %v21168_v27  ;;  %20293 = vmatprep.subr.bf16.mxu1 %v20292_v51  ;;  %v21346_v20 = vld [vmem:[%s24968_s17 + $0x30] sm:$0xff] }
0x3dc2   :  { %v12353_v41 = vsel %vm1509_vm5, %v12345_v57, 0.0 }
0x3dc3   :  { %v21170_v48 = vpop.eup %21169 }
0x3dc4   :  { %12354 = vadd.xlane.f32.xlu1 %v12353_v41  ;;  %v12346_v32 = vmul.f32 %v23996_v35, %v21170_v48 }
0x3dc6   :  { %v12356_v49 = vsel %vm1509_vm5, %v12346_v32, 0.0 }
0x3dc7   :  { %12357 = vadd.xlane.f32.xlu0 %v12356_v49 }
0x3e4c   :  { %v12352_v13 = vpop.xlane.xlu0 %12351 }
0x3e4d   :  { %v12349_v9 = vpop.xlane.xlu1 %12348  ;;  %21171 = vrcp.f32 %v12352_v13 }
0x3e4e   :  { %21173 = vrcp.f32 %v12349_v9 }
0x3e51   :  { %v12355_v17 = vpop.xlane.xlu1 %12354 }
0x3e52   :  { %21175 = vrcp.f32 %v12355_v17 }
0x3e54   :  { %v12358_v35 = vpop.xlane.xlu0 %12357 }
0x3e55   :  { %21177 = vrcp.f32 %v12358_v35 }
0x3e57   :  { %v21172_v42 = vpop.eup %21171 }
0x3e58   :  { %v21174_v4 = vpop.eup %21173  ;;  %v12364_v12 = vmul.f32 %v21172_v42, %v12344_v39 }
0x3e59   :  { %v12363_v60 = vmul.f32 %v21174_v4, %v12343_v47 }
0x3e5b   :  { %19200 = vmatprep.mubr.msk.f32.mxu1 %vm1509_vm5, %v12363_v60 }
0x3e5c   :  { %v21176_v28 = vpop.eup %21175  ;;  %19201 = vmatmul.mubr.msk.f32.vlgmr.msra.gmra.mrb[150].mxu1 %vm1509_vm5, %v12364_v12 }
0x3e5d   :  { %v12365_v38 = vmul.f32 %v21176_v28, %v12345_v57  ;;  %20295 = vmatpush3.bf16.msra.mxu1 %v20292_v51  ;;  %v12479_v57 = vrot.slane %v21346_v20, %v22020_v34 }
0x3e5e   :  { %20300 = vmatprep.subr.bf16.mxu1 %v25010_v29 }
0x3e5f   :  { %v21178_v56 = vpop.eup %21177  ;;  %19203 = vmatprep.mubr.msk.f32.mxu1 %vm1509_vm5, %v12365_v38 }
0x3e60   :  { %v12366_v2 = vmul.f32 %v21178_v56, %v12346_v32 }
0x3e62   :  { %19204 = vmatmul.mubr.msk.f32.gmra.mrb[152].mxu1 %vm1509_vm5, %v12366_v2 }
0x3e63   :  { %19224 = vmatprep.mubr.msk.f32.mxu1 %vm76_vm0, %v24058_v63  ;;  %v2329_v63 = vld [vmem:[%s24967_s16 + $0x68] sm:$0xff] }
0x3e64   :  { %v20296_v26 = vpack.c.bf16 %v2329_v63, %v2328_v31 }
0x3e66   :  { %19225 = vmatmul.mubr.msk.f32.vlgmr.msra.gmra.mrb[156].mxu1 %vm76_vm0, %v24056_v52  ;;  %20297 = vmatprep.subr.bf16.mxu0 %v20296_v26 }
0x3e67   :  { %19227 = vmatprep.mubr.msk.f32.mxu1 %vm76_vm0, %v24062_v46  ;;  %20299 = vmatpush3.bf16.msra.mxu0 %v20296_v26 }
0x3e68   :  { %20308 = vmatprep.subr.bf16.mxu0 %v25010_v29 }
0x3e6a   :  { %19228 = vmatmul.mubr.msk.f32.gmra.mrb[158].mxu1 %vm76_vm0, %v24060_v33 }
0x3e6b   :  { %19248 = vmatprep.mubr.msk.f32.mxu1 %vm21383_vm9, %v25008_v7 }
0x3f2f   :  { %v19202_v52 = vpop.f32.mrb[150].mxu1 }
0x3f30   :  { %v12449_v46 = vpop.f32.mrb[151].mxu1  ;;  %v12473_v27 = vmul.f32 0.33333334, %v19202_v52 }
0x3f31   :  { %v12472_v48 = vmul.f32 0.33333334, %v12449_v46 }
0x3f32   :  { %v12481_v55 = vadd.f32 %v12479_v57, %v12473_v27 }
0x3f33   :  { %v12480_v8 = vadd.f32 %v12479_v57, %v12472_v48 }
0x3f34   :  { %v12691_v9 = vmul.f32 0.01, %v12481_v55  ;;  %vm12687_vm6 = vcmp.gt.f32.partialorder %v12481_v55, 0.0 }
0x3f35   :  { %v19205_v5 = vpop.f32.mrb[152].mxu1  ;;  %v12690_v35 = vmul.f32 0.01, %v12480_v8  ;;  %vm12686_vm13 = vcmp.gt.f32.partialorder %v12480_v8, 0.0 }
0x3f36   :  { %v12459_v33 = vpop.f32.mrb[153].mxu1  ;;  %v12475_v51 = vmul.f32 0.33333334, %v19205_v5  ;;  %v12695_v38 = vsel %vm12687_vm6, %v12481_v55, %v12691_v9 }
0x3f37   :  { %v12474_v13 = vmul.f32 0.33333334, %v12459_v33  ;;  %v12694_v31 = vsel %vm12686_vm13, %v12480_v8, %v12690_v35  ;;  %v24157_v35 = vld [vmem:[%s24968_s17 + $0x28] sm:$0xff] }
0x3f38   :  { %v12483_v42 = vadd.f32 %v12479_v57, %v12475_v51 }
0x3f39   :  { %v19226_v25 = vpop.f32.mrb[156].mxu1  ;;  %v12482_v12 = vadd.f32 %v12479_v57, %v12474_v13 }
0x3f3a   :  { %v12657_v23 = vadd.f32 %v19226_v25, %v12572_v37  ;;  %v12651_v40 = vpop.f32.mrb[157].mxu1  ;;  %vm12689_vm4 = vcmp.gt.f32.partialorder %v12483_v42, 0.0  ;;  %v12693_v63 = vmul.f32 0.01, %v12483_v42 }
0x3f3b   :  { %v12652_v62 = vadd.f32 %v12651_v40, %v12572_v37  ;;  %v12692_v46 = vmul.f32 0.01, %v12482_v12  ;;  %vm12688_vm2 = vcmp.gt.f32.partialorder %v12482_v12, 0.0 }
0x3f3c   :  { %v12671_v3 = vmul.f32 0.5, %v12657_v23 }
0x3f3d   :  { %v12670_v36 = vmul.f32 0.5, %v12652_v62  ;;  %v19229_v39 = vpop.f32.mrb[158].mxu1 }
0x3f3e   :  { %21179 = vtanh.f32 %v12671_v3  ;;  %v12667_v47 = vadd.f32 %v19229_v39, %v12572_v37  ;;  %v12661_v50 = vpop.f32.mrb[159].mxu1  ;;  %v12697_v3 = vsel %vm12689_vm4, %v12483_v42, %v12693_v63 }
0x3f3f   :  { %21181 = vtanh.f32 %v12670_v36  ;;  %v12662_v41 = vadd.f32 %v12661_v50, %v12572_v37 }
0x3f40   :  { %v12673_v32 = vmul.f32 0.5, %v12667_v47  ;;  %v12696_v47 = vsel %vm12688_vm2, %v12482_v12, %v12692_v46 }
0x3f41   :  { %v12672_v49 = vmul.f32 0.5, %v12662_v41 }
0x3f42   :  { %21183 = vtanh.f32 %v12673_v32 }
0x3f43   :  { %21185 = vtanh.f32 %v12672_v49 }
0x3f48   :  { %v21180_v17 = vpop.eup %21179 }
0x3f49   :  { %v21182_v4 = vpop.eup %21181  ;;  %v12679_v60 = vadd.f32 1.0, %v21180_v17 }
0x3f4a   :  { %v12678_v28 = vadd.f32 1.0, %v21182_v4 }
0x3f4b   :  { %v12683_v56 = vmul.f32 0.5, %v12679_v60  ;;  %v13335_v60 = vrot.slane %v24157_v35, %v21712_v59 }
0x3f4c   :  { %v21184_v2 = vpop.eup %21183  ;;  %v12682_v26 = vmul.f32 0.5, %v12678_v28 }
0x3f4d   :  { %v21186_v52 = vpop.eup %21185  ;;  %v12699_v5 = vmul.f32 %v12695_v38, %v12683_v56  ;;  %v12703_v33 = vsub.f32 1.0, %v12683_v56  ;;  %v12681_v30 = vadd.f32 1.0, %v21184_v2  ;;  %v24197_v2 = vld [vmem:[%s24968_s17 + $0x20] sm:$0xff] }
0x3f4e   :  { %v12698_v37 = vmul.f32 %v12694_v31, %v12682_v26  ;;  %v12702_v25 = vsub.f32 1.0, %v12682_v26  ;;  %v12680_v23 = vadd.f32 1.0, %v21186_v52  ;;  %v12815_v31 = vrot.slane %v24197_v2, 4 }
0x3f4f   :  { %v12707_v40 = vmul.f32 %v12703_v33, %v23740_v0  ;;  %v12685_v62 = vmul.f32 0.5, %v12681_v30 }
0x3f50   :  { %v12706_v36 = vmul.f32 %v12702_v25, %v23743_v16  ;;  %v12684_v39 = vmul.f32 0.5, %v12680_v23 }
0x3f51   :  { %v24123_v50 = vadd.f32 %v12707_v40, %v12699_v5  ;;  %v12701_v27 = vmul.f32 %v12697_v3, %v12685_v62  ;;  %v12705_v20 = vsub.f32 1.0, %v12685_v62 }
0x3f52   :  { %v24125_v57 = vadd.f32 %v12706_v36, %v12698_v37  ;;  %v12700_v41 = vmul.f32 %v12696_v47, %v12684_v39  ;;  %v12704_v48 = vsub.f32 1.0, %v12684_v39  ;;  %v13170_v36 = vrot.slane %v24197_v2, 5  ;;  %v25013_v39 = vld [vmem:[#allocation8_spill] sm:$0xff] }
0x3f53   :  { %v12715_v32 = vmax.f32 %v24123_v50, 0.0  ;;  %v12709_v49 = vmul.f32 %v12705_v20, %v23747_v10  ;;  %v12976_v47 = vrot.slane %v24197_v2, %v25013_v39 }
0x3f54   :  { %v12708_v0 = vmul.f32 %v12704_v48, %v23749_v22  ;;  %v12714_v55 = vmax.f32 %v24125_v57, 0.0 }
0x3f55   :  { %v24131_v8 = vadd.f32 %v12709_v49, %v12701_v27 }
0x3f56   :  { %v24133_v16 = vadd.f32 %v12708_v0, %v12700_v41  ;;  %19234 = vmatprep.mubr.msk.f32.mxu0 %vm76_vm0, %v12714_v55  ;;  %v24136_v51 = vpack.c.bf16 %v12715_v32, %v12714_v55 }
0x3f57   :  { %19235 = vmatmul.mubr.msk.f32.vlgmr.msra.gmra.mrb[140].mxu0 %vm76_vm0, %v12715_v32  ;;  %v12717_v13 = vmax.f32 %v24131_v8, 0.0 }
0x3f58   :  { %v12716_v9 = vmax.f32 %v24133_v16, 0.0  ;;  %20310 = vmatpush3.bf16.msra.mxu0 %v23403_v54 }
0x3f59   :  { %20311 = vmatprep.subr.bf16.mxu0 %v25010_v29 }
0x3f5a   :  { %19237 = vmatprep.mubr.msk.f32.mxu0 %vm76_vm0, %v12716_v9  ;;  %v24144_v10 = vpack.c.bf16 %v12717_v13, %v12716_v9 }
0x3f5b   :  { %19238 = vmatmul.mubr.msk.f32.gmra.mrb[142].mxu0 %vm76_vm0, %v12717_v13 }
0x3f5c   :  { %20313 = vmatpush3.bf16.msra.mxu0 %v23413_v61  ;;  %19259 = vmatprep.mubr.msk.f32.mxu0 %vm21383_vm9, %v25008_v7 }
0x402a   :  { %v24150_v22 = vpop.f32.mrb[140].mxu0 }
0x402b   :  { %v24152_v17 = vpop.f32.mrb[141].mxu0  ;;  %v12978_v27 = vmul.f32 %v24150_v22, %v12976_v47 }
0x402c   :  { %v24161_v42 = vpack.c.bf16 %v24150_v22, %v24152_v17  ;;  %v24165_v4 = vpack.i.bf16 %v24150_v22, %v24152_v17  ;;  %v12977_v48 = vmul.f32 %v12976_v47, %v24152_v17 }
0x402d   :  { %v12984_v20 = vsel %vm76_vm0, %v12978_v27, 0.0 }
0x402e   :  { %20760 = vrot.lane.b32.xlu1 %v24165_v4, %s21369_s3  ;;  %v24169_v12 = vpop.f32.mrb[142].mxu0  ;;  %20303 = vmatpush3.bf16.xpose.msk.msra.mxu1 %vm21908_vm10, %v24161_v42  ;;  %v12981_v49 = vsel %vm76_vm0, %v12977_v48, 0.0 }
0x402f   :  { %v24176_v28 = vpop.f32.mrb[143].mxu0  ;;  %20304 = vmatprep.subr.bf16.mxu1 %v25010_v29  ;;  %v12980_v0 = vmul.f32 %v24169_v12, %v12976_v47 }
0x4030   :  { %v24181_v38 = vpack.c.bf16 %v24169_v12, %v24176_v28  ;;  %v24185_v56 = vpack.i.bf16 %v24169_v12, %v24176_v28  ;;  %v12979_v41 = vmul.f32 %v12976_v47, %v24176_v28 }
0x4031   :  { %v12990_v55 = vsel %vm76_vm0, %v12980_v0, 0.0 }
0x4032   :  { %13337 = vrot.lane.b32.xlu1 %v13335_v60, %s21385_s2  ;;  %20765 = vrot.lane.b32.xlu0 %v24185_v56, %s21369_s3  ;;  %v12987_v32 = vsel %vm76_vm0, %v12979_v41, 0.0  ;;  %v24233_v60 = vld [vmem:[%s24969_s11 + $0xa0] sm:$0xff] }
0x4036   :  { %20307 = vmatpush3.bf16.xpose.msk.msra.mxu1 %vm21908_vm10, %v24181_v38 }
0x4037   :  { %20322 = vmatprep.subr.bf16.mxu1 %v25010_v29 }
0x403d   :  { %19249 = vmatmul.mubr.msk.f32.vlgmr.msra.gmra.mrb[160].mxu1 %vm76_vm0, %v12815_v31 }
0x403e   :  { %19284 = vmatprep.mubr.msk.f32.mxu1 %vm21383_vm9, %v25008_v7 }
0x40a0   :  { %v20761_v63 = vpop.permute.xlu1 %20760 }
0x40a1   :  { %v20763_v26 = vunpack.i.h.bf16 %v20761_v63  ;;  %v20762_v52 = vunpack.i.l.bf16 %v20761_v63 }
0x40a3   :  { %v20323_v46 = vpack.c.bf16 %v20763_v26, %v20762_v52 }
0x40a4   :  { %v13338_v5 = vpop.permute.xlu1 %13337  ;;  %v20766_v33 = vpop.permute.xlu0 %20765 }
0x40a5   :  { %20325 = vmatpush3.bf16.xpose.msk.msra.mxu1 %vm21908_vm10, %v20323_v46  ;;  %v13340_v30 = vmul.f32 %v13338_v5, %v24152_v17  ;;  %v13341_v37 = vmul.f32 %v24150_v22, %v13338_v5  ;;  %v20768_v25 = vunpack.i.h.bf16 %v20766_v33  ;;  %v20767_v23 = vunpack.i.l.bf16 %v20766_v33 }
0x40a6   :  { %20326 = vmatprep.subr.bf16.mxu1 %v25010_v29  ;;  %v13343_v40 = vmul.f32 %v24169_v12, %v13338_v5  ;;  %v13342_v62 = vmul.f32 %v13338_v5, %v24176_v28 }
0x40a7   :  { %13348 = vrot.lane.b32.xlu1 %v13340_v30, %s21369_s3  ;;  %13350 = vrot.lane.b32.xlu0 %v13341_v37, %s21369_s3  ;;  %v20327_v3 = vpack.c.bf16 %v20768_v25, %v20767_v23  ;;  %v13912_v37 = vrot.slane %v24157_v35, %v21744_v19  ;;  %v24252_v19 = vld [vmem:[%s24969_s11 + $0xa8] sm:$0xff]  ;;  %v24260_v35 = vld [vmem:[%s24969_s11 + $0xb0] sm:$0xff] }
0x40ab   :  { %13354 = vrot.lane.b32.xlu0 %v13343_v40, %s21369_s3  ;;  %13352 = vrot.lane.b32.xlu1 %v13342_v62, %s21369_s3 }
0x40ad   :  { %20329 = vmatpush3.bf16.xpose.msk.msra.mxu1 %vm21908_vm10, %v20327_v3 }
0x40ae   :  { %20345 = vmatprep.subr.bf16.mxu1 %v20323_v46 }
0x40b4   :  { %19285 = vmatmul.mubr.msk.f32.vlgmr.msra.gmra.mrb[162].mxu1 %vm76_vm0, %v13170_v36 }
0x40b5   :  { %20347 = vmatpush3.bf16.msra.mxu1 %v20323_v46 }
0x40b6   :  { %20349 = vmatprep.subr.bf16.mxu1 %v20327_v3 }
0x40b9   :  { %20351 = vmatpush3.bf16.msra.mxu1 %v20327_v3 }
0x40ba   :  { %20353 = vmatprep.subr.bf16.mxu1 %v24161_v42 }
0x40ca   :  { %12985 = vadd.xlane.f32.xlu0 %v12984_v20 }
0x40ce   :  { %12988 = vadd.xlane.f32.xlu0 %v12987_v32 }
0x40cf   :  { %12982 = vadd.xlane.f32.xlu1 %v12981_v49 }
0x40d3   :  { %12991 = vadd.xlane.f32.xlu1 %v12990_v55 }
0x4110   :  { %v12896_v13 = vpop.f32.mrb[160].mxu1 }
0x4111   :  { %19260 = vmatmul.mubr.msk.f32.vlgmr.msra.gmra.mrb[144].mxu0 %vm1509_vm5, %v12896_v13  ;;  %v19250_v9 = vpop.f32.mrb[161].mxu1 }
0x4112   :  { %19270 = vmatprep.mubr.msk.f32.mxu0 %vm1509_vm5, %v24233_v60 }
0x4119   :  { %v13349_v31 = vpop.permute.xlu1 %13348  ;;  %v13351_v63 = vpop.permute.xlu0 %13350 }
0x411a   :  { %v13363_v26 = vsel %vm76_vm0, %v13351_v63, 0.0  ;;  %v13360_v52 = vsel %vm76_vm0, %v13349_v31, 0.0 }
0x411b   :  { %13364 = vadd.xlane.f32.xlu1 %v13363_v26  ;;  %13361 = vadd.xlane.f32.xlu0 %v13360_v52 }
0x411d   :  { %v13355_v46 = vpop.permute.xlu0 %13354  ;;  %v13353_v5 = vpop.permute.xlu1 %13352 }
0x411e   :  { %v13369_v33 = vsel %vm76_vm0, %v13355_v46, 0.0  ;;  %v13366_v30 = vsel %vm76_vm0, %v13353_v5, 0.0 }
0x411f   :  { %13370 = vadd.xlane.f32.xlu1 %v13369_v33  ;;  %13367 = vadd.xlane.f32.xlu0 %v13366_v30 }
0x4130   :  { %20775 = vrot.lane.b32.xlu1 %v24185_v56, %s21370_s4 }
0x4134   :  { %13914 = vrot.lane.b32.xlu1 %v13912_v37, %s21386_s21 }
0x4135   :  { %20770 = vrot.lane.b32.xlu0 %v24165_v4, %s21370_s4  ;;  %v24268_v4 = vld [vmem:[%s24969_s11 + $0xb8] sm:$0xff] }
0x4157   :  { %v12986_v25 = vpop.xlane.xlu0 %12985 }
0x415b   :  { %v12989_v62 = vpop.xlane.xlu0 %12988 }
0x415c   :  { %v12983_v23 = vpop.xlane.xlu1 %12982 }
0x415d   :  { %v20314_v40 = vpack.c.bf16 %v12986_v25, %v12983_v23 }
0x415f   :  { %20315 = vmatprep.subr.bf16.mxu0 %v20314_v40 }
0x4160   :  { %v12992_v3 = vpop.xlane.xlu1 %12991  ;;  %20317 = vmatpush3.bf16.msra.mxu0 %v20314_v40 }
0x4161   :  { %v20318_v36 = vpack.c.bf16 %v12992_v3, %v12989_v62 }
0x4163   :  { %20319 = vmatprep.subr.bf16.mxu0 %v20318_v36 }
0x4164   :  { %20321 = vmatpush3.bf16.msra.mxu0 %v20318_v36 }
0x4165   :  { %20330 = vmatprep.subr.bf16.mxu0 %v25010_v29 }
0x4167   :  { %19271 = vmatmul.mubr.msk.f32.vlgmr.msra.gmra.mrb[146].mxu0 %vm1509_vm5, %v24252_v19 }
0x4168   :  { %20332 = vmatpush3.bf16.msra.mxu0 %v23403_v54  ;;  %19273 = vmatprep.mubr.msk.f32.mxu0 %vm1509_vm5, %v24260_v35 }
0x4169   :  { %20333 = vmatprep.subr.bf16.mxu0 %v25010_v29 }
0x416b   :  { %19274 = vmatmul.mubr.msk.f32.gmra.mrb[148].mxu0 %vm1509_vm5, %v24268_v4 }
0x416c   :  { %20335 = vmatpush3.bf16.msra.mxu0 %v23413_v61  ;;  %19295 = vmatprep.mubr.msk.f32.mxu0 %vm21383_vm9, %v25008_v7 }
0x4187   :  { %v13255_v56 = vpop.f32.mrb[162].mxu1 }
0x4188   :  { %19296 = vmatmul.mubr.msk.f32.vlgmr.msra.gmra.mrb[150].mxu0 %vm1509_vm5, %v13255_v56  ;;  %v19286_v47 = vpop.f32.mrb[163].mxu1 }
0x4189   :  { %19306 = vmatprep.mubr.msk.f32.mxu0 %vm1509_vm5, %v24233_v60 }
0x41a8   :  { %v13365_v27 = vpop.xlane.xlu1 %13364  ;;  %v13362_v20 = vpop.xlane.xlu0 %13361 }
0x41a9   :  { %v20336_v41 = vpack.c.bf16 %v13365_v27, %v13362_v20 }
0x41ab   :  { %20337 = vmatprep.subr.bf16.mxu0 %v20336_v41 }
0x41ac   :  { %v13371_v48 = vpop.xlane.xlu1 %13370  ;;  %v13368_v32 = vpop.xlane.xlu0 %13367  ;;  %20339 = vmatpush3.bf16.msra.mxu0 %v20336_v41 }
0x41ad   :  { %v20340_v49 = vpack.c.bf16 %v13371_v48, %v13368_v32  ;;  %v13747_v32 = vrot.slane %v24197_v2, 6 }
0x41af   :  { %20341 = vmatprep.subr.bf16.mxu0 %v20340_v49 }
0x41b0   :  { %v20771_v0 = vpop.permute.xlu0 %20770  ;;  %20343 = vmatpush3.bf16.msra.mxu0 %v20340_v49  ;;  %v20776_v31 = vpop.permute.xlu1 %20775 }
0x41b1   :  { %20360 = vmatprep.subr.bf16.mxu0 %v25010_v29  ;;  %v20773_v55 = vunpack.i.h.bf16 %v20771_v0  ;;  %v20772_v13 = vunpack.i.l.bf16 %v20771_v0  ;;  %v20778_v63 = vunpack.i.h.bf16 %v20776_v31  ;;  %v20777_v26 = vunpack.i.l.bf16 %v20776_v31 }
0x41b3   :  { %19307 = vmatmul.mubr.msk.f32.vlgmr.msra.gmra.mrb[152].mxu0 %vm1509_vm5, %v24252_v19  ;;  %v24283_v9 = vpack.c.bf16 %v20773_v55, %v20772_v13  ;;  %v24293_v52 = vpack.c.bf16 %v20778_v63, %v20777_v26 }
0x41b4   :  { %19309 = vmatprep.mubr.msk.f32.mxu0 %vm1509_vm5, %v24260_v35  ;;  %v13915_v47 = vpop.permute.xlu1 %13914 }
0x41b5   :  { %v13918_v27 = vmul.f32 %v24150_v22, %v13915_v47  ;;  %v13917_v20 = vmul.f32 %v13915_v47, %v24152_v17  ;;  %v13920_v41 = vmul.f32 %v24169_v12, %v13915_v47  ;;  %v13919_v48 = vmul.f32 %v13915_v47, %v24176_v28 }
0x41b7   :  { %19310 = vmatmul.mubr.msk.f32.gmra.mrb[154].mxu0 %vm1509_vm5, %v24268_v4 }
0x41b8   :  { %19348 = vmatprep.mubr.msk.f32.mxu0 %vm21383_vm9, %v25008_v7 }
0x41b9   :  { %20363 = vmatpush3.bf16.xpose.msk.msra.mxu0 %vm21908_vm10, %v24283_v9 }
0x41ba   :  { %20364 = vmatprep.subr.bf16.mxu0 %v25010_v29 }
0x41c1   :  { %20367 = vmatpush3.bf16.xpose.msk.msra.mxu0 %vm21908_vm10, %v24293_v52 }
0x41c8   :  { %19349 = vmatmul.mubr.msk.f32.vlgmr.msra.gmra.mrb[156].mxu0 %vm76_vm0, %v13747_v32 }
0x41c9   :  { %19370 = vmatprep.mubr.msk.f32.mxu0 %vm1509_vm5, %v24233_v60 }
0x41e4   :  { %v12969_v46 = vpop.f32.mrb[144].mxu0 }
0x41e5   :  { %v19261_v5 = vpop.f32.mrb[145].mxu0  ;;  %v13101_v2 = vrot.slane %v12969_v46, %v21712_v59 }
0x423a   :  { %v19272_v33 = vpop.f32.mrb[146].mxu0 }
0x423b   :  { %v13059_v30 = vpop.f32.mrb[147].mxu0 }
0x423e   :  { %v19275_v37 = vpop.f32.mrb[148].mxu0 }
0x423f   :  { %v13069_v25 = vpop.f32.mrb[149].mxu0 }
0x425b   :  { %v13328_v23 = vpop.f32.mrb[150].mxu0 }
0x425c   :  { %v19297_v40 = vpop.f32.mrb[151].mxu0  ;;  %v13480_v22 = vrot.slane %v13328_v23, %v21712_v59 }
0x4286   :  { %v19308_v62 = vpop.f32.mrb[152].mxu0 }
0x4287   :  { %13464 = vperm.xlu1 %20678, %v19308_v62   ;;  %v13438_v3 = vpop.f32.mrb[153].mxu0 }
0x4288   :  { %13459 = vperm.xlu0 %20677, %v13438_v3  }
0x428a   :  { %v19311_v36 = vpop.f32.mrb[154].mxu0 }
0x428b   :  { %13474 = vperm.xlu1 %20678, %v19311_v36   ;;  %v13448_v56 = vpop.f32.mrb[155].mxu0 }
0x428c   :  { %13469 = vperm.xlu0 %20677, %v13448_v56  }
0x428f   :  { %13085 = vperm.xlu1 %20678, %v19272_v33  }
0x4290   :  { %13080 = vperm.xlu0 %20677, %v13059_v30  }
0x4293   :  { %13095 = vperm.xlu1 %20678, %v19275_v37  }
0x4294   :  { %13090 = vperm.xlu0 %20677, %v13069_v25  }
0x4297   :  { %13927 = vrot.lane.b32.xlu1 %v13918_v27, %s21370_s4 }
0x4298   :  { %13925 = vrot.lane.b32.xlu0 %v13917_v20, %s21370_s4 }
0x429b   :  { %13931 = vrot.lane.b32.xlu1 %v13920_v41, %s21370_s4 }
0x429c   :  { %13929 = vrot.lane.b32.xlu0 %v13919_v48, %s21370_s4 }
0x4306   :  { %v13465_v17 = vpop.permute.xlu1 %13464 }
0x4307   :  { %v13482_v49 = vadd.f32 %v13480_v22, %v13465_v17  ;;  %v13460_v0 = vpop.permute.xlu0 %13459 }
0x4308   :  { %v13481_v55 = vadd.f32 %v13480_v22, %v13460_v0 }
0x4309   :  { %v13490_v12 = vmul.f32 0.2, %v13482_v49  ;;  %vm13486_vm14 = vcmp.gt.f32.partialorder %v13482_v49, 0.0 }
0x430a   :  { %v13489_v28 = vmul.f32 0.2, %v13481_v55  ;;  %v13475_v13 = vpop.permute.xlu1 %13474  ;;  %vm13485_vm15 = vcmp.gt.f32.partialorder %v13481_v55, 0.0 }
0x430b   :  { %v13484_v31 = vadd.f32 %v13480_v22, %v13475_v13  ;;  %v13470_v63 = vpop.permute.xlu0 %13469  ;;  %v13494_v26 = vsel %vm13486_vm14, %v13482_v49, %v13490_v12 }
0x430c   :  { %v13483_v5 = vadd.f32 %v13480_v22, %v13470_v63  ;;  %v24314_v60 = vsel %vm8810_vm11, %v13494_v26, -1e+30  ;;  %v13493_v33 = vsel %vm13485_vm15, %v13481_v55, %v13489_v28 }
0x430d   :  { %v13492_v30 = vmul.f32 0.2, %v13484_v31  ;;  %v13504_v37 = vsel %vm1509_vm5, %v24314_v60, -inf  ;;  %v24320_v25 = vsel %vm8809_vm12, %v13493_v33, -1e+30  ;;  %vm13488_vm7 = vcmp.gt.f32.partialorder %v13484_v31, 0.0 }
0x430e   :  { %v13491_v23 = vmul.f32 0.2, %v13483_v5  ;;  %13505 = vmax.xlane.f32.xlu1 %v13504_v37  ;;  %v13086_v40 = vpop.permute.xlu1 %13085  ;;  %v13501_v46 = vsel %vm1509_vm5, %v24320_v25, -inf  ;;  %vm13487_vm6 = vcmp.gt.f32.partialorder %v13483_v5, 0.0 }
0x430f   :  { %v13103_v62 = vadd.f32 %v13101_v2, %v13086_v40  ;;  %13502 = vmax.xlane.f32.xlu0 %v13501_v46  ;;  %v13081_v3 = vpop.permute.xlu0 %13080  ;;  %v13496_v47 = vsel %vm13488_vm7, %v13484_v31, %v13492_v30 }
0x4310   :  { %v13102_v36 = vadd.f32 %v13101_v2, %v13081_v3  ;;  %v13495_v56 = vsel %vm13487_vm6, %v13483_v5, %v13491_v23  ;;  %v13500_v49 = vsel %vm8812_vm8, %v13496_v47, -1e+30 }
0x4311   :  { %v13111_v27 = vmul.f32 0.2, %v13103_v62  ;;  %v13499_v20 = vsel %vm8811_vm3, %v13495_v56, -1e+30  ;;  %vm13107_vm13 = vcmp.gt.f32.partialorder %v13103_v62, 0.0  ;;  %v13510_v63 = vsel %vm1509_vm5, %v13500_v49, -inf }
0x4312   :  { %v13110_v41 = vmul.f32 0.2, %v13102_v36  ;;  %v13096_v48 = vpop.permute.xlu1 %13095  ;;  %v13507_v32 = vsel %vm1509_vm5, %v13499_v20, -inf  ;;  %vm13106_vm4 = vcmp.gt.f32.partialorder %v13102_v36, 0.0 }
0x4313   :  { %v13105_v22 = vadd.f32 %v13101_v2, %v13096_v48  ;;  %13508 = vmax.xlane.f32.xlu0 %v13507_v32  ;;  %v13091_v17 = vpop.permute.xlu0 %13090  ;;  %v13115_v12 = vsel %vm13107_vm13, %v13103_v62, %v13111_v27 }
0x4314   :  { %v13104_v0 = vadd.f32 %v13101_v2, %v13091_v17  ;;  %v13114_v55 = vsel %vm13106_vm4, %v13102_v36, %v13110_v41  ;;  %v13119_v5 = vsel %vm8810_vm11, %v13115_v12, -1e+30 }
0x4315   :  { %vm13109_vm2 = vcmp.gt.f32.partialorder %v13105_v22, 0.0  ;;  %v13113_v28 = vmul.f32 0.2, %v13105_v22  ;;  %v13118_v13 = vsel %vm8809_vm12, %v13114_v55, -1e+30  ;;  %v13125_v23 = vsel %vm1509_vm5, %v13119_v5, -inf }
0x4316   :  { %v13112_v31 = vmul.f32 0.2, %v13104_v0  ;;  %v13122_v26 = vsel %vm1509_vm5, %v13118_v13, -inf  ;;  %vm13108_vm14 = vcmp.gt.f32.partialorder %v13104_v0, 0.0  ;;  %v13928_v62 = vpop.permute.xlu1 %13927 }
0x4317   :  { %13511 = vmax.xlane.f32.xlu0 %v13510_v63  ;;  %13123 = vmax.xlane.f32.xlu1 %v13122_v26  ;;  %v13117_v2 = vsel %vm13109_vm2, %v13105_v22, %v13113_v28  ;;  %v13926_v30 = vpop.permute.xlu0 %13925  ;;  %v13940_v47 = vsel %vm76_vm0, %v13928_v62, 0.0 }
0x4318   :  { %v13116_v33 = vsel %vm13108_vm14, %v13104_v0, %v13112_v31  ;;  %v13121_v46 = vsel %vm8812_vm8, %v13117_v2, -1e+30  ;;  %v13937_v36 = vsel %vm76_vm0, %v13926_v30, 0.0 }
0x4319   :  { %v13120_v37 = vsel %vm8811_vm3, %v13116_v33, -1e+30  ;;  %v13131_v3 = vsel %vm1509_vm5, %v13121_v46, -inf }
0x431a   :  { %v13128_v40 = vsel %vm1509_vm5, %v13120_v37, -inf  ;;  %v13932_v41 = vpop.permute.xlu1 %13931 }
0x431b   :  { %13126 = vmax.xlane.f32.xlu0 %v13125_v23  ;;  %13129 = vmax.xlane.f32.xlu1 %v13128_v40  ;;  %v13930_v56 = vpop.permute.xlu0 %13929  ;;  %v13946_v48 = vsel %vm76_vm0, %v13932_v41, 0.0  ;;  %v24359_v41 = vld [vmem:[%s24969_s11 + $0x60] sm:$0xff] }
0x431c   :  { %v13943_v27 = vsel %vm76_vm0, %v13930_v56, 0.0 }
0x431f   :  { %13132 = vmax.xlane.f32.xlu0 %v13131_v3  ;;  %13938 = vadd.xlane.f32.xlu1 %v13937_v36 }
0x4323   :  { %13941 = vadd.xlane.f32.xlu0 %v13940_v47  ;;  %13944 = vadd.xlane.f32.xlu1 %v13943_v27 }
0x4327   :  { %13947 = vadd.xlane.f32.xlu0 %v13946_v48 }
0x439b   :  { %v13506_v32 = vpop.xlane.xlu1 %13505 }
0x439c   :  { %v13514_v22 = vsub.f32 %v24314_v60, %v13506_v32  ;;  %v13503_v17 = vpop.xlane.xlu0 %13502 }
0x439d   :  { %v13513_v0 = vsub.f32 %v24320_v25, %v13503_v17 }
0x439e   :  { %v13519_v55 = vmul.f32 1.442695, %v13514_v22 }
0x439f   :  { %v13517_v12 = vmul.f32 1.442695, %v13513_v0 }
0x43a0   :  { %21187 = vpow2.f32 %v13519_v55  ;;  %v13509_v28 = vpop.xlane.xlu0 %13508 }
0x43a1   :  { %21189 = vpow2.f32 %v13517_v12  ;;  %v13515_v31 = vsub.f32 %v13499_v20, %v13509_v28  ;;  %v24351_v20 = vld [vmem:[%s24969_s11 + $0x68] sm:$0xff]  ;;  %v24371_v12 = vld [vmem:[%s24969_s11 + $0x70] sm:$0xff] }
0x43a3   :  { %v13521_v63 = vmul.f32 1.442695, %v13515_v31 }
0x43a4   :  { %v13124_v26 = vpop.xlane.xlu1 %13123  ;;  %v13512_v33 = vpop.xlane.xlu0 %13511 }
0x43a5   :  { %21191 = vpow2.f32 %v13521_v63  ;;  %v13134_v2 = vsub.f32 %v13118_v13, %v13124_v26  ;;  %v13516_v30 = vsub.f32 %v13500_v49, %v13512_v33 }
0x43a7   :  { %v13138_v23 = vmul.f32 1.442695, %v13134_v2  ;;  %v13523_v40 = vmul.f32 1.442695, %v13516_v30 }
0x43a8   :  { %v13130_v62 = vpop.xlane.xlu1 %13129  ;;  %v13127_v3 = vpop.xlane.xlu0 %13126 }
0x43a9   :  { %21193 = vpow2.f32 %v13138_v23  ;;  %v13136_v60 = vsub.f32 %v13120_v37, %v13130_v62  ;;  %v13135_v36 = vsub.f32 %v13119_v5, %v13127_v3 }
0x43aa   :  { %v21188_v25 = vpop.eup %21187  ;;  %21195 = vpow2.f32 %v13523_v40  ;;  %v24384_v40 = vld [vmem:[%s24969_s11 + $0x78] sm:$0xff] }
0x43ab   :  { %v21190_v56 = vpop.eup %21189  ;;  %v13142_v47 = vmul.f32 1.442695, %v13136_v60  ;;  %v13140_v27 = vmul.f32 1.442695, %v13135_v36  ;;  %v24354_v13 = vmul.f32 %v24351_v20, %v21188_v25 }
0x43ac   :  { %v13133_v49 = vpop.xlane.xlu0 %13132  ;;  %v24362_v5 = vmul.f32 %v24359_v41, %v21190_v56  ;;  %v13939_v32 = vpop.xlane.xlu1 %13938 }
0x43ad   :  { %21197 = vpow2.f32 %v13142_v47  ;;  %v13137_v37 = vsub.f32 %v13121_v46, %v13133_v49  ;;  %v13532_v48 = vsel %vm1509_vm5, %v24354_v13, 0.0 }
0x43ae   :  { %21199 = vpow2.f32 %v13140_v27  ;;  %13533 = vadd.xlane.f32.xlu0 %v13532_v48  ;;  %v13529_v22 = vsel %vm1509_vm5, %v24362_v5, 0.0 }
0x43af   :  { %v21192_v17 = vpop.eup %21191  ;;  %v13144_v0 = vmul.f32 1.442695, %v13137_v37  ;;  %13530 = vadd.xlane.f32.xlu1 %v13529_v22 }
0x43b0   :  { %v13942_v55 = vpop.xlane.xlu0 %13941  ;;  %v24374_v46 = vmul.f32 %v24371_v12, %v21192_v17  ;;  %v13945_v33 = vpop.xlane.xlu1 %13944 }
0x43b1   :  { %21201 = vpow2.f32 %v13144_v0  ;;  %v20374_v28 = vpack.c.bf16 %v13942_v55, %v13939_v32 }
0x43b2   :  { %v13535_v31 = vsel %vm1509_vm5, %v24374_v46, 0.0 }
0x43b3   :  { %v21194_v63 = vpop.eup %21193  ;;  %13536 = vadd.xlane.f32.xlu1 %v13535_v31  ;;  %20375 = vmatprep.subr.bf16.mxu0 %v20374_v28 }
0x43b4   :  { %v21196_v26 = vpop.eup %21195  ;;  %20377 = vmatpush3.bf16.msra.mxu0 %v20374_v28  ;;  %v13948_v2 = vpop.xlane.xlu0 %13947  ;;  %v24379_v30 = vmul.f32 %v24359_v41, %v21194_v63 }
0x43b5   :  { %v20378_v23 = vpack.c.bf16 %v13948_v2, %v13945_v33  ;;  %v24387_v62 = vmul.f32 %v24384_v40, %v21196_v26 }
0x43b6   :  { %v13150_v3 = vsel %vm1509_vm5, %v24379_v30, 0.0 }
0x43b7   :  { %v21198_v60 = vpop.eup %21197  ;;  %13151 = vadd.xlane.f32.xlu1 %v13150_v3  ;;  %v13538_v36 = vsel %vm1509_vm5, %v24387_v62, 0.0  ;;  %20379 = vmatprep.subr.bf16.mxu0 %v20378_v23 }
0x43b8   :  { %v21200_v25 = vpop.eup %21199  ;;  %13539 = vadd.xlane.f32.xlu0 %v13538_v36  ;;  %20381 = vmatpush3.bf16.msra.mxu0 %v20378_v23  ;;  %v13148_v56 = vmul.f32 %v24371_v12, %v21198_v60 }
0x43b9   :  { %20391 = vmatprep.subr.bf16.mxu0 %v24136_v51  ;;  %v13147_v47 = vmul.f32 %v24351_v20, %v21200_v25 }
0x43ba   :  { %v13156_v27 = vsel %vm1509_vm5, %v13148_v56, 0.0 }
0x43bb   :  { %v21202_v49 = vpop.eup %21201  ;;  %13157 = vadd.xlane.f32.xlu1 %v13156_v27  ;;  %v13153_v37 = vsel %vm1509_vm5, %v13147_v47, 0.0  ;;  %19371 = vmatmul.mubr.msk.f32.vlgmr.msra.gmra.mrb[158].mxu0 %vm1509_vm5, %v24252_v19 }
0x43bc   :  { %13154 = vadd.xlane.f32.xlu0 %v13153_v37  ;;  %20393 = vmatpush3.bf16.msra.mxu0 %v24136_v51  ;;  %v13149_v48 = vmul.f32 %v24384_v40, %v21202_v49  ;;  %v13832_v51 = vpop.f32.mrb[156].mxu0 }
0x43bd   :  { %20395 = vmatprep.subr.bf16.mxu0 %v24144_v10  ;;  %19373 = vmatprep.mubr.msk.f32.mxu0 %vm1509_vm5, %v24260_v35  ;;  %v19350_v19 = vpop.f32.mrb[157].mxu0 }
0x43be   :  { %v13159_v32 = vsel %vm1509_vm5, %v13149_v48, 0.0 }
0x43bf   :  { %19374 = vmatmul.mubr.msk.f32.gmra.mrb[160].mxu0 %vm1509_vm5, %v24268_v4 }
0x43c0   :  { %13160 = vadd.xlane.f32.xlu0 %v13159_v32  ;;  %20397 = vmatpush3.bf16.msra.mxu0 %v24144_v10 }
0x43c1   :  { %19398 = vmatprep.mubr.msk.f32.mxu0 %vm1509_vm5, %v23610_v44 }
0x43c3   :  { %19399 = vmatmul.mubr.msk.f32.vlgmr.msra.gmra.mrb[162].mxu0 %vm1509_vm5, %v23619_v18 }
0x43c4   :  { %19401 = vmatprep.mubr.msk.f32.mxu0 %vm1509_vm5, %v23627_v1 }
0x43c7   :  { %19402 = vmatmul.mubr.msk.f32.gmra.mrb[164].mxu0 %vm1509_vm5, %v23637_v53 }
0x443b   :  { %v13534_v35 = vpop.xlane.xlu0 %13533 }
0x443c   :  { %21203 = vrcp.f32 %v13534_v35  ;;  %v13531_v4 = vpop.xlane.xlu1 %13530 }
0x443d   :  { %21205 = vrcp.f32 %v13531_v4 }
0x4440   :  { %v13537_v22 = vpop.xlane.xlu1 %13536 }
0x4441   :  { %21207 = vrcp.f32 %v13537_v22 }
0x4444   :  { %v13152_v10 = vpop.xlane.xlu1 %13151 }
0x4445   :  { %21209 = vrcp.f32 %v13152_v10  ;;  %v13540_v17 = vpop.xlane.xlu0 %13539 }
0x4446   :  { %v21204_v0 = vpop.eup %21203  ;;  %21211 = vrcp.f32 %v13540_v17 }
0x4447   :  { %v21206_v55 = vpop.eup %21205  ;;  %v13546_v63 = vmul.f32 %v21204_v0, %v24354_v13 }
0x4448   :  { %v13158_v28 = vpop.xlane.xlu1 %13157  ;;  %v13545_v31 = vmul.f32 %v21206_v55, %v24362_v5 }
0x4449   :  { %21213 = vrcp.f32 %v13158_v28  ;;  %v13155_v26 = vpop.xlane.xlu0 %13154 }
0x444a   :  { %21215 = vrcp.f32 %v13155_v26  ;;  %19320 = vmatprep.mubr.msk.f32.mxu1 %vm1509_vm5, %v13545_v31 }
0x444b   :  { %v21208_v33 = vpop.eup %21207  ;;  %19321 = vmatmul.mubr.msk.f32.vlgmr.msra.gmra.mrb[164].mxu1 %vm1509_vm5, %v13546_v63 }
0x444c   :  { %20355 = vmatpush3.bf16.msra.mxu1 %v24161_v42  ;;  %v13547_v2 = vmul.f32 %v21208_v33, %v24374_v46 }
0x444d   :  { %20357 = vmatprep.subr.bf16.mxu1 %v24181_v38  ;;  %v13161_v23 = vpop.xlane.xlu0 %13160 }
0x444e   :  { %21217 = vrcp.f32 %v13161_v23  ;;  %19323 = vmatprep.mubr.msk.f32.mxu1 %vm1509_vm5, %v13547_v2 }
0x444f   :  { %v21210_v5 = vpop.eup %21209 }
0x4450   :  { %v21212_v13 = vpop.eup %21211  ;;  %20359 = vmatpush3.bf16.msra.mxu1 %v24181_v38  ;;  %v13166_v3 = vmul.f32 %v21210_v5, %v24379_v30 }
0x4451   :  { %v13548_v60 = vmul.f32 %v21212_v13, %v24387_v62  ;;  %20368 = vmatprep.subr.bf16.mxu1 %v25010_v29 }
0x4453   :  { %v21214_v36 = vpop.eup %21213  ;;  %19324 = vmatmul.mubr.msk.f32.gmra.mrb[166].mxu1 %vm1509_vm5, %v13548_v60 }
0x4454   :  { %v21216_v42 = vpop.eup %21215  ;;  %19334 = vmatprep.mubr.msk.f32.mxu1 %vm1509_vm5, %v13166_v3  ;;  %v13168_v46 = vmul.f32 %v21214_v36, %v13148_v56 }
0x4455   :  { %v13167_v25 = vmul.f32 %v21216_v42, %v13147_v47 }
0x4457   :  { %19335 = vmatmul.mubr.msk.f32.vlgmr.msra.gmra.mrb[164].mxu1 %vm1509_vm5, %v13167_v25 }
0x4458   :  { %v21218_v27 = vpop.eup %21217  ;;  %20370 = vmatpush3.bf16.msra.mxu1 %v23403_v54  ;;  %19337 = vmatprep.mubr.msk.f32.mxu1 %vm1509_vm5, %v13168_v46 }
0x4459   :  { %20371 = vmatprep.subr.bf16.mxu1 %v25010_v29  ;;  %v13169_v38 = vmul.f32 %v21218_v27, %v13149_v48 }
0x445b   :  { %19338 = vmatmul.mubr.msk.f32.gmra.mrb[166].mxu1 %vm1509_vm5, %v13169_v38 }
0x445c   :  { %20373 = vmatpush3.bf16.msra.mxu1 %v23413_v61  ;;  %19359 = vmatprep.mubr.msk.f32.mxu1 %vm21383_vm9, %v25008_v7 }
0x445d   :  { %20383 = vmatprep.subr.bf16.mxu1 %v24283_v9 }
0x445f   :  { %19360 = vmatmul.mubr.msk.f32.vlgmr.msra.gmra.mrb[168].mxu1 %vm1509_vm5, %v13832_v51 }
0x4460   :  { %20385 = vmatpush3.bf16.msra.mxu1 %v24283_v9 }
0x4461   :  { %20387 = vmatprep.subr.bf16.mxu1 %v24293_v52 }
0x4464   :  { %20389 = vmatpush3.bf16.msra.mxu1 %v24293_v52 }
0x448e   :  { %v19372_v30 = vpop.f32.mrb[158].mxu0 }
0x448f   :  { %14041 = vperm.xlu0 %20677, %v19372_v30   ;;  %v14015_v62 = vpop.f32.mrb[159].mxu0 }
0x4490   :  { %14036 = vperm.xlu1 %20678, %v14015_v62  }
0x4492   :  { %v19375_v56 = vpop.f32.mrb[160].mxu0 }
0x4493   :  { %v14025_v47 = vpop.f32.mrb[161].mxu0 }
0x4494   :  { %14046 = vperm.xlu1 %20678, %v14025_v47  }
0x4496   :  { %v24444_v49 = vpop.f32.mrb[162].mxu0 }
0x4497   :  { %v24446_v37 = vpop.f32.mrb[163].mxu0 }
0x4498   :  { %14051 = vperm.xlu1 %20678, %v19375_v56  }
0x449a   :  { %v24448_v48 = vpop.f32.mrb[164].mxu0 }
0x449b   :  { %v24450_v32 = vpop.f32.mrb[165].mxu0 }
0x450e   :  { %v14042_v4 = vpop.permute.xlu0 %14041 }
0x450f   :  { %v14037_v9 = vpop.permute.xlu1 %14036 }
0x4513   :  { %v14047_v51 = vpop.permute.xlu1 %14046 }
0x4517   :  { %v14052_v22 = vpop.permute.xlu1 %14051 }
0x4532   :  { %v13905_v19 = vpop.f32.mrb[168].mxu1 }
0x4533   :  { %v14057_v52 = vrot.slane %v13905_v19, %v21712_v59  ;;  %v19361_v35 = vpop.f32.mrb[169].mxu1 }
0x4535   :  { %v14059_v10 = vadd.f32 %v14057_v52, %v14042_v4  ;;  %v14058_v17 = vadd.f32 %v14057_v52, %v14037_v9  ;;  %v14060_v0 = vadd.f32 %v14057_v52, %v14047_v51  ;;  %v14061_v55 = vadd.f32 %v14057_v52, %v14052_v22 }
0x4537   :  { %vm14063_vm15 = vcmp.gt.f32.partialorder %v14059_v10, 0.0  ;;  %v14067_v28 = vmul.f32 0.2, %v14059_v10  ;;  %vm14062_vm7 = vcmp.gt.f32.partialorder %v14058_v17, 0.0  ;;  %v14066_v31 = vmul.f32 0.2, %v14058_v17 }
0x4538   :  { %vm14064_vm6 = vcmp.gt.f32.partialorder %v14060_v0, 0.0  ;;  %v14068_v63 = vmul.f32 0.2, %v14060_v0  ;;  %v14069_v2 = vmul.f32 0.2, %v14061_v55  ;;  %vm14065_vm13 = vcmp.gt.f32.partialorder %v14061_v55, 0.0 }
0x4539   :  { %v14071_v26 = vsel %vm14063_vm15, %v14059_v10, %v14067_v28  ;;  %v14070_v33 = vsel %vm14062_vm7, %v14058_v17, %v14066_v31 }
0x453a   :  { %v14075_v23 = vsel %vm8810_vm11, %v14071_v26, -1e+30  ;;  %v14074_v5 = vsel %vm8809_vm12, %v14070_v33, -1e+30  ;;  %v14072_v13 = vsel %vm14064_vm6, %v14060_v0, %v14068_v63  ;;  %v14073_v42 = vsel %vm14065_vm13, %v14061_v55, %v14069_v2 }
0x453b   :  { %v14081_v3 = vsel %vm1509_vm5, %v14075_v23, -inf  ;;  %v14078_v60 = vsel %vm1509_vm5, %v14074_v5, -inf  ;;  %v14076_v36 = vsel %vm8811_vm3, %v14072_v13, -1e+30  ;;  %v14077_v25 = vsel %vm8812_vm8, %v14073_v42, -1e+30 }
0x453c   :  { %14082 = vmax.xlane.f32.xlu1 %v14081_v3  ;;  %14079 = vmax.xlane.f32.xlu0 %v14078_v60  ;;  %v14084_v46 = vsel %vm1509_vm5, %v14076_v36, -inf  ;;  %v14087_v27 = vsel %vm1509_vm5, %v14077_v25, -inf }
0x4540   :  { %14085 = vmax.xlane.f32.xlu0 %v14084_v46 }
0x4544   :  { %14088 = vmax.xlane.f32.xlu0 %v14087_v27 }
0x45c9   :  { %v14083_v38 = vpop.xlane.xlu1 %14082  ;;  %v14080_v30 = vpop.xlane.xlu0 %14079 }
0x45ca   :  { %v14091_v62 = vsub.f32 %v14075_v23, %v14083_v38  ;;  %v14090_v56 = vsub.f32 %v14074_v5, %v14080_v30 }
0x45cc   :  { %v14096_v47 = vmul.f32 1.442695, %v14091_v62  ;;  %v14094_v9 = vmul.f32 1.442695, %v14090_v56  ;;  %v2330_v56 = vld [vmem:[%s24967_s16 + $0x70] sm:$0xff] }
0x45cd   :  { %v14086_v51 = vpop.xlane.xlu0 %14085 }
0x45ce   :  { %21219 = vpow2.f32 %v14096_v47  ;;  %v14092_v19 = vsub.f32 %v14076_v36, %v14086_v51 }
0x45cf   :  { %21221 = vpow2.f32 %v14094_v9  ;;  %v25014_v9 = vld [vmem:[#allocation2_spill] sm:$0xff] }
0x45d0   :  { %v14098_v52 = vmul.f32 1.442695, %v14092_v19 }
0x45d1   :  { %v14089_v35 = vpop.xlane.xlu0 %14088 }
0x45d2   :  { %21223 = vpow2.f32 %v14098_v52  ;;  %v14093_v4 = vsub.f32 %v14077_v25, %v14089_v35  ;;  %v21356_v52 = vld [vmem:[%s24968_s17 + $0x38] sm:$0xff] }
0x45d4   :  { %v14100_v22 = vmul.f32 1.442695, %v14093_v4 }
0x45d6   :  { %21225 = vpow2.f32 %v14100_v22 }
0x45d8   :  { %v21220_v10 = vpop.eup %21219 }
0x45d9   :  { %v21222_v17 = vpop.eup %21221  ;;  %v14103_v0 = vmul.f32 %v24351_v20, %v21220_v10  ;;  %v2350_v20 = vld [vmem:[%s24971_s18 + $0x60] sm:$0xff] }
0x45da   :  { %v14102_v55 = vmul.f32 %v24359_v41, %v21222_v17  ;;  %v2351_v41 = vld [vmem:[%s24971_s18 + $0x68] sm:$0xff] }
0x45db   :  { %v14109_v28 = vsel %vm1509_vm5, %v14103_v0, 0.0  ;;  %v20398_v13 = vpack.c.bf16 %v2351_v41, %v2350_v20 }
0x45dc   :  { %v21224_v31 = vpop.eup %21223  ;;  %14110 = vadd.xlane.f32.xlu0 %v14109_v28  ;;  %v14106_v63 = vsel %vm1509_vm5, %v14102_v55, 0.0 }
0x45dd   :  { %14107 = vadd.xlane.f32.xlu1 %v14106_v63  ;;  %v14104_v26 = vmul.f32 %v24371_v12, %v21224_v31  ;;  %20399 = vmatprep.subr.bf16.mxu1 %v20398_v13 }
0x45df   :  { %v14112_v33 = vsel %vm1509_vm5, %v14104_v26, 0.0 }
0x45e0   :  { %v21226_v2 = vpop.eup %21225 }
0x45e1   :  { %14113 = vadd.xlane.f32.xlu1 %v14112_v33  ;;  %v14105_v23 = vmul.f32 %v24384_v40, %v21226_v2 }
0x45e3   :  { %v14115_v5 = vsel %vm1509_vm5, %v14105_v23, 0.0 }
0x45e4   :  { %14116 = vadd.xlane.f32.xlu0 %v14115_v5  ;;  %v21357_v5 = vld [vmem:[%s24968_s17 + $0x30] sm:$0xff] }
0x4669   :  { %v14111_v12 = vpop.xlane.xlu0 %14110 }
0x466a   :  { %v14108_v3 = vpop.xlane.xlu1 %14107  ;;  %21227 = vrcp.f32 %v14111_v12 }
0x466b   :  { %21229 = vrcp.f32 %v14108_v3 }
0x466e   :  { %v14114_v60 = vpop.xlane.xlu1 %14113 }
0x466f   :  { %21231 = vrcp.f32 %v14114_v60 }
0x4671   :  { %v14117_v40 = vpop.xlane.xlu0 %14116 }
0x4672   :  { %21233 = vrcp.f32 %v14117_v40 }
0x4674   :  { %v21228_v36 = vpop.eup %21227 }
0x4675   :  { %v21230_v42 = vpop.eup %21229  ;;  %v14123_v46 = vmul.f32 %v21228_v36, %v14103_v0 }
0x4676   :  { %v14122_v25 = vmul.f32 %v21230_v42, %v14102_v55 }
0x4678   :  { %19384 = vmatprep.mubr.msk.f32.mxu1 %vm1509_vm5, %v14122_v25 }
0x4679   :  { %v21232_v27 = vpop.eup %21231  ;;  %19385 = vmatmul.mubr.msk.f32.vlgmr.msra.gmra.mrb[164].mxu1 %vm1509_vm5, %v14123_v46 }
0x467a   :  { %v14124_v38 = vmul.f32 %v21232_v27, %v14104_v26  ;;  %20401 = vmatpush3.bf16.msra.mxu1 %v20398_v13 }
0x467b   :  { %20406 = vmatprep.subr.bf16.mxu1 %v25010_v29 }
0x467c   :  { %v21234_v30 = vpop.eup %21233  ;;  %19387 = vmatprep.mubr.msk.f32.mxu1 %vm1509_vm5, %v14124_v38 }
0x467d   :  { %v14125_v62 = vmul.f32 %v21234_v30, %v14105_v23 }
0x467f   :  { %19388 = vmatmul.mubr.msk.f32.gmra.mrb[166].mxu1 %vm1509_vm5, %v14125_v62 }
0x4680   :  { %19408 = vmatprep.mubr.msk.f32.mxu1 %vm76_vm0, %v24446_v37  ;;  %v2331_v37 = vld [vmem:[%s24967_s16 + $0x78] sm:$0xff] }
0x4681   :  { %v20402_v47 = vpack.c.bf16 %v2331_v37, %v2330_v56 }
0x4683   :  { %19409 = vmatmul.mubr.msk.f32.vlgmr.msra.gmra.mrb[170].mxu1 %vm76_vm0, %v24444_v49  ;;  %20403 = vmatprep.subr.bf16.mxu0 %v20402_v47 }
0x4684   :  { %19411 = vmatprep.mubr.msk.f32.mxu1 %vm76_vm0, %v24450_v32  ;;  %20405 = vmatpush3.bf16.msra.mxu0 %v20402_v47 }
0x4685   :  { %20414 = vmatprep.subr.bf16.mxu0 %v25010_v29 }
0x4687   :  { %19412 = vmatmul.mubr.msk.f32.gmra.mrb[172].mxu1 %vm76_vm0, %v24448_v48  ;;  %v24502_v48 = vsub.s32 6, %v25014_v9 }
0x4688   :  { %19432 = vmatprep.mubr.msk.f32.mxu1 %vm21383_vm9, %v25008_v7 }
0x4689   :  { %v14331_v35 = vrot.slane %v21356_v52, %v24502_v48  ;;  %v14238_v20 = vrot.slane %v21357_v5, %v24502_v48 }
0x474c   :  { %v19386_v49 = vpop.f32.mrb[164].mxu1 }
0x474d   :  { %v14208_v32 = vpop.f32.mrb[165].mxu1  ;;  %v14232_v23 = vmul.f32 0.33333334, %v19386_v49 }
0x474e   :  { %v14231_v41 = vmul.f32 0.33333334, %v14208_v32 }
0x474f   :  { %v14240_v13 = vadd.f32 %v14238_v20, %v14232_v23 }
0x4750   :  { %v14239_v60 = vadd.f32 %v14238_v20, %v14231_v41 }
0x4751   :  { %v14446_v25 = vmax.f32 %v14240_v13, 0.0 }
0x4752   :  { %v19389_v51 = vpop.f32.mrb[166].mxu1  ;;  %v14445_v62 = vmax.f32 %v14239_v60, 0.0 }
0x4753   :  { %v14218_v19 = vpop.f32.mrb[167].mxu1  ;;  %v14234_v12 = vmul.f32 0.33333334, %v19389_v51 }
0x4754   :  { %v14233_v40 = vmul.f32 0.33333334, %v14218_v19 }
0x4755   :  { %v14242_v27 = vadd.f32 %v14238_v20, %v14234_v12 }
0x4756   :  { %v19410_v4 = vpop.f32.mrb[170].mxu1  ;;  %v14241_v56 = vadd.f32 %v14238_v20, %v14233_v40 }
0x4757   :  { %v14416_v22 = vadd.f32 %v19410_v4, %v14331_v35  ;;  %v14410_v10 = vpop.f32.mrb[171].mxu1  ;;  %v14448_v4 = vmax.f32 %v14242_v27, 0.0 }
0x4758   :  { %v14411_v17 = vadd.f32 %v14410_v10, %v14331_v35  ;;  %v14447_v10 = vmax.f32 %v14241_v56, 0.0 }
0x4759   :  { %v14430_v0 = vmul.f32 0.5, %v14416_v22 }
0x475a   :  { %v14429_v55 = vmul.f32 0.5, %v14411_v17  ;;  %v19413_v28 = vpop.f32.mrb[172].mxu1 }
0x475b   :  { %21235 = vtanh.f32 %v14430_v0  ;;  %v14426_v31 = vadd.f32 %v19413_v28, %v14331_v35  ;;  %v14420_v63 = vpop.f32.mrb[173].mxu1 }
0x475c   :  { %21237 = vtanh.f32 %v14429_v55  ;;  %v14421_v26 = vadd.f32 %v14420_v63, %v14331_v35 }
0x475d   :  { %v14432_v33 = vmul.f32 0.5, %v14426_v31 }
0x475e   :  { %v14431_v2 = vmul.f32 0.5, %v14421_v26 }
0x475f   :  { %21239 = vtanh.f32 %v14432_v33 }
0x4760   :  { %21241 = vtanh.f32 %v14431_v2 }
0x4765   :  { %v21236_v3 = vpop.eup %21235 }
0x4766   :  { %v21238_v36 = vpop.eup %21237  ;;  %v14438_v42 = vadd.f32 1.0, %v21236_v3 }
0x4767   :  { %v14437_v46 = vadd.f32 1.0, %v21238_v36 }
0x4768   :  { %v14442_v38 = vmul.f32 0.5, %v14438_v42  ;;  %v24563_v42 = vld [vmem:[%s24968_s17 + $0x28] sm:$0xff] }
0x4769   :  { %v21240_v30 = vpop.eup %21239  ;;  %v14441_v37 = vmul.f32 0.5, %v14437_v46  ;;  %v15087_v46 = vrot.slane %v24563_v42, %v24502_v48  ;;  %v14567_v48 = vrot.slane %v24563_v42, 2 }
0x476a   :  { %v21242_v47 = vpop.eup %21241  ;;  %v14450_v49 = vmul.f32 %v14446_v25, %v14442_v38  ;;  %v14454_v9 = vsub.f32 1.0, %v14442_v38  ;;  %v14440_v52 = vadd.f32 1.0, %v21240_v30 }
0x476b   :  { %v14449_v32 = vmul.f32 %v14445_v62, %v14441_v37  ;;  %v14453_v35 = vsub.f32 1.0, %v14441_v37  ;;  %v14439_v51 = vadd.f32 1.0, %v21242_v47 }
0x476c   :  { %v14458_v19 = vmul.f32 %v14454_v9, %v24123_v50  ;;  %v14444_v22 = vmul.f32 0.5, %v14440_v52 }
0x476d   :  { %v14457_v17 = vmul.f32 %v14453_v35, %v24125_v57  ;;  %v14443_v0 = vmul.f32 0.5, %v14439_v51 }
0x476e   :  { %v24514_v55 = vadd.f32 %v14458_v19, %v14450_v49  ;;  %v14452_v28 = vmul.f32 %v14448_v4, %v14444_v22  ;;  %v14456_v31 = vsub.f32 1.0, %v14444_v22  ;;  %v14922_v22 = vrot.slane %v24563_v42, 3 }
0x476f   :  { %v24516_v63 = vadd.f32 %v14457_v17, %v14449_v32  ;;  %v14451_v26 = vmul.f32 %v14447_v10, %v14443_v0  ;;  %v14455_v33 = vsub.f32 1.0, %v14443_v0  ;;  %v14728_v10 = vrot.slane %v24563_v42, %v22020_v34 }
0x4770   :  { %v14466_v2 = vmax.f32 %v24514_v55, 0.0  ;;  %v14460_v23 = vmul.f32 %v14456_v31, %v24131_v8 }
0x4771   :  { %v14459_v5 = vmul.f32 %v14455_v33, %v24133_v16  ;;  %v14465_v50 = vmax.f32 %v24516_v63, 0.0 }
0x4772   :  { %v24522_v20 = vadd.f32 %v14460_v23, %v14452_v28 }
0x4773   :  { %v24524_v57 = vadd.f32 %v14459_v5, %v14451_v26  ;;  %19418 = vmatprep.mubr.msk.f32.mxu0 %vm76_vm0, %v14465_v50  ;;  %v24527_v41 = vpack.c.bf16 %v14466_v2, %v14465_v50  ;;  %v24619_v50 = vld [vmem:[%s24969_s11 + $0xa0] sm:$0xff] }
0x4774   :  { %19419 = vmatmul.mubr.msk.f32.vlgmr.msra.gmra.mrb[166].mxu0 %vm76_vm0, %v14466_v2  ;;  %v14468_v13 = vmax.f32 %v24522_v20, 0.0 }
0x4775   :  { %v14467_v12 = vmax.f32 %v24524_v57, 0.0  ;;  %20416 = vmatpush3.bf16.msra.mxu0 %v23403_v54 }
0x4776   :  { %20417 = vmatprep.subr.bf16.mxu0 %v25010_v29 }
0x4777   :  { %19421 = vmatprep.mubr.msk.f32.mxu0 %vm76_vm0, %v14467_v12  ;;  %v24535_v8 = vpack.c.bf16 %v14468_v13, %v14467_v12 }
0x4778   :  { %19422 = vmatmul.mubr.msk.f32.gmra.mrb[168].mxu0 %vm76_vm0, %v14468_v13 }
0x4779   :  { %20419 = vmatpush3.bf16.msra.mxu0 %v23413_v61  ;;  %19443 = vmatprep.mubr.msk.f32.mxu0 %vm21383_vm9, %v25008_v7 }
0x4847   :  { %v24541_v16 = vpop.f32.mrb[166].mxu0 }
0x4848   :  { %v24543_v3 = vpop.f32.mrb[167].mxu0  ;;  %v14730_v17 = vmul.f32 %v24541_v16, %v14728_v10 }
0x4849   :  { %v24547_v60 = vpack.c.bf16 %v24541_v16, %v24543_v3  ;;  %v24551_v40 = vpack.i.bf16 %v24541_v16, %v24543_v3  ;;  %v14729_v31 = vmul.f32 %v14728_v10, %v24543_v3 }
0x484a   :  { %v14736_v0 = vsel %vm76_vm0, %v14730_v17, 0.0 }
0x484b   :  { %20780 = vrot.lane.b32.xlu1 %v24551_v40, %s21369_s3  ;;  %v24555_v36 = vpop.f32.mrb[168].mxu0  ;;  %20409 = vmatpush3.bf16.xpose.msk.msra.mxu1 %vm21908_vm10, %v24547_v60  ;;  %v14733_v33 = vsel %vm76_vm0, %v14729_v31, 0.0 }
0x484c   :  { %v24567_v25 = vpop.f32.mrb[169].mxu0  ;;  %20410 = vmatprep.subr.bf16.mxu1 %v25010_v29  ;;  %v14732_v2 = vmul.f32 %v24555_v36, %v14728_v10 }
0x484d   :  { %v24572_v27 = vpack.c.bf16 %v24555_v36, %v24567_v25  ;;  %v24576_v38 = vpack.i.bf16 %v24555_v36, %v24567_v25  ;;  %v14731_v28 = vmul.f32 %v14728_v10, %v24567_v25 }
0x484e   :  { %v14742_v23 = vsel %vm76_vm0, %v14732_v2, 0.0 }
0x484f   :  { %15089 = vrot.lane.b32.xlu1 %v15087_v46, %s21385_s2  ;;  %20785 = vrot.lane.b32.xlu0 %v24576_v38, %s21369_s3  ;;  %v14739_v26 = vsel %vm76_vm0, %v14731_v28, 0.0 }
0x4853   :  { %20413 = vmatpush3.bf16.xpose.msk.msra.mxu1 %vm21908_vm10, %v24572_v27 }
0x4854   :  { %20428 = vmatprep.subr.bf16.mxu1 %v25010_v29 }
0x485a   :  { %19433 = vmatmul.mubr.msk.f32.vlgmr.msra.gmra.mrb[174].mxu1 %vm76_vm0, %v14567_v48 }
0x485b   :  { %19468 = vmatprep.mubr.msk.f32.mxu1 %vm21383_vm9, %v25008_v7 }
0x48bd   :  { %v20781_v30 = vpop.permute.xlu1 %20780 }
0x48be   :  { %v20783_v62 = vunpack.i.h.bf16 %v20781_v30  ;;  %v20782_v56 = vunpack.i.l.bf16 %v20781_v30 }
0x48c0   :  { %v20429_v37 = vpack.c.bf16 %v20783_v62, %v20782_v56 }
0x48c1   :  { %v15090_v47 = vpop.permute.xlu1 %15089  ;;  %v20786_v49 = vpop.permute.xlu0 %20785 }
0x48c2   :  { %v15092_v9 = vmul.f32 %v15090_v47, %v24543_v3  ;;  %v15093_v52 = vmul.f32 %v24541_v16, %v15090_v47  ;;  %20431 = vmatpush3.bf16.xpose.msk.msra.mxu1 %vm21908_vm10, %v20429_v37  ;;  %v20788_v32 = vunpack.i.h.bf16 %v20786_v49  ;;  %v20787_v35 = vunpack.i.l.bf16 %v20786_v49 }
0x48c3   :  { %20432 = vmatprep.subr.bf16.mxu1 %v25010_v29  ;;  %v15094_v51 = vmul.f32 %v15090_v47, %v24567_v25  ;;  %v15095_v4 = vmul.f32 %v24555_v36, %v15090_v47  ;;  %v15664_v47 = vrot.slane %v24563_v42, %v25013_v39 }
0x48c4   :  { %15100 = vrot.lane.b32.xlu1 %v15092_v9, %s21369_s3  ;;  %15102 = vrot.lane.b32.xlu0 %v15093_v52, %s21369_s3  ;;  %v20433_v19 = vpack.c.bf16 %v20788_v32, %v20787_v35 }
0x48c8   :  { %15106 = vrot.lane.b32.xlu0 %v15095_v4, %s21369_s3  ;;  %15104 = vrot.lane.b32.xlu1 %v15094_v51, %s21369_s3  ;;  %v24654_v4 = vld [vmem:[%s24969_s11 + $0xb8] sm:$0xff] }
0x48ca   :  { %20435 = vmatpush3.bf16.xpose.msk.msra.mxu1 %vm21908_vm10, %v20433_v19 }
0x48cb   :  { %20451 = vmatprep.subr.bf16.mxu1 %v20429_v37 }
0x48d1   :  { %19469 = vmatmul.mubr.msk.f32.vlgmr.msra.gmra.mrb[176].mxu1 %vm76_vm0, %v14922_v22 }
0x48d2   :  { %20453 = vmatpush3.bf16.msra.mxu1 %v20429_v37 }
0x48d3   :  { %20455 = vmatprep.subr.bf16.mxu1 %v20433_v19 }
0x48d6   :  { %20457 = vmatpush3.bf16.msra.mxu1 %v20433_v19 }
0x48d7   :  { %20459 = vmatprep.subr.bf16.mxu1 %v24547_v60 }
0x48e7   :  { %14737 = vadd.xlane.f32.xlu0 %v14736_v0 }
0x48eb   :  { %14740 = vadd.xlane.f32.xlu0 %v14739_v26 }
0x48ec   :  { %14734 = vadd.xlane.f32.xlu1 %v14733_v33 }
0x48f0   :  { %14743 = vadd.xlane.f32.xlu1 %v14742_v23 }
0x492d   :  { %v14648_v34 = vpop.f32.mrb[174].mxu1 }
0x492e   :  { %19444 = vmatmul.mubr.msk.f32.vlgmr.msra.gmra.mrb[170].mxu0 %vm1509_vm5, %v14648_v34  ;;  %v19434_v5 = vpop.f32.mrb[175].mxu1 }
0x492f   :  { %19454 = vmatprep.mubr.msk.f32.mxu0 %vm1509_vm5, %v24619_v50 }
0x4936   :  { %v15101_v13 = vpop.permute.xlu1 %15100  ;;  %v15103_v12 = vpop.permute.xlu0 %15102 }
0x4937   :  { %v15112_v46 = vsel %vm76_vm0, %v15101_v13, 0.0  ;;  %v15115_v48 = vsel %vm76_vm0, %v15103_v12, 0.0 }
0x4938   :  { %15116 = vadd.xlane.f32.xlu1 %v15115_v48  ;;  %15113 = vadd.xlane.f32.xlu0 %v15112_v46 }
0x493a   :  { %v15107_v30 = vpop.permute.xlu0 %15106  ;;  %v15105_v62 = vpop.permute.xlu1 %15104 }
0x493b   :  { %v15121_v56 = vsel %vm76_vm0, %v15107_v30, 0.0  ;;  %v15118_v37 = vsel %vm76_vm0, %v15105_v62, 0.0 }
0x493c   :  { %15122 = vadd.xlane.f32.xlu1 %v15121_v56  ;;  %15119 = vadd.xlane.f32.xlu0 %v15118_v37 }
0x494d   :  { %20795 = vrot.lane.b32.xlu1 %v24576_v38, %s21370_s4  ;;  %v24638_v38 = vld [vmem:[%s24969_s11 + $0xa8] sm:$0xff] }
0x4951   :  { %15666 = vrot.lane.b32.xlu1 %v15664_v47, %s21386_s21 }
0x4952   :  { %20790 = vrot.lane.b32.xlu0 %v24551_v40, %s21370_s4  ;;  %v24646_v40 = vld [vmem:[%s24969_s11 + $0xb0] sm:$0xff] }
0x4974   :  { %v14738_v49 = vpop.xlane.xlu0 %14737 }
0x4978   :  { %v14741_v32 = vpop.xlane.xlu0 %14740 }
0x4979   :  { %v14735_v9 = vpop.xlane.xlu1 %14734 }
0x497a   :  { %v20420_v52 = vpack.c.bf16 %v14738_v49, %v14735_v9 }
0x497c   :  { %20421 = vmatprep.subr.bf16.mxu0 %v20420_v52 }
0x497d   :  { %v14744_v35 = vpop.xlane.xlu1 %14743  ;;  %20423 = vmatpush3.bf16.msra.mxu0 %v20420_v52 }
0x497e   :  { %v20424_v51 = vpack.c.bf16 %v14744_v35, %v14741_v32 }
0x4980   :  { %20425 = vmatprep.subr.bf16.mxu0 %v20424_v51 }
0x4981   :  { %20427 = vmatpush3.bf16.msra.mxu0 %v20424_v51 }
0x4982   :  { %20436 = vmatprep.subr.bf16.mxu0 %v25010_v29 }
0x4984   :  { %19455 = vmatmul.mubr.msk.f32.vlgmr.msra.gmra.mrb[172].mxu0 %vm1509_vm5, %v24638_v38 }
0x4985   :  { %20438 = vmatpush3.bf16.msra.mxu0 %v23403_v54  ;;  %19457 = vmatprep.mubr.msk.f32.mxu0 %vm1509_vm5, %v24646_v40 }
0x4986   :  { %20439 = vmatprep.subr.bf16.mxu0 %v25010_v29 }
0x4988   :  { %19458 = vmatmul.mubr.msk.f32.gmra.mrb[174].mxu0 %vm1509_vm5, %v24654_v4 }
0x4989   :  { %20441 = vmatpush3.bf16.msra.mxu0 %v23413_v61  ;;  %19479 = vmatprep.mubr.msk.f32.mxu0 %vm21383_vm9, %v25008_v7 }
0x49a4   :  { %v15007_v19 = vpop.f32.mrb[176].mxu1 }
0x49a5   :  { %19480 = vmatmul.mubr.msk.f32.vlgmr.msra.gmra.mrb[176].mxu0 %vm1509_vm5, %v15007_v19  ;;  %v19470_v22 = vpop.f32.mrb[177].mxu1 }
0x49a6   :  { %19490 = vmatprep.mubr.msk.f32.mxu0 %vm1509_vm5, %v24619_v50 }
0x49c5   :  { %v15117_v10 = vpop.xlane.xlu1 %15116  ;;  %v15114_v17 = vpop.xlane.xlu0 %15113 }
0x49c6   :  { %v20442_v0 = vpack.c.bf16 %v15117_v10, %v15114_v17 }
0x49c8   :  { %20443 = vmatprep.subr.bf16.mxu0 %v20442_v0 }
0x49c9   :  { %v15123_v28 = vpop.xlane.xlu1 %15122  ;;  %v15120_v31 = vpop.xlane.xlu0 %15119  ;;  %20445 = vmatpush3.bf16.msra.mxu0 %v20442_v0  ;;  %v15499_v0 = vrot.slane %v24563_v42, 4 }
0x49ca   :  { %v20446_v26 = vpack.c.bf16 %v15123_v28, %v15120_v31 }
0x49cc   :  { %20447 = vmatprep.subr.bf16.mxu0 %v20446_v26 }
0x49cd   :  { %v20791_v33 = vpop.permute.xlu0 %20790  ;;  %20449 = vmatpush3.bf16.msra.mxu0 %v20446_v26  ;;  %v20796_v5 = vpop.permute.xlu1 %20795 }
0x49ce   :  { %20466 = vmatprep.subr.bf16.mxu0 %v25010_v29  ;;  %v20793_v2 = vunpack.i.h.bf16 %v20791_v33  ;;  %v20792_v23 = vunpack.i.l.bf16 %v20791_v33  ;;  %v20798_v13 = vunpack.i.h.bf16 %v20796_v5  ;;  %v20797_v12 = vunpack.i.l.bf16 %v20796_v5 }
0x49d0   :  { %19491 = vmatmul.mubr.msk.f32.vlgmr.msra.gmra.mrb[178].mxu0 %vm1509_vm5, %v24638_v38  ;;  %v24669_v34 = vpack.c.bf16 %v20793_v2, %v20792_v23  ;;  %v24679_v46 = vpack.c.bf16 %v20798_v13, %v20797_v12 }
0x49d1   :  { %19493 = vmatprep.mubr.msk.f32.mxu0 %vm1509_vm5, %v24646_v40  ;;  %v15667_v15 = vpop.permute.xlu1 %15666 }
0x49d2   :  { %v15670_v19 = vmul.f32 %v24541_v16, %v15667_v15  ;;  %v15669_v22 = vmul.f32 %v15667_v15, %v24543_v3  ;;  %v15672_v10 = vmul.f32 %v24555_v36, %v15667_v15  ;;  %v15671_v17 = vmul.f32 %v15667_v15, %v24567_v25 }
0x49d4   :  { %19494 = vmatmul.mubr.msk.f32.gmra.mrb[180].mxu0 %vm1509_vm5, %v24654_v4 }
0x49d5   :  { %19532 = vmatprep.mubr.msk.f32.mxu0 %vm21383_vm9, %v25008_v7 }
0x49d6   :  { %20469 = vmatpush3.bf16.xpose.msk.msra.mxu0 %vm21908_vm10, %v24669_v34 }
0x49d7   :  { %20470 = vmatprep.subr.bf16.mxu0 %v25010_v29 }
0x49de   :  { %20473 = vmatpush3.bf16.xpose.msk.msra.mxu0 %vm21908_vm10, %v24679_v46 }
0x49e5   :  { %19533 = vmatmul.mubr.msk.f32.vlgmr.msra.gmra.mrb[182].mxu0 %vm76_vm0, %v15499_v0 }
0x49e6   :  { %19554 = vmatprep.mubr.msk.f32.mxu0 %vm1509_vm5, %v24619_v50 }
0x4a01   :  { %v14721_v48 = vpop.f32.mrb[170].mxu0 }
0x4a02   :  { %v19445_v30 = vpop.f32.mrb[171].mxu0  ;;  %v14853_v42 = vrot.slane %v14721_v48, %v21712_v59 }
0x4a57   :  { %v19456_v62 = vpop.f32.mrb[172].mxu0 }
0x4a58   :  { %v14811_v56 = vpop.f32.mrb[173].mxu0 }
0x4a5b   :  { %v19459_v37 = vpop.f32.mrb[174].mxu0 }
0x4a5c   :  { %v14821_v47 = vpop.f32.mrb[175].mxu0 }
0x4a78   :  { %v15080_v49 = vpop.f32.mrb[176].mxu0 }
0x4a79   :  { %v19481_v9 = vpop.f32.mrb[177].mxu0  ;;  %v15232_v16 = vrot.slane %v15080_v49, %v21712_v59 }
0x4aa3   :  { %v19492_v52 = vpop.f32.mrb[178].mxu0 }
0x4aa4   :  { %15216 = vperm.xlu1 %20678, %v19492_v52   ;;  %v15190_v32 = vpop.f32.mrb[179].mxu0 }
0x4aa5   :  { %15211 = vperm.xlu0 %20677, %v15190_v32  }
0x4aa7   :  { %v19495_v35 = vpop.f32.mrb[180].mxu0 }
0x4aa8   :  { %15226 = vperm.xlu1 %20678, %v19495_v35   ;;  %v15200_v51 = vpop.f32.mrb[181].mxu0 }
0x4aa9   :  { %15221 = vperm.xlu0 %20677, %v15200_v51  }
0x4aac   :  { %14837 = vperm.xlu1 %20678, %v19456_v62  }
0x4aad   :  { %14832 = vperm.xlu0 %20677, %v14811_v56  }
0x4ab0   :  { %14847 = vperm.xlu1 %20678, %v19459_v37  }
0x4ab1   :  { %14842 = vperm.xlu0 %20677, %v14821_v47  }
0x4ab4   :  { %15679 = vrot.lane.b32.xlu1 %v15670_v19, %s21370_s4 }
0x4ab5   :  { %15677 = vrot.lane.b32.xlu0 %v15669_v22, %s21370_s4 }
0x4ab8   :  { %15683 = vrot.lane.b32.xlu1 %v15672_v10, %s21370_s4 }
0x4ab9   :  { %15681 = vrot.lane.b32.xlu0 %v15671_v17, %s21370_s4 }
0x4b23   :  { %v15217_v3 = vpop.permute.xlu1 %15216 }
0x4b24   :  { %v15234_v28 = vadd.f32 %v15232_v16, %v15217_v3  ;;  %v15212_v31 = vpop.permute.xlu0 %15211 }
0x4b25   :  { %v15233_v26 = vadd.f32 %v15232_v16, %v15212_v31 }
0x4b26   :  { %vm15238_vm10 = vcmp.gt.f32.partialorder %v15234_v28, 0.0  ;;  %v15242_v36 = vmul.f32 0.2, %v15234_v28 }
0x4b27   :  { %vm15237_vm4 = vcmp.gt.f32.partialorder %v15233_v26, 0.0  ;;  %v15241_v25 = vmul.f32 0.2, %v15233_v26  ;;  %v15227_v33 = vpop.permute.xlu1 %15226 }
0x4b28   :  { %v15236_v2 = vadd.f32 %v15232_v16, %v15227_v33  ;;  %v15222_v23 = vpop.permute.xlu0 %15221  ;;  %v15246_v5 = vsel %vm15238_vm10, %v15234_v28, %v15242_v36 }
0x4b29   :  { %v15235_v13 = vadd.f32 %v15232_v16, %v15222_v23  ;;  %v24700_v50 = vsel %vm8810_vm11, %v15246_v5, -1e+30  ;;  %v15245_v12 = vsel %vm15237_vm4, %v15233_v26, %v15241_v25 }
0x4b2a   :  { %vm15240_vm2 = vcmp.gt.f32.partialorder %v15236_v2, 0.0  ;;  %v15244_v30 = vmul.f32 0.2, %v15236_v2  ;;  %v15256_v62 = vsel %vm1509_vm5, %v24700_v50, -inf  ;;  %v24706_v56 = vsel %vm8809_vm12, %v15245_v12, -1e+30 }
0x4b2b   :  { %vm15239_vm14 = vcmp.gt.f32.partialorder %v15235_v13, 0.0  ;;  %v15243_v37 = vmul.f32 0.2, %v15235_v13  ;;  %15257 = vmax.xlane.f32.xlu1 %v15256_v62  ;;  %v14838_v47 = vpop.permute.xlu1 %14837  ;;  %v15253_v48 = vsel %vm1509_vm5, %v24706_v56, -inf }
0x4b2c   :  { %v14855_v49 = vadd.f32 %v14853_v42, %v14838_v47  ;;  %15254 = vmax.xlane.f32.xlu0 %v15253_v48  ;;  %v14833_v9 = vpop.permute.xlu0 %14832  ;;  %v15248_v35 = vsel %vm15240_vm2, %v15236_v2, %v15244_v30 }
0x4b2d   :  { %v14854_v52 = vadd.f32 %v14853_v42, %v14833_v9  ;;  %v15247_v32 = vsel %vm15239_vm14, %v15235_v13, %v15243_v37  ;;  %v15252_v16 = vsel %vm8812_vm8, %v15248_v35, -1e+30 }
0x4b2e   :  { %vm14859_vm15 = vcmp.gt.f32.partialorder %v14855_v49, 0.0  ;;  %v14863_v51 = vmul.f32 0.2, %v14855_v49  ;;  %v15251_v15 = vsel %vm8811_vm3, %v15247_v32, -1e+30  ;;  %v15262_v33 = vsel %vm1509_vm5, %v15252_v16, -inf }
0x4b2f   :  { %vm14858_vm7 = vcmp.gt.f32.partialorder %v14854_v52, 0.0  ;;  %v14862_v19 = vmul.f32 0.2, %v14854_v52  ;;  %v14848_v22 = vpop.permute.xlu1 %14847  ;;  %v15259_v10 = vsel %vm1509_vm5, %v15251_v15, -inf }
0x4b30   :  { %v14857_v17 = vadd.f32 %v14853_v42, %v14848_v22  ;;  %15260 = vmax.xlane.f32.xlu0 %v15259_v10  ;;  %v14843_v0 = vpop.permute.xlu0 %14842  ;;  %v14867_v31 = vsel %vm14859_vm15, %v14855_v49, %v14863_v51 }
0x4b31   :  { %v14856_v3 = vadd.f32 %v14853_v42, %v14843_v0  ;;  %v14866_v28 = vsel %vm14858_vm7, %v14854_v52, %v14862_v19  ;;  %v14871_v23 = vsel %vm8810_vm11, %v14867_v31, -1e+30 }
0x4b32   :  { %vm14861_vm6 = vcmp.gt.f32.partialorder %v14857_v17, 0.0  ;;  %v14865_v26 = vmul.f32 0.2, %v14857_v17  ;;  %v14870_v36 = vsel %vm8809_vm12, %v14866_v28, -1e+30  ;;  %v14877_v30 = vsel %vm1509_vm5, %v14871_v23, -inf }
0x4b33   :  { %vm14860_vm13 = vcmp.gt.f32.partialorder %v14856_v3, 0.0  ;;  %v14864_v25 = vmul.f32 0.2, %v14856_v3  ;;  %v14874_v2 = vsel %vm1509_vm5, %v14870_v36, -inf  ;;  %v15680_v47 = vpop.permute.xlu1 %15679 }
0x4b34   :  { %15263 = vmax.xlane.f32.xlu0 %v15262_v33  ;;  %14875 = vmax.xlane.f32.xlu1 %v14874_v2  ;;  %v14869_v42 = vsel %vm14861_vm6, %v14857_v17, %v14865_v26  ;;  %v15678_v13 = vpop.permute.xlu0 %15677  ;;  %v15692_v52 = vsel %vm76_vm0, %v15680_v47, 0.0 }
0x4b35   :  { %v14868_v5 = vsel %vm14860_vm13, %v14856_v3, %v14864_v25  ;;  %v14873_v37 = vsel %vm8812_vm8, %v14869_v42, -1e+30  ;;  %v15689_v48 = vsel %vm76_vm0, %v15678_v13, 0.0 }
0x4b36   :  { %v14872_v12 = vsel %vm8811_vm3, %v14868_v5, -1e+30  ;;  %v14883_v49 = vsel %vm1509_vm5, %v14873_v37, -inf }
0x4b37   :  { %v14880_v62 = vsel %vm1509_vm5, %v14872_v12, -inf  ;;  %v15684_v35 = vpop.permute.xlu1 %15683 }
0x4b38   :  { %14878 = vmax.xlane.f32.xlu0 %v14877_v30  ;;  %14881 = vmax.xlane.f32.xlu1 %v14880_v62  ;;  %v15682_v9 = vpop.permute.xlu0 %15681  ;;  %v15698_v51 = vsel %vm76_vm0, %v15684_v35, 0.0 }
0x4b39   :  { %v15695_v32 = vsel %vm76_vm0, %v15682_v9, 0.0 }
0x4b3c   :  { %14884 = vmax.xlane.f32.xlu0 %v14883_v49  ;;  %15690 = vadd.xlane.f32.xlu1 %v15689_v48 }
0x4b40   :  { %15693 = vadd.xlane.f32.xlu0 %v15692_v52  ;;  %15696 = vadd.xlane.f32.xlu1 %v15695_v32  ;;  %v24745_v52 = vld [vmem:[%s24969_s11 + $0x60] sm:$0xff] }
0x4b44   :  { %15699 = vadd.xlane.f32.xlu0 %v15698_v51 }
0x4bb8   :  { %v15258_v19 = vpop.xlane.xlu1 %15257 }
0x4bb9   :  { %v15266_v22 = vsub.f32 %v24700_v50, %v15258_v19  ;;  %v15255_v10 = vpop.xlane.xlu0 %15254 }
0x4bba   :  { %v15265_v17 = vsub.f32 %v24706_v56, %v15255_v10 }
0x4bbb   :  { %v15271_v0 = vmul.f32 1.442695, %v15266_v22 }
0x4bbc   :  { %v15269_v3 = vmul.f32 1.442695, %v15265_v17  ;;  %v24757_v17 = vld [vmem:[%s24969_s11 + $0x70] sm:$0xff] }
0x4bbd   :  { %21243 = vpow2.f32 %v15271_v0  ;;  %v15261_v28 = vpop.xlane.xlu0 %15260 }
0x4bbe   :  { %21245 = vpow2.f32 %v15269_v3  ;;  %v15267_v31 = vsub.f32 %v15251_v15, %v15261_v28  ;;  %v24737_v15 = vld [vmem:[%s24969_s11 + $0x68] sm:$0xff] }
0x4bc0   :  { %v15273_v26 = vmul.f32 1.442695, %v15267_v31 }
0x4bc1   :  { %v14876_v25 = vpop.xlane.xlu1 %14875  ;;  %v15264_v33 = vpop.xlane.xlu0 %15263 }
0x4bc2   :  { %21247 = vpow2.f32 %v15273_v26  ;;  %v14886_v2 = vsub.f32 %v14870_v36, %v14876_v25  ;;  %v15268_v5 = vsub.f32 %v15252_v16, %v15264_v33 }
0x4bc4   :  { %v14890_v42 = vmul.f32 1.442695, %v14886_v2  ;;  %v15275_v13 = vmul.f32 1.442695, %v15268_v5  ;;  %v24770_v5 = vld [vmem:[%s24969_s11 + $0x78] sm:$0xff] }
0x4bc5   :  { %v14882_v30 = vpop.xlane.xlu1 %14881  ;;  %v14879_v62 = vpop.xlane.xlu0 %14878 }
0x4bc6   :  { %21249 = vpow2.f32 %v14890_v42  ;;  %v14888_v50 = vsub.f32 %v14872_v12, %v14882_v30  ;;  %v14887_v47 = vsub.f32 %v14871_v23, %v14879_v62 }
0x4bc7   :  { %v21244_v56 = vpop.eup %21243  ;;  %21251 = vpow2.f32 %v15275_v13 }
0x4bc8   :  { %v21246_v48 = vpop.eup %21245  ;;  %v14894_v49 = vmul.f32 1.442695, %v14888_v50  ;;  %v14892_v9 = vmul.f32 1.442695, %v14887_v47  ;;  %v24740_v36 = vmul.f32 %v24737_v15, %v21244_v56 }
0x4bc9   :  { %v14885_v16 = vpop.xlane.xlu0 %14884  ;;  %v24748_v23 = vmul.f32 %v24745_v52, %v21246_v48  ;;  %v15691_v35 = vpop.xlane.xlu1 %15690 }
0x4bca   :  { %21253 = vpow2.f32 %v14894_v49  ;;  %v14889_v12 = vsub.f32 %v14873_v37, %v14885_v16  ;;  %v15284_v32 = vsel %vm1509_vm5, %v24740_v36, 0.0 }
0x4bcb   :  { %21255 = vpow2.f32 %v14892_v9  ;;  %15285 = vadd.xlane.f32.xlu0 %v15284_v32  ;;  %v15281_v51 = vsel %vm1509_vm5, %v24748_v23, 0.0 }
0x4bcc   :  { %v21248_v19 = vpop.eup %21247  ;;  %v14896_v22 = vmul.f32 1.442695, %v14889_v12  ;;  %15282 = vadd.xlane.f32.xlu1 %v15281_v51 }
0x4bcd   :  { %v15694_v10 = vpop.xlane.xlu0 %15693  ;;  %v24760_v37 = vmul.f32 %v24757_v17, %v21248_v19  ;;  %v15697_v26 = vpop.xlane.xlu1 %15696 }
0x4bce   :  { %21257 = vpow2.f32 %v14896_v22  ;;  %v20480_v0 = vpack.c.bf16 %v15694_v10, %v15691_v35 }
0x4bcf   :  { %v15287_v3 = vsel %vm1509_vm5, %v24760_v37, 0.0 }
0x4bd0   :  { %v21250_v28 = vpop.eup %21249  ;;  %15288 = vadd.xlane.f32.xlu1 %v15287_v3  ;;  %20481 = vmatprep.subr.bf16.mxu0 %v20480_v0 }
0x4bd1   :  { %v21252_v31 = vpop.eup %21251  ;;  %20483 = vmatpush3.bf16.msra.mxu0 %v20480_v0  ;;  %v15700_v25 = vpop.xlane.xlu0 %15699  ;;  %v24765_v33 = vmul.f32 %v24745_v52, %v21250_v28 }
0x4bd2   :  { %v20484_v2 = vpack.c.bf16 %v15700_v25, %v15697_v26  ;;  %v24773_v42 = vmul.f32 %v24770_v5, %v21252_v31 }
0x4bd3   :  { %v14902_v13 = vsel %vm1509_vm5, %v24765_v33, 0.0 }
0x4bd4   :  { %v21254_v30 = vpop.eup %21253  ;;  %14903 = vadd.xlane.f32.xlu1 %v14902_v13  ;;  %v15290_v62 = vsel %vm1509_vm5, %v24773_v42, 0.0  ;;  %20485 = vmatprep.subr.bf16.mxu0 %v20484_v2 }
0x4bd5   :  { %v21256_v50 = vpop.eup %21255  ;;  %15291 = vadd.xlane.f32.xlu0 %v15290_v62  ;;  %20487 = vmatpush3.bf16.msra.mxu0 %v20484_v2  ;;  %v14900_v47 = vmul.f32 %v24757_v17, %v21254_v30 }
0x4bd6   :  { %20497 = vmatprep.subr.bf16.mxu0 %v24527_v41  ;;  %v14899_v56 = vmul.f32 %v24737_v15, %v21256_v50 }
0x4bd7   :  { %v14908_v48 = vsel %vm1509_vm5, %v14900_v47, 0.0 }
0x4bd8   :  { %v21258_v49 = vpop.eup %21257  ;;  %14909 = vadd.xlane.f32.xlu1 %v14908_v48  ;;  %v14905_v9 = vsel %vm1509_vm5, %v14899_v56, 0.0  ;;  %19555 = vmatmul.mubr.msk.f32.vlgmr.msra.gmra.mrb[184].mxu0 %vm1509_vm5, %v24638_v38 }
0x4bd9   :  { %14906 = vadd.xlane.f32.xlu0 %v14905_v9  ;;  %20499 = vmatpush3.bf16.msra.mxu0 %v24527_v41  ;;  %v14901_v16 = vmul.f32 %v24770_v5, %v21258_v49  ;;  %v15584_v41 = vpop.f32.mrb[182].mxu0 }
0x4bda   :  { %20501 = vmatprep.subr.bf16.mxu0 %v24535_v8  ;;  %19557 = vmatprep.mubr.msk.f32.mxu0 %vm1509_vm5, %v24646_v40  ;;  %v19534_v38 = vpop.f32.mrb[183].mxu0 }
0x4bdb   :  { %v14911_v12 = vsel %vm1509_vm5, %v14901_v16, 0.0 }
0x4bdc   :  { %19558 = vmatmul.mubr.msk.f32.gmra.mrb[186].mxu0 %vm1509_vm5, %v24654_v4 }
0x4bdd   :  { %14912 = vadd.xlane.f32.xlu0 %v14911_v12  ;;  %20503 = vmatpush3.bf16.msra.mxu0 %v24535_v8 }
0x4bde   :  { %19582 = vmatprep.mubr.msk.f32.mxu0 %vm1509_vm5, %v23610_v44 }
0x4be0   :  { %19583 = vmatmul.mubr.msk.f32.vlgmr.msra.gmra.mrb[188].mxu0 %vm1509_vm5, %v23619_v18 }
0x4be1   :  { %19585 = vmatprep.mubr.msk.f32.mxu0 %vm1509_vm5, %v23627_v1 }
0x4be4   :  { %19586 = vmatmul.mubr.msk.f32.gmra.mrb[190].mxu0 %vm1509_vm5, %v23637_v53 }
0x4c58   :  { %v15286_v40 = vpop.xlane.xlu0 %15285 }
0x4c59   :  { %21259 = vrcp.f32 %v15286_v40  ;;  %v15283_v4 = vpop.xlane.xlu1 %15282 }
0x4c5a   :  { %21261 = vrcp.f32 %v15283_v4 }
0x4c5d   :  { %v15289_v32 = vpop.xlane.xlu1 %15288 }
0x4c5e   :  { %21263 = vrcp.f32 %v15289_v32 }
0x4c61   :  { %v14904_v8 = vpop.xlane.xlu1 %14903 }
0x4c62   :  { %21265 = vrcp.f32 %v14904_v8  ;;  %v15292_v44 = vpop.xlane.xlu0 %15291 }
0x4c63   :  { %v21260_v35 = vpop.eup %21259  ;;  %21267 = vrcp.f32 %v15292_v44 }
0x4c64   :  { %v21262_v18 = vpop.eup %21261  ;;  %v15298_v19 = vmul.f32 %v21260_v35, %v24740_v36 }
0x4c65   :  { %v14910_v51 = vpop.xlane.xlu1 %14909  ;;  %v15297_v1 = vmul.f32 %v21262_v18, %v24748_v23 }
0x4c66   :  { %21269 = vrcp.f32 %v14910_v51  ;;  %v14907_v53 = vpop.xlane.xlu0 %14906 }
0x4c67   :  { %21271 = vrcp.f32 %v14907_v53  ;;  %19504 = vmatprep.mubr.msk.f32.mxu1 %vm1509_vm5, %v15297_v1 }
0x4c68   :  { %v21264_v22 = vpop.eup %21263  ;;  %19505 = vmatmul.mubr.msk.f32.vlgmr.msra.gmra.mrb[178].mxu1 %vm1509_vm5, %v15298_v19 }
0x4c69   :  { %20461 = vmatpush3.bf16.msra.mxu1 %v24547_v60  ;;  %v15299_v10 = vmul.f32 %v21264_v22, %v24760_v37 }
0x4c6a   :  { %20463 = vmatprep.subr.bf16.mxu1 %v24572_v27  ;;  %v14913_v0 = vpop.xlane.xlu0 %14912 }
0x4c6b   :  { %21273 = vrcp.f32 %v14913_v0  ;;  %19507 = vmatprep.mubr.msk.f32.mxu1 %vm1509_vm5, %v15299_v10 }
0x4c6c   :  { %v21266_v23 = vpop.eup %21265 }
0x4c6d   :  { %v21268_v36 = vpop.eup %21267  ;;  %20465 = vmatpush3.bf16.msra.mxu1 %v24572_v27  ;;  %v14918_v3 = vmul.f32 %v21266_v23, %v24765_v33 }
0x4c6e   :  { %v15300_v28 = vmul.f32 %v21268_v36, %v24773_v42  ;;  %20474 = vmatprep.subr.bf16.mxu1 %v25010_v29 }
0x4c70   :  { %v21270_v31 = vpop.eup %21269  ;;  %19508 = vmatmul.mubr.msk.f32.gmra.mrb[180].mxu1 %vm1509_vm5, %v15300_v28 }
0x4c71   :  { %v21272_v60 = vpop.eup %21271  ;;  %19518 = vmatprep.mubr.msk.f32.mxu1 %vm1509_vm5, %v14918_v3  ;;  %v14920_v37 = vmul.f32 %v21270_v31, %v14900_v47 }
0x4c72   :  { %v14919_v26 = vmul.f32 %v21272_v60, %v14899_v56 }
0x4c74   :  { %19519 = vmatmul.mubr.msk.f32.vlgmr.msra.gmra.mrb[178].mxu1 %vm1509_vm5, %v14919_v26 }
0x4c75   :  { %v21274_v25 = vpop.eup %21273  ;;  %20476 = vmatpush3.bf16.msra.mxu1 %v23403_v54  ;;  %19521 = vmatprep.mubr.msk.f32.mxu1 %vm1509_vm5, %v14920_v37 }
0x4c76   :  { %20477 = vmatprep.subr.bf16.mxu1 %v25010_v29  ;;  %v14921_v27 = vmul.f32 %v21274_v25, %v14901_v16 }
0x4c78   :  { %19522 = vmatmul.mubr.msk.f32.gmra.mrb[180].mxu1 %vm1509_vm5, %v14921_v27 }
0x4c79   :  { %20479 = vmatpush3.bf16.msra.mxu1 %v23413_v61  ;;  %19543 = vmatprep.mubr.msk.f32.mxu1 %vm21383_vm9, %v25008_v7 }
0x4c7a   :  { %20489 = vmatprep.subr.bf16.mxu1 %v24669_v34 }
0x4c7c   :  { %19544 = vmatmul.mubr.msk.f32.vlgmr.msra.gmra.mrb[182].mxu1 %vm1509_vm5, %v15584_v41 }
0x4c7d   :  { %20491 = vmatpush3.bf16.msra.mxu1 %v24669_v34 }
0x4c7e   :  { %20493 = vmatprep.subr.bf16.mxu1 %v24679_v46 }
0x4c81   :  { %20495 = vmatpush3.bf16.msra.mxu1 %v24679_v46 }
0x4cab   :  { %v19556_v54 = vpop.f32.mrb[184].mxu0 }
0x4cac   :  { %15793 = vperm.xlu0 %20677, %v19556_v54   ;;  %v15767_v29 = vpop.f32.mrb[185].mxu0 }
0x4cad   :  { %15788 = vperm.xlu1 %20678, %v15767_v29  }
0x4caf   :  { %v19559_v33 = vpop.f32.mrb[186].mxu0 }
0x4cb0   :  { %v15777_v2 = vpop.f32.mrb[187].mxu0 }
0x4cb1   :  { %15798 = vperm.xlu1 %20678, %v15777_v2  }
0x4cb3   :  { %v24830_v61 = vpop.f32.mrb[188].mxu0 }
0x4cb4   :  { %v24832_v7 = vpop.f32.mrb[189].mxu0 }
0x4cb5   :  { %15803 = vperm.xlu1 %20678, %v19559_v33  }
0x4cb7   :  { %v24834_v42 = vpop.f32.mrb[190].mxu0 }
0x4cb8   :  { %v24836_v13 = vpop.f32.mrb[191].mxu0 }
0x4d2b   :  { %v15794_v47 = vpop.permute.xlu0 %15793 }
0x4d2c   :  { %v15789_v34 = vpop.permute.xlu1 %15788 }
0x4d30   :  { %v15799_v30 = vpop.permute.xlu1 %15798 }
0x4d34   :  { %v15804_v56 = vpop.permute.xlu1 %15803 }
0x4d4f   :  { %v15657_v62 = vpop.f32.mrb[182].mxu1 }
0x4d50   :  { %v15809_v46 = vrot.slane %v15657_v62, %v21712_v59  ;;  %v19545_v50 = vpop.f32.mrb[183].mxu1 }
0x4d52   :  { %v15811_v48 = vadd.f32 %v15809_v46, %v15794_v47  ;;  %v15810_v49 = vadd.f32 %v15809_v46, %v15789_v34  ;;  %v15812_v9 = vadd.f32 %v15809_v46, %v15799_v30  ;;  %v15813_v16 = vadd.f32 %v15809_v46, %v15804_v56 }
0x4d54   :  { %vm15815_vm9 = vcmp.gt.f32.partialorder %v15811_v48, 0.0  ;;  %v15819_v12 = vmul.f32 0.2, %v15811_v48  ;;  %vm15814_vm10 = vcmp.gt.f32.partialorder %v15810_v49, 0.0  ;;  %v15818_v41 = vmul.f32 0.2, %v15810_v49 }
0x4d55   :  { %vm15816_vm4 = vcmp.gt.f32.partialorder %v15812_v9, 0.0  ;;  %v15820_v38 = vmul.f32 0.2, %v15812_v9  ;;  %v15821_v32 = vmul.f32 0.2, %v15813_v16  ;;  %vm15817_vm2 = vcmp.gt.f32.partialorder %v15813_v16, 0.0 }
0x4d56   :  { %v15823_v40 = vsel %vm15815_vm9, %v15811_v48, %v15819_v12  ;;  %v15822_v4 = vsel %vm15814_vm10, %v15810_v49, %v15818_v41 }
0x4d57   :  { %v15827_v8 = vsel %vm8810_vm11, %v15823_v40, -1e+30  ;;  %v15826_v59 = vsel %vm8809_vm12, %v15822_v4, -1e+30  ;;  %v15824_v44 = vsel %vm15816_vm4, %v15812_v9, %v15820_v38  ;;  %v15825_v1 = vsel %vm15817_vm2, %v15813_v16, %v15821_v32  ;;  %v16221_v4 = vld [vmem:[%s24972_s19 + $0x20] sm:$0xff]  ;;  %v16222_v32 = vld [vmem:[%s24972_s19 + $0x28] sm:$0xff] }
0x4d58   :  { %v15833_v35 = vsel %vm1509_vm5, %v15827_v8, -inf  ;;  %v15830_v18 = vsel %vm1509_vm5, %v15826_v59, -inf  ;;  %v15828_v51 = vsel %vm8811_vm3, %v15824_v44, -1e+30  ;;  %v15829_v45 = vsel %vm8812_vm8, %v15825_v1, -1e+30 }
0x4d59   :  { %15834 = vmax.xlane.f32.xlu1 %v15833_v35  ;;  %15831 = vmax.xlane.f32.xlu0 %v15830_v18  ;;  %v15836_v19 = vsel %vm1509_vm5, %v15828_v51, -inf  ;;  %v15839_v6 = vsel %vm1509_vm5, %v15829_v45, -inf  ;;  %v21367_v18 = vld [vmem:[%s24968_s17 + $0x38] sm:$0xff] }
0x4d5d   :  { %15837 = vmax.xlane.f32.xlu0 %v15836_v19 }
0x4d61   :  { %15840 = vmax.xlane.f32.xlu0 %v15839_v6 }
0x4de6   :  { %v15835_v53 = vpop.xlane.xlu1 %15834  ;;  %v15832_v22 = vpop.xlane.xlu0 %15831 }
0x4de7   :  { %v15843_v10 = vsub.f32 %v15827_v8, %v15835_v53  ;;  %v15842_v0 = vsub.f32 %v15826_v59, %v15832_v22  ;;  %v20508_v8 = vpack.c.bf16 %v16222_v32, %v16221_v4  ;;  %v16217_v4 = vld [vmem:[%s24972_s19] sm:$0xff]  ;;  %v16218_v32 = vld [vmem:[%s24972_s19 + $0x8] sm:$0xff] }
0x4de9   :  { %v15848_v23 = vmul.f32 1.442695, %v15843_v10  ;;  %v15846_v36 = vmul.f32 1.442695, %v15842_v0  ;;  %20509 = vmatprep.subr.bf16.mxu0 %v20508_v8 }
0x4dea   :  { %v15838_v3 = vpop.xlane.xlu0 %15837  ;;  %20511 = vmatpush3.bf16.msra.mxu0 %v20508_v8 }
0x4deb   :  { %21275 = vpow2.f32 %v15848_v23  ;;  %v15844_v14 = vsub.f32 %v15828_v51, %v15838_v3  ;;  %v16083_v51 = vrot.slane %v21367_v18, %v25013_v39 }
0x4dec   :  { %21277 = vpow2.f32 %v15846_v36 }
0x4ded   :  { %v15850_v28 = vmul.f32 1.442695, %v15844_v14 }
0x4dee   :  { %v15841_v31 = vpop.xlane.xlu0 %15840 }
0x4def   :  { %21279 = vpow2.f32 %v15850_v28  ;;  %v15845_v60 = vsub.f32 %v15829_v45, %v15841_v31  ;;  %v21368_v31 = vld [vmem:[%s24968_s17 + $0x30] sm:$0xff] }
0x4df1   :  { %v15852_v37 = vmul.f32 1.442695, %v15845_v60  ;;  %v15990_v60 = vrot.slane %v21368_v31, %v25013_v39 }
0x4df3   :  { %21281 = vpow2.f32 %v15852_v37 }
0x4df5   :  { %v21276_v21 = vpop.eup %21275 }
0x4df6   :  { %v21278_v26 = vpop.eup %21277  ;;  %v15855_v25 = vmul.f32 %v24737_v15, %v21276_v21  ;;  %v2352_v15 = vld [vmem:[%s24971_s18 + $0x70] sm:$0xff] }
0x4df7   :  { %v15854_v27 = vmul.f32 %v24745_v52, %v21278_v26  ;;  %v2353_v52 = vld [vmem:[%s24971_s18 + $0x78] sm:$0xff] }
0x4df8   :  { %v15861_v54 = vsel %vm1509_vm5, %v15855_v25, 0.0  ;;  %v20504_v50 = vpack.c.bf16 %v2353_v52, %v2352_v15 }
0x4df9   :  { %v21280_v29 = vpop.eup %21279  ;;  %15862 = vadd.xlane.f32.xlu0 %v15861_v54  ;;  %v15858_v33 = vsel %vm1509_vm5, %v15854_v27, 0.0 }
0x4dfa   :  { %15859 = vadd.xlane.f32.xlu1 %v15858_v33  ;;  %v15856_v2 = vmul.f32 %v24757_v17, %v21280_v29  ;;  %20505 = vmatprep.subr.bf16.mxu1 %v20504_v50 }
0x4dfc   :  { %v15864_v34 = vsel %vm1509_vm5, %v15856_v2, 0.0 }
0x4dfd   :  { %v21282_v30 = vpop.eup %21281 }
0x4dfe   :  { %15865 = vadd.xlane.f32.xlu1 %v15864_v34  ;;  %v15857_v62 = vmul.f32 %v24770_v5, %v21282_v30 }
0x4e00   :  { %v15867_v46 = vsel %vm1509_vm5, %v15857_v62, 0.0 }
0x4e01   :  { %15868 = vadd.xlane.f32.xlu0 %v15867_v46 }
0x4e86   :  { %v15863_v17 = vpop.xlane.xlu0 %15862 }
0x4e87   :  { %v15860_v47 = vpop.xlane.xlu1 %15859  ;;  %21283 = vrcp.f32 %v15863_v17 }
0x4e88   :  { %21285 = vrcp.f32 %v15860_v47 }
0x4e8b   :  { %v15866_v56 = vpop.xlane.xlu1 %15865 }
0x4e8c   :  { %21287 = vrcp.f32 %v15866_v56 }
0x4e8e   :  { %v15869_v5 = vpop.xlane.xlu0 %15868 }
0x4e8f   :  { %21289 = vrcp.f32 %v15869_v5 }
0x4e91   :  { %v21284_v48 = vpop.eup %21283 }
0x4e92   :  { %v21286_v49 = vpop.eup %21285  ;;  %v15875_v9 = vmul.f32 %v21284_v48, %v15855_v25 }
0x4e93   :  { %v15874_v16 = vmul.f32 %v21286_v49, %v15854_v27 }
0x4e95   :  { %19568 = vmatprep.mubr.msk.f32.mxu1 %vm1509_vm5, %v15874_v16 }
0x4e96   :  { %v21288_v12 = vpop.eup %21287  ;;  %19569 = vmatmul.mubr.msk.f32.vlgmr.msra.gmra.mrb[178].mxu1 %vm1509_vm5, %v15875_v9 }
0x4e97   :  { %v15876_v41 = vmul.f32 %v21288_v12, %v15856_v2  ;;  %20507 = vmatpush3.bf16.msra.mxu1 %v20504_v50 }
0x4e99   :  { %v21290_v38 = vpop.eup %21289  ;;  %19571 = vmatprep.mubr.msk.f32.mxu1 %vm1509_vm5, %v15876_v41 }
0x4e9a   :  { %v15877_v40 = vmul.f32 %v21290_v38, %v15857_v62 }
0x4e9c   :  { %19572 = vmatmul.mubr.msk.f32.gmra.mrb[180].mxu1 %vm1509_vm5, %v15877_v40 }
0x4e9d   :  { %19592 = vmatprep.mubr.msk.f32.mxu1 %vm76_vm0, %v24832_v7  ;;  %v16220_v7 = vld [vmem:[%s24972_s19 + $0x18] sm:$0xff] }
0x4ea0   :  { %19593 = vmatmul.mubr.msk.f32.vlgmr.msra.gmra.mrb[184].mxu1 %vm76_vm0, %v24830_v61  ;;  %v16219_v61 = vld [vmem:[%s24972_s19 + $0x10] sm:$0xff] }
0x4ea1   :  { %19595 = vmatprep.mubr.msk.f32.mxu1 %vm76_vm0, %v24836_v13 }
0x4ea4   :  { %19596 = vmatmul.mubr.msk.f32.gmra.mrb[186].mxu1 %vm76_vm0, %v24834_v42  ;;  %v24889_v42 = vpack.c.bf16 %v16220_v7, %v16219_v61 }
0x4ea6   :  { %20513 = vmatprep.subr.bf16.mxu0 %v24889_v42 }
0x4f69   :  { %v19570_v13 = vpop.f32.mrb[178].mxu1 }
0x4f6a   :  { %v15960_v59 = vpop.f32.mrb[179].mxu1  ;;  %v15984_v28 = vmul.f32 0.33333334, %v19570_v13 }
0x4f6b   :  { %v15983_v37 = vmul.f32 0.33333334, %v15960_v59 }
0x4f6c   :  { %v15992_v21 = vadd.f32 %v15990_v60, %v15984_v28 }
0x4f6d   :  { %v15991_v27 = vadd.f32 %v15990_v60, %v15983_v37 }
0x4f6e   :  { %v16198_v34 = vmax.f32 %v15992_v21, 0.0 }
0x4f6f   :  { %v19573_v44 = vpop.f32.mrb[180].mxu1  ;;  %v16197_v15 = vmax.f32 %v15991_v27, 0.0 }
0x4f70   :  { %v15970_v35 = vpop.f32.mrb[181].mxu1  ;;  %v15986_v26 = vmul.f32 0.33333334, %v19573_v44 }
0x4f71   :  { %v15985_v54 = vmul.f32 0.33333334, %v15970_v35  ;;  %v20516_v35 = vpack.c.bf16 %v16218_v32, %v16217_v4 }
0x4f72   :  { %v15994_v30 = vadd.f32 %v15990_v60, %v15986_v26 }
0x4f73   :  { %v19594_v1 = vpop.f32.mrb[184].mxu1  ;;  %v15993_v52 = vadd.f32 %v15990_v60, %v15985_v54 }
0x4f74   :  { %v16168_v19 = vadd.f32 %v19594_v1, %v16083_v51  ;;  %v16162_v45 = vpop.f32.mrb[185].mxu1  ;;  %v16200_v9 = vmax.f32 %v15994_v30, 0.0 }
0x4f75   :  { %v16163_v6 = vadd.f32 %v16162_v45, %v16083_v51  ;;  %v16199_v41 = vmax.f32 %v15993_v52, 0.0 }
0x4f76   :  { %v16182_v53 = vmul.f32 0.5, %v16168_v19  ;;  %v25017_v19 = vld [vmem:[#allocation6_spill] sm:$0xff] }
0x4f77   :  { %v16181_v22 = vmul.f32 0.5, %v16163_v6  ;;  %v19597_v10 = vpop.f32.mrb[186].mxu1  ;;  %v17109_v6 = vld [vmem:[%s24972_s19 + $0x30] ss:$0 sm:$0xff] }
0x4f78   :  { %21291 = vtanh.f32 %v16182_v53  ;;  %v16178_v0 = vadd.f32 %v19597_v10, %v16083_v51  ;;  %v16172_v23 = vpop.f32.mrb[187].mxu1 }
0x4f79   :  { %21293 = vtanh.f32 %v16181_v22  ;;  %v16173_v36 = vadd.f32 %v16172_v23, %v16083_v51 }
0x4f7a   :  { %v16184_v3 = vmul.f32 0.5, %v16178_v0 }
0x4f7b   :  { %v16183_v14 = vmul.f32 0.5, %v16173_v36 }
0x4f7c   :  { %21295 = vtanh.f32 %v16184_v3 }
0x4f7d   :  { %21297 = vtanh.f32 %v16183_v14 }
0x4f82   :  { %v21292_v25 = vpop.eup %21291 }
0x4f83   :  { %v21294_v29 = vpop.eup %21293  ;;  %v16190_v33 = vadd.f32 1.0, %v21292_v25 }
0x4f84   :  { %v16189_v2 = vadd.f32 1.0, %v21294_v29 }
0x4f85   :  { %v16194_v62 = vmul.f32 0.5, %v16190_v33 }
0x4f86   :  { %v21296_v46 = vpop.eup %21295  ;;  %v16193_v50 = vmul.f32 0.5, %v16189_v2 }
0x4f87   :  { %v21298_v17 = vpop.eup %21297  ;;  %v16202_v47 = vmul.f32 %v16198_v34, %v16194_v62  ;;  %v16206_v39 = vsub.f32 1.0, %v16194_v62  ;;  %v16192_v56 = vadd.f32 1.0, %v21296_v46 }
0x4f88   :  { %v16201_v5 = vmul.f32 %v16197_v15, %v16193_v50  ;;  %v16205_v48 = vsub.f32 1.0, %v16193_v50  ;;  %v16191_v49 = vadd.f32 1.0, %v21298_v17 }
0x4f89   :  { %v16210_v16 = vmul.f32 %v16206_v39, %v24514_v55  ;;  %v16196_v12 = vmul.f32 0.5, %v16192_v56 }
0x4f8a   :  { %v16209_v38 = vmul.f32 %v16205_v48, %v24516_v63  ;;  %v16195_v40 = vmul.f32 0.5, %v16191_v49 }
0x4f8b   :  { %v16214_v8 = vadd.f32 %v16210_v16, %v16202_v47  ;;  %v16204_v61 = vmul.f32 %v16200_v9, %v16196_v12  ;;  %v16208_v7 = vsub.f32 1.0, %v16196_v12 }
0x4f8c   :  { %v16203_v13 = vmul.f32 %v16199_v41, %v16195_v40  ;;  %v16207_v59 = vsub.f32 1.0, %v16195_v40  ;;  %v16213_v44 = vadd.f32 %v16209_v38, %v16201_v5 }
0x4f8d   :  { %v16212_v55 = vmul.f32 %v16208_v7, %v24522_v20  ;;  %v16648_v20 = vld [vmem:[%s24960_s7 + $0x20] ss:$0 sm:$0xff] }
0x4f8e   :  { %v16211_v63 = vmul.f32 %v16207_v59, %v24524_v57  ;;  %19602 = vmatprep.mubr.msk.f32.mxu0 %vm76_vm0, %v16213_v44  ;;  %v25015_v57 = vld [vmem:[#allocation4_spill] sm:$0xff]  ;;  %v2157_v45 = vadd.f32 %v16648_v20, %v25017_v19 }
0x4f8f   :  { %19603 = vmatmul.mubr.msk.f32.vlgmr.msra.gmra.mrb[192].mxu0 %vm76_vm0, %v16214_v8  ;;  %v16216_v18 = vadd.f32 %v16212_v55, %v16204_v61 }
0x4f90   :  { %v16215_v51 = vadd.f32 %v16211_v63, %v16203_v13  ;;  %20515 = vmatpush3.bf16.msra.mxu0 %v24889_v42  ;;  %v1753_v42 = vadd.f32 %v16648_v20, %v25015_v57 }
0x4f91   :  { %20517 = vmatprep.subr.bf16.mxu0 %v20516_v35 }
0x4f92   :  { %19605 = vmatprep.mubr.msk.f32.mxu0 %vm76_vm0, %v16215_v51 }
0x4f93   :  { %19606 = vmatmul.mubr.msk.f32.gmra.mrb[194].mxu0 %vm76_vm0, %v16216_v18 }
0x4f94   :  { %19612 = vmatprep.mubr.msk.f32.mxu0 %vm76_vm0, %v23356_v43  ;;  %v25016_v43 = vld [vmem:[#allocation3_spill] sm:$0xff] }
0x4f95   :  { %v1758_v1 = vadd.f32 %v25016_v43, %v16648_v20 }
0x4f97   :  { %19613 = vmatmul.mubr.msk.f32.vlgmr.msra.gmra.mrb[192].mxu0 %vm76_vm0, %v23350_v24  ;;  %v25018_v24 = vld [vmem:[#allocation5_spill] sm:$0xff] }
0x4f98   :  { %19615 = vmatprep.mubr.msk.f32.mxu0 %vm76_vm0, %v23365_v11  ;;  %20519 = vmatpush3.bf16.msra.mxu0 %v20516_v35  ;;  %v2162_v11 = vadd.f32 %v25018_v24, %v16648_v20 }
0x4f99   :  { %20521 = vmatprep.subr.bf16.mxu0 %v20516_v35 }
0x4f9b   :  { %19616 = vmatmul.mubr.msk.f32.gmra.mrb[194].mxu0 %vm76_vm0, %v23362_v58 }
0x4f9c   :  { %19622 = vmatprep.mubr.msk.f32.mxu0 %vm76_vm0, %v1753_v42 }
0x4f9f   :  { %19623 = vmatmul.mubr.msk.f32.vlgmr.msra.gmra.mrb[192].mxu0 %vm76_vm0, %v1758_v1 }
0x4fa0   :  { %20523 = vmatpush3.bf16.msra.mxu0 %v20516_v35  ;;  %19629 = vmatprep.mubr.msk.f32.mxu0 %vm76_vm0, %v2157_v45 }
0x4fa3   :  { %19630 = vmatmul.mubr.msk.f32.vlgmr.msra.gmra.mrb[194].mxu0 %vm76_vm0, %v2162_v11 }
0x5072   :  { %v19624_v58 = vpop.f32.mrb[192].mxu0 }
0x5073   :  { %v20528_v53 = vadd.f32 %v19624_v58, %v17109_v6  ;;  %v16498_v22 = vpop.f32.mrb[193].mxu0 }
0x5074   :  { %v20529_v10 = vadd.f32 %v17109_v6, %v16498_v22 }
0x5075   :  { %16510 = vst.msk [vmem:[%s24973_s20 + $0x8] sm:$0xff] %vm166_vm1, %v20528_v53 }
0x5076   :  { %16509 = vst.msk [vmem:[%s24973_s20] sm:$0xff] %vm166_vm1, %v20529_v10  ;;  %v19631_v0 = vpop.f32.mrb[194].mxu0 }
0x5077   :  { %v20530_v23 = vadd.f32 %v19631_v0, %v17109_v6  ;;  %v16583_v36 = vpop.f32.mrb[195].mxu0 }
0x5078   :  { %v20531_v3 = vadd.f32 %v17109_v6, %v16583_v36 }
0x5079   :  { %16595 = vst.msk [vmem:[%s24973_s20 + $0x18] sm:$0xff] %vm166_vm1, %v20530_v23 }
0x507a   :  { %16594 = vst.msk [vmem:[%s24973_s20 + $0x10] sm:$0xff] %vm166_vm1, %v20531_v3 }

</bundles_post_ra>
